<compile_context>
chip_gen: v7x
topology: tpu7x:2x2x1
jax: 0.10.0
libtpu: 0.0.40
codegen_flags: <defaults>
</compile_context>

<pallas_src>
import functools

import jax
import jax.numpy as jnp
from jax.experimental import pallas as pl
from jax.experimental.pallas import tpu as pltpu


# ---------------------------------------------------------------------------
# Kernel 1: tiled matmul with fused bias + ReLU epilogue.
#   A [M,K] (bf16) @ B [K,N] (bf16) -> f32 accumulator -> (+bias, ReLU) -> out
# ---------------------------------------------------------------------------
def _mm_bias_relu_kernel(a_ref, b_ref, bias_ref, o_ref, acc_ref, *, n_k, relu):
    k = pl.program_id(2)

    @pl.when(k == 0)
    def _():
        acc_ref[...] = jnp.zeros_like(acc_ref)

    acc_ref[...] += jnp.dot(a_ref[...], b_ref[...],
                            preferred_element_type=jnp.float32)

    @pl.when(k == n_k - 1)
    def _():
        y = acc_ref[...] + bias_ref[...]
        if relu:
            y = jnp.maximum(y, 0.0)
        o_ref[...] = y.astype(o_ref.dtype)


def _largest_divisor(dim, candidates):
    for c in candidates:
        if c <= dim and dim % c == 0:
            return c
    return dim


def pallas_matmul_bias_relu(a, b, bias, *, relu=True, out_dtype=jnp.bfloat16):
    """a: [M,K], b: [K,N] (cast to bf16), bias: [N] f32 -> [M,N] out_dtype.

    Tiles divide the real dims exactly -> no padded operand copies."""
    M, K = a.shape
    K2, N = b.shape
    assert K == K2

    tm = _largest_divisor(M, (256, 128, 64, 32, 16, 8))
    tn = _largest_divisor(N, (256, 128))                       # 512/256->256, 128->128, 64->64
    tk = K if K <= 1152 else _largest_divisor(
        K, (1152, 1024, 768, 576, 512, 384, 256, 128))
    # v7x has 2 TensorCores: make sure there are >= 2 parallel grid tiles.
    if (M // tm) * (N // tn) < 2 and N % 256 == 0:
        tn = max(128, tn // 2)
    n_k = K // tk

    a = a.astype(jnp.bfloat16)
    b = b.astype(jnp.bfloat16)
    bias2d = bias.reshape(1, N).astype(jnp.float32)

    return pl.pallas_call(
        functools.partial(_mm_bias_relu_kernel, n_k=n_k, relu=relu),
        out_shape=jax.ShapeDtypeStruct((M, N), out_dtype),
        grid_spec=pltpu.PrefetchScalarGridSpec(
            num_scalar_prefetch=0,
            grid=(M // tm, N // tn, n_k),
            in_specs=[
                pl.BlockSpec((tm, tk), lambda i, j, k: (i, k)),
                pl.BlockSpec((tk, tn), lambda i, j, k: (k, j)),
                pl.BlockSpec((1, tn), lambda i, j, k: (0, j)),
            ],
            out_specs=pl.BlockSpec((tm, tn), lambda i, j, k: (i, j)),
            scratch_shapes=[pltpu.VMEM((tm, tn), jnp.float32)],
        ),
        compiler_params=pltpu.CompilerParams(
            dimension_semantics=("parallel", "parallel", "arbitrary"),
            vmem_limit_bytes=32 * 1024 * 1024),
    )(a, b, bias2d)


# ---------------------------------------------------------------------------
# Kernel 2: MaxPool2d(kernel=2, stride=2), NHWC.
# Wrapper reshapes [B,H,W,C] -> [B,H,W/2,2C] (free, row-major) so the two
# horizontal neighbours sit side by side on the lane axis; the kernel does a
# vertical pair-max then a lane-slice pair-max. No strided loads needed.
# ---------------------------------------------------------------------------
def _maxpool2x2_kernel(x_ref, o_ref):
    c = o_ref.shape[-1]
    m = jnp.maximum(x_ref[0, 0], x_ref[0, 1])          # (Wo, 2C): vertical max
    o_ref[0, 0] = jnp.maximum(m[:, :c], m[:, c:])      # (Wo, C) : horizontal max


def maxpool2x2(x_nhwc):
    B, H, W, C = x_nhwc.shape
    Ho, Wo = H // 2, W // 2
    x_r = x_nhwc.reshape(B, H, Wo, 2 * C)
    return pl.pallas_call(
        _maxpool2x2_kernel,
        out_shape=jax.ShapeDtypeStruct((B, Ho, Wo, C), x_nhwc.dtype),
        grid_spec=pltpu.PrefetchScalarGridSpec(
            num_scalar_prefetch=0,
            grid=(B, Ho),
            in_specs=[pl.BlockSpec((1, 2, Wo, 2 * C), lambda b, h: (b, h, 0, 0))],
            out_specs=pl.BlockSpec((1, 1, Wo, C), lambda b, h: (b, h, 0, 0)),
        ),
        compiler_params=pltpu.CompilerParams(
            dimension_semantics=("parallel", "parallel"),
            vmem_limit_bytes=32 * 1024 * 1024),
    )(x_r)


# ---------------------------------------------------------------------------
# Conv2d(3x3, padding=1) + ReLU wrapper (im2col glue in XLA, matmul in Pallas)
# ---------------------------------------------------------------------------
def _im2col_3x3(x_nhwc):
    # TODO(synk): for large spatial sizes, replace this HBM im2col (9x patch
    #             expansion) with an in-kernel halo-DMA / tap-indexed K grid.
    B, H, W, C = x_nhwc.shape
    xp = jnp.pad(x_nhwc, ((0, 0), (1, 1), (1, 1), (0, 0)))
    cols = [xp[:, ky:ky + H, kx:kx + W, :] for ky in range(3) for kx in range(3)]
    return jnp.concatenate(cols, axis=-1).reshape(B * H * W, 9 * C)


def conv3x3_relu(x_nhwc, w, b, *, relu=True, out_dtype=jnp.bfloat16):
    """PyTorch-style Conv2d(k=3, pad=1)+ReLU on NHWC. w: [Cout,Cin,3,3], b: [Cout]."""
    B, H, W, C = x_nhwc.shape
    Cout = w.shape[0]
    patches = _im2col_3x3(x_nhwc)                                   # [B*H*W, 9*Cin]
    wf = jnp.transpose(w, (2, 3, 1, 0)).reshape(9 * C, Cout)        # [9*Cin, Cout]
    y = pallas_matmul_bias_relu(patches, wf, b, relu=relu, out_dtype=out_dtype)
    return y.reshape(B, H, W, Cout)


# ---------------------------------------------------------------------------
# Encoder forward: VGG-19 features[0:21]  (conv1_1 ... relu4_1)
# ---------------------------------------------------------------------------
_VGG_SLICE_CFG = [
    # (Cin, Cout, maxpool_after)
    (3, 64, False),      # conv1_1 + relu
    (64, 64, True),      # conv1_2 + relu + pool
    (64, 128, False),    # conv2_1 + relu
    (128, 128, True),    # conv2_2 + relu + pool
    (128, 256, False),   # conv3_1 + relu
    (256, 256, False),   # conv3_2 + relu
    (256, 256, False),   # conv3_3 + relu
    (256, 256, True),    # conv3_4 + relu + pool
    (256, 512, False),   # conv4_1 + relu   -> output (relu4_1)
]


def encoder_forward(params, x_nchw):
    """Equivalent of Encoder.forward: nn.Sequential(vgg19.features[0:21])."""
    h = jnp.transpose(x_nchw, (0, 2, 3, 1)).astype(jnp.bfloat16)   # NHWC, C on lanes
    n = len(_VGG_SLICE_CFG)
    for li, (_, _, pool_after) in enumerate(_VGG_SLICE_CFG):
        last = li == n - 1
        h = conv3x3_relu(h, params[f"conv{li}_w"], params[f"conv{li}_b"],
                         relu=True,
                         out_dtype=jnp.float32 if last else jnp.bfloat16)
        if pool_after:
            h = maxpool2x2(h)
    return jnp.transpose(h, (0, 3, 1, 2))                          # back to NCHW


# ---------------------------------------------------------------------------
# Deterministic parameters / inputs
# ---------------------------------------------------------------------------
def init_params(key):
    # TODO(synk): the real Encoder loads torchvision VGG-19 *pretrained* weights;
    #             a self-contained script uses deterministic random weights.
    params = {}
    keys = jax.random.split(key, 2 * len(_VGG_SLICE_CFG))
    for li, (cin, cout, _) in enumerate(_VGG_SLICE_CFG):
        kw, kb = keys[2 * li], keys[2 * li + 1]
        fan_in = cin * 9
        params[f"conv{li}_w"] = (jax.random.normal(kw, (cout, cin, 3, 3), jnp.float32)
                                 * jnp.sqrt(2.0 / fan_in))
        params[f"conv{li}_b"] = jax.random.normal(kb, (cout,), jnp.float32) * 0.01
    return params


if __name__ == "__main__":
    key = jax.random.PRNGKey(0)
    k_p, k_x = jax.random.split(key)

    B, H, W = 2, 32, 32                       # small image; output is relu4_1 @ 4x4
    x = jax.random.normal(k_x, (B, 3, H, W), jnp.float32)
    params = init_params(k_p)

    out = jax.jit(encoder_forward)(params, x)
    out = jax.block_until_ready(out)

    assert out.shape == (B, 512, H // 8, W // 8), out.shape
    assert bool(jnp.all(jnp.isfinite(out)))
    print("KERNEL_OK")
</pallas_src>

<mosaic_0001>
module attributes {stable_mosaic.version = 11 : i64} {
  func.func @_mm_bias_relu_kernel(%arg0: i32, %arg1: i32, %arg2: i32, %arg3: memref<256x27xbf16, #tpu.memory_space<vmem>>, %arg4: memref<27x64xbf16, #tpu.memory_space<vmem>>, %arg5: memref<1x64xf32, #tpu.memory_space<vmem>>, %arg6: memref<256x64xbf16, #tpu.memory_space<vmem>>, %arg7: memref<256x64xf32, #tpu.memory_space<vmem>>) attributes {dimension_semantics = [#tpu.dimension_semantics<parallel>, #tpu.dimension_semantics<parallel>, #tpu.dimension_semantics<arbitrary>], iteration_bounds = array<i64: 8, 1, 1>, scalar_prefetch = 0 : i64, scratch_operands = 1 : i64, tpu.core_type = #tpu.core_type<tc>, window_params = [{transform_indices = @transform_0, window_bounds = array<i64: 256, 27>}, {transform_indices = @transform_1, window_bounds = array<i64: 27, 64>}, {transform_indices = @transform_2, window_bounds = array<i64: 1, 64>}, {transform_indices = @transform_3, window_bounds = array<i64: 256, 64>}]} {
    %c0_i32 = arith.constant 0 : i32
    %0 = arith.cmpi eq, %arg2, %c0_i32 : i32
    %1 = arith.extui %0 : i1 to i32
    %c0_i32_0 = arith.constant 0 : i32
    %2 = arith.cmpi ne, %1, %c0_i32_0 : i32
    scf.if %2 {
      %cst_10 = arith.constant 0.000000e+00 : f32
      %12 = vector.broadcast %cst_10 : f32 to vector<256x64xf32>
      %c0_11 = arith.constant 0 : index
      %c0_12 = arith.constant 0 : index
      %13 = vector.load %arg7[%c0_11, %c0_12] : memref<256x64xf32, #tpu.memory_space<vmem>>, vector<256x64xf32>
      tpu.vector_store %arg7[%c0_11, %c0_12], %12 {strides = array<i32>} : memref<256x64xf32, #tpu.memory_space<vmem>>, vector<256x64xf32>,
    } else {
    }
    %c0 = arith.constant 0 : index
    %c0_1 = arith.constant 0 : index
    %3 = vector.load %arg7[%c0, %c0_1] : memref<256x64xf32, #tpu.memory_space<vmem>>, vector<256x64xf32>
    %c0_2 = arith.constant 0 : index
    %c0_3 = arith.constant 0 : index
    %4 = vector.load %arg3[%c0_2, %c0_3] : memref<256x27xbf16, #tpu.memory_space<vmem>>, vector<256x27xbf16>
    %c0_4 = arith.constant 0 : index
    %c0_5 = arith.constant 0 : index
    %5 = vector.load %arg4[%c0_4, %c0_5] : memref<27x64xbf16, #tpu.memory_space<vmem>>, vector<27x64xbf16>
    %cst = arith.constant dense<0.000000e+00> : vector<256x64xf32>
    %6 = tpu.matmul %4, %5, %cst {dimension_numbers = #tpu.dot_dimension_numbers<[1], [0], [0], [1], [0, 0, 1, 1], [], []>} : vector<256x27xbf16>, vector<27x64xbf16>, vector<256x64xf32> -> vector<256x64xf32>
    %7 = arith.addf %3, %6 : vector<256x64xf32>
    %c0_6 = arith.constant 0 : index
    %c0_7 = arith.constant 0 : index
    %8 = vector.load %arg7[%c0_6, %c0_7] : memref<256x64xf32, #tpu.memory_space<vmem>>, vector<256x64xf32>
    tpu.vector_store %arg7[%c0_6, %c0_7], %7 {strides = array<i32>} : memref<256x64xf32, #tpu.memory_space<vmem>>, vector<256x64xf32>,
    %c0_i32_8 = arith.constant 0 : i32
    %9 = arith.cmpi eq, %arg2, %c0_i32_8 : i32
    %10 = arith.extui %9 : i1 to i32
    %c0_i32_9 = arith.constant 0 : i32
    %11 = arith.cmpi ne, %10, %c0_i32_9 : i32
    scf.if %11 {
      %c0_10 = arith.constant 0 : index
      %c0_11 = arith.constant 0 : index
      %12 = vector.load %arg7[%c0_10, %c0_11] : memref<256x64xf32, #tpu.memory_space<vmem>>, vector<256x64xf32>
      %c0_12 = arith.constant 0 : index
      %c0_13 = arith.constant 0 : index
      %13 = vector.load %arg5[%c0_12, %c0_13] : memref<1x64xf32, #tpu.memory_space<vmem>>, vector<1x64xf32>
      %14 = vector.broadcast %13 : vector<1x64xf32> to vector<256x64xf32>
      %15 = arith.addf %12, %14 : vector<256x64xf32>
      %cst_14 = arith.constant 0.000000e+00 : f32
      %16 = vector.broadcast %cst_14 : f32 to vector<256x64xf32>
      %17 = arith.maximumf %15, %16 : vector<256x64xf32>
      %18 = arith.truncf %17 : vector<256x64xf32> to vector<256x64xbf16>
      %c0_15 = arith.constant 0 : index
      %c0_16 = arith.constant 0 : index
      %19 = vector.load %arg6[%c0_15, %c0_16] : memref<256x64xbf16, #tpu.memory_space<vmem>>, vector<256x64xbf16>
      tpu.vector_store %arg6[%c0_15, %c0_16], %18 {strides = array<i32>} : memref<256x64xbf16, #tpu.memory_space<vmem>>, vector<256x64xbf16>,
    } else {
    }
    return
  }
  func.func @transform_0(%arg0: i32, %arg1: i32, %arg2: i32) -> (i32, i32) {
    %c0_i32 = arith.constant 0 : i32
    return %arg0, %arg2 : i32, i32
  }
  func.func @transform_1(%arg0: i32, %arg1: i32, %arg2: i32) -> (i32, i32) {
    %c0_i32 = arith.constant 0 : i32
    return %arg2, %arg1 : i32, i32
  }
  func.func @transform_2(%arg0: i32, %arg1: i32, %arg2: i32) -> (i32, i32) {
    %c0_i32 = arith.constant 0 : i32
    %c0_i32_0 = arith.constant 0 : i32
    return %c0_i32, %arg1 : i32, i32
  }
  func.func @transform_3(%arg0: i32, %arg1: i32, %arg2: i32) -> (i32, i32) {
    %c0_i32 = arith.constant 0 : i32
    return %arg0, %arg1 : i32, i32
  }
}

module attributes {stable_mosaic.version = 11 : i64} {
  func.func @_mm_bias_relu_kernel(%arg0: i32, %arg1: i32, %arg2: i32, %arg3: memref<256x576xbf16, #tpu.memory_space<vmem>>, %arg4: memref<576x64xbf16, #tpu.memory_space<vmem>>, %arg5: memref<1x64xf32, #tpu.memory_space<vmem>>, %arg6: memref<256x64xbf16, #tpu.memory_space<vmem>>, %arg7: memref<256x64xf32, #tpu.memory_space<vmem>>) attributes {dimension_semantics = [#tpu.dimension_semantics<parallel>, #tpu.dimension_semantics<parallel>, #tpu.dimension_semantics<arbitrary>], iteration_bounds = array<i64: 8, 1, 1>, scalar_prefetch = 0 : i64, scratch_operands = 1 : i64, tpu.core_type = #tpu.core_type<tc>, window_params = [{transform_indices = @transform_0, window_bounds = array<i64: 256, 576>}, {transform_indices = @transform_1, window_bounds = array<i64: 576, 64>}, {transform_indices = @transform_2, window_bounds = array<i64: 1, 64>}, {transform_indices = @transform_3, window_bounds = array<i64: 256, 64>}]} {
    %c0_i32 = arith.constant 0 : i32
    %0 = arith.cmpi eq, %arg2, %c0_i32 : i32
    %1 = arith.extui %0 : i1 to i32
    %c0_i32_0 = arith.constant 0 : i32
    %2 = arith.cmpi ne, %1, %c0_i32_0 : i32
    scf.if %2 {
      %cst_10 = arith.constant 0.000000e+00 : f32
      %12 = vector.broadcast %cst_10 : f32 to vector<256x64xf32>
      %c0_11 = arith.constant 0 : index
      %c0_12 = arith.constant 0 : index
      %13 = vector.load %arg7[%c0_11, %c0_12] : memref<256x64xf32, #tpu.memory_space<vmem>>, vector<256x64xf32>
      tpu.vector_store %arg7[%c0_11, %c0_12], %12 {strides = array<i32>} : memref<256x64xf32, #tpu.memory_space<vmem>>, vector<256x64xf32>,
    } else {
    }
    %c0 = arith.constant 0 : index
    %c0_1 = arith.constant 0 : index
    %3 = vector.load %arg7[%c0, %c0_1] : memref<256x64xf32, #tpu.memory_space<vmem>>, vector<256x64xf32>
    %c0_2 = arith.constant 0 : index
    %c0_3 = arith.constant 0 : index
    %4 = vector.load %arg3[%c0_2, %c0_3] : memref<256x576xbf16, #tpu.memory_space<vmem>>, vector<256x576xbf16>
    %c0_4 = arith.constant 0 : index
    %c0_5 = arith.constant 0 : index
    %5 = vector.load %arg4[%c0_4, %c0_5] : memref<576x64xbf16, #tpu.memory_space<vmem>>, vector<576x64xbf16>
    %cst = arith.constant dense<0.000000e+00> : vector<256x64xf32>
    %6 = tpu.matmul %4, %5, %cst {dimension_numbers = #tpu.dot_dimension_numbers<[1], [0], [0], [1], [0, 0, 1, 1], [], []>} : vector<256x576xbf16>, vector<576x64xbf16>, vector<256x64xf32> -> vector<256x64xf32>
    %7 = arith.addf %3, %6 : vector<256x64xf32>
    %c0_6 = arith.constant 0 : index
    %c0_7 = arith.constant 0 : index
    %8 = vector.load %arg7[%c0_6, %c0_7] : memref<256x64xf32, #tpu.memory_space<vmem>>, vector<256x64xf32>
    tpu.vector_store %arg7[%c0_6, %c0_7], %7 {strides = array<i32>} : memref<256x64xf32, #tpu.memory_space<vmem>>, vector<256x64xf32>,
    %c0_i32_8 = arith.constant 0 : i32
    %9 = arith.cmpi eq, %arg2, %c0_i32_8 : i32
    %10 = arith.extui %9 : i1 to i32
    %c0_i32_9 = arith.constant 0 : i32
    %11 = arith.cmpi ne, %10, %c0_i32_9 : i32
    scf.if %11 {
      %c0_10 = arith.constant 0 : index
      %c0_11 = arith.constant 0 : index
      %12 = vector.load %arg7[%c0_10, %c0_11] : memref<256x64xf32, #tpu.memory_space<vmem>>, vector<256x64xf32>
      %c0_12 = arith.constant 0 : index
      %c0_13 = arith.constant 0 : index
      %13 = vector.load %arg5[%c0_12, %c0_13] : memref<1x64xf32, #tpu.memory_space<vmem>>, vector<1x64xf32>
      %14 = vector.broadcast %13 : vector<1x64xf32> to vector<256x64xf32>
      %15 = arith.addf %12, %14 : vector<256x64xf32>
      %cst_14 = arith.constant 0.000000e+00 : f32
      %16 = vector.broadcast %cst_14 : f32 to vector<256x64xf32>
      %17 = arith.maximumf %15, %16 : vector<256x64xf32>
      %18 = arith.truncf %17 : vector<256x64xf32> to vector<256x64xbf16>
      %c0_15 = arith.constant 0 : index
      %c0_16 = arith.constant 0 : index
      %19 = vector.load %arg6[%c0_15, %c0_16] : memref<256x64xbf16, #tpu.memory_space<vmem>>, vector<256x64xbf16>
      tpu.vector_store %arg6[%c0_15, %c0_16], %18 {strides = array<i32>} : memref<256x64xbf16, #tpu.memory_space<vmem>>, vector<256x64xbf16>,
    } else {
    }
    return
  }
  func.func @transform_0(%arg0: i32, %arg1: i32, %arg2: i32) -> (i32, i32) {
    %c0_i32 = arith.constant 0 : i32
    return %arg0, %arg2 : i32, i32
  }
  func.func @transform_1(%arg0: i32, %arg1: i32, %arg2: i32) -> (i32, i32) {
    %c0_i32 = arith.constant 0 : i32
    return %arg2, %arg1 : i32, i32
  }
  func.func @transform_2(%arg0: i32, %arg1: i32, %arg2: i32) -> (i32, i32) {
    %c0_i32 = arith.constant 0 : i32
    %c0_i32_0 = arith.constant 0 : i32
    return %c0_i32, %arg1 : i32, i32
  }
  func.func @transform_3(%arg0: i32, %arg1: i32, %arg2: i32) -> (i32, i32) {
    %c0_i32 = arith.constant 0 : i32
    return %arg0, %arg1 : i32, i32
  }
}

module attributes {stable_mosaic.version = 11 : i64} {
  func.func @_maxpool2x2_kernel(%arg0: i32, %arg1: i32, %arg2: memref<1x2x16x128xbf16, #tpu.memory_space<vmem>>, %arg3: memref<1x1x16x64xbf16, #tpu.memory_space<vmem>>) attributes {dimension_semantics = [#tpu.dimension_semantics<parallel>, #tpu.dimension_semantics<parallel>], iteration_bounds = array<i64: 2, 16>, scalar_prefetch = 0 : i64, scratch_operands = 0 : i64, tpu.core_type = #tpu.core_type<tc>, window_params = [{transform_indices = @transform_0, window_bounds = array<i64: 1, 2, 16, 128>}, {transform_indices = @transform_1, window_bounds = array<i64: 1, 1, 16, 64>}]} {
    %c0 = arith.constant 0 : index
    %c0_0 = arith.constant 0 : index
    %c0_1 = arith.constant 0 : index
    %c0_2 = arith.constant 0 : index
    %0 = vector.load %arg2[%c0, %c0_0, %c0_1, %c0_2] : memref<1x2x16x128xbf16, #tpu.memory_space<vmem>>, vector<1x1x16x128xbf16>
    %1 = vector.shape_cast %0 : vector<1x1x16x128xbf16> to vector<16x128xbf16>
    %c0_3 = arith.constant 0 : index
    %c1 = arith.constant 1 : index
    %c0_4 = arith.constant 0 : index
    %c0_5 = arith.constant 0 : index
    %2 = vector.load %arg2[%c0_3, %c1, %c0_4, %c0_5] : memref<1x2x16x128xbf16, #tpu.memory_space<vmem>>, vector<1x1x16x128xbf16>
    %3 = vector.shape_cast %2 : vector<1x1x16x128xbf16> to vector<16x128xbf16>
    %4 = arith.maximumf %1, %3 : vector<16x128xbf16>
    %5 = vector.extract_strided_slice %4 {offsets = [0, 0], sizes = [16, 64], strides = [1, 1]} : vector<16x128xbf16> to vector<16x64xbf16>
    %6 = vector.extract_strided_slice %4 {offsets = [0, 64], sizes = [16, 64], strides = [1, 1]} : vector<16x128xbf16> to vector<16x64xbf16>
    %7 = arith.maximumf %5, %6 : vector<16x64xbf16>
    %c0_6 = arith.constant 0 : index
    %c0_7 = arith.constant 0 : index
    %c0_8 = arith.constant 0 : index
    %c0_9 = arith.constant 0 : index
    %8 = vector.load %arg3[%c0_6, %c0_7, %c0_8, %c0_9] : memref<1x1x16x64xbf16, #tpu.memory_space<vmem>>, vector<1x1x16x64xbf16>
    %9 = vector.shape_cast %8 : vector<1x1x16x64xbf16> to vector<16x64xbf16>
    %10 = vector.shape_cast %7 : vector<16x64xbf16> to vector<1x1x16x64xbf16>
    tpu.vector_store %arg3[%c0_6, %c0_7, %c0_8, %c0_9], %10 {strides = array<i32>} : memref<1x1x16x64xbf16, #tpu.memory_space<vmem>>, vector<1x1x16x64xbf16>,
    return
  }
  func.func @transform_0(%arg0: i32, %arg1: i32) -> (i32, i32, i32, i32) {
    %c0_i32 = arith.constant 0 : i32
    %c0_i32_0 = arith.constant 0 : i32
    %c0_i32_1 = arith.constant 0 : i32
    return %arg0, %arg1, %c0_i32, %c0_i32_0 : i32, i32, i32, i32
  }
  func.func @transform_1(%arg0: i32, %arg1: i32) -> (i32, i32, i32, i32) {
    %c0_i32 = arith.constant 0 : i32
    %c0_i32_0 = arith.constant 0 : i32
    %c0_i32_1 = arith.constant 0 : i32
    return %arg0, %arg1, %c0_i32, %c0_i32_0 : i32, i32, i32, i32
  }
}

module attributes {stable_mosaic.version = 11 : i64} {
  func.func @_mm_bias_relu_kernel(%arg0: i32, %arg1: i32, %arg2: i32, %arg3: memref<256x576xbf16, #tpu.memory_space<vmem>>, %arg4: memref<576x128xbf16, #tpu.memory_space<vmem>>, %arg5: memref<1x128xf32, #tpu.memory_space<vmem>>, %arg6: memref<256x128xbf16, #tpu.memory_space<vmem>>, %arg7: memref<256x128xf32, #tpu.memory_space<vmem>>) attributes {dimension_semantics = [#tpu.dimension_semantics<parallel>, #tpu.dimension_semantics<parallel>, #tpu.dimension_semantics<arbitrary>], iteration_bounds = array<i64: 2, 1, 1>, scalar_prefetch = 0 : i64, scratch_operands = 1 : i64, tpu.core_type = #tpu.core_type<tc>, window_params = [{transform_indices = @transform_0, window_bounds = array<i64: 256, 576>}, {transform_indices = @transform_1, window_bounds = array<i64: 576, 128>}, {transform_indices = @transform_2, window_bounds = array<i64: 1, 128>}, {transform_indices = @transform_3, window_bounds = array<i64: 256, 128>}]} {
    %c0_i32 = arith.constant 0 : i32
    %0 = arith.cmpi eq, %arg2, %c0_i32 : i32
    %1 = arith.extui %0 : i1 to i32
    %c0_i32_0 = arith.constant 0 : i32
    %2 = arith.cmpi ne, %1, %c0_i32_0 : i32
    scf.if %2 {
      %cst_10 = arith.constant 0.000000e+00 : f32
      %12 = vector.broadcast %cst_10 : f32 to vector<256x128xf32>
      %c0_11 = arith.constant 0 : index
      %c0_12 = arith.constant 0 : index
      %13 = vector.load %arg7[%c0_11, %c0_12] : memref<256x128xf32, #tpu.memory_space<vmem>>, vector<256x128xf32>
      tpu.vector_store %arg7[%c0_11, %c0_12], %12 {strides = array<i32>} : memref<256x128xf32, #tpu.memory_space<vmem>>, vector<256x128xf32>,
    } else {
    }
    %c0 = arith.constant 0 : index
    %c0_1 = arith.constant 0 : index
    %3 = vector.load %arg7[%c0, %c0_1] : memref<256x128xf32, #tpu.memory_space<vmem>>, vector<256x128xf32>
    %c0_2 = arith.constant 0 : index
    %c0_3 = arith.constant 0 : index
    %4 = vector.load %arg3[%c0_2, %c0_3] : memref<256x576xbf16, #tpu.memory_space<vmem>>, vector<256x576xbf16>
    %c0_4 = arith.constant 0 : index
    %c0_5 = arith.constant 0 : index
    %5 = vector.load %arg4[%c0_4, %c0_5] : memref<576x128xbf16, #tpu.memory_space<vmem>>, vector<576x128xbf16>
    %cst = arith.constant dense<0.000000e+00> : vector<256x128xf32>
    %6 = tpu.matmul %4, %5, %cst {dimension_numbers = #tpu.dot_dimension_numbers<[1], [0], [0], [1], [0, 0, 1, 1], [], []>} : vector<256x576xbf16>, vector<576x128xbf16>, vector<256x128xf32> -> vector<256x128xf32>
    %7 = arith.addf %3, %6 : vector<256x128xf32>
    %c0_6 = arith.constant 0 : index
    %c0_7 = arith.constant 0 : index
    %8 = vector.load %arg7[%c0_6, %c0_7] : memref<256x128xf32, #tpu.memory_space<vmem>>, vector<256x128xf32>
    tpu.vector_store %arg7[%c0_6, %c0_7], %7 {strides = array<i32>} : memref<256x128xf32, #tpu.memory_space<vmem>>, vector<256x128xf32>,
    %c0_i32_8 = arith.constant 0 : i32
    %9 = arith.cmpi eq, %arg2, %c0_i32_8 : i32
    %10 = arith.extui %9 : i1 to i32
    %c0_i32_9 = arith.constant 0 : i32
    %11 = arith.cmpi ne, %10, %c0_i32_9 : i32
    scf.if %11 {
      %c0_10 = arith.constant 0 : index
      %c0_11 = arith.constant 0 : index
      %12 = vector.load %arg7[%c0_10, %c0_11] : memref<256x128xf32, #tpu.memory_space<vmem>>, vector<256x128xf32>
      %c0_12 = arith.constant 0 : index
      %c0_13 = arith.constant 0 : index
      %13 = vector.load %arg5[%c0_12, %c0_13] : memref<1x128xf32, #tpu.memory_space<vmem>>, vector<1x128xf32>
      %14 = vector.broadcast %13 : vector<1x128xf32> to vector<256x128xf32>
      %15 = arith.addf %12, %14 : vector<256x128xf32>
      %cst_14 = arith.constant 0.000000e+00 : f32
      %16 = vector.broadcast %cst_14 : f32 to vector<256x128xf32>
      %17 = arith.maximumf %15, %16 : vector<256x128xf32>
      %18 = arith.truncf %17 : vector<256x128xf32> to vector<256x128xbf16>
      %c0_15 = arith.constant 0 : index
      %c0_16 = arith.constant 0 : index
      %19 = vector.load %arg6[%c0_15, %c0_16] : memref<256x128xbf16, #tpu.memory_space<vmem>>, vector<256x128xbf16>
      tpu.vector_store %arg6[%c0_15, %c0_16], %18 {strides = array<i32>} : memref<256x128xbf16, #tpu.memory_space<vmem>>, vector<256x128xbf16>,
    } else {
    }
    return
  }
  func.func @transform_0(%arg0: i32, %arg1: i32, %arg2: i32) -> (i32, i32) {
    %c0_i32 = arith.constant 0 : i32
    return %arg0, %arg2 : i32, i32
  }
  func.func @transform_1(%arg0: i32, %arg1: i32, %arg2: i32) -> (i32, i32) {
    %c0_i32 = arith.constant 0 : i32
    return %arg2, %arg1 : i32, i32
  }
  func.func @transform_2(%arg0: i32, %arg1: i32, %arg2: i32) -> (i32, i32) {
    %c0_i32 = arith.constant 0 : i32
    %c0_i32_0 = arith.constant 0 : i32
    return %c0_i32, %arg1 : i32, i32
  }
  func.func @transform_3(%arg0: i32, %arg1: i32, %arg2: i32) -> (i32, i32) {
    %c0_i32 = arith.constant 0 : i32
    return %arg0, %arg1 : i32, i32
  }
}

module attributes {stable_mosaic.version = 11 : i64} {
  func.func @_mm_bias_relu_kernel(%arg0: i32, %arg1: i32, %arg2: i32, %arg3: memref<256x1152xbf16, #tpu.memory_space<vmem>>, %arg4: memref<1152x128xbf16, #tpu.memory_space<vmem>>, %arg5: memref<1x128xf32, #tpu.memory_space<vmem>>, %arg6: memref<256x128xbf16, #tpu.memory_space<vmem>>, %arg7: memref<256x128xf32, #tpu.memory_space<vmem>>) attributes {dimension_semantics = [#tpu.dimension_semantics<parallel>, #tpu.dimension_semantics<parallel>, #tpu.dimension_semantics<arbitrary>], iteration_bounds = array<i64: 2, 1, 1>, scalar_prefetch = 0 : i64, scratch_operands = 1 : i64, tpu.core_type = #tpu.core_type<tc>, window_params = [{transform_indices = @transform_0, window_bounds = array<i64: 256, 1152>}, {transform_indices = @transform_1, window_bounds = array<i64: 1152, 128>}, {transform_indices = @transform_2, window_bounds = array<i64: 1, 128>}, {transform_indices = @transform_3, window_bounds = array<i64: 256, 128>}]} {
    %c0_i32 = arith.constant 0 : i32
    %0 = arith.cmpi eq, %arg2, %c0_i32 : i32
    %1 = arith.extui %0 : i1 to i32
    %c0_i32_0 = arith.constant 0 : i32
    %2 = arith.cmpi ne, %1, %c0_i32_0 : i32
    scf.if %2 {
      %cst_10 = arith.constant 0.000000e+00 : f32
      %12 = vector.broadcast %cst_10 : f32 to vector<256x128xf32>
      %c0_11 = arith.constant 0 : index
      %c0_12 = arith.constant 0 : index
      %13 = vector.load %arg7[%c0_11, %c0_12] : memref<256x128xf32, #tpu.memory_space<vmem>>, vector<256x128xf32>
      tpu.vector_store %arg7[%c0_11, %c0_12], %12 {strides = array<i32>} : memref<256x128xf32, #tpu.memory_space<vmem>>, vector<256x128xf32>,
    } else {
    }
    %c0 = arith.constant 0 : index
    %c0_1 = arith.constant 0 : index
    %3 = vector.load %arg7[%c0, %c0_1] : memref<256x128xf32, #tpu.memory_space<vmem>>, vector<256x128xf32>
    %c0_2 = arith.constant 0 : index
    %c0_3 = arith.constant 0 : index
    %4 = vector.load %arg3[%c0_2, %c0_3] : memref<256x1152xbf16, #tpu.memory_space<vmem>>, vector<256x1152xbf16>
    %c0_4 = arith.constant 0 : index
    %c0_5 = arith.constant 0 : index
    %5 = vector.load %arg4[%c0_4, %c0_5] : memref<1152x128xbf16, #tpu.memory_space<vmem>>, vector<1152x128xbf16>
    %cst = arith.constant dense<0.000000e+00> : vector<256x128xf32>
    %6 = tpu.matmul %4, %5, %cst {dimension_numbers = #tpu.dot_dimension_numbers<[1], [0], [0], [1], [0, 0, 1, 1], [], []>} : vector<256x1152xbf16>, vector<1152x128xbf16>, vector<256x128xf32> -> vector<256x128xf32>
    %7 = arith.addf %3, %6 : vector<256x128xf32>
    %c0_6 = arith.constant 0 : index
    %c0_7 = arith.constant 0 : index
    %8 = vector.load %arg7[%c0_6, %c0_7] : memref<256x128xf32, #tpu.memory_space<vmem>>, vector<256x128xf32>
    tpu.vector_store %arg7[%c0_6, %c0_7], %7 {strides = array<i32>} : memref<256x128xf32, #tpu.memory_space<vmem>>, vector<256x128xf32>,
    %c0_i32_8 = arith.constant 0 : i32
    %9 = arith.cmpi eq, %arg2, %c0_i32_8 : i32
    %10 = arith.extui %9 : i1 to i32
    %c0_i32_9 = arith.constant 0 : i32
    %11 = arith.cmpi ne, %10, %c0_i32_9 : i32
    scf.if %11 {
      %c0_10 = arith.constant 0 : index
      %c0_11 = arith.constant 0 : index
      %12 = vector.load %arg7[%c0_10, %c0_11] : memref<256x128xf32, #tpu.memory_space<vmem>>, vector<256x128xf32>
      %c0_12 = arith.constant 0 : index
      %c0_13 = arith.constant 0 : index
      %13 = vector.load %arg5[%c0_12, %c0_13] : memref<1x128xf32, #tpu.memory_space<vmem>>, vector<1x128xf32>
      %14 = vector.broadcast %13 : vector<1x128xf32> to vector<256x128xf32>
      %15 = arith.addf %12, %14 : vector<256x128xf32>
      %cst_14 = arith.constant 0.000000e+00 : f32
      %16 = vector.broadcast %cst_14 : f32 to vector<256x128xf32>
      %17 = arith.maximumf %15, %16 : vector<256x128xf32>
      %18 = arith.truncf %17 : vector<256x128xf32> to vector<256x128xbf16>
      %c0_15 = arith.constant 0 : index
      %c0_16 = arith.constant 0 : index
      %19 = vector.load %arg6[%c0_15, %c0_16] : memref<256x128xbf16, #tpu.memory_space<vmem>>, vector<256x128xbf16>
      tpu.vector_store %arg6[%c0_15, %c0_16], %18 {strides = array<i32>} : memref<256x128xbf16, #tpu.memory_space<vmem>>, vector<256x128xbf16>,
    } else {
    }
    return
  }
  func.func @transform_0(%arg0: i32, %arg1: i32, %arg2: i32) -> (i32, i32) {
    %c0_i32 = arith.constant 0 : i32
    return %arg0, %arg2 : i32, i32
  }
  func.func @transform_1(%arg0: i32, %arg1: i32, %arg2: i32) -> (i32, i32) {
    %c0_i32 = arith.constant 0 : i32
    return %arg2, %arg1 : i32, i32
  }
  func.func @transform_2(%arg0: i32, %arg1: i32, %arg2: i32) -> (i32, i32) {
    %c0_i32 = arith.constant 0 : i32
    %c0_i32_0 = arith.constant 0 : i32
    return %c0_i32, %arg1 : i32, i32
  }
  func.func @transform_3(%arg0: i32, %arg1: i32, %arg2: i32) -> (i32, i32) {
    %c0_i32 = arith.constant 0 : i32
    return %arg0, %arg1 : i32, i32
  }
}

module attributes {stable_mosaic.version = 11 : i64} {
  func.func @_maxpool2x2_kernel(%arg0: i32, %arg1: i32, %arg2: memref<1x2x8x256xbf16, #tpu.memory_space<vmem>>, %arg3: memref<1x1x8x128xbf16, #tpu.memory_space<vmem>>) attributes {dimension_semantics = [#tpu.dimension_semantics<parallel>, #tpu.dimension_semantics<parallel>], iteration_bounds = array<i64: 2, 8>, scalar_prefetch = 0 : i64, scratch_operands = 0 : i64, tpu.core_type = #tpu.core_type<tc>, window_params = [{transform_indices = @transform_0, window_bounds = array<i64: 1, 2, 8, 256>}, {transform_indices = @transform_1, window_bounds = array<i64: 1, 1, 8, 128>}]} {
    %c0 = arith.constant 0 : index
    %c0_0 = arith.constant 0 : index
    %c0_1 = arith.constant 0 : index
    %c0_2 = arith.constant 0 : index
    %0 = vector.load %arg2[%c0, %c0_0, %c0_1, %c0_2] : memref<1x2x8x256xbf16, #tpu.memory_space<vmem>>, vector<1x1x8x256xbf16>
    %1 = vector.shape_cast %0 : vector<1x1x8x256xbf16> to vector<8x256xbf16>
    %c0_3 = arith.constant 0 : index
    %c1 = arith.constant 1 : index
    %c0_4 = arith.constant 0 : index
    %c0_5 = arith.constant 0 : index
    %2 = vector.load %arg2[%c0_3, %c1, %c0_4, %c0_5] : memref<1x2x8x256xbf16, #tpu.memory_space<vmem>>, vector<1x1x8x256xbf16>
    %3 = vector.shape_cast %2 : vector<1x1x8x256xbf16> to vector<8x256xbf16>
    %4 = arith.maximumf %1, %3 : vector<8x256xbf16>
    %5 = vector.extract_strided_slice %4 {offsets = [0, 0], sizes = [8, 128], strides = [1, 1]} : vector<8x256xbf16> to vector<8x128xbf16>
    %6 = vector.extract_strided_slice %4 {offsets = [0, 128], sizes = [8, 128], strides = [1, 1]} : vector<8x256xbf16> to vector<8x128xbf16>
    %7 = arith.maximumf %5, %6 : vector<8x128xbf16>
    %c0_6 = arith.constant 0 : index
    %c0_7 = arith.constant 0 : index
    %c0_8 = arith.constant 0 : index
    %c0_9 = arith.constant 0 : index
    %8 = vector.load %arg3[%c0_6, %c0_7, %c0_8, %c0_9] : memref<1x1x8x128xbf16, #tpu.memory_space<vmem>>, vector<1x1x8x128xbf16>
    %9 = vector.shape_cast %8 : vector<1x1x8x128xbf16> to vector<8x128xbf16>
    %10 = vector.shape_cast %7 : vector<8x128xbf16> to vector<1x1x8x128xbf16>
    tpu.vector_store %arg3[%c0_6, %c0_7, %c0_8, %c0_9], %10 {strides = array<i32>} : memref<1x1x8x128xbf16, #tpu.memory_space<vmem>>, vector<1x1x8x128xbf16>,
    return
  }
  func.func @transform_0(%arg0: i32, %arg1: i32) -> (i32, i32, i32, i32) {
    %c0_i32 = arith.constant 0 : i32
    %c0_i32_0 = arith.constant 0 : i32
    %c0_i32_1 = arith.constant 0 : i32
    return %arg0, %arg1, %c0_i32, %c0_i32_0 : i32, i32, i32, i32
  }
  func.func @transform_1(%arg0: i32, %arg1: i32) -> (i32, i32, i32, i32) {
    %c0_i32 = arith.constant 0 : i32
    %c0_i32_0 = arith.constant 0 : i32
    %c0_i32_1 = arith.constant 0 : i32
    return %arg0, %arg1, %c0_i32, %c0_i32_0 : i32, i32, i32, i32
  }
}

module attributes {stable_mosaic.version = 11 : i64} {
  func.func @_mm_bias_relu_kernel(%arg0: i32, %arg1: i32, %arg2: i32, %arg3: memref<128x1152xbf16, #tpu.memory_space<vmem>>, %arg4: memref<1152x128xbf16, #tpu.memory_space<vmem>>, %arg5: memref<1x128xf32, #tpu.memory_space<vmem>>, %arg6: memref<128x128xbf16, #tpu.memory_space<vmem>>, %arg7: memref<128x128xf32, #tpu.memory_space<vmem>>) attributes {dimension_semantics = [#tpu.dimension_semantics<parallel>, #tpu.dimension_semantics<parallel>, #tpu.dimension_semantics<arbitrary>], iteration_bounds = array<i64: 1, 2, 1>, scalar_prefetch = 0 : i64, scratch_operands = 1 : i64, tpu.core_type = #tpu.core_type<tc>, window_params = [{transform_indices = @transform_0, window_bounds = array<i64: 128, 1152>}, {transform_indices = @transform_1, window_bounds = array<i64: 1152, 128>}, {transform_indices = @transform_2, window_bounds = array<i64: 1, 128>}, {transform_indices = @transform_3, window_bounds = array<i64: 128, 128>}]} {
    %c0_i32 = arith.constant 0 : i32
    %0 = arith.cmpi eq, %arg2, %c0_i32 : i32
    %1 = arith.extui %0 : i1 to i32
    %c0_i32_0 = arith.constant 0 : i32
    %2 = arith.cmpi ne, %1, %c0_i32_0 : i32
    scf.if %2 {
      %cst_10 = arith.constant 0.000000e+00 : f32
      %12 = vector.broadcast %cst_10 : f32 to vector<128x128xf32>
      %c0_11 = arith.constant 0 : index
      %c0_12 = arith.constant 0 : index
      %13 = vector.load %arg7[%c0_11, %c0_12] : memref<128x128xf32, #tpu.memory_space<vmem>>, vector<128x128xf32>
      tpu.vector_store %arg7[%c0_11, %c0_12], %12 {strides = array<i32>} : memref<128x128xf32, #tpu.memory_space<vmem>>, vector<128x128xf32>,
    } else {
    }
    %c0 = arith.constant 0 : index
    %c0_1 = arith.constant 0 : index
    %3 = vector.load %arg7[%c0, %c0_1] : memref<128x128xf32, #tpu.memory_space<vmem>>, vector<128x128xf32>
    %c0_2 = arith.constant 0 : index
    %c0_3 = arith.constant 0 : index
    %4 = vector.load %arg3[%c0_2, %c0_3] : memref<128x1152xbf16, #tpu.memory_space<vmem>>, vector<128x1152xbf16>
    %c0_4 = arith.constant 0 : index
    %c0_5 = arith.constant 0 : index
    %5 = vector.load %arg4[%c0_4, %c0_5] : memref<1152x128xbf16, #tpu.memory_space<vmem>>, vector<1152x128xbf16>
    %cst = arith.constant dense<0.000000e+00> : vector<128x128xf32>
    %6 = tpu.matmul %4, %5, %cst {dimension_numbers = #tpu.dot_dimension_numbers<[1], [0], [0], [1], [0, 0, 1, 1], [], []>} : vector<128x1152xbf16>, vector<1152x128xbf16>, vector<128x128xf32> -> vector<128x128xf32>
    %7 = arith.addf %3, %6 : vector<128x128xf32>
    %c0_6 = arith.constant 0 : index
    %c0_7 = arith.constant 0 : index
    %8 = vector.load %arg7[%c0_6, %c0_7] : memref<128x128xf32, #tpu.memory_space<vmem>>, vector<128x128xf32>
    tpu.vector_store %arg7[%c0_6, %c0_7], %7 {strides = array<i32>} : memref<128x128xf32, #tpu.memory_space<vmem>>, vector<128x128xf32>,
    %c0_i32_8 = arith.constant 0 : i32
    %9 = arith.cmpi eq, %arg2, %c0_i32_8 : i32
    %10 = arith.extui %9 : i1 to i32
    %c0_i32_9 = arith.constant 0 : i32
    %11 = arith.cmpi ne, %10, %c0_i32_9 : i32
    scf.if %11 {
      %c0_10 = arith.constant 0 : index
      %c0_11 = arith.constant 0 : index
      %12 = vector.load %arg7[%c0_10, %c0_11] : memref<128x128xf32, #tpu.memory_space<vmem>>, vector<128x128xf32>
      %c0_12 = arith.constant 0 : index
      %c0_13 = arith.constant 0 : index
      %13 = vector.load %arg5[%c0_12, %c0_13] : memref<1x128xf32, #tpu.memory_space<vmem>>, vector<1x128xf32>
      %14 = vector.broadcast %13 : vector<1x128xf32> to vector<128x128xf32>
      %15 = arith.addf %12, %14 : vector<128x128xf32>
      %cst_14 = arith.constant 0.000000e+00 : f32
      %16 = vector.broadcast %cst_14 : f32 to vector<128x128xf32>
      %17 = arith.maximumf %15, %16 : vector<128x128xf32>
      %18 = arith.truncf %17 : vector<128x128xf32> to vector<128x128xbf16>
      %c0_15 = arith.constant 0 : index
      %c0_16 = arith.constant 0 : index
      %19 = vector.load %arg6[%c0_15, %c0_16] : memref<128x128xbf16, #tpu.memory_space<vmem>>, vector<128x128xbf16>
      tpu.vector_store %arg6[%c0_15, %c0_16], %18 {strides = array<i32>} : memref<128x128xbf16, #tpu.memory_space<vmem>>, vector<128x128xbf16>,
    } else {
    }
    return
  }
  func.func @transform_0(%arg0: i32, %arg1: i32, %arg2: i32) -> (i32, i32) {
    %c0_i32 = arith.constant 0 : i32
    return %arg0, %arg2 : i32, i32
  }
  func.func @transform_1(%arg0: i32, %arg1: i32, %arg2: i32) -> (i32, i32) {
    %c0_i32 = arith.constant 0 : i32
    return %arg2, %arg1 : i32, i32
  }
  func.func @transform_2(%arg0: i32, %arg1: i32, %arg2: i32) -> (i32, i32) {
    %c0_i32 = arith.constant 0 : i32
    %c0_i32_0 = arith.constant 0 : i32
    return %c0_i32, %arg1 : i32, i32
  }
  func.func @transform_3(%arg0: i32, %arg1: i32, %arg2: i32) -> (i32, i32) {
    %c0_i32 = arith.constant 0 : i32
    return %arg0, %arg1 : i32, i32
  }
}

module attributes {stable_mosaic.version = 11 : i64} {
  func.func @_mm_bias_relu_kernel(%arg0: i32, %arg1: i32, %arg2: i32, %arg3: memref<128x1152xbf16, #tpu.memory_space<vmem>>, %arg4: memref<1152x128xbf16, #tpu.memory_space<vmem>>, %arg5: memref<1x128xf32, #tpu.memory_space<vmem>>, %arg6: memref<128x128xbf16, #tpu.memory_space<vmem>>, %arg7: memref<128x128xf32, #tpu.memory_space<vmem>>) attributes {dimension_semantics = [#tpu.dimension_semantics<parallel>, #tpu.dimension_semantics<parallel>, #tpu.dimension_semantics<arbitrary>], iteration_bounds = array<i64: 1, 2, 2>, scalar_prefetch = 0 : i64, scratch_operands = 1 : i64, tpu.core_type = #tpu.core_type<tc>, window_params = [{transform_indices = @transform_0, window_bounds = array<i64: 128, 1152>}, {transform_indices = @transform_1, window_bounds = array<i64: 1152, 128>}, {transform_indices = @transform_2, window_bounds = array<i64: 1, 128>}, {transform_indices = @transform_3, window_bounds = array<i64: 128, 128>}]} {
    %c0_i32 = arith.constant 0 : i32
    %0 = arith.cmpi eq, %arg2, %c0_i32 : i32
    %1 = arith.extui %0 : i1 to i32
    %c0_i32_0 = arith.constant 0 : i32
    %2 = arith.cmpi ne, %1, %c0_i32_0 : i32
    scf.if %2 {
      %cst_9 = arith.constant 0.000000e+00 : f32
      %12 = vector.broadcast %cst_9 : f32 to vector<128x128xf32>
      %c0_10 = arith.constant 0 : index
      %c0_11 = arith.constant 0 : index
      %13 = vector.load %arg7[%c0_10, %c0_11] : memref<128x128xf32, #tpu.memory_space<vmem>>, vector<128x128xf32>
      tpu.vector_store %arg7[%c0_10, %c0_11], %12 {strides = array<i32>} : memref<128x128xf32, #tpu.memory_space<vmem>>, vector<128x128xf32>,
    } else {
    }
    %c0 = arith.constant 0 : index
    %c0_1 = arith.constant 0 : index
    %3 = vector.load %arg7[%c0, %c0_1] : memref<128x128xf32, #tpu.memory_space<vmem>>, vector<128x128xf32>
    %c0_2 = arith.constant 0 : index
    %c0_3 = arith.constant 0 : index
    %4 = vector.load %arg3[%c0_2, %c0_3] : memref<128x1152xbf16, #tpu.memory_space<vmem>>, vector<128x1152xbf16>
    %c0_4 = arith.constant 0 : index
    %c0_5 = arith.constant 0 : index
    %5 = vector.load %arg4[%c0_4, %c0_5] : memref<1152x128xbf16, #tpu.memory_space<vmem>>, vector<1152x128xbf16>
    %cst = arith.constant dense<0.000000e+00> : vector<128x128xf32>
    %6 = tpu.matmul %4, %5, %cst {dimension_numbers = #tpu.dot_dimension_numbers<[1], [0], [0], [1], [0, 0, 1, 1], [], []>} : vector<128x1152xbf16>, vector<1152x128xbf16>, vector<128x128xf32> -> vector<128x128xf32>
    %7 = arith.addf %3, %6 : vector<128x128xf32>
    %c0_6 = arith.constant 0 : index
    %c0_7 = arith.constant 0 : index
    %8 = vector.load %arg7[%c0_6, %c0_7] : memref<128x128xf32, #tpu.memory_space<vmem>>, vector<128x128xf32>
    tpu.vector_store %arg7[%c0_6, %c0_7], %7 {strides = array<i32>} : memref<128x128xf32, #tpu.memory_space<vmem>>, vector<128x128xf32>,
    %c1_i32 = arith.constant 1 : i32
    %9 = arith.cmpi eq, %arg2, %c1_i32 : i32
    %10 = arith.extui %9 : i1 to i32
    %c0_i32_8 = arith.constant 0 : i32
    %11 = arith.cmpi ne, %10, %c0_i32_8 : i32
    scf.if %11 {
      %c0_9 = arith.constant 0 : index
      %c0_10 = arith.constant 0 : index
      %12 = vector.load %arg7[%c0_9, %c0_10] : memref<128x128xf32, #tpu.memory_space<vmem>>, vector<128x128xf32>
      %c0_11 = arith.constant 0 : index
      %c0_12 = arith.constant 0 : index
      %13 = vector.load %arg5[%c0_11, %c0_12] : memref<1x128xf32, #tpu.memory_space<vmem>>, vector<1x128xf32>
      %14 = vector.broadcast %13 : vector<1x128xf32> to vector<128x128xf32>
      %15 = arith.addf %12, %14 : vector<128x128xf32>
      %cst_13 = arith.constant 0.000000e+00 : f32
      %16 = vector.broadcast %cst_13 : f32 to vector<128x128xf32>
      %17 = arith.maximumf %15, %16 : vector<128x128xf32>
      %18 = arith.truncf %17 : vector<128x128xf32> to vector<128x128xbf16>
      %c0_14 = arith.constant 0 : index
      %c0_15 = arith.constant 0 : index
      %19 = vector.load %arg6[%c0_14, %c0_15] : memref<128x128xbf16, #tpu.memory_space<vmem>>, vector<128x128xbf16>
      tpu.vector_store %arg6[%c0_14, %c0_15], %18 {strides = array<i32>} : memref<128x128xbf16, #tpu.memory_space<vmem>>, vector<128x128xbf16>,
    } else {
    }
    return
  }
  func.func @transform_0(%arg0: i32, %arg1: i32, %arg2: i32) -> (i32, i32) {
    %c0_i32 = arith.constant 0 : i32
    return %arg0, %arg2 : i32, i32
  }
  func.func @transform_1(%arg0: i32, %arg1: i32, %arg2: i32) -> (i32, i32) {
    %c0_i32 = arith.constant 0 : i32
    return %arg2, %arg1 : i32, i32
  }
  func.func @transform_2(%arg0: i32, %arg1: i32, %arg2: i32) -> (i32, i32) {
    %c0_i32 = arith.constant 0 : i32
    %c0_i32_0 = arith.constant 0 : i32
    return %c0_i32, %arg1 : i32, i32
  }
  func.func @transform_3(%arg0: i32, %arg1: i32, %arg2: i32) -> (i32, i32) {
    %c0_i32 = arith.constant 0 : i32
    return %arg0, %arg1 : i32, i32
  }
}

module attributes {stable_mosaic.version = 11 : i64} {
  func.func @_maxpool2x2_kernel(%arg0: i32, %arg1: i32, %arg2: memref<1x2x4x512xbf16, #tpu.memory_space<vmem>>, %arg3: memref<1x1x4x256xbf16, #tpu.memory_space<vmem>>) attributes {dimension_semantics = [#tpu.dimension_semantics<parallel>, #tpu.dimension_semantics<parallel>], iteration_bounds = array<i64: 2, 4>, scalar_prefetch = 0 : i64, scratch_operands = 0 : i64, tpu.core_type = #tpu.core_type<tc>, window_params = [{transform_indices = @transform_0, window_bounds = array<i64: 1, 2, 4, 512>}, {transform_indices = @transform_1, window_bounds = array<i64: 1, 1, 4, 256>}]} {
    %c0 = arith.constant 0 : index
    %c0_0 = arith.constant 0 : index
    %c0_1 = arith.constant 0 : index
    %c0_2 = arith.constant 0 : index
    %0 = vector.load %arg2[%c0, %c0_0, %c0_1, %c0_2] : memref<1x2x4x512xbf16, #tpu.memory_space<vmem>>, vector<1x1x4x512xbf16>
    %1 = vector.shape_cast %0 : vector<1x1x4x512xbf16> to vector<4x512xbf16>
    %c0_3 = arith.constant 0 : index
    %c1 = arith.constant 1 : index
    %c0_4 = arith.constant 0 : index
    %c0_5 = arith.constant 0 : index
    %2 = vector.load %arg2[%c0_3, %c1, %c0_4, %c0_5] : memref<1x2x4x512xbf16, #tpu.memory_space<vmem>>, vector<1x1x4x512xbf16>
    %3 = vector.shape_cast %2 : vector<1x1x4x512xbf16> to vector<4x512xbf16>
    %4 = arith.maximumf %1, %3 : vector<4x512xbf16>
    %5 = vector.extract_strided_slice %4 {offsets = [0, 0], sizes = [4, 256], strides = [1, 1]} : vector<4x512xbf16> to vector<4x256xbf16>
    %6 = vector.extract_strided_slice %4 {offsets = [0, 256], sizes = [4, 256], strides = [1, 1]} : vector<4x512xbf16> to vector<4x256xbf16>
    %7 = arith.maximumf %5, %6 : vector<4x256xbf16>
    %c0_6 = arith.constant 0 : index
    %c0_7 = arith.constant 0 : index
    %c0_8 = arith.constant 0 : index
    %c0_9 = arith.constant 0 : index
    %8 = vector.load %arg3[%c0_6, %c0_7, %c0_8, %c0_9] : memref<1x1x4x256xbf16, #tpu.memory_space<vmem>>, vector<1x1x4x256xbf16>
    %9 = vector.shape_cast %8 : vector<1x1x4x256xbf16> to vector<4x256xbf16>
    %10 = vector.shape_cast %7 : vector<4x256xbf16> to vector<1x1x4x256xbf16>
    tpu.vector_store %arg3[%c0_6, %c0_7, %c0_8, %c0_9], %10 {strides = array<i32>} : memref<1x1x4x256xbf16, #tpu.memory_space<vmem>>, vector<1x1x4x256xbf16>,
    return
  }
  func.func @transform_0(%arg0: i32, %arg1: i32) -> (i32, i32, i32, i32) {
    %c0_i32 = arith.constant 0 : i32
    %c0_i32_0 = arith.constant 0 : i32
    %c0_i32_1 = arith.constant 0 : i32
    return %arg0, %arg1, %c0_i32, %c0_i32_0 : i32, i32, i32, i32
  }
  func.func @transform_1(%arg0: i32, %arg1: i32) -> (i32, i32, i32, i32) {
    %c0_i32 = arith.constant 0 : i32
    %c0_i32_0 = arith.constant 0 : i32
    %c0_i32_1 = arith.constant 0 : i32
    return %arg0, %arg1, %c0_i32, %c0_i32_0 : i32, i32, i32, i32
  }
}

module attributes {stable_mosaic.version = 11 : i64} {
  func.func @_mm_bias_relu_kernel(%arg0: i32, %arg1: i32, %arg2: i32, %arg3: memref<32x1152xbf16, #tpu.memory_space<vmem>>, %arg4: memref<1152x256xbf16, #tpu.memory_space<vmem>>, %arg5: memref<1x256xf32, #tpu.memory_space<vmem>>, %arg6: memref<32x256xf32, #tpu.memory_space<vmem>>, %arg7: memref<32x256xf32, #tpu.memory_space<vmem>>) attributes {dimension_semantics = [#tpu.dimension_semantics<parallel>, #tpu.dimension_semantics<parallel>, #tpu.dimension_semantics<arbitrary>], iteration_bounds = array<i64: 1, 2, 2>, scalar_prefetch = 0 : i64, scratch_operands = 1 : i64, tpu.core_type = #tpu.core_type<tc>, window_params = [{transform_indices = @transform_0, window_bounds = array<i64: 32, 1152>}, {transform_indices = @transform_1, window_bounds = array<i64: 1152, 256>}, {transform_indices = @transform_2, window_bounds = array<i64: 1, 256>}, {transform_indices = @transform_3, window_bounds = array<i64: 32, 256>}]} {
    %c0_i32 = arith.constant 0 : i32
    %0 = arith.cmpi eq, %arg2, %c0_i32 : i32
    %1 = arith.extui %0 : i1 to i32
    %c0_i32_0 = arith.constant 0 : i32
    %2 = arith.cmpi ne, %1, %c0_i32_0 : i32
    scf.if %2 {
      %cst_9 = arith.constant 0.000000e+00 : f32
      %12 = vector.broadcast %cst_9 : f32 to vector<32x256xf32>
      %c0_10 = arith.constant 0 : index
      %c0_11 = arith.constant 0 : index
      %13 = vector.load %arg7[%c0_10, %c0_11] : memref<32x256xf32, #tpu.memory_space<vmem>>, vector<32x256xf32>
      tpu.vector_store %arg7[%c0_10, %c0_11], %12 {strides = array<i32>} : memref<32x256xf32, #tpu.memory_space<vmem>>, vector<32x256xf32>,
    } else {
    }
    %c0 = arith.constant 0 : index
    %c0_1 = arith.constant 0 : index
    %3 = vector.load %arg7[%c0, %c0_1] : memref<32x256xf32, #tpu.memory_space<vmem>>, vector<32x256xf32>
    %c0_2 = arith.constant 0 : index
    %c0_3 = arith.constant 0 : index
    %4 = vector.load %arg3[%c0_2, %c0_3] : memref<32x1152xbf16, #tpu.memory_space<vmem>>, vector<32x1152xbf16>
    %c0_4 = arith.constant 0 : index
    %c0_5 = arith.constant 0 : index
    %5 = vector.load %arg4[%c0_4, %c0_5] : memref<1152x256xbf16, #tpu.memory_space<vmem>>, vector<1152x256xbf16>
    %cst = arith.constant dense<0.000000e+00> : vector<32x256xf32>
    %6 = tpu.matmul %4, %5, %cst {dimension_numbers = #tpu.dot_dimension_numbers<[1], [0], [0], [1], [0, 0, 1, 1], [], []>} : vector<32x1152xbf16>, vector<1152x256xbf16>, vector<32x256xf32> -> vector<32x256xf32>
    %7 = arith.addf %3, %6 : vector<32x256xf32>
    %c0_6 = arith.constant 0 : index
    %c0_7 = arith.constant 0 : index
    %8 = vector.load %arg7[%c0_6, %c0_7] : memref<32x256xf32, #tpu.memory_space<vmem>>, vector<32x256xf32>
    tpu.vector_store %arg7[%c0_6, %c0_7], %7 {strides = array<i32>} : memref<32x256xf32, #tpu.memory_space<vmem>>, vector<32x256xf32>,
    %c1_i32 = arith.constant 1 : i32
    %9 = arith.cmpi eq, %arg2, %c1_i32 : i32
    %10 = arith.extui %9 : i1 to i32
    %c0_i32_8 = arith.constant 0 : i32
    %11 = arith.cmpi ne, %10, %c0_i32_8 : i32
    scf.if %11 {
      %c0_9 = arith.constant 0 : index
      %c0_10 = arith.constant 0 : index
      %12 = vector.load %arg7[%c0_9, %c0_10] : memref<32x256xf32, #tpu.memory_space<vmem>>, vector<32x256xf32>
      %c0_11 = arith.constant 0 : index
      %c0_12 = arith.constant 0 : index
      %13 = vector.load %arg5[%c0_11, %c0_12] : memref<1x256xf32, #tpu.memory_space<vmem>>, vector<1x256xf32>
      %14 = vector.broadcast %13 : vector<1x256xf32> to vector<32x256xf32>
      %15 = arith.addf %12, %14 : vector<32x256xf32>
      %cst_13 = arith.constant 0.000000e+00 : f32
      %16 = vector.broadcast %cst_13 : f32 to vector<32x256xf32>
      %17 = arith.maximumf %15, %16 : vector<32x256xf32>
      %c0_14 = arith.constant 0 : index
      %c0_15 = arith.constant 0 : index
      %18 = vector.load %arg6[%c0_14, %c0_15] : memref<32x256xf32, #tpu.memory_space<vmem>>, vector<32x256xf32>
      tpu.vector_store %arg6[%c0_14, %c0_15], %17 {strides = array<i32>} : memref<32x256xf32, #tpu.memory_space<vmem>>, vector<32x256xf32>,
    } else {
    }
    return
  }
  func.func @transform_0(%arg0: i32, %arg1: i32, %arg2: i32) -> (i32, i32) {
    %c0_i32 = arith.constant 0 : i32
    return %arg0, %arg2 : i32, i32
  }
  func.func @transform_1(%arg0: i32, %arg1: i32, %arg2: i32) -> (i32, i32) {
    %c0_i32 = arith.constant 0 : i32
    return %arg2, %arg1 : i32, i32
  }
  func.func @transform_2(%arg0: i32, %arg1: i32, %arg2: i32) -> (i32, i32) {
    %c0_i32 = arith.constant 0 : i32
    %c0_i32_0 = arith.constant 0 : i32
    return %c0_i32, %arg1 : i32, i32
  }
  func.func @transform_3(%arg0: i32, %arg1: i32, %arg2: i32) -> (i32, i32) {
    %c0_i32 = arith.constant 0 : i32
    return %arg0, %arg1 : i32, i32
  }
}

</mosaic_0001>

<bundles_post_ra>
// kernel: encoder_forward.12
= control target key start
LH: loop header
LB: loop body
LE: loop exit
PB: predicated region body
PF: predicated region fallthrough
CT: control target
= control target key end

     0   :  { %s1376_s12 = smov 0   ;;  %s1378_s13 = smov 0   ;;  %s1636_s0 = inlined_call_operand.vmem [shape: bf16[2048,27], index: 0, kind: input, shape index: {}]   ;;  %s1637_s1 = inlined_call_operand.vmem [shape: bf16[27,64], index: 1, kind: input, shape index: {}]   ;;  %s1638_s2 = inlined_call_operand.vmem [shape: f32[1,64], index: 2, kind: input, shape index: {}]   ;;  %s1639_s3 = inlined_call_operand.vmem [shape: bf16[2048,64], index: 3, kind: output, shape index: {}]  }
   0x1   :  { %s1380_s14 = smov 0  }
   0x2 LB: > { %s32_s15 = sadd.s32 1, %s1348_s13  ;;  %p1122_p0 = scmp.ge.s32.totalorder %s1352_s14, 1  ;;  %s1352_s14 = sphi %s1380_s14, %s13_s14   ;;  %s1348_s13 = sphi %s1378_s13, %s1642_s13   ;;  %s1344_s12 = sphi %s1376_s12, %s1641_s12  }
   0x3   : > { %p34_p1 = scmp.ge.s32.totalorder %s32_s15, 8  ;;  %p188_p2 = scmp.lt.s32.totalorder %s1352_s14, 9 }
   0x5   : > { %s1644_s15 = smov (%p34_p1, %s32_s15), 0  ;;  %p189_p3 = pnand %p1122_p0, %p188_p2 }
   0x6   : > { %v1312_v0 = vld [vmem:[%s1637_s1] sm:$0xff] (!%p189_p3)   ;;  %vm505_vm0 = vcmask (!%p189_p3), 1044480   ;;  %v1313_v1 = vld [vmem:[%s1637_s1 + $0x8] sm:$0x3f] (!%p189_p3)   ;;  %vm506_vm1 = vcmask (!%p189_p3), 1045504   ;;  %s1123_s20 = sshll.u32 (!%p189_p3), %s1344_s12, 5 }
   0x7   : > { %192 = sbr.rel (%p189_p3) target bundleno = 281 (0x119), region = 32  ;;  %1246 = vmatprep.subr.bf16.mxu0 (!%p189_p3), %v1312_v0  ;;  %1282 = vmatprep.subr.bf16.mxu1 (!%p189_p3), %v1312_v0  ;;  %vm264_vm2 = vcmask (!%p189_p3), 523264   ;;  %v1354_v2 = vmov (!%p189_p3), 65535   ;;  %p1405_p4 = scmp.lt.s32.totalorder (!%p189_p3), %s1123_s20, 255  ;;  %v1355_v5 = vmov (!%p189_p3), 0.0   ;;  %vm456_vm3 = vcmask (!%p189_p3), 220160  }
   0x8   : > { %1247 = vmatpush3.bf16.msra.mxu0 (!%p189_p3), %v1312_v0  ;;  %1284 = vmatpush3.bf16.msra.mxu1 (!%p189_p3), %v1312_v0  ;;  %v507_v3 = vsel (!%p189_p3), %vm505_vm0, 4294967295, %v1354_v2  ;;  %267 = vst.msk [vmem:[#allocation2 + $0x10] sm:$0xff] (!%p189_p3), %vm264_vm2, %v1355_v5  ;;  %265 = vst.msk [vmem:[#allocation2] sm:$0xff] (!%p189_p3), %vm264_vm2, %v1355_v5  ;;  %v1498_v50 = vld [vmem:[%s1638_s2] ss:$0 sm:$0xff] (!%p189_p3)  ;;  %vm972_vm4 = vcmask (!%p189_p3), 519168  }
   0x9   : > { %v508_v4 = vsel (!%p189_p3), %vm506_vm1, %v507_v3, 0  ;;  %266 = vst.msk [vmem:[#allocation2 + $0x8] sm:$0xff] (!%p189_p3), %vm264_vm2, %v1355_v5  ;;  %268 = vst.msk [vmem:[#allocation2 + $0x18] sm:$0xff] (!%p189_p3), %vm264_vm2, %v1355_v5 }
   0xa   : > { %269 = vst.msk [vmem:[#allocation2 + $0x20] sm:$0xff] (!%p189_p3), %vm264_vm2, %v1355_v5  ;;  %270 = vst.msk [vmem:[#allocation2 + $0x28] sm:$0xff] (!%p189_p3), %vm264_vm2, %v1355_v5  ;;  %v510_v6 = vand.u32 (!%p189_p3), %v1313_v1, %v508_v4 }
   0xb   : > { %271 = vst.msk [vmem:[#allocation2 + $0x30] sm:$0xff] (!%p189_p3), %vm264_vm2, %v1355_v5  ;;  %272 = vst.msk [vmem:[#allocation2 + $0x38] sm:$0xff] (!%p189_p3), %vm264_vm2, %v1355_v5 }
   0xc   : > { %273 = vst.msk [vmem:[#allocation2 + $0x40] sm:$0xff] (!%p189_p3), %vm264_vm2, %v1355_v5  ;;  %274 = vst.msk [vmem:[#allocation2 + $0x48] sm:$0xff] (!%p189_p3), %vm264_vm2, %v1355_v5  ;;  %1248 = vmatprep.subr.bf16.mxu0 (!%p189_p3), %v510_v6  ;;  %1283 = vmatprep.subr.bf16.mxu1 (!%p189_p3), %v510_v6 }
   0xd   : > { %275 = vst.msk [vmem:[#allocation2 + $0x50] sm:$0xff] (!%p189_p3), %vm264_vm2, %v1355_v5  ;;  %276 = vst.msk [vmem:[#allocation2 + $0x58] sm:$0xff] (!%p189_p3), %vm264_vm2, %v1355_v5  ;;  %1249 = vmatpush3.bf16.msra.mxu0 (!%p189_p3), %v510_v6  ;;  %1285 = vmatpush3.bf16.msra.mxu1 (!%p189_p3), %v510_v6 }
   0xe   : > { %277 = vst.msk [vmem:[#allocation2 + $0x60] sm:$0xff] %vm264_vm2, %v1355_v5  ;;  %278 = vst.msk [vmem:[#allocation2 + $0x68] sm:$0xff] %vm264_vm2, %v1355_v5  ;;  %s1646_s20 = smov (!%p1405_p4, %s1123_s20), 255 }
   0xf   : > { %279 = vst.msk [vmem:[#allocation2 + $0x70] sm:$0xff] %vm264_vm2, %v1355_v5  ;;  %280 = vst.msk [vmem:[#allocation2 + $0x78] sm:$0xff] %vm264_vm2, %v1355_v5  ;;  %s1124_s22 = sshll.u32 %s1646_s20, 2  ;;  %v299_v23 = vld [vmem:[#allocation2 + $0x10] sm:$0xff]  ;;  %v297_v25 = vld [vmem:[#allocation2] sm:$0xff] }
  0x10   : > { %281 = vst.msk [vmem:[#allocation2 + $0x80] sm:$0xff] %vm264_vm2, %v1355_v5  ;;  %282 = vst.msk [vmem:[#allocation2 + $0x88] sm:$0xff] %vm264_vm2, %v1355_v5  ;;  %s1453_s25 = scalar_lea.vmem %s1636_s0, %s1124_s22  ;;  %v300_v28 = vld [vmem:[#allocation2 + $0x18] sm:$0xff]  ;;  %v298_v33 = vld [vmem:[#allocation2 + $0x8] sm:$0xff]  ;;  %s1515_s30 = scalar_lea.vmem %s1639_s3, %s1124_s22 }
  0x11   : > { %283 = vst.msk [vmem:[#allocation2 + $0x90] sm:$0xff] %vm264_vm2, %v1355_v5  ;;  %284 = vst.msk [vmem:[#allocation2 + $0x98] sm:$0xff] %vm264_vm2, %v1355_v5  ;;  %v1314_v7 = vld [vmem:[%s1453_s25] sm:$0xff]   ;;  %v1316_v9 = vld [vmem:[%s1453_s25 + $0x8] sm:$0xff]  }
  0x12   : > { %285 = vst.msk [vmem:[#allocation2 + $0xa0] sm:$0xff] %vm264_vm2, %v1355_v5  ;;  %286 = vst.msk [vmem:[#allocation2 + $0xa8] sm:$0xff] %vm264_vm2, %v1355_v5  ;;  %v1315_v8 = vld [vmem:[%s1453_s25 + $0x40] sm:$0xff]   ;;  %1250 = vmatprep.mubr.msk.bf16.mxu0 %vm456_vm3, %v1314_v7  ;;  %v1317_v10 = vld [vmem:[%s1453_s25 + $0x48] sm:$0xff]  }
  0x13   : > { %287 = vst.msk [vmem:[#allocation2 + $0xb0] sm:$0xff] %vm264_vm2, %v1355_v5  ;;  %288 = vst.msk [vmem:[#allocation2 + $0xb8] sm:$0xff] %vm264_vm2, %v1355_v5  ;;  %1266 = vmatprep.mubr.msk.bf16.mxu1 %vm456_vm3, %v1315_v8  ;;  %1251 = vmatmul.mubr.msk.bf16.vlgmr.msra.gmra.mrb[0].mxu0 %vm456_vm3, %v1316_v9  ;;  %v1318_v11 = vld [vmem:[%s1453_s25 + $0x10] sm:$0xff]   ;;  %v1320_v13 = vld [vmem:[%s1453_s25 + $0x18] sm:$0xff]  }
  0x14   : > { %289 = vst.msk [vmem:[#allocation2 + $0xc0] sm:$0xff] %vm264_vm2, %v1355_v5  ;;  %290 = vst.msk [vmem:[#allocation2 + $0xc8] sm:$0xff] %vm264_vm2, %v1355_v5  ;;  %1267 = vmatmul.mubr.msk.bf16.vlgmr.msra.gmra.mrb[0].mxu1 %vm456_vm3, %v1317_v10  ;;  %v1319_v12 = vld [vmem:[%s1453_s25 + $0x50] sm:$0xff]   ;;  %1254 = vmatprep.mubr.msk.bf16.mxu0 %vm456_vm3, %v1318_v11  ;;  %v1321_v14 = vld [vmem:[%s1453_s25 + $0x58] sm:$0xff]  }
  0x15   : > { %291 = vst.msk [vmem:[#allocation2 + $0xd0] sm:$0xff] %vm264_vm2, %v1355_v5  ;;  %292 = vst.msk [vmem:[#allocation2 + $0xd8] sm:$0xff] %vm264_vm2, %v1355_v5  ;;  %1270 = vmatprep.mubr.msk.bf16.mxu1 %vm456_vm3, %v1319_v12  ;;  %v1322_v15 = vld [vmem:[%s1453_s25 + $0x20] sm:$0xff]   ;;  %v1324_v17 = vld [vmem:[%s1453_s25 + $0x28] sm:$0xff]  }
  0x16   : > { %293 = vst.msk [vmem:[#allocation2 + $0xe0] sm:$0xff] %vm264_vm2, %v1355_v5  ;;  %294 = vst.msk [vmem:[#allocation2 + $0xe8] sm:$0xff] %vm264_vm2, %v1355_v5  ;;  %v1323_v16 = vld [vmem:[%s1453_s25 + $0x60] sm:$0xff]   ;;  %v1325_v18 = vld [vmem:[%s1453_s25 + $0x68] sm:$0xff]  }
  0x17   : > { %295 = vst.msk [vmem:[#allocation2 + $0xf0] sm:$0xff] %vm264_vm2, %v1355_v5  ;;  %296 = vst.msk [vmem:[#allocation2 + $0xf8] sm:$0xff] %vm264_vm2, %v1355_v5  ;;  %v1326_v19 = vld [vmem:[%s1453_s25 + $0x30] sm:$0xff]   ;;  %v1328_v21 = vld [vmem:[%s1453_s25 + $0x38] sm:$0xff]  }
  0x18   : > { %v1327_v20 = vld [vmem:[%s1453_s25 + $0x70] sm:$0xff]   ;;  %v1329_v22 = vld [vmem:[%s1453_s25 + $0x78] sm:$0xff]   ;;  %v313_v27 = vld [vmem:[#allocation2 + $0x80] sm:$0xff] }
  0x19   : > { %v315_v24 = vld [vmem:[#allocation2 + $0x90] sm:$0xff]  ;;  %v316_v32 = vld [vmem:[#allocation2 + $0x98] sm:$0xff]  ;;  %v314_v38 = vld [vmem:[#allocation2 + $0x88] sm:$0xff] }
  0x1a   : > { %v303_v47 = vld [vmem:[#allocation2 + $0x30] sm:$0xff]  ;;  %v301_v49 = vld [vmem:[#allocation2 + $0x20] sm:$0xff]  ;;  %v304_v53 = vld [vmem:[#allocation2 + $0x38] sm:$0xff] }
  0x1b   : > { %1255 = vmatmul.mubr.msk.bf16.gmra.mrb[4].mxu0 %vm456_vm3, %v1320_v13  ;;  %v319_v48 = vld [vmem:[#allocation2 + $0xb0] sm:$0xff]  ;;  %v317_v52 = vld [vmem:[#allocation2 + $0xa0] sm:$0xff]  ;;  %v320_v57 = vld [vmem:[#allocation2 + $0xb8] sm:$0xff] }
  0x1c   : > { %1271 = vmatmul.mubr.msk.bf16.gmra.mrb[4].mxu1 %vm456_vm3, %v1321_v14  ;;  %1258 = vmatprep.mubr.msk.bf16.mxu0 %vm456_vm3, %v1322_v15  ;;  %v302_v58 = vld [vmem:[#allocation2 + $0x28] sm:$0xff] }
  0x1d   : > { %1274 = vmatprep.mubr.msk.bf16.mxu1 %vm456_vm3, %v1323_v16  ;;  %v318_v0 = vld [vmem:[#allocation2 + $0xa8] sm:$0xff] }
  0x23   : > { %1259 = vmatmul.mubr.msk.bf16.gmra.mrb[8].mxu0 %vm456_vm3, %v1324_v17 }
  0x24   : > { %1275 = vmatmul.mubr.msk.bf16.gmra.mrb[8].mxu1 %vm456_vm3, %v1325_v18  ;;  %1262 = vmatprep.mubr.msk.bf16.mxu0 %vm456_vm3, %v1326_v19 }
  0x25   : > { %1278 = vmatprep.mubr.msk.bf16.mxu1 %vm456_vm3, %v1327_v20 }
  0x2b   : > { %1263 = vmatmul.mubr.msk.bf16.gmra.mrb[12].mxu0 %vm456_vm3, %v1328_v21 }
  0x2c   : > { %1279 = vmatmul.mubr.msk.bf16.gmra.mrb[12].mxu1 %vm456_vm3, %v1329_v22 }
  0xe6   : > { %v1252_v26 = vpop.f32.mrb[0].mxu0 }
  0xe7   : > { %v675_v29 = vadd.f32 %v1252_v26, %v299_v23  ;;  %v1268_v30 = vpop.f32.mrb[0].mxu1  ;;  %v546_v31 = vpop.f32.mrb[1].mxu0  ;;  %v307_v26 = vld [vmem:[#allocation2 + $0x50] sm:$0xff] }
  0xe8   : > { %v691_v34 = vadd.f32 %v1268_v30, %v315_v24  ;;  %v673_v35 = vadd.f32 %v546_v31, %v297_v25  ;;  %v610_v36 = vpop.f32.mrb[1].mxu1  ;;  %v1253_v37 = vpop.f32.mrb[2].mxu0  ;;  %v323_v31 = vld [vmem:[#allocation2 + $0xd0] sm:$0xff] }
  0xe9   : > { %708 = vst.msk [vmem:[#allocation2 + $0x10] sm:$0xff] %vm264_vm2, %v675_v29  ;;  %v689_v39 = vadd.f32 %v610_v36, %v313_v27  ;;  %v676_v40 = vadd.f32 %v1253_v37, %v300_v28  ;;  %v1269_v41 = vpop.f32.mrb[2].mxu1  ;;  %v549_v42 = vpop.f32.mrb[3].mxu0 }
  0xea   : > { %724 = vst.msk [vmem:[#allocation2 + $0x90] sm:$0xff] %vm264_vm2, %v691_v34  ;;  %706 = vst.msk [vmem:[#allocation2] sm:$0xff] %vm264_vm2, %v673_v35  ;;  %v692_v43 = vadd.f32 %v1269_v41, %v316_v32  ;;  %v674_v44 = vadd.f32 %v549_v42, %v298_v33  ;;  %v613_v45 = vpop.f32.mrb[3].mxu1  ;;  %v305_v32 = vld [vmem:[#allocation2 + $0x40] sm:$0xff] }
  0xeb   : > { %722 = vst.msk [vmem:[#allocation2 + $0x80] sm:$0xff] %vm264_vm2, %v689_v39  ;;  %709 = vst.msk [vmem:[#allocation2 + $0x18] sm:$0xff] %vm264_vm2, %v676_v40  ;;  %v690_v46 = vadd.f32 %v613_v45, %v314_v38  ;;  %v321_v38 = vld [vmem:[#allocation2 + $0xc0] sm:$0xff]  ;;  %v308_v39 = vld [vmem:[#allocation2 + $0x58] sm:$0xff] }
  0xec   : > { %725 = vst.msk [vmem:[#allocation2 + $0x98] sm:$0xff] %vm264_vm2, %v692_v43  ;;  %707 = vst.msk [vmem:[#allocation2 + $0x8] sm:$0xff] %vm264_vm2, %v674_v44 }
  0xed   : > { %723 = vst.msk [vmem:[#allocation2 + $0x88] sm:$0xff] %vm264_vm2, %v690_v46  ;;  %v324_v46 = vld [vmem:[#allocation2 + $0xd8] sm:$0xff] }
  0xee   : > { %v1256_v51 = vpop.f32.mrb[4].mxu0 }
  0xef   : > { %v679_v54 = vadd.f32 %v1256_v51, %v303_v47  ;;  %v1272_v55 = vpop.f32.mrb[4].mxu1  ;;  %v562_v56 = vpop.f32.mrb[5].mxu0  ;;  %v306_v47 = vld [vmem:[#allocation2 + $0x48] sm:$0xff] }
  0xf0   : > { %v743_v59 = vld [vmem:[#allocation2 + $0x10] sm:$0xff]  ;;  %v695_v60 = vadd.f32 %v1272_v55, %v319_v48  ;;  %v677_v61 = vadd.f32 %v562_v56, %v301_v49  ;;  %v626_v62 = vpop.f32.mrb[5].mxu1  ;;  %v1257_v63 = vpop.f32.mrb[6].mxu0  ;;  %v322_v56 = vld [vmem:[#allocation2 + $0xc8] sm:$0xff] }
  0xf1   : > { %v782_v1 = vadd.f32 %v1498_v50, %v743_v59  ;;  %v759_v2 = vld [vmem:[#allocation2 + $0x90] sm:$0xff]  ;;  %v741_v3 = vld [vmem:[#allocation2] sm:$0xff]  ;;  %712 = vst.msk [vmem:[#allocation2 + $0x30] sm:$0xff] %vm264_vm2, %v679_v54  ;;  %v693_v4 = vadd.f32 %v626_v62, %v317_v52  ;;  %v680_v5 = vadd.f32 %v1257_v63, %v304_v53  ;;  %v1273_v6 = vpop.f32.mrb[6].mxu1  ;;  %v565_v7 = vpop.f32.mrb[7].mxu0 }
  0xf2   : > { %v798_v8 = vadd.f32 %v1498_v50, %v759_v2  ;;  %v780_v9 = vadd.f32 %v1498_v50, %v741_v3  ;;  %v757_v10 = vld [vmem:[#allocation2 + $0x80] sm:$0xff]  ;;  %v744_v11 = vld [vmem:[#allocation2 + $0x18] sm:$0xff]  ;;  %728 = vst.msk [vmem:[#allocation2 + $0xb0] sm:$0xff] %vm264_vm2, %v695_v60  ;;  %710 = vst.msk [vmem:[#allocation2 + $0x20] sm:$0xff] %vm264_vm2, %v677_v61  ;;  %v696_v12 = vadd.f32 %v1273_v6, %v320_v57  ;;  %v629_v14 = vpop.f32.mrb[7].mxu1 }
  0xf3   : > { %v678_v13 = vadd.f32 %v565_v7, %v302_v58  ;;  %v814_v15 = vmax.f32 %v782_v1, 0.0  ;;  %v796_v16 = vadd.f32 %v1498_v50, %v757_v10  ;;  %v783_v17 = vadd.f32 %v1498_v50, %v744_v11  ;;  %v760_v18 = vld [vmem:[#allocation2 + $0x98] sm:$0xff]  ;;  %v742_v19 = vld [vmem:[#allocation2 + $0x8] sm:$0xff]  ;;  %726 = vst.msk [vmem:[#allocation2 + $0xa0] sm:$0xff] %vm264_vm2, %v693_v4  ;;  %713 = vst.msk [vmem:[#allocation2 + $0x38] sm:$0xff] %vm264_vm2, %v680_v5 }
  0xf4   : > { %v694_v20 = vadd.f32 %v629_v14, %v318_v0  ;;  %v830_v21 = vmax.f32 %v798_v8, 0.0  ;;  %v812_v22 = vmax.f32 %v780_v9, 0.0  ;;  %v799_v23 = vadd.f32 %v1498_v50, %v760_v18  ;;  %v758_v25 = vld [vmem:[#allocation2 + $0x88] sm:$0xff]  ;;  %729 = vst.msk [vmem:[#allocation2 + $0xb8] sm:$0xff] %vm264_vm2, %v696_v12 }
  0xf5   : > { %v781_v24 = vadd.f32 %v1498_v50, %v742_v19  ;;  %711 = vst.msk [vmem:[#allocation2 + $0x28] sm:$0xff] %vm264_vm2, %v678_v13  ;;  %v1198_v27 = vpack.c.bf16 %v814_v15, %v814_v15  ;;  %v828_v28 = vmax.f32 %v796_v16, 0.0  ;;  %v815_v29 = vmax.f32 %v783_v17, 0.0  ;;  %v311_v19 = vld [vmem:[#allocation2 + $0x70] sm:$0xff] }
  0xf6   : > { %v797_v30 = vadd.f32 %v1498_v50, %v758_v25  ;;  %727 = vst.msk [vmem:[#allocation2 + $0xa8] sm:$0xff] %vm264_vm2, %v694_v20  ;;  %v1214_v33 = vpack.c.bf16 %v830_v21, %v830_v21  ;;  %v1196_v34 = vpack.c.bf16 %v812_v22, %v812_v22  ;;  %v831_v35 = vmax.f32 %v799_v23, 0.0  ;;  %v1260_v37 = vpop.f32.mrb[8].mxu0  ;;  %v309_v25 = vld [vmem:[#allocation2 + $0x60] sm:$0xff] }
  0xf7   : > { %v813_v36 = vmax.f32 %v781_v24, 0.0  ;;  %975 = vst.msk [vmem:[%s1515_s30 + $0x8] sm:$0xf] %vm972_vm4, %v1198_v27  ;;  %v1212_v40 = vpack.c.bf16 %v828_v28, %v828_v28  ;;  %v1199_v41 = vpack.c.bf16 %v815_v29, %v815_v29  ;;  %v683_v43 = vadd.f32 %v1260_v37, %v307_v26  ;;  %v1276_v44 = vpop.f32.mrb[8].mxu1  ;;  %v578_v45 = vpop.f32.mrb[9].mxu0  ;;  %v327_v24 = vld [vmem:[#allocation2 + $0xf0] sm:$0xff] }
  0xf8   : > { %v829_v42 = vmax.f32 %v797_v30, 0.0  ;;  %991 = vst.msk [vmem:[%s1515_s30 + $0x48] sm:$0xf] %vm972_vm4, %v1214_v33  ;;  %973 = vst.msk [vmem:[%s1515_s30] sm:$0xf] %vm972_vm4, %v1196_v34  ;;  %v1215_v48 = vpack.c.bf16 %v831_v35, %v831_v35  ;;  %v747_v51 = vld [vmem:[#allocation2 + $0x30] sm:$0xff]  ;;  %v699_v52 = vadd.f32 %v1276_v44, %v323_v31  ;;  %v681_v53 = vadd.f32 %v578_v45, %v305_v32 }
  0xf9   : > { %v1197_v49 = vpack.c.bf16 %v813_v36, %v813_v36  ;;  %v642_v54 = vpop.f32.mrb[9].mxu1  ;;  %v1261_v55 = vpop.f32.mrb[10].mxu0  ;;  %989 = vst.msk [vmem:[%s1515_s30 + $0x40] sm:$0xf] %vm972_vm4, %v1212_v40  ;;  %976 = vst.msk [vmem:[%s1515_s30 + $0xc] sm:$0xf] %vm972_vm4, %v1199_v41  ;;  %v786_v58 = vadd.f32 %v1498_v50, %v747_v51 }
  0xfa   : > { %v1213_v57 = vpack.c.bf16 %v829_v42, %v829_v42  ;;  %v763_v59 = vld [vmem:[#allocation2 + $0xb0] sm:$0xff]  ;;  %v745_v60 = vld [vmem:[#allocation2 + $0x20] sm:$0xff]  ;;  %716 = vst.msk [vmem:[#allocation2 + $0x50] sm:$0xff] %vm264_vm2, %v683_v43  ;;  %v697_v61 = vadd.f32 %v642_v54, %v321_v38  ;;  %v684_v62 = vadd.f32 %v1261_v55, %v308_v39  ;;  %v1277_v63 = vpop.f32.mrb[10].mxu1  ;;  %v581_v0 = vpop.f32.mrb[11].mxu0  ;;  %v748_v4 = vld [vmem:[#allocation2 + $0x38] sm:$0xff] }
  0xfb   : > { %992 = vst.msk [vmem:[%s1515_s30 + $0x4c] sm:$0xf] %vm972_vm4, %v1215_v48  ;;  %974 = vst.msk [vmem:[%s1515_s30 + $0x4] sm:$0xf] %vm972_vm4, %v1197_v49  ;;  %v802_v1 = vadd.f32 %v1498_v50, %v763_v59  ;;  %v784_v2 = vadd.f32 %v1498_v50, %v745_v60  ;;  %v761_v3 = vld [vmem:[#allocation2 + $0xa0] sm:$0xff]  ;;  %v700_v5 = vadd.f32 %v1277_v63, %v324_v46  ;;  %v645_v7 = vpop.f32.mrb[11].mxu1 }
  0xfc   : > { %732 = vst.msk [vmem:[#allocation2 + $0xd0] sm:$0xff] %vm264_vm2, %v699_v52  ;;  %714 = vst.msk [vmem:[#allocation2 + $0x40] sm:$0xff] %vm264_vm2, %v681_v53  ;;  %v682_v6 = vadd.f32 %v581_v0, %v306_v47  ;;  %v818_v8 = vmax.f32 %v786_v58, 0.0  ;;  %v800_v9 = vadd.f32 %v1498_v50, %v761_v3  ;;  %v787_v10 = vadd.f32 %v1498_v50, %v748_v4  ;;  %v764_v11 = vld [vmem:[#allocation2 + $0xb8] sm:$0xff]  ;;  %v746_v12 = vld [vmem:[#allocation2 + $0x28] sm:$0xff] }
  0xfd   : > { %990 = vst.msk [vmem:[%s1515_s30 + $0x44] sm:$0xf] %vm972_vm4, %v1213_v57  ;;  %v698_v13 = vadd.f32 %v645_v7, %v322_v56  ;;  %v834_v14 = vmax.f32 %v802_v1, 0.0  ;;  %v816_v15 = vmax.f32 %v784_v2, 0.0  ;;  %v803_v16 = vadd.f32 %v1498_v50, %v764_v11  ;;  %v762_v18 = vld [vmem:[#allocation2 + $0xa8] sm:$0xff]  ;;  %v325_v31 = vld [vmem:[#allocation2 + $0xe0] sm:$0xff] }
  0xfe   : > { %730 = vst.msk [vmem:[#allocation2 + $0xc0] sm:$0xff] %vm264_vm2, %v697_v61  ;;  %717 = vst.msk [vmem:[#allocation2 + $0x58] sm:$0xff] %vm264_vm2, %v684_v62  ;;  %v785_v17 = vadd.f32 %v1498_v50, %v746_v12  ;;  %v1202_v20 = vpack.c.bf16 %v818_v8, %v818_v8  ;;  %v832_v21 = vmax.f32 %v800_v9, 0.0  ;;  %v819_v22 = vmax.f32 %v787_v10, 0.0  ;;  %v1264_v30 = vpop.f32.mrb[12].mxu0  ;;  %v312_v32 = vld [vmem:[#allocation2 + $0x78] sm:$0xff] }
  0xff   : > { %733 = vst.msk [vmem:[#allocation2 + $0xd8] sm:$0xff] %vm264_vm2, %v700_v5  ;;  %715 = vst.msk [vmem:[#allocation2 + $0x48] sm:$0xff] %vm264_vm2, %v682_v6  ;;  %v801_v23 = vadd.f32 %v1498_v50, %v762_v18  ;;  %v1218_v26 = vpack.c.bf16 %v834_v14, %v834_v14  ;;  %v1200_v27 = vpack.c.bf16 %v816_v15, %v816_v15  ;;  %v835_v28 = vmax.f32 %v803_v16, 0.0  ;;  %v1280_v37 = vpop.f32.mrb[12].mxu1  ;;  %v594_v38 = vpop.f32.mrb[13].mxu0  ;;  %v328_v39 = vld [vmem:[#allocation2 + $0xf8] sm:$0xff] }
 0x100   : > { %731 = vst.msk [vmem:[#allocation2 + $0xc8] sm:$0xff] %vm264_vm2, %v698_v13  ;;  %v817_v29 = vmax.f32 %v785_v17, 0.0  ;;  %v1216_v33 = vpack.c.bf16 %v832_v21, %v832_v21  ;;  %v1203_v34 = vpack.c.bf16 %v819_v22, %v819_v22  ;;  %v687_v36 = vadd.f32 %v1264_v30, %v311_v19  ;;  %v310_v40 = vld [vmem:[#allocation2 + $0x68] sm:$0xff]  ;;  %v658_v46 = vpop.f32.mrb[13].mxu1  ;;  %v1265_v47 = vpop.f32.mrb[14].mxu0 }
 0x101   : > { %979 = vst.msk [vmem:[%s1515_s30 + $0x18] sm:$0xf] %vm972_vm4, %v1202_v20  ;;  %v833_v35 = vmax.f32 %v801_v23, 0.0  ;;  %995 = vst.msk [vmem:[%s1515_s30 + $0x58] sm:$0xf] %vm972_vm4, %v1218_v26  ;;  %v1219_v41 = vpack.c.bf16 %v835_v28, %v835_v28  ;;  %v751_v43 = vld [vmem:[#allocation2 + $0x50] sm:$0xff]  ;;  %v703_v44 = vadd.f32 %v1280_v37, %v327_v24  ;;  %v685_v45 = vadd.f32 %v594_v38, %v309_v25 }
 0x102   : > { %977 = vst.msk [vmem:[%s1515_s30 + $0x10] sm:$0xf] %vm972_vm4, %v1200_v27  ;;  %v1201_v42 = vpack.c.bf16 %v817_v29, %v817_v29  ;;  %v326_v48 = vld [vmem:[#allocation2 + $0xe8] sm:$0xff]  ;;  %993 = vst.msk [vmem:[%s1515_s30 + $0x50] sm:$0xf] %vm972_vm4, %v1216_v33  ;;  %v790_v51 = vadd.f32 %v1498_v50, %v751_v43  ;;  %v701_v54 = vadd.f32 %v658_v46, %v325_v31  ;;  %v1281_v56 = vpop.f32.mrb[14].mxu1 }
 0x103   : > { %980 = vst.msk [vmem:[%s1515_s30 + $0x1c] sm:$0xf] %vm972_vm4, %v1203_v34  ;;  %v1217_v49 = vpack.c.bf16 %v833_v35, %v833_v35  ;;  %v767_v52 = vld [vmem:[#allocation2 + $0xd0] sm:$0xff]  ;;  %v749_v53 = vld [vmem:[#allocation2 + $0x40] sm:$0xff]  ;;  %v688_v55 = vadd.f32 %v1265_v47, %v312_v32  ;;  %v597_v57 = vpop.f32.mrb[15].mxu0  ;;  %v704_v62 = vadd.f32 %v1281_v56, %v328_v39  ;;  %v661_v0 = vpop.f32.mrb[15].mxu1 }
 0x104   : > { %720 = vst.msk [vmem:[#allocation2 + $0x70] sm:$0xff] %vm264_vm2, %v687_v36  ;;  %v806_v58 = vadd.f32 %v1498_v50, %v767_v52  ;;  %v788_v59 = vadd.f32 %v1498_v50, %v749_v53  ;;  %736 = vst.msk [vmem:[#allocation2 + $0xf0] sm:$0xff] %vm264_vm2, %v703_v44  ;;  %v686_v63 = vadd.f32 %v597_v57, %v310_v40  ;;  %v822_v1 = vmax.f32 %v790_v51, 0.0 }
 0x105   : > { %996 = vst.msk [vmem:[%s1515_s30 + $0x5c] sm:$0xf] %vm972_vm4, %v1219_v41  ;;  %978 = vst.msk [vmem:[%s1515_s30 + $0x14] sm:$0xf] %vm972_vm4, %v1201_v42  ;;  %v765_v60 = vld [vmem:[#allocation2 + $0xc0] sm:$0xff]  ;;  %v752_v61 = vld [vmem:[#allocation2 + $0x58] sm:$0xff]  ;;  %v702_v6 = vadd.f32 %v661_v0, %v326_v48 }
 0x106   : > { %718 = vst.msk [vmem:[#allocation2 + $0x60] sm:$0xff] %vm264_vm2, %v685_v45  ;;  %v804_v2 = vadd.f32 %v1498_v50, %v765_v60  ;;  %v791_v3 = vadd.f32 %v1498_v50, %v752_v61  ;;  %v768_v4 = vld [vmem:[#allocation2 + $0xd8] sm:$0xff]  ;;  %v750_v5 = vld [vmem:[#allocation2 + $0x48] sm:$0xff]  ;;  %734 = vst.msk [vmem:[#allocation2 + $0xe0] sm:$0xff] %vm264_vm2, %v701_v54  ;;  %v838_v7 = vmax.f32 %v806_v58, 0.0  ;;  %v820_v8 = vmax.f32 %v788_v59, 0.0 }
 0x107   : > { %994 = vst.msk [vmem:[%s1515_s30 + $0x54] sm:$0xf] %vm972_vm4, %v1217_v49  ;;  %v807_v9 = vadd.f32 %v1498_v50, %v768_v4  ;;  %v789_v10 = vadd.f32 %v1498_v50, %v750_v5  ;;  %v766_v11 = vld [vmem:[#allocation2 + $0xc8] sm:$0xff]  ;;  %v1206_v12 = vpack.c.bf16 %v822_v1, %v822_v1 }
 0x108   : > { %721 = vst.msk [vmem:[#allocation2 + $0x78] sm:$0xff] %vm264_vm2, %v688_v55  ;;  %737 = vst.msk [vmem:[#allocation2 + $0xf8] sm:$0xff] %vm264_vm2, %v704_v62  ;;  %v836_v13 = vmax.f32 %v804_v2, 0.0  ;;  %v823_v14 = vmax.f32 %v791_v3, 0.0  ;;  %v805_v15 = vadd.f32 %v1498_v50, %v766_v11  ;;  %v1222_v16 = vpack.c.bf16 %v838_v7, %v838_v7 }
 0x109   : > { %719 = vst.msk [vmem:[#allocation2 + $0x68] sm:$0xff] %vm264_vm2, %v686_v63  ;;  %735 = vst.msk [vmem:[#allocation2 + $0xe8] sm:$0xff] %vm264_vm2, %v702_v6  ;;  %v1204_v17 = vpack.c.bf16 %v820_v8, %v820_v8  ;;  %v839_v18 = vmax.f32 %v807_v9, 0.0  ;;  %v821_v19 = vmax.f32 %v789_v10, 0.0 }
 0x10a   : > { %983 = vst.msk [vmem:[%s1515_s30 + $0x28] sm:$0xf] %vm972_vm4, %v1206_v12  ;;  %v1220_v20 = vpack.c.bf16 %v836_v13, %v836_v13  ;;  %v1207_v21 = vpack.c.bf16 %v823_v14, %v823_v14  ;;  %v837_v22 = vmax.f32 %v805_v15, 0.0  ;;  %999 = vst.msk [vmem:[%s1515_s30 + $0x68] sm:$0xf] %vm972_vm4, %v1222_v16 }
 0x10b   : > { %981 = vst.msk [vmem:[%s1515_s30 + $0x20] sm:$0xf] %vm972_vm4, %v1204_v17  ;;  %v1223_v23 = vpack.c.bf16 %v839_v18, %v839_v18  ;;  %v1205_v24 = vpack.c.bf16 %v821_v19, %v821_v19  ;;  %v755_v25 = vld [vmem:[#allocation2 + $0x70] sm:$0xff] }
 0x10c   : > { %997 = vst.msk [vmem:[%s1515_s30 + $0x60] sm:$0xf] %vm972_vm4, %v1220_v20  ;;  %984 = vst.msk [vmem:[%s1515_s30 + $0x2c] sm:$0xf] %vm972_vm4, %v1207_v21  ;;  %v1221_v26 = vpack.c.bf16 %v837_v22, %v837_v22  ;;  %v794_v27 = vadd.f32 %v1498_v50, %v755_v25  ;;  %v771_v28 = vld [vmem:[#allocation2 + $0xf0] sm:$0xff] }
 0x10d   : > { %v753_v29 = vld [vmem:[#allocation2 + $0x60] sm:$0xff]  ;;  %1000 = vst.msk [vmem:[%s1515_s30 + $0x6c] sm:$0xf] %vm972_vm4, %v1223_v23  ;;  %982 = vst.msk [vmem:[%s1515_s30 + $0x24] sm:$0xf] %vm972_vm4, %v1205_v24  ;;  %v810_v30 = vadd.f32 %v1498_v50, %v771_v28 }
 0x10e   : > { %v792_v31 = vadd.f32 %v1498_v50, %v753_v29  ;;  %v769_v32 = vld [vmem:[#allocation2 + $0xe0] sm:$0xff]  ;;  %998 = vst.msk [vmem:[%s1515_s30 + $0x64] sm:$0xf] %vm972_vm4, %v1221_v26  ;;  %v826_v34 = vmax.f32 %v794_v27, 0.0 }
 0x10f   : > { %v756_v33 = vld [vmem:[#allocation2 + $0x78] sm:$0xff]  ;;  %v808_v35 = vadd.f32 %v1498_v50, %v769_v32  ;;  %v842_v39 = vmax.f32 %v810_v30, 0.0 }
 0x110   : > { %v795_v36 = vadd.f32 %v1498_v50, %v756_v33  ;;  %v772_v37 = vld [vmem:[#allocation2 + $0xf8] sm:$0xff]  ;;  %v754_v38 = vld [vmem:[#allocation2 + $0x68] sm:$0xff]  ;;  %v824_v40 = vmax.f32 %v792_v31, 0.0  ;;  %v1210_v44 = vpack.c.bf16 %v826_v34, %v826_v34 }
 0x111   : > { %v811_v41 = vadd.f32 %v1498_v50, %v772_v37  ;;  %v793_v42 = vadd.f32 %v1498_v50, %v754_v38  ;;  %v770_v43 = vld [vmem:[#allocation2 + $0xe8] sm:$0xff]  ;;  %v840_v45 = vmax.f32 %v808_v35, 0.0  ;;  %v1226_v48 = vpack.c.bf16 %v842_v39, %v842_v39 }
 0x112   : > { %v827_v46 = vmax.f32 %v795_v36, 0.0  ;;  %v809_v47 = vadd.f32 %v1498_v50, %v770_v43  ;;  %v1208_v49 = vpack.c.bf16 %v824_v40, %v824_v40  ;;  %987 = vst.msk [vmem:[%s1515_s30 + $0x38] sm:$0xf] %vm972_vm4, %v1210_v44 }
 0x113   : > { %v843_v51 = vmax.f32 %v811_v41, 0.0  ;;  %v825_v52 = vmax.f32 %v793_v42, 0.0  ;;  %v1224_v53 = vpack.c.bf16 %v840_v45, %v840_v45  ;;  %1003 = vst.msk [vmem:[%s1515_s30 + $0x78] sm:$0xf] %vm972_vm4, %v1226_v48 }
 0x114   : > { %v1211_v54 = vpack.c.bf16 %v827_v46, %v827_v46  ;;  %v841_v55 = vmax.f32 %v809_v47, 0.0  ;;  %985 = vst.msk [vmem:[%s1515_s30 + $0x30] sm:$0xf] %vm972_vm4, %v1208_v49 }
 0x115   : > { %v1227_v56 = vpack.c.bf16 %v843_v51, %v843_v51  ;;  %v1209_v57 = vpack.c.bf16 %v825_v52, %v825_v52  ;;  %1001 = vst.msk [vmem:[%s1515_s30 + $0x70] sm:$0xf] %vm972_vm4, %v1224_v53 }
 0x116   : > { %988 = vst.msk [vmem:[%s1515_s30 + $0x3c] sm:$0xf] %vm972_vm4, %v1211_v54  ;;  %v1225_v50 = vpack.c.bf16 %v841_v55, %v841_v55 }
 0x117   : > { %1004 = vst.msk [vmem:[%s1515_s30 + $0x7c] sm:$0xf] %vm972_vm4, %v1227_v56  ;;  %986 = vst.msk [vmem:[%s1515_s30 + $0x34] sm:$0xf] %vm972_vm4, %v1209_v57 }
 0x118   : > { %1002 = vst.msk [vmem:[%s1515_s30 + $0x74] sm:$0xf] %vm972_vm4, %v1225_v50 }
 0x119 PF: > { %s13_s14 = sadd.s32 1, %s1352_s14   ;;  %s1641_s12 = smov %s1348_s13 }
 0x11a   : > { %p10_p5 = scmp.ge.s32.totalorder %s13_s14, 10   ;;  %s1642_s13 = smov %s1644_s15 }
 0x11c   :  { %12 = sbr.rel (!%p10_p5) target bundleno = 2 (0x2), region = 76 }

// kernel: encoder_forward.13
= control target key start
LH: loop header
LB: loop body
LE: loop exit
PB: predicated region body
PF: predicated region fallthrough
CT: control target
= control target key end

     0   :  { %s2827_s12 = smov 0   ;;  %s2829_s13 = smov 0   ;;  %s3363_s0 = inlined_call_operand.vmem [shape: bf16[2048,576], index: 0, kind: input, shape index: {}]   ;;  %s3364_s1 = inlined_call_operand.vmem [shape: bf16[576,64], index: 1, kind: input, shape index: {}]   ;;  %s3365_s2 = inlined_call_operand.vmem [shape: f32[1,64], index: 2, kind: input, shape index: {}]   ;;  %s3366_s3 = inlined_call_operand.vmem [shape: bf16[2048,64], index: 3, kind: output, shape index: {}]  }
   0x1   :  { %s2831_s14 = smov 0  }
   0x2 LB: > { %s32_s15 = sadd.s32 1, %s2800_s13  ;;  %p2104_p0 = scmp.ge.s32.totalorder %s2804_s14, 1  ;;  %s2804_s14 = sphi %s2831_s14, %s13_s14   ;;  %s2800_s13 = sphi %s2829_s13, %s3368_s13   ;;  %s2796_s12 = sphi %s2827_s12, %s3367_s12  }
   0x3   : > { %p34_p1 = scmp.ge.s32.totalorder %s32_s15, 8  ;;  %p191_p2 = scmp.lt.s32.totalorder %s2804_s14, 9 }
   0x5   : > { %s3370_s15 = smov (%p34_p1, %s32_s15), 0  ;;  %p192_p3 = pnand %p2104_p0, %p191_p2 }
   0x6   : > { %v2634_v0 = vld [vmem:[%s3364_s1 + $0x40] sm:$0xff] (!%p192_p3)   ;;  %s2105_s18 = sshll.u32 (!%p192_p3), %s2796_s12, 5  ;;  %v2636_v2 = vld [vmem:[%s3364_s1 + $0x48] sm:$0xff] (!%p192_p3)   ;;  %v2638_v4 = vld [vmem:[%s3364_s1 + $0x50] sm:$0xff] (!%p192_p3)   ;;  %vm272_vm0 = vcmask (!%p192_p3), 523264   ;;  %vm1951_vm1 = vcmask (!%p192_p3), 519168  }
   0x7   : > { %195 = sbr.rel (%p192_p3) target bundleno = 430 (0x1ae), region = 32  ;;  %v2635_v1 = vld [vmem:[%s3364_s1] sm:$0xff] (!%p192_p3)   ;;  %2308 = vmatprep.subr.bf16.mxu0 (!%p192_p3), %v2634_v0  ;;  %2592 = vmatprep.subr.bf16.mxu1 (!%p192_p3), %v2634_v0  ;;  %p236_p4 = scmp.lt.s32.totalorder (!%p192_p3), %s2105_s18, 255  ;;  %v2637_v3 = vld [vmem:[%s3364_s1 + $0x8] sm:$0xff] (!%p192_p3)   ;;  %v2639_v5 = vld [vmem:[%s3364_s1 + $0x10] sm:$0xff] (!%p192_p3)  }
   0x8   : > { %2309 = vmatpush3.bf16.msra.mxu0 (!%p192_p3), %v2635_v1  ;;  %2600 = vmatpush3.bf16.msra.mxu1 (!%p192_p3), %v2635_v1  ;;  %v2640_v6 = vld [vmem:[%s3364_s1 + $0x58] sm:$0xff] (!%p192_p3)   ;;  %v2642_v8 = vld [vmem:[%s3364_s1 + $0x60] sm:$0xff] (!%p192_p3)   ;;  %v2644_v10 = vld [vmem:[%s3364_s1 + $0x68] sm:$0xff] (!%p192_p3)  }
   0x9   : > { %2310 = vmatprep.subr.bf16.mxu0 (!%p192_p3), %v2636_v2  ;;  %2593 = vmatprep.subr.bf16.mxu1 (!%p192_p3), %v2636_v2  ;;  %v2641_v7 = vld [vmem:[%s3364_s1 + $0x18] sm:$0xff] (!%p192_p3)   ;;  %v2643_v9 = vld [vmem:[%s3364_s1 + $0x20] sm:$0xff] (!%p192_p3)   ;;  %v2645_v13 = vld [vmem:[%s3364_s1 + $0x28] sm:$0xff] (!%p192_p3)  }
   0xa   : > { %v2646_v14 = vld [vmem:[%s3364_s1 + $0x70] sm:$0xff] (!%p192_p3)   ;;  %v2648_v16 = vld [vmem:[%s3364_s1 + $0x78] sm:$0xff] (!%p192_p3)   ;;  %v2656_v18 = vld [vmem:[%s3364_s1 + $0xc0] sm:$0xff] (!%p192_p3)  }
   0xb   : > { %v2647_v15 = vld [vmem:[%s3364_s1 + $0x30] sm:$0xff] (!%p192_p3)   ;;  %v2649_v17 = vld [vmem:[%s3364_s1 + $0x38] sm:$0xff] (!%p192_p3)   ;;  %v2659_v19 = vld [vmem:[%s3364_s1 + $0x100] sm:$0xff] (!%p192_p3)  }
   0xc   : > { %2311 = vmatpush3.bf16.msra.mxu0 (!%p192_p3), %v2637_v3  ;;  %2601 = vmatpush3.bf16.msra.mxu1 (!%p192_p3), %v2637_v3  ;;  %v2657_v22 = vld [vmem:[%s3364_s1 + $0x80] sm:$0xff] (!%p192_p3)   ;;  %v2658_v23 = vld [vmem:[%s3364_s1 + $0xc8] sm:$0xff] (!%p192_p3)   ;;  %v2667_v28 = vld [vmem:[%s3364_s1 + $0xd0] sm:$0xff] (!%p192_p3)  }
   0xd   : > { %2312 = vmatprep.subr.bf16.mxu0 (!%p192_p3), %v2638_v4  ;;  %2594 = vmatprep.subr.bf16.mxu1 (!%p192_p3), %v2638_v4  ;;  %v2660_v26 = vld [vmem:[%s3364_s1 + $0x88] sm:$0xff] (!%p192_p3)   ;;  %v2668_v30 = vld [vmem:[%s3364_s1 + $0x90] sm:$0xff] (!%p192_p3)   ;;  %v2669_v31 = vld [vmem:[%s3364_s1 + $0xd8] sm:$0xff] (!%p192_p3)  }
   0xe   : > { %s3372_s18 = smov (!%p236_p4, %s2105_s18), 255  ;;  %v2670_v34 = vld [vmem:[%s3364_s1 + $0x98] sm:$0xff]   ;;  %v2690_v35 = vld [vmem:[%s3364_s1 + $0x108] sm:$0xff]   ;;  %v2677_v37 = vld [vmem:[%s3364_s1 + $0xe0] sm:$0xff]  }
   0xf   : > { %s2608_s4 = smul.u32 20, %s3372_s18  ;;  %v2678_v39 = vld [vmem:[%s3364_s1 + $0xa0] sm:$0xff]   ;;  %v2679_v40 = vld [vmem:[%s3364_s1 + $0xe8] sm:$0xff]   ;;  %v2687_v46 = vld [vmem:[%s3364_s1 + $0xf0] sm:$0xff]   ;;  %s2108_s27 = sshll.u32 %s3372_s18, 2 }
  0x10   : > { %2313 = vmatpush3.bf16.msra.mxu0 %v2639_v5  ;;  %2602 = vmatpush3.bf16.msra.mxu1 %v2639_v5  ;;  %v2680_v43 = vld [vmem:[%s3364_s1 + $0xa8] sm:$0xff]   ;;  %v2710_v47 = vld [vmem:[%s3364_s1 + $0x110] sm:$0xff]   ;;  %v2689_v49 = vld [vmem:[%s3364_s1 + $0xf8] sm:$0xff]   ;;  %s3192_s29 = scalar_lea.vmem %s3366_s3, %s2108_s27 }
  0x11   : > { %2314 = vmatprep.subr.bf16.mxu0 %v2640_v6  ;;  %2595 = vmatprep.subr.bf16.mxu1 %v2640_v6  ;;  %s2878_s11 = scalar_lea.vmem %s3363_s0, %s2608_s4  ;;  %v2688_v48 = vld [vmem:[%s3364_s1 + $0xb0] sm:$0xff]   ;;  %v2691_v52 = vld [vmem:[%s3364_s1 + $0xb8] sm:$0xff]  }
  0x12   : > { %v2652_v11 = vld [vmem:[%s2878_s11 + $0x4] ss:$20 sps:$4 sm:$0xff]   ;;  %v2650_v20 = vld [vmem:[%s2878_s11] ss:$20 sps:$4 sm:$0xff]   ;;  %v2665_v27 = vld [vmem:[%s2878_s11 + $0x28] ss:$20 sps:$4 sm:$0xff]  }
  0x13   : > { %v2655_v12 = vld [vmem:[%s2878_s11 + $0x1e4] ss:$20 sps:$4 sm:$0xff]   ;;  %1202 = vmatprep.mubr.bf16.mxu0 %v2652_v11  ;;  %v2653_v21 = vld [vmem:[%s2878_s11 + $0x1e0] ss:$20 sps:$4 sm:$0xff]   ;;  %v2666_v29 = vld [vmem:[%s2878_s11 + $0x208] ss:$20 sps:$4 sm:$0xff]  }
  0x14   : > { %2315 = vmatpush3.bf16.msra.mxu0 %v2641_v7  ;;  %2603 = vmatpush3.bf16.msra.mxu1 %v2641_v7  ;;  %v2661_v24 = vld [vmem:[%s2878_s11 + $0x2c] ss:$20 sps:$4 sm:$0xff]   ;;  %v2671_v32 = vld [vmem:[%s2878_s11 + $0x54] ss:$20 sps:$4 sm:$0xff]   ;;  %v2675_v36 = vld [vmem:[%s2878_s11 + $0x50] ss:$20 sps:$4 sm:$0xff]  }
  0x15   : > { %2316 = vmatprep.subr.bf16.mxu0 %v2642_v8  ;;  %2596 = vmatprep.subr.bf16.mxu1 %v2642_v8  ;;  %v2663_v25 = vld [vmem:[%s2878_s11 + $0x20c] ss:$20 sps:$4 sm:$0xff]   ;;  %v2673_v33 = vld [vmem:[%s2878_s11 + $0x234] ss:$20 sps:$4 sm:$0xff]   ;;  %v2676_v38 = vld [vmem:[%s2878_s11 + $0x230] ss:$20 sps:$4 sm:$0xff]  }
  0x16   : > { %1298 = vmatprep.mubr.bf16.mxu1 %v2655_v12  ;;  %v2681_v41 = vld [vmem:[%s2878_s11 + $0x7c] ss:$20 sps:$4 sm:$0xff]   ;;  %v2685_v44 = vld [vmem:[%s2878_s11 + $0x78] ss:$20 sps:$4 sm:$0xff]   ;;  %v2697_v54 = vld [vmem:[%s2878_s11 + $0xa0] ss:$20 sps:$4 sm:$0xff]  }
  0x17   : > { %v2683_v42 = vld [vmem:[%s2878_s11 + $0x25c] ss:$20 sps:$4 sm:$0xff]   ;;  %v2686_v45 = vld [vmem:[%s2878_s11 + $0x258] ss:$20 sps:$4 sm:$0xff]   ;;  %v2700_v57 = vld [vmem:[%s2878_s11 + $0x34] ss:$20 sps:$4 sm:$0xff]  }
  0x18   : > { %2317 = vmatpush3.bf16.msra.mxu0 %v2643_v9  ;;  %2604 = vmatpush3.bf16.msra.mxu1 %v2643_v9  ;;  %v2692_v50 = vld [vmem:[%s2878_s11 + $0xa4] ss:$20 sps:$4 sm:$0xff]   ;;  %v2696_v51 = vld [vmem:[%s2878_s11 + $0xc] ss:$20 sps:$4 sm:$0xff]   ;;  %v2694_v53 = vld [vmem:[%s2878_s11 + $0x8] ss:$20 sps:$4 sm:$0xff]  }
  0x19   : > { %2318 = vmatprep.subr.bf16.mxu0 %v2644_v10  ;;  %2597 = vmatprep.subr.bf16.mxu1 %v2644_v10  ;;  %v2698_v55 = vld [vmem:[%s2878_s11 + $0xcc] ss:$20 sps:$4 sm:$0xff]   ;;  %v2729_v56 = vld [vmem:[%s3364_s1 + $0x118] sm:$0xff]   ;;  %v2703_v59 = vld [vmem:[%s2878_s11 + $0x30] ss:$20 sps:$4 sm:$0xff]  }
  0x1a   : > { %v2702_v58 = vld [vmem:[%s2878_s11 + $0xc8] ss:$20 sps:$4 sm:$0xff]   ;;  %v2708_v62 = vld [vmem:[%s2878_s11 + $0xf0] ss:$20 sps:$4 sm:$0xff]   ;;  %v2709_v63 = vld [vmem:[%s2878_s11 + $0x58] ss:$20 sps:$4 sm:$0xff]  }
  0x1b   : > { %v2704_v60 = vld [vmem:[%s2878_s11 + $0xf4] ss:$20 sps:$4 sm:$0xff]   ;;  %v2706_v61 = vld [vmem:[%s2878_s11 + $0x5c] ss:$20 sps:$4 sm:$0xff]   ;;  %v2713_v1 = vld [vmem:[%s2878_s11 + $0x84] ss:$20 sps:$4 sm:$0xff]  }
  0x1c   : > { %2319 = vmatpush3.bf16.msra.mxu0 %v2645_v13  ;;  %2605 = vmatpush3.bf16.msra.mxu1 %v2645_v13  ;;  %v2711_v0 = vld [vmem:[%s2878_s11 + $0x11c] ss:$20 sps:$4 sm:$0xff]   ;;  %v2715_v2 = vld [vmem:[%s2878_s11 + $0x118] ss:$20 sps:$4 sm:$0xff]   ;;  %v2716_v3 = vld [vmem:[%s2878_s11 + $0x80] ss:$20 sps:$4 sm:$0xff]  }
  0x1d   : > { %2320 = vmatprep.subr.bf16.mxu0 %v2646_v14  ;;  %2598 = vmatprep.subr.bf16.mxu1 %v2646_v14  ;;  %v2717_v4 = vld [vmem:[%s2878_s11 + $0x144] ss:$20 sps:$4 sm:$0xff]   ;;  %v2719_v5 = vld [vmem:[%s2878_s11 + $0xac] ss:$20 sps:$4 sm:$0xff]   ;;  %v2722_v7 = vld [vmem:[%s2878_s11 + $0xa8] ss:$20 sps:$4 sm:$0xff]  }
  0x1e   : > { %v2721_v6 = vld [vmem:[%s2878_s11 + $0x140] ss:$20 sps:$4 sm:$0xff]   ;;  %v2727_v10 = vld [vmem:[%s2878_s11 + $0x168] ss:$20 sps:$4 sm:$0xff]   ;;  %v2728_v11 = vld [vmem:[%s2878_s11 + $0xd0] ss:$20 sps:$4 sm:$0xff]  }
  0x1f   : > { %v2723_v8 = vld [vmem:[%s2878_s11 + $0x16c] ss:$20 sps:$4 sm:$0xff]   ;;  %v2725_v9 = vld [vmem:[%s2878_s11 + $0xd4] ss:$20 sps:$4 sm:$0xff]   ;;  %v2732_v13 = vld [vmem:[%s2878_s11 + $0xfc] ss:$20 sps:$4 sm:$0xff]  }
  0x20   : > { %2321 = vmatpush3.bf16.msra.mxu0 %v2647_v15  ;;  %2606 = vmatpush3.bf16.msra.mxu1 %v2647_v15  ;;  %v2730_v12 = vld [vmem:[%s2878_s11 + $0x194] ss:$20 sps:$4 sm:$0xff]   ;;  %v2734_v14 = vld [vmem:[%s2878_s11 + $0x190] ss:$20 sps:$4 sm:$0xff]   ;;  %v2735_v15 = vld [vmem:[%s2878_s11 + $0xf8] ss:$20 sps:$4 sm:$0xff]  }
  0x21   : > { %2322 = vmatprep.subr.bf16.mxu0 %v2648_v16  ;;  %2599 = vmatprep.subr.bf16.mxu1 %v2648_v16  ;;  %v2736_v16 = vld [vmem:[%s2878_s11 + $0x1bc] ss:$20 sps:$4 sm:$0xff]  }
  0x24   : > { %2323 = vmatpush3.bf16.msra.mxu0 %v2649_v17  ;;  %2607 = vmatpush3.bf16.msra.mxu1 %v2649_v17  ;;  %v2738_v17 = vld [vmem:[%s2878_s11 + $0x124] ss:$20 sps:$4 sm:$0xff]  }
  0x25   : > { %2420 = vmatprep.subr.bf16.mxu1 %v2656_v18  ;;  %2552 = vmatprep.subr.bf16.mxu0 %v2659_v19  ;;  %v2740_v18 = vld [vmem:[%s2878_s11 + $0x1b8] ss:$20 sps:$4 sm:$0xff]  }
  0x27   : > { %1203 = vmatmul.mubr.bf16.vlgmr.msra.gmra.mrb[0].mxu0 %v2650_v20  ;;  %1299 = vmatmul.mubr.bf16.vlgmr.msra.gmra.mrb[0].mxu1 %v2653_v21  ;;  %v2742_v20 = vld [vmem:[%s2878_s11 + $0x14c] ss:$20 sps:$4 sm:$0xff]   ;;  %v2744_v21 = vld [vmem:[%s2878_s11 + $0x10] ss:$20 sps:$4 sm:$0xff]  }
  0x28   : > { %2421 = vmatpush3.bf16.msra.mxu1 %v2657_v22  ;;  %2553 = vmatpush3.bf16.msra.mxu0 %v2659_v19  ;;  %v2741_v19 = vld [vmem:[%s2878_s11 + $0x120] ss:$20 sps:$4 sm:$0xff]   ;;  %v2745_v22 = vld [vmem:[%s2878_s11 + $0x148] ss:$20 sps:$4 sm:$0xff]  }
  0x29   : > { %2422 = vmatprep.subr.bf16.mxu1 %v2658_v23  ;;  %1210 = vmatprep.mubr.bf16.mxu0 %v2661_v24  ;;  %v2746_v23 = vld [vmem:[%s2878_s11 + $0x38] ss:$20 sps:$4 sm:$0xff]   ;;  %v2747_v24 = vld [vmem:[%s2878_s11 + $0x174] ss:$20 sps:$4 sm:$0xff]  }
  0x2a   : > { %1306 = vmatprep.mubr.bf16.mxu1 %v2663_v25  ;;  %2554 = vmatprep.subr.bf16.mxu0 %v2690_v35  ;;  %v2749_v25 = vld [vmem:[%s2878_s11 + $0x60] ss:$20 sps:$4 sm:$0xff]  }
  0x2c   : > { %2423 = vmatpush3.bf16.msra.mxu1 %v2660_v26  ;;  %2555 = vmatpush3.bf16.msra.mxu0 %v2690_v35  ;;  %v2750_v26 = vld [vmem:[%s2878_s11 + $0x170] ss:$20 sps:$4 sm:$0xff]   ;;  %v2761_v35 = vld [vmem:[%s2878_s11 + $0x128] ss:$20 sps:$4 sm:$0xff]  }
  0x2d   : > { %2424 = vmatprep.subr.bf16.mxu1 %v2667_v28  ;;  %2556 = vmatprep.subr.bf16.mxu0 %v2710_v47  ;;  %v2752_v28 = vld [vmem:[%s2878_s11 + $0x19c] ss:$20 sps:$4 sm:$0xff]  }
  0x2f   : > { %1211 = vmatmul.mubr.bf16.gmra.mrb[4].mxu0 %v2665_v27  ;;  %1307 = vmatmul.mubr.bf16.gmra.mrb[4].mxu1 %v2666_v29  ;;  %v2751_v27 = vld [vmem:[%s2878_s11 + $0x88] ss:$20 sps:$4 sm:$0xff]   ;;  %v2754_v29 = vld [vmem:[%s2878_s11 + $0xb0] ss:$20 sps:$4 sm:$0xff]  }
  0x30   : > { %2425 = vmatpush3.bf16.msra.mxu1 %v2668_v30  ;;  %1218 = vmatprep.mubr.bf16.mxu0 %v2671_v32  ;;  %v2755_v30 = vld [vmem:[%s2878_s11 + $0x198] ss:$20 sps:$4 sm:$0xff]  }
  0x31   : > { %2426 = vmatprep.subr.bf16.mxu1 %v2669_v31  ;;  %1314 = vmatprep.mubr.bf16.mxu1 %v2673_v33  ;;  %v2756_v31 = vld [vmem:[%s2878_s11 + $0xd8] ss:$20 sps:$4 sm:$0xff]   ;;  %v2759_v33 = vld [vmem:[%s2878_s11 + $0x100] ss:$20 sps:$4 sm:$0xff]  }
  0x32   : > { %2557 = vmatpush3.bf16.msra.mxu0 %v2710_v47  ;;  %v2757_v32 = vld [vmem:[%s2878_s11 + $0x1c4] ss:$20 sps:$4 sm:$0xff]  }
  0x33   : > { %2558 = vmatprep.subr.bf16.mxu0 %v2729_v56  ;;  %v2776_v47 = vld [vmem:[%s2878_s11 + $0x218] ss:$20 sps:$4 sm:$0xff]  }
  0x34   : > { %2427 = vmatpush3.bf16.msra.mxu1 %v2670_v34  ;;  %v2760_v34 = vld [vmem:[%s2878_s11 + $0x1c0] ss:$20 sps:$4 sm:$0xff]  }
  0x35   : > { %2428 = vmatprep.subr.bf16.mxu1 %v2677_v37  ;;  %v2764_v37 = vld [vmem:[%s2878_s11 + $0x150] ss:$20 sps:$4 sm:$0xff]  }
  0x36   : > { %2559 = vmatpush3.bf16.msra.mxu0 %v2729_v56 }
  0x37   : > { %1219 = vmatmul.mubr.bf16.gmra.mrb[8].mxu0 %v2675_v36  ;;  %1315 = vmatmul.mubr.bf16.gmra.mrb[8].mxu1 %v2676_v38  ;;  %v2762_v36 = vld [vmem:[%s2878_s11 + $0x1ec] ss:$20 sps:$4 sm:$0xff]   ;;  %v2765_v38 = vld [vmem:[%s2878_s11 + $0x1e8] ss:$20 sps:$4 sm:$0xff]  }
  0x38   : > { %2429 = vmatpush3.bf16.msra.mxu1 %v2678_v39  ;;  %1226 = vmatprep.mubr.bf16.mxu0 %v2681_v41  ;;  %v2766_v39 = vld [vmem:[%s2878_s11 + $0x178] ss:$20 sps:$4 sm:$0xff]   ;;  %v2769_v41 = vld [vmem:[%s2878_s11 + $0x1a0] ss:$20 sps:$4 sm:$0xff]  }
  0x39   : > { %2430 = vmatprep.subr.bf16.mxu1 %v2679_v40  ;;  %1322 = vmatprep.mubr.bf16.mxu1 %v2683_v42  ;;  %v2767_v40 = vld [vmem:[%s2878_s11 + $0x214] ss:$20 sps:$4 sm:$0xff]   ;;  %v2770_v42 = vld [vmem:[%s2878_s11 + $0x210] ss:$20 sps:$4 sm:$0xff]  }
  0x3c   : > { %2431 = vmatpush3.bf16.msra.mxu1 %v2680_v43  ;;  %v2771_v43 = vld [vmem:[%s2878_s11 + $0x1c8] ss:$20 sps:$4 sm:$0xff]  }
  0x3d   : > { %2432 = vmatprep.subr.bf16.mxu1 %v2687_v46  ;;  %v2775_v46 = vld [vmem:[%s2878_s11 + $0x238] ss:$20 sps:$4 sm:$0xff]  }
  0x3f   : > { %1227 = vmatmul.mubr.bf16.gmra.mrb[12].mxu0 %v2685_v44  ;;  %1323 = vmatmul.mubr.bf16.gmra.mrb[12].mxu1 %v2686_v45  ;;  %v2772_v44 = vld [vmem:[%s2878_s11 + $0x23c] ss:$20 sps:$4 sm:$0xff]  }
  0x40   : > { %2433 = vmatpush3.bf16.msra.mxu1 %v2688_v48  ;;  %1234 = vmatprep.mubr.bf16.mxu0 %v2692_v50  ;;  %v2774_v45 = vld [vmem:[%s2878_s11 + $0x1f0] ss:$20 sps:$4 sm:$0xff]   ;;  %v2780_v50 = vld [vmem:[%s2878_s11 + $0x260] ss:$20 sps:$4 sm:$0xff]  }
  0x41   : > { %2434 = vmatprep.subr.bf16.mxu1 %v2689_v49  ;;  %1363 = vmatprep.mubr.bf16.mxu1 %v2696_v51  ;;  %v2777_v48 = vld [vmem:[%s2878_s11 + $0x264] ss:$20 sps:$4 sm:$0xff]   ;;  %v2779_v49 = vld [vmem:[%s2878_s11 + $0x240] ss:$20 sps:$4 sm:$0xff]   ;;  %v2781_v51 = vld [vmem:[%s2878_s11 + $0x268] ss:$20 sps:$4 sm:$0xff]  }
  0x44   : > { %2435 = vmatpush3.bf16.msra.mxu1 %v2691_v52  ;;  %v2806_v52 = vmov 0.0  }
  0x45   : > { %275 = vst.msk [vmem:[#allocation2 + $0x10] sm:$0xff] %vm272_vm0, %v2806_v52  ;;  %273 = vst.msk [vmem:[#allocation2] sm:$0xff] %vm272_vm0, %v2806_v52 }
  0x46   : > { %274 = vst.msk [vmem:[#allocation2 + $0x8] sm:$0xff] %vm272_vm0, %v2806_v52  ;;  %276 = vst.msk [vmem:[#allocation2 + $0x18] sm:$0xff] %vm272_vm0, %v2806_v52 }
  0x47   : > { %1235 = vmatmul.mubr.bf16.gmra.mrb[16].mxu0 %v2697_v54  ;;  %1364 = vmatmul.mubr.bf16.vlgmr.msra.gmra.mrb[16].mxu1 %v2694_v53  ;;  %277 = vst.msk [vmem:[#allocation2 + $0x20] sm:$0xff] %vm272_vm0, %v2806_v52  ;;  %278 = vst.msk [vmem:[#allocation2 + $0x28] sm:$0xff] %vm272_vm0, %v2806_v52 }
  0x48   : > { %1242 = vmatprep.mubr.bf16.mxu0 %v2698_v55  ;;  %1371 = vmatprep.mubr.bf16.mxu1 %v2700_v57  ;;  %279 = vst.msk [vmem:[#allocation2 + $0x30] sm:$0xff] %vm272_vm0, %v2806_v52  ;;  %280 = vst.msk [vmem:[#allocation2 + $0x38] sm:$0xff] %vm272_vm0, %v2806_v52 }
  0x49   : > { %281 = vst.msk [vmem:[#allocation2 + $0x40] sm:$0xff] %vm272_vm0, %v2806_v52  ;;  %282 = vst.msk [vmem:[#allocation2 + $0x48] sm:$0xff] %vm272_vm0, %v2806_v52 }
  0x4a   : > { %283 = vst.msk [vmem:[#allocation2 + $0x50] sm:$0xff] %vm272_vm0, %v2806_v52  ;;  %284 = vst.msk [vmem:[#allocation2 + $0x58] sm:$0xff] %vm272_vm0, %v2806_v52 }
  0x4b   : > { %285 = vst.msk [vmem:[#allocation2 + $0x60] sm:$0xff] %vm272_vm0, %v2806_v52  ;;  %286 = vst.msk [vmem:[#allocation2 + $0x68] sm:$0xff] %vm272_vm0, %v2806_v52 }
  0x4c   : > { %287 = vst.msk [vmem:[#allocation2 + $0x70] sm:$0xff] %vm272_vm0, %v2806_v52  ;;  %288 = vst.msk [vmem:[#allocation2 + $0x78] sm:$0xff] %vm272_vm0, %v2806_v52 }
  0x4d   : > { %289 = vst.msk [vmem:[#allocation2 + $0x80] sm:$0xff] %vm272_vm0, %v2806_v52  ;;  %290 = vst.msk [vmem:[#allocation2 + $0x88] sm:$0xff] %vm272_vm0, %v2806_v52 }
  0x4e   : > { %291 = vst.msk [vmem:[#allocation2 + $0x90] sm:$0xff] %vm272_vm0, %v2806_v52  ;;  %292 = vst.msk [vmem:[#allocation2 + $0x98] sm:$0xff] %vm272_vm0, %v2806_v52 }
  0x4f   : > { %1243 = vmatmul.mubr.bf16.gmra.mrb[20].mxu0 %v2702_v58  ;;  %1372 = vmatmul.mubr.bf16.gmra.mrb[20].mxu1 %v2703_v59  ;;  %293 = vst.msk [vmem:[#allocation2 + $0xa0] sm:$0xff] %vm272_vm0, %v2806_v52  ;;  %294 = vst.msk [vmem:[#allocation2 + $0xa8] sm:$0xff] %vm272_vm0, %v2806_v52 }
  0x50   : > { %1250 = vmatprep.mubr.bf16.mxu0 %v2704_v60  ;;  %1379 = vmatprep.mubr.bf16.mxu1 %v2706_v61  ;;  %295 = vst.msk [vmem:[#allocation2 + $0xb0] sm:$0xff] %vm272_vm0, %v2806_v52  ;;  %296 = vst.msk [vmem:[#allocation2 + $0xb8] sm:$0xff] %vm272_vm0, %v2806_v52 }
  0x51   : > { %297 = vst.msk [vmem:[#allocation2 + $0xc0] sm:$0xff] %vm272_vm0, %v2806_v52  ;;  %298 = vst.msk [vmem:[#allocation2 + $0xc8] sm:$0xff] %vm272_vm0, %v2806_v52 }
  0x52   : > { %299 = vst.msk [vmem:[#allocation2 + $0xd0] sm:$0xff] %vm272_vm0, %v2806_v52  ;;  %300 = vst.msk [vmem:[#allocation2 + $0xd8] sm:$0xff] %vm272_vm0, %v2806_v52 }
  0x53   : > { %301 = vst.msk [vmem:[#allocation2 + $0xe0] sm:$0xff] %vm272_vm0, %v2806_v52  ;;  %302 = vst.msk [vmem:[#allocation2 + $0xe8] sm:$0xff] %vm272_vm0, %v2806_v52 }
  0x54   : > { %303 = vst.msk [vmem:[#allocation2 + $0xf0] sm:$0xff] %vm272_vm0, %v2806_v52  ;;  %304 = vst.msk [vmem:[#allocation2 + $0xf8] sm:$0xff] %vm272_vm0, %v2806_v52 }
  0x57   : > { %1251 = vmatmul.mubr.bf16.gmra.mrb[24].mxu0 %v2708_v62  ;;  %1380 = vmatmul.mubr.bf16.gmra.mrb[24].mxu1 %v2709_v63 }
  0x58   : > { %1258 = vmatprep.mubr.bf16.mxu0 %v2711_v0  ;;  %1387 = vmatprep.mubr.bf16.mxu1 %v2713_v1 }
  0x5f   : > { %1259 = vmatmul.mubr.bf16.gmra.mrb[28].mxu0 %v2715_v2  ;;  %1388 = vmatmul.mubr.bf16.gmra.mrb[28].mxu1 %v2716_v3 }
  0x60   : > { %1266 = vmatprep.mubr.bf16.mxu0 %v2717_v4  ;;  %1395 = vmatprep.mubr.bf16.mxu1 %v2719_v5 }
  0x67   : > { %1267 = vmatmul.mubr.bf16.gmra.mrb[32].mxu0 %v2721_v6  ;;  %1396 = vmatmul.mubr.bf16.gmra.mrb[32].mxu1 %v2722_v7 }
  0x68   : > { %1274 = vmatprep.mubr.bf16.mxu0 %v2723_v8  ;;  %1403 = vmatprep.mubr.bf16.mxu1 %v2725_v9 }
  0x6f   : > { %1275 = vmatmul.mubr.bf16.gmra.mrb[36].mxu0 %v2727_v10  ;;  %1404 = vmatmul.mubr.bf16.gmra.mrb[36].mxu1 %v2728_v11 }
  0x70   : > { %1282 = vmatprep.mubr.bf16.mxu0 %v2730_v12  ;;  %1411 = vmatprep.mubr.bf16.mxu1 %v2732_v13 }
  0x77   : > { %1283 = vmatmul.mubr.bf16.gmra.mrb[40].mxu0 %v2734_v14  ;;  %1412 = vmatmul.mubr.bf16.gmra.mrb[40].mxu1 %v2735_v15 }
  0x78   : > { %1290 = vmatprep.mubr.bf16.mxu0 %v2736_v16  ;;  %1419 = vmatprep.mubr.bf16.mxu1 %v2738_v17 }
  0x7f   : > { %1291 = vmatmul.mubr.bf16.gmra.mrb[44].mxu0 %v2740_v18  ;;  %1420 = vmatmul.mubr.bf16.gmra.mrb[44].mxu1 %v2741_v19 }
  0x80   : > { %1427 = vmatprep.mubr.bf16.mxu1 %v2742_v20  ;;  %2560 = vmatprep.mubr.msk.bf16.mxu0 %vm272_vm0, %v2744_v21 }
  0x87   : > { %1428 = vmatmul.mubr.bf16.gmra.mrb[48].mxu1 %v2745_v22  ;;  %2561 = vmatmul.mubr.msk.bf16.vlgmr.msra.gmra.mrb[48].mxu0 %vm272_vm0, %v2746_v23 }
  0x88   : > { %1435 = vmatprep.mubr.bf16.mxu1 %v2747_v24  ;;  %2564 = vmatprep.mubr.msk.bf16.mxu0 %vm272_vm0, %v2749_v25 }
  0x8f   : > { %1436 = vmatmul.mubr.bf16.gmra.mrb[52].mxu1 %v2750_v26  ;;  %2565 = vmatmul.mubr.msk.bf16.gmra.mrb[52].mxu0 %vm272_vm0, %v2751_v27 }
  0x90   : > { %1443 = vmatprep.mubr.bf16.mxu1 %v2752_v28  ;;  %2568 = vmatprep.mubr.msk.bf16.mxu0 %vm272_vm0, %v2754_v29 }
  0x97   : > { %1444 = vmatmul.mubr.bf16.gmra.mrb[56].mxu1 %v2755_v30  ;;  %2569 = vmatmul.mubr.msk.bf16.gmra.mrb[56].mxu0 %vm272_vm0, %v2756_v31 }
  0x98   : > { %1451 = vmatprep.mubr.bf16.mxu1 %v2757_v32  ;;  %2572 = vmatprep.mubr.msk.bf16.mxu0 %vm272_vm0, %v2759_v33 }
  0x9f   : > { %1452 = vmatmul.mubr.bf16.gmra.mrb[60].mxu1 %v2760_v34  ;;  %2573 = vmatmul.mubr.msk.bf16.gmra.mrb[60].mxu0 %vm272_vm0, %v2761_v35 }
  0xa0   : > { %1459 = vmatprep.mubr.bf16.mxu1 %v2762_v36  ;;  %2576 = vmatprep.mubr.msk.bf16.mxu0 %vm272_vm0, %v2764_v37 }
  0xa7   : > { %1460 = vmatmul.mubr.bf16.gmra.mrb[64].mxu1 %v2765_v38  ;;  %2577 = vmatmul.mubr.msk.bf16.gmra.mrb[64].mxu0 %vm272_vm0, %v2766_v39 }
  0xa8   : > { %1467 = vmatprep.mubr.bf16.mxu1 %v2767_v40  ;;  %2580 = vmatprep.mubr.msk.bf16.mxu0 %vm272_vm0, %v2769_v41 }
  0xaf   : > { %1468 = vmatmul.mubr.bf16.gmra.mrb[68].mxu1 %v2770_v42  ;;  %2581 = vmatmul.mubr.msk.bf16.gmra.mrb[68].mxu0 %vm272_vm0, %v2771_v43 }
  0xb0   : > { %1475 = vmatprep.mubr.bf16.mxu1 %v2772_v44  ;;  %2584 = vmatprep.mubr.msk.bf16.mxu0 %vm272_vm0, %v2774_v45 }
  0xb7   : > { %1476 = vmatmul.mubr.bf16.gmra.mrb[72].mxu1 %v2775_v46  ;;  %2585 = vmatmul.mubr.msk.bf16.gmra.mrb[72].mxu0 %vm272_vm0, %v2776_v47 }
  0xb8   : > { %1483 = vmatprep.mubr.bf16.mxu1 %v2777_v48  ;;  %2588 = vmatprep.mubr.msk.bf16.mxu0 %vm272_vm0, %v2779_v49 }
  0xbf   : > { %1484 = vmatmul.mubr.bf16.gmra.mrb[76].mxu1 %v2780_v50  ;;  %2589 = vmatmul.mubr.msk.bf16.gmra.mrb[76].mxu0 %vm272_vm0, %v2781_v51 }
  0xfa   : > { %v2396_v53 = vpop.f32.mrb[0].mxu1  ;;  %v2324_v54 = vpop.f32.mrb[0].mxu0 }
  0xfb   : > { %v2397_v55 = vpop.f32.mrb[1].mxu1  ;;  %v2325_v56 = vpop.f32.mrb[1].mxu0 }
  0xfc   : > { %v3089_v57 = vadd.f32 %v2397_v55, %v2396_v53  ;;  %v2399_v58 = vpop.f32.mrb[2].mxu1  ;;  %v2326_v59 = vadd.f32 %v2325_v56, %v2324_v54  ;;  %v2327_v60 = vpop.f32.mrb[2].mxu0 }
  0xfd   : > { %v2400_v61 = vpop.f32.mrb[3].mxu1  ;;  %v2328_v62 = vpop.f32.mrb[3].mxu0 }
  0xfe   : > { %v3091_v63 = vadd.f32 %v2400_v61, %v2399_v58  ;;  %v2329_v0 = vadd.f32 %v2328_v62, %v2327_v60 }
 0x102   : > { %v2402_v1 = vpop.f32.mrb[4].mxu1  ;;  %v2330_v2 = vpop.f32.mrb[4].mxu0 }
 0x103   : > { %v2403_v3 = vpop.f32.mrb[5].mxu1  ;;  %v2331_v4 = vpop.f32.mrb[5].mxu0 }
 0x104   : > { %v3093_v5 = vadd.f32 %v2403_v3, %v2402_v1  ;;  %v2405_v6 = vpop.f32.mrb[6].mxu1  ;;  %v2332_v7 = vadd.f32 %v2331_v4, %v2330_v2  ;;  %v2333_v8 = vpop.f32.mrb[6].mxu0 }
 0x105   : > { %v2406_v9 = vpop.f32.mrb[7].mxu1  ;;  %v2334_v10 = vpop.f32.mrb[7].mxu0 }
 0x106   : > { %v3095_v11 = vadd.f32 %v2406_v9, %v2405_v6  ;;  %v2335_v12 = vadd.f32 %v2334_v10, %v2333_v8 }
 0x10a   : > { %v2408_v13 = vpop.f32.mrb[8].mxu1  ;;  %v2336_v14 = vpop.f32.mrb[8].mxu0 }
 0x10b   : > { %v2409_v15 = vpop.f32.mrb[9].mxu1  ;;  %v2337_v16 = vpop.f32.mrb[9].mxu0 }
 0x10c   : > { %v3097_v17 = vadd.f32 %v2409_v15, %v2408_v13  ;;  %v2411_v18 = vpop.f32.mrb[10].mxu1  ;;  %v2338_v19 = vadd.f32 %v2337_v16, %v2336_v14  ;;  %v2339_v20 = vpop.f32.mrb[10].mxu0 }
 0x10d   : > { %v2412_v21 = vpop.f32.mrb[11].mxu1  ;;  %v2340_v22 = vpop.f32.mrb[11].mxu0 }
 0x10e   : > { %v3099_v23 = vadd.f32 %v2412_v21, %v2411_v18  ;;  %v2341_v24 = vadd.f32 %v2340_v22, %v2339_v20 }
 0x112   : > { %v2414_v25 = vpop.f32.mrb[12].mxu1  ;;  %v2342_v26 = vpop.f32.mrb[12].mxu0 }
 0x113   : > { %v2415_v27 = vpop.f32.mrb[13].mxu1  ;;  %v2343_v28 = vpop.f32.mrb[13].mxu0 }
 0x114   : > { %v3101_v29 = vadd.f32 %v2415_v27, %v2414_v25  ;;  %v2417_v30 = vpop.f32.mrb[14].mxu1  ;;  %v2344_v31 = vadd.f32 %v2343_v28, %v2342_v26  ;;  %v2345_v32 = vpop.f32.mrb[14].mxu0 }
 0x115   : > { %v2418_v33 = vpop.f32.mrb[15].mxu1  ;;  %v2346_v34 = vpop.f32.mrb[15].mxu0 }
 0x116   : > { %v3103_v35 = vadd.f32 %v2418_v33, %v2417_v30  ;;  %v2347_v36 = vadd.f32 %v2346_v34, %v2345_v32 }
 0x11a   : > { %v2436_v37 = vpop.f32.mrb[16].mxu1  ;;  %v2348_v38 = vpop.f32.mrb[16].mxu0 }
 0x11b   : > { %v2437_v39 = vpop.f32.mrb[17].mxu1  ;;  %v2349_v40 = vpop.f32.mrb[17].mxu0 }
 0x11c   : > { %v2438_v41 = vadd.f32 %v2437_v39, %v2436_v37  ;;  %v2439_v42 = vpop.f32.mrb[18].mxu1  ;;  %v2350_v43 = vadd.f32 %v2349_v40, %v2348_v38  ;;  %v2351_v44 = vpop.f32.mrb[18].mxu0 }
 0x11d   : > { %v2440_v45 = vpop.f32.mrb[19].mxu1  ;;  %v2352_v46 = vpop.f32.mrb[19].mxu0 }
 0x11e   : > { %v2441_v47 = vadd.f32 %v2440_v45, %v2439_v42  ;;  %v2353_v48 = vadd.f32 %v2352_v46, %v2351_v44  ;;  %v3105_v49 = vadd.f32 %v2438_v41, %v2326_v59 }
 0x120   : > { %v3107_v50 = vadd.f32 %v2441_v47, %v2329_v0 }
 0x122   : > { %v2442_v51 = vpop.f32.mrb[20].mxu1  ;;  %v2354_v52 = vpop.f32.mrb[20].mxu0 }
 0x123   : > { %v2443_v53 = vpop.f32.mrb[21].mxu1  ;;  %v2355_v54 = vpop.f32.mrb[21].mxu0 }
 0x124   : > { %v2444_v55 = vadd.f32 %v2443_v53, %v2442_v51  ;;  %v2445_v56 = vpop.f32.mrb[22].mxu1  ;;  %v2356_v58 = vadd.f32 %v2355_v54, %v2354_v52  ;;  %v2357_v60 = vpop.f32.mrb[22].mxu0 }
 0x125   : > { %v2446_v61 = vpop.f32.mrb[23].mxu1  ;;  %v2358_v62 = vpop.f32.mrb[23].mxu0 }
 0x126   : > { %v2447_v1 = vadd.f32 %v2446_v61, %v2445_v56  ;;  %v2359_v2 = vadd.f32 %v2358_v62, %v2357_v60  ;;  %v3109_v3 = vadd.f32 %v2444_v55, %v2332_v7 }
 0x128   : > { %v3111_v4 = vadd.f32 %v2447_v1, %v2335_v12 }
 0x12a   : > { %v2448_v59 = vpop.f32.mrb[24].mxu1  ;;  %v2360_v6 = vpop.f32.mrb[24].mxu0 }
 0x12b   : > { %v2449_v0 = vpop.f32.mrb[25].mxu1  ;;  %v2361_v8 = vpop.f32.mrb[25].mxu0 }
 0x12c   : > { %v2450_v9 = vadd.f32 %v2449_v0, %v2448_v59  ;;  %v2451_v10 = vpop.f32.mrb[26].mxu1  ;;  %v2362_v13 = vadd.f32 %v2361_v8, %v2360_v6  ;;  %v2363_v14 = vpop.f32.mrb[26].mxu0 }
 0x12d   : > { %v2452_v15 = vpop.f32.mrb[27].mxu1  ;;  %v2364_v16 = vpop.f32.mrb[27].mxu0 }
 0x12e   : > { %v2453_v18 = vadd.f32 %v2452_v15, %v2451_v10  ;;  %v2365_v20 = vadd.f32 %v2364_v16, %v2363_v14  ;;  %v3113_v21 = vadd.f32 %v2450_v9, %v2338_v19 }
 0x130   : > { %v3115_v22 = vadd.f32 %v2453_v18, %v2341_v24 }
 0x132   : > { %v2454_v7 = vpop.f32.mrb[28].mxu1  ;;  %v2366_v25 = vpop.f32.mrb[28].mxu0 }
 0x133   : > { %v2455_v12 = vpop.f32.mrb[29].mxu1  ;;  %v2367_v26 = vpop.f32.mrb[29].mxu0 }
 0x134   : > { %v2456_v27 = vadd.f32 %v2455_v12, %v2454_v7  ;;  %v2457_v28 = vpop.f32.mrb[30].mxu1  ;;  %v2368_v30 = vadd.f32 %v2367_v26, %v2366_v25  ;;  %v2369_v32 = vpop.f32.mrb[30].mxu0 }
 0x135   : > { %v2458_v33 = vpop.f32.mrb[31].mxu1  ;;  %v2370_v34 = vpop.f32.mrb[31].mxu0 }
 0x136   : > { %v2459_v37 = vadd.f32 %v2458_v33, %v2457_v28  ;;  %v2371_v38 = vadd.f32 %v2370_v34, %v2369_v32  ;;  %v3117_v39 = vadd.f32 %v2456_v27, %v2344_v31 }
 0x138   : > { %v3119_v40 = vadd.f32 %v2459_v37, %v2347_v36 }
 0x13a   : > { %v2460_v19 = vpop.f32.mrb[32].mxu1  ;;  %v2372_v41 = vpop.f32.mrb[32].mxu0 }
 0x13b   : > { %v2461_v24 = vpop.f32.mrb[33].mxu1  ;;  %v2373_v42 = vpop.f32.mrb[33].mxu0 }
 0x13c   : > { %v2462_v44 = vadd.f32 %v2461_v24, %v2460_v19  ;;  %v2463_v45 = vpop.f32.mrb[34].mxu1  ;;  %v3121_v46 = vadd.f32 %v2373_v42, %v2372_v41  ;;  %v2375_v47 = vpop.f32.mrb[34].mxu0 }
 0x13d   : > { %v2464_v51 = vpop.f32.mrb[35].mxu1  ;;  %v2376_v52 = vpop.f32.mrb[35].mxu0 }
 0x13e   : > { %v2465_v53 = vadd.f32 %v2464_v51, %v2463_v45  ;;  %v3123_v54 = vadd.f32 %v2376_v52, %v2375_v47  ;;  %v3125_v55 = vadd.f32 %v2462_v44, %v2350_v43 }
 0x140   : > { %v3127_v31 = vadd.f32 %v2465_v53, %v2353_v48 }
 0x142   : > { %v2466_v36 = vpop.f32.mrb[36].mxu1  ;;  %v2378_v56 = vpop.f32.mrb[36].mxu0 }
 0x143   : > { %v2467_v60 = vpop.f32.mrb[37].mxu1  ;;  %v2379_v61 = vpop.f32.mrb[37].mxu0 }
 0x144   : > { %v2468_v62 = vadd.f32 %v2467_v60, %v2466_v36  ;;  %v2469_v1 = vpop.f32.mrb[38].mxu1  ;;  %v3129_v59 = vadd.f32 %v2379_v61, %v2378_v56  ;;  %v2381_v6 = vpop.f32.mrb[38].mxu0  ;;  %v307_v56 = vld [vmem:[#allocation2 + $0x10] sm:$0xff] }
 0x145   : > { %v2470_v0 = vpop.f32.mrb[39].mxu1  ;;  %v2382_v8 = vpop.f32.mrb[39].mxu0 }
 0x146   : > { %v2471_v9 = vadd.f32 %v2470_v0, %v2469_v1  ;;  %v3131_v10 = vadd.f32 %v2382_v8, %v2381_v6  ;;  %v3133_v14 = vadd.f32 %v2468_v62, %v2356_v58  ;;  %v305_v1 = vld [vmem:[#allocation2] sm:$0xff] }
 0x148   : > { %v3135_v43 = vadd.f32 %v2471_v9, %v2359_v2 }
 0x14a   : > { %v2472_v48 = vpop.f32.mrb[40].mxu1  ;;  %v2384_v15 = vpop.f32.mrb[40].mxu0 }
 0x14b   : > { %v2473_v16 = vpop.f32.mrb[41].mxu1  ;;  %v2385_v18 = vpop.f32.mrb[41].mxu0 }
 0x14c   : > { %v2474_v7 = vadd.f32 %v2473_v16, %v2472_v48  ;;  %v2475_v25 = vpop.f32.mrb[42].mxu1  ;;  %v3137_v12 = vadd.f32 %v2385_v18, %v2384_v15  ;;  %v2387_v26 = vpop.f32.mrb[42].mxu0  ;;  %v308_v48 = vld [vmem:[#allocation2 + $0x18] sm:$0xff] }
 0x14d   : > { %v2476_v27 = vpop.f32.mrb[43].mxu1  ;;  %v2388_v28 = vpop.f32.mrb[43].mxu0 }
 0x14e   : > { %v2477_v32 = vadd.f32 %v2476_v27, %v2475_v25  ;;  %v3139_v33 = vadd.f32 %v2388_v28, %v2387_v26  ;;  %v3141_v34 = vadd.f32 %v2474_v7, %v2362_v13 }
 0x150   : > { %v3143_v58 = vadd.f32 %v2477_v32, %v2365_v20 }
 0x152   : > { %v2478_v2 = vpop.f32.mrb[44].mxu1  ;;  %v2390_v37 = vpop.f32.mrb[44].mxu0 }
 0x153   : > { %v2479_v19 = vpop.f32.mrb[45].mxu1  ;;  %v2391_v41 = vpop.f32.mrb[45].mxu0 }
 0x154   : > { %v2480_v24 = vadd.f32 %v2479_v19, %v2478_v2  ;;  %v2481_v42 = vpop.f32.mrb[46].mxu1  ;;  %v3145_v44 = vadd.f32 %v2391_v41, %v2390_v37  ;;  %v2393_v45 = vpop.f32.mrb[46].mxu0  ;;  %v311_v2 = vld [vmem:[#allocation2 + $0x30] sm:$0xff]  ;;  %v309_v19 = vld [vmem:[#allocation2 + $0x20] sm:$0xff] }
 0x155   : > { %v2482_v47 = vpop.f32.mrb[47].mxu1  ;;  %v2394_v51 = vpop.f32.mrb[47].mxu0 }
 0x156   : > { %v2483_v52 = vadd.f32 %v2482_v47, %v2481_v42  ;;  %v3147_v53 = vadd.f32 %v2394_v51, %v2393_v45  ;;  %v3149_v36 = vadd.f32 %v2480_v24, %v2368_v30  ;;  %v3171_v24 = vld [vmem:[%s3365_s2] ss:$0 sm:$0xff]  ;;  %v312_v47 = vld [vmem:[#allocation2 + $0x38] sm:$0xff] }
 0x158   : > { %v3151_v13 = vadd.f32 %v2483_v52, %v2371_v38  ;;  %v306_v38 = vld [vmem:[#allocation2 + $0x8] sm:$0xff] }
 0x15a   : > { %v2484_v20 = vpop.f32.mrb[48].mxu1  ;;  %v2562_v60 = vpop.f32.mrb[48].mxu0 }
 0x15b   : > { %v1535_v61 = vadd.f32 %v2562_v60, %v3109_v3  ;;  %v2485_v62 = vpop.f32.mrb[49].mxu1  ;;  %v1526_v6 = vpop.f32.mrb[49].mxu0 }
 0x15c   : > { %v2486_v0 = vadd.f32 %v2485_v62, %v2484_v20  ;;  %v1527_v8 = vadd.f32 %v1526_v6, %v3105_v49  ;;  %v2487_v9 = vpop.f32.mrb[50].mxu1  ;;  %v2563_v15 = vpop.f32.mrb[50].mxu0 }
 0x15d   : > { %v1655_v16 = vadd.f32 %v1535_v61, %v307_v56  ;;  %v1538_v30 = vadd.f32 %v2563_v15, %v3111_v4  ;;  %v2488_v18 = vpop.f32.mrb[51].mxu1  ;;  %v1529_v7 = vpop.f32.mrb[51].mxu0 }
 0x15e   : > { %v1653_v25 = vadd.f32 %v1527_v8, %v305_v1  ;;  %v2489_v26 = vadd.f32 %v2488_v18, %v2487_v9  ;;  %v1530_v27 = vadd.f32 %v1529_v7, %v3107_v50  ;;  %v3158_v3 = vadd.f32 %v2486_v0, %v3121_v46 }
 0x15f   : > { %1687 = vst.msk [vmem:[#allocation2 + $0x10] sm:$0xff] %vm272_vm0, %v1655_v16  ;;  %v1656_v28 = vadd.f32 %v1538_v30, %v308_v48 }
 0x160   : > { %1685 = vst.msk [vmem:[#allocation2] sm:$0xff] %vm272_vm0, %v1653_v25  ;;  %v1654_v49 = vadd.f32 %v1530_v27, %v306_v38  ;;  %v3163_v32 = vadd.f32 %v2489_v26, %v3123_v54 }
 0x161   : > { %1688 = vst.msk [vmem:[#allocation2 + $0x18] sm:$0xff] %vm272_vm0, %v1656_v28 }
 0x162   : > { %1686 = vst.msk [vmem:[#allocation2 + $0x8] sm:$0xff] %vm272_vm0, %v1654_v49  ;;  %v2490_v4 = vpop.f32.mrb[52].mxu1  ;;  %v2566_v37 = vpop.f32.mrb[52].mxu0 }
 0x163   : > { %v1551_v50 = vadd.f32 %v2566_v37, %v3117_v39  ;;  %v2491_v46 = vpop.f32.mrb[53].mxu1  ;;  %v1542_v41 = vpop.f32.mrb[53].mxu0  ;;  %v310_v39 = vld [vmem:[#allocation2 + $0x28] sm:$0xff] }
 0x164   : > { %v2492_v54 = vadd.f32 %v2491_v46, %v2490_v4  ;;  %v1543_v42 = vadd.f32 %v1542_v41, %v3113_v21  ;;  %v2493_v45 = vpop.f32.mrb[54].mxu1  ;;  %v2567_v51 = vpop.f32.mrb[54].mxu0  ;;  %v313_v4 = vld [vmem:[#allocation2 + $0x40] sm:$0xff] }
 0x165   : > { %v1659_v52 = vadd.f32 %v1551_v50, %v311_v2  ;;  %v1554_v20 = vadd.f32 %v2567_v51, %v3119_v40  ;;  %v2494_v56 = vpop.f32.mrb[55].mxu1  ;;  %v1545_v60 = vpop.f32.mrb[55].mxu0 }
 0x166   : > { %v1722_v61 = vld [vmem:[#allocation2 + $0x10] sm:$0xff]  ;;  %v1657_v62 = vadd.f32 %v1543_v42, %v309_v19  ;;  %v2495_v1 = vadd.f32 %v2494_v56, %v2493_v45  ;;  %v1546_v6 = vadd.f32 %v1545_v60, %v3115_v22  ;;  %v3177_v0 = vadd.f32 %v2492_v54, %v3129_v59  ;;  %v316_v54 = vld [vmem:[#allocation2 + $0x58] sm:$0xff] }
 0x167   : > { %v1761_v21 = vadd.f32 %v3171_v24, %v1722_v61  ;;  %v1720_v8 = vld [vmem:[#allocation2] sm:$0xff]  ;;  %1691 = vst.msk [vmem:[#allocation2 + $0x30] sm:$0xff] %vm272_vm0, %v1659_v52  ;;  %v1660_v9 = vadd.f32 %v1554_v20, %v312_v47  ;;  %v314_v52 = vld [vmem:[#allocation2 + $0x48] sm:$0xff] }
 0x168   : > { %v1759_v40 = vadd.f32 %v3171_v24, %v1720_v8  ;;  %v1723_v48 = vld [vmem:[#allocation2 + $0x18] sm:$0xff]  ;;  %1689 = vst.msk [vmem:[#allocation2 + $0x20] sm:$0xff] %vm272_vm0, %v1657_v62  ;;  %v1658_v15 = vadd.f32 %v1546_v6, %v310_v39  ;;  %v3185_v16 = vadd.f32 %v2495_v1, %v3131_v10  ;;  %v315_v10 = vld [vmem:[#allocation2 + $0x50] sm:$0xff] }
 0x169   : > { %v1793_v22 = vmax.f32 %v1761_v21, 0.0  ;;  %v1762_v59 = vadd.f32 %v3171_v24, %v1723_v48  ;;  %v1721_v30 = vld [vmem:[#allocation2 + $0x8] sm:$0xff]  ;;  %1692 = vst.msk [vmem:[#allocation2 + $0x38] sm:$0xff] %vm272_vm0, %v1660_v9 }
 0x16a   : > { %v1791_v18 = vmax.f32 %v1759_v40, 0.0  ;;  %v1760_v38 = vadd.f32 %v3171_v24, %v1721_v30  ;;  %1690 = vst.msk [vmem:[#allocation2 + $0x28] sm:$0xff] %vm272_vm0, %v1658_v15  ;;  %v2496_v7 = vpop.f32.mrb[56].mxu1  ;;  %v2570_v25 = vpop.f32.mrb[56].mxu0  ;;  %v319_v30 = vld [vmem:[#allocation2 + $0x70] sm:$0xff] }
 0x16b   : > { %v2278_v26 = vpack.c.bf16 %v1793_v22, %v1793_v22  ;;  %v1794_v27 = vmax.f32 %v1762_v59, 0.0  ;;  %v1567_v28 = vadd.f32 %v2570_v25, %v3133_v14  ;;  %v2497_v49 = vpop.f32.mrb[57].mxu1  ;;  %v1558_v2 = vpop.f32.mrb[57].mxu0  ;;  %v317_v25 = vld [vmem:[#allocation2 + $0x60] sm:$0xff] }
 0x16c   : > { %v2276_v37 = vpack.c.bf16 %v1791_v18, %v1791_v18  ;;  %v1792_v50 = vmax.f32 %v1760_v38, 0.0  ;;  %v2498_v46 = vadd.f32 %v2497_v49, %v2496_v7  ;;  %v1559_v19 = vadd.f32 %v1558_v2, %v3125_v55  ;;  %v2499_v41 = vpop.f32.mrb[58].mxu1  ;;  %v2571_v42 = vpop.f32.mrb[58].mxu0 }
 0x16d   : > { %1954 = vst.msk [vmem:[%s3192_s29 + $0x8] sm:$0xf] %vm1951_vm1, %v2278_v26  ;;  %v2279_v45 = vpack.c.bf16 %v1794_v27, %v1794_v27  ;;  %v1663_v47 = vadd.f32 %v1567_v28, %v315_v10  ;;  %v1570_v51 = vadd.f32 %v2571_v42, %v3135_v43  ;;  %v2500_v14 = vpop.f32.mrb[59].mxu1  ;;  %v1561_v20 = vpop.f32.mrb[59].mxu0 }
 0x16e   : > { %1952 = vst.msk [vmem:[%s3192_s29] sm:$0xf] %vm1951_vm1, %v2276_v37  ;;  %v2277_v56 = vpack.c.bf16 %v1792_v50, %v1792_v50  ;;  %v1726_v39 = vld [vmem:[#allocation2 + $0x30] sm:$0xff]  ;;  %v1661_v60 = vadd.f32 %v1559_v19, %v313_v4  ;;  %v2501_v55 = vadd.f32 %v2500_v14, %v2499_v41  ;;  %v1562_v61 = vadd.f32 %v1561_v20, %v3127_v31  ;;  %v320_v37 = vld [vmem:[#allocation2 + $0x78] sm:$0xff] }
 0x16f   : > { %1955 = vst.msk [vmem:[%s3192_s29 + $0xc] sm:$0xf] %vm1951_vm1, %v2279_v45  ;;  %v1765_v62 = vadd.f32 %v3171_v24, %v1726_v39  ;;  %v1724_v1 = vld [vmem:[#allocation2 + $0x20] sm:$0xff]  ;;  %v1664_v43 = vadd.f32 %v1570_v51, %v316_v54  ;;  %v3209_v6 = vadd.f32 %v2498_v46, %v3137_v12  ;;  %v318_v54 = vld [vmem:[#allocation2 + $0x68] sm:$0xff] }
 0x170   : > { %1695 = vst.msk [vmem:[#allocation2 + $0x50] sm:$0xff] %vm272_vm0, %v1663_v47  ;;  %v1763_v21 = vadd.f32 %v3171_v24, %v1724_v1  ;;  %v1727_v8 = vld [vmem:[#allocation2 + $0x38] sm:$0xff]  ;;  %1693 = vst.msk [vmem:[#allocation2 + $0x40] sm:$0xff] %vm272_vm0, %v1661_v60  ;;  %v1662_v9 = vadd.f32 %v1562_v61, %v314_v52  ;;  %v3216_v31 = vadd.f32 %v2501_v55, %v3139_v33 }
 0x171   : > { %1953 = vst.msk [vmem:[%s3192_s29 + $0x4] sm:$0xf] %vm1951_vm1, %v2277_v56  ;;  %v1797_v40 = vmax.f32 %v1765_v62, 0.0  ;;  %v1766_v48 = vadd.f32 %v3171_v24, %v1727_v8  ;;  %v1725_v15 = vld [vmem:[#allocation2 + $0x28] sm:$0xff]  ;;  %v323_v8 = vld [vmem:[#allocation2 + $0x90] sm:$0xff] }
 0x172   : > { %1696 = vst.msk [vmem:[#allocation2 + $0x58] sm:$0xff] %vm272_vm0, %v1664_v43  ;;  %v1795_v22 = vmax.f32 %v1763_v21, 0.0  ;;  %v1764_v12 = vadd.f32 %v3171_v24, %v1725_v15  ;;  %1694 = vst.msk [vmem:[#allocation2 + $0x48] sm:$0xff] %vm272_vm0, %v1662_v9  ;;  %v2502_v59 = vpop.f32.mrb[60].mxu1  ;;  %v2574_v18 = vpop.f32.mrb[60].mxu0 }
 0x173   : > { %v2282_v38 = vpack.c.bf16 %v1797_v40, %v1797_v40  ;;  %v1798_v7 = vmax.f32 %v1766_v48, 0.0  ;;  %v1583_v33 = vadd.f32 %v2574_v18, %v3149_v36  ;;  %v2503_v10 = vpop.f32.mrb[61].mxu1  ;;  %v1574_v26 = vpop.f32.mrb[61].mxu0 }
 0x174   : > { %v2280_v27 = vpack.c.bf16 %v1795_v22, %v1795_v22  ;;  %v1796_v28 = vmax.f32 %v1764_v12, 0.0  ;;  %v2504_v49 = vadd.f32 %v2503_v10, %v2502_v59  ;;  %v1575_v4 = vadd.f32 %v1574_v26, %v3141_v34  ;;  %v2505_v2 = vpop.f32.mrb[62].mxu1  ;;  %v2575_v50 = vpop.f32.mrb[62].mxu0  ;;  %v321_v22 = vld [vmem:[#allocation2 + $0x80] sm:$0xff] }
 0x175   : > { %1958 = vst.msk [vmem:[%s3192_s29 + $0x18] sm:$0xf] %vm1951_vm1, %v2282_v38  ;;  %v2283_v46 = vpack.c.bf16 %v1798_v7, %v1798_v7  ;;  %v1667_v19 = vadd.f32 %v1583_v33, %v319_v30  ;;  %v1586_v41 = vadd.f32 %v2575_v50, %v3151_v13  ;;  %v2506_v36 = vpop.f32.mrb[63].mxu1  ;;  %v1577_v42 = vpop.f32.mrb[63].mxu0  ;;  %v324_v33 = vld [vmem:[#allocation2 + $0x98] sm:$0xff] }
 0x176   : > { %1956 = vst.msk [vmem:[%s3192_s29 + $0x10] sm:$0xf] %vm1951_vm1, %v2280_v27  ;;  %v2281_v45 = vpack.c.bf16 %v1796_v28, %v1796_v28  ;;  %v1665_v51 = vadd.f32 %v1575_v4, %v317_v25  ;;  %v2507_v34 = vadd.f32 %v2506_v36, %v2505_v2  ;;  %v1578_v14 = vadd.f32 %v1577_v42, %v3143_v58  ;;  %v322_v28 = vld [vmem:[#allocation2 + $0x88] sm:$0xff] }
 0x177   : > { %v1730_v47 = vld [vmem:[#allocation2 + $0x50] sm:$0xff]  ;;  %1959 = vst.msk [vmem:[%s3192_s29 + $0x1c] sm:$0xf] %vm1951_vm1, %v2283_v46  ;;  %v1728_v20 = vld [vmem:[#allocation2 + $0x40] sm:$0xff]  ;;  %v1668_v13 = vadd.f32 %v1586_v41, %v320_v37  ;;  %v3235_v56 = vadd.f32 %v2504_v49, %v3145_v44 }
 0x178   : > { %v1769_v52 = vadd.f32 %v3171_v24, %v1730_v47  ;;  %1699 = vst.msk [vmem:[#allocation2 + $0x70] sm:$0xff] %vm272_vm0, %v1667_v19  ;;  %v1767_v39 = vadd.f32 %v3171_v24, %v1728_v20  ;;  %1697 = vst.msk [vmem:[#allocation2 + $0x60] sm:$0xff] %vm272_vm0, %v1665_v51  ;;  %v1666_v55 = vadd.f32 %v1578_v14, %v318_v54 }
 0x179   : > { %1957 = vst.msk [vmem:[%s3192_s29 + $0x14] sm:$0xf] %vm1951_vm1, %v2281_v45  ;;  %v1731_v60 = vld [vmem:[#allocation2 + $0x58] sm:$0xff]  ;;  %v3242_v58 = vadd.f32 %v2507_v34, %v3147_v53  ;;  %v1729_v1 = vld [vmem:[#allocation2 + $0x48] sm:$0xff] }
 0x17a   : > { %v1801_v61 = vmax.f32 %v1769_v52, 0.0  ;;  %v1770_v62 = vadd.f32 %v3171_v24, %v1731_v60  ;;  %1700 = vst.msk [vmem:[#allocation2 + $0x78] sm:$0xff] %vm272_vm0, %v1668_v13  ;;  %v1799_v43 = vmax.f32 %v1767_v39, 0.0  ;;  %v1768_v44 = vadd.f32 %v3171_v24, %v1729_v1  ;;  %1698 = vst.msk [vmem:[#allocation2 + $0x68] sm:$0xff] %vm272_vm0, %v1666_v55  ;;  %v2508_v21 = vpop.f32.mrb[64].mxu1  ;;  %v2578_v9 = vpop.f32.mrb[64].mxu0 }
 0x17b   : > { %v1599_v53 = vadd.f32 %v2578_v9, %v3177_v0  ;;  %v2509_v15 = vpop.f32.mrb[65].mxu1  ;;  %v1590_v12 = vpop.f32.mrb[65].mxu0  ;;  %v327_v52 = vld [vmem:[#allocation2 + $0xb0] sm:$0xff]  ;;  %v325_v55 = vld [vmem:[#allocation2 + $0xa0] sm:$0xff] }
 0x17c   : > { %v2286_v40 = vpack.c.bf16 %v1801_v61, %v1801_v61  ;;  %v1802_v48 = vmax.f32 %v1770_v62, 0.0  ;;  %v2284_v59 = vpack.c.bf16 %v1799_v43, %v1799_v43  ;;  %v1800_v30 = vmax.f32 %v1768_v44, 0.0  ;;  %v2511_v7 = vpop.f32.mrb[66].mxu1  ;;  %v2579_v10 = vpop.f32.mrb[66].mxu0 }
 0x17d   : > { %v2510_v18 = vadd.f32 %v2509_v15, %v2508_v21  ;;  %v1591_v38 = vadd.f32 %v1590_v12, %v3158_v3  ;;  %v1671_v26 = vadd.f32 %v1599_v53, %v323_v8  ;;  %v1602_v27 = vadd.f32 %v2579_v10, %v3185_v16  ;;  %v2512_v0 = vpop.f32.mrb[67].mxu1  ;;  %v1593_v49 = vpop.f32.mrb[67].mxu0  ;;  %v328_v8 = vld [vmem:[#allocation2 + $0xb8] sm:$0xff]  ;;  %v326_v15 = vld [vmem:[#allocation2 + $0xa8] sm:$0xff] }
 0x17e   : > { %1962 = vst.msk [vmem:[%s3192_s29 + $0x28] sm:$0xf] %vm1951_vm1, %v2286_v40  ;;  %v2287_v25 = vpack.c.bf16 %v1802_v48, %v1802_v48  ;;  %1960 = vst.msk [vmem:[%s3192_s29 + $0x20] sm:$0xf] %vm1951_vm1, %v2284_v59  ;;  %v2285_v4 = vpack.c.bf16 %v1800_v30, %v1800_v30  ;;  %v2513_v3 = vadd.f32 %v2512_v0, %v2511_v7 }
 0x17f   : > { %v1734_v2 = vld [vmem:[#allocation2 + $0x70] sm:$0xff]  ;;  %v1669_v37 = vadd.f32 %v1591_v38, %v321_v22  ;;  %v1594_v50 = vadd.f32 %v1593_v49, %v3163_v32  ;;  %v1732_v19 = vld [vmem:[#allocation2 + $0x60] sm:$0xff]  ;;  %1703 = vst.msk [vmem:[#allocation2 + $0x90] sm:$0xff] %vm272_vm0, %v1671_v26  ;;  %v1672_v16 = vadd.f32 %v1602_v27, %v324_v33  ;;  %v3261_v41 = vadd.f32 %v2510_v18, %v3089_v57 }
 0x180   : > { %1963 = vst.msk [vmem:[%s3192_s29 + $0x2c] sm:$0xf] %vm1951_vm1, %v2287_v25  ;;  %v1773_v46 = vadd.f32 %v3171_v24, %v1734_v2  ;;  %1961 = vst.msk [vmem:[%s3192_s29 + $0x24] sm:$0xf] %vm1951_vm1, %v2285_v4  ;;  %v1771_v36 = vadd.f32 %v3171_v24, %v1732_v19  ;;  %v3268_v32 = vadd.f32 %v2513_v3, %v3091_v63  ;;  %v331_v2 = vld [vmem:[#allocation2 + $0xd0] sm:$0xff] }
 0x181   : > { %v1735_v54 = vld [vmem:[#allocation2 + $0x78] sm:$0xff]  ;;  %1701 = vst.msk [vmem:[#allocation2 + $0x80] sm:$0xff] %vm272_vm0, %v1669_v37  ;;  %v1670_v42 = vadd.f32 %v1594_v50, %v322_v28  ;;  %v1733_v51 = vld [vmem:[#allocation2 + $0x68] sm:$0xff]  ;;  %1704 = vst.msk [vmem:[#allocation2 + $0x98] sm:$0xff] %vm272_vm0, %v1672_v16 }
 0x182   : > { %v1805_v45 = vmax.f32 %v1773_v46, 0.0  ;;  %v1774_v47 = vadd.f32 %v3171_v24, %v1735_v54  ;;  %v1803_v34 = vmax.f32 %v1771_v36, 0.0  ;;  %v1772_v57 = vadd.f32 %v3171_v24, %v1733_v51  ;;  %v2514_v14 = vpop.f32.mrb[68].mxu1  ;;  %v2582_v20 = vpop.f32.mrb[68].mxu0  ;;  %v332_v51 = vld [vmem:[#allocation2 + $0xd8] sm:$0xff] }
 0x183   : > { %1702 = vst.msk [vmem:[#allocation2 + $0x88] sm:$0xff] %vm272_vm0, %v1670_v42  ;;  %v1615_v63 = vadd.f32 %v2582_v20, %v3235_v56  ;;  %v2515_v60 = vpop.f32.mrb[69].mxu1  ;;  %v1606_v61 = vpop.f32.mrb[69].mxu0 }
 0x184   : > { %v2290_v13 = vpack.c.bf16 %v1805_v45, %v1805_v45  ;;  %v1806_v39 = vmax.f32 %v1774_v47, 0.0  ;;  %v2288_v62 = vpack.c.bf16 %v1803_v34, %v1803_v34  ;;  %v1804_v1 = vmax.f32 %v1772_v57, 0.0  ;;  %v2517_v21 = vpop.f32.mrb[70].mxu1  ;;  %v2583_v9 = vpop.f32.mrb[70].mxu0 }
 0x185   : > { %v2516_v43 = vadd.f32 %v2515_v60, %v2514_v14  ;;  %v1607_v44 = vadd.f32 %v1606_v61, %v3209_v6  ;;  %v1675_v48 = vadd.f32 %v1615_v63, %v327_v52  ;;  %v1618_v53 = vadd.f32 %v2583_v9, %v3242_v58  ;;  %v2518_v56 = vpop.f32.mrb[71].mxu1  ;;  %v1609_v22 = vpop.f32.mrb[71].mxu0 }
 0x186   : > { %1966 = vst.msk [vmem:[%s3192_s29 + $0x38] sm:$0xf] %vm1951_vm1, %v2290_v13  ;;  %v2291_v40 = vpack.c.bf16 %v1806_v39, %v1806_v39  ;;  %1964 = vst.msk [vmem:[%s3192_s29 + $0x30] sm:$0xf] %vm1951_vm1, %v2288_v62  ;;  %v2289_v12 = vpack.c.bf16 %v1804_v1, %v1804_v1  ;;  %v1738_v59 = vld [vmem:[#allocation2 + $0x90] sm:$0xff]  ;;  %v2519_v6 = vadd.f32 %v2518_v56, %v2517_v21  ;;  %v330_v13 = vld [vmem:[#allocation2 + $0xc8] sm:$0xff] }
 0x187   : > { %v1673_v30 = vadd.f32 %v1607_v44, %v325_v55  ;;  %v1610_v18 = vadd.f32 %v1609_v22, %v3216_v31  ;;  %v1777_v38 = vadd.f32 %v3171_v24, %v1738_v59  ;;  %1707 = vst.msk [vmem:[#allocation2 + $0xb0] sm:$0xff] %vm272_vm0, %v1675_v48  ;;  %v1676_v58 = vadd.f32 %v1618_v53, %v328_v8 }
 0x188   : > { %1967 = vst.msk [vmem:[%s3192_s29 + $0x3c] sm:$0xf] %vm1951_vm1, %v2291_v40  ;;  %v1736_v7 = vld [vmem:[#allocation2 + $0x80] sm:$0xff]  ;;  %v1470_v33 = vadd.f32 %v2516_v43, %v3093_v5  ;;  %1965 = vst.msk [vmem:[%s3192_s29 + $0x34] sm:$0xf] %vm1951_vm1, %v2289_v12  ;;  %v1739_v25 = vld [vmem:[#allocation2 + $0x98] sm:$0xff]  ;;  %v1473_v31 = vadd.f32 %v2519_v6, %v3095_v11 }
 0x189   : > { %v1775_v10 = vadd.f32 %v3171_v24, %v1736_v7  ;;  %1705 = vst.msk [vmem:[#allocation2 + $0xa0] sm:$0xff] %vm272_vm0, %v1673_v30  ;;  %v1674_v26 = vadd.f32 %v1610_v18, %v326_v15  ;;  %v1809_v27 = vmax.f32 %v1777_v38, 0.0  ;;  %v1778_v0 = vadd.f32 %v3171_v24, %v1739_v25  ;;  %1708 = vst.msk [vmem:[#allocation2 + $0xb8] sm:$0xff] %vm272_vm0, %v1676_v58  ;;  %v329_v11 = vld [vmem:[#allocation2 + $0xc0] sm:$0xff] }
 0x18a   : > { %v1737_v28 = vld [vmem:[#allocation2 + $0x88] sm:$0xff]  ;;  %v2520_v5 = vpop.f32.mrb[72].mxu1  ;;  %v2586_v37 = vpop.f32.mrb[72].mxu0  ;;  %v333_v6 = vld [vmem:[#allocation2 + $0xe0] sm:$0xff] }
 0x18b   : > { %v1807_v49 = vmax.f32 %v1775_v10, 0.0  ;;  %v1776_v4 = vadd.f32 %v3171_v24, %v1737_v28  ;;  %1706 = vst.msk [vmem:[#allocation2 + $0xa8] sm:$0xff] %vm272_vm0, %v1674_v26  ;;  %v2294_v3 = vpack.c.bf16 %v1809_v27, %v1809_v27  ;;  %v1810_v50 = vmax.f32 %v1778_v0, 0.0  ;;  %v2521_v19 = vpop.f32.mrb[73].mxu1  ;;  %v1622_v16 = vpop.f32.mrb[73].mxu0 }
 0x18c   : > { %v1631_v46 = vadd.f32 %v2586_v37, %v1470_v33  ;;  %v2522_v42 = vadd.f32 %v2521_v19, %v2520_v5  ;;  %v1623_v45 = vadd.f32 %v1622_v16, %v3261_v41  ;;  %v2523_v47 = vpop.f32.mrb[74].mxu1  ;;  %v2587_v34 = vpop.f32.mrb[74].mxu0  ;;  %v334_v5 = vld [vmem:[#allocation2 + $0xe8] sm:$0xff] }
 0x18d   : > { %v2292_v36 = vpack.c.bf16 %v1807_v49, %v1807_v49  ;;  %v1808_v54 = vmax.f32 %v1776_v4, 0.0  ;;  %1970 = vst.msk [vmem:[%s3192_s29 + $0x48] sm:$0xf] %vm1951_vm1, %v2294_v3  ;;  %v2295_v57 = vpack.c.bf16 %v1810_v50, %v1810_v50  ;;  %v1634_v52 = vadd.f32 %v2587_v34, %v1473_v31  ;;  %v2524_v20 = vpop.f32.mrb[75].mxu1  ;;  %v1625_v39 = vpop.f32.mrb[75].mxu0  ;;  %v335_v3 = vld [vmem:[#allocation2 + $0xf0] sm:$0xff] }
 0x18e   : > { %v1679_v14 = vadd.f32 %v1631_v46, %v331_v2  ;;  %v1742_v60 = vld [vmem:[#allocation2 + $0xb0] sm:$0xff]  ;;  %v1677_v55 = vadd.f32 %v1623_v45, %v329_v11  ;;  %v2525_v61 = vadd.f32 %v2524_v20, %v2523_v47  ;;  %v1626_v41 = vadd.f32 %v1625_v39, %v3268_v32 }
 0x18f   : > { %1968 = vst.msk [vmem:[%s3192_s29 + $0x40] sm:$0xf] %vm1951_vm1, %v2292_v36  ;;  %v2293_v63 = vpack.c.bf16 %v1808_v54, %v1808_v54  ;;  %1971 = vst.msk [vmem:[%s3192_s29 + $0x4c] sm:$0xf] %vm1951_vm1, %v2295_v57  ;;  %v1781_v62 = vadd.f32 %v3171_v24, %v1742_v60  ;;  %v1680_v43 = vadd.f32 %v1634_v52, %v332_v51 }
 0x190   : > { %v1740_v1 = vld [vmem:[#allocation2 + $0xa0] sm:$0xff]  ;;  %1711 = vst.msk [vmem:[#allocation2 + $0xd0] sm:$0xff] %vm272_vm0, %v1679_v14  ;;  %v1478_v44 = vadd.f32 %v2522_v42, %v3097_v17  ;;  %v1743_v8 = vld [vmem:[#allocation2 + $0xb8] sm:$0xff]  ;;  %1709 = vst.msk [vmem:[#allocation2 + $0xc0] sm:$0xff] %vm272_vm0, %v1677_v55  ;;  %v1678_v9 = vadd.f32 %v1626_v41, %v330_v13  ;;  %v1481_v32 = vadd.f32 %v2525_v61, %v3099_v23 }
 0x191   : > { %1969 = vst.msk [vmem:[%s3192_s29 + $0x44] sm:$0xf] %vm1951_vm1, %v2293_v63  ;;  %v1779_v21 = vadd.f32 %v3171_v24, %v1740_v1  ;;  %v1813_v40 = vmax.f32 %v1781_v62, 0.0  ;;  %v1782_v48 = vadd.f32 %v3171_v24, %v1743_v8  ;;  %v336_v42 = vld [vmem:[#allocation2 + $0xf8] sm:$0xff] }
 0x192   : > { %v1741_v53 = vld [vmem:[#allocation2 + $0xa8] sm:$0xff]  ;;  %1712 = vst.msk [vmem:[#allocation2 + $0xd8] sm:$0xff] %vm272_vm0, %v1680_v43  ;;  %1710 = vst.msk [vmem:[#allocation2 + $0xc8] sm:$0xff] %vm272_vm0, %v1678_v9  ;;  %v2526_v15 = vpop.f32.mrb[76].mxu1  ;;  %v2590_v22 = vpop.f32.mrb[76].mxu0 }
 0x193   : > { %v1811_v56 = vmax.f32 %v1779_v21, 0.0  ;;  %v1780_v17 = vadd.f32 %v3171_v24, %v1741_v53  ;;  %v2298_v12 = vpack.c.bf16 %v1813_v40, %v1813_v40  ;;  %v1814_v59 = vmax.f32 %v1782_v48, 0.0  ;;  %v2527_v30 = vpop.f32.mrb[77].mxu1  ;;  %v1638_v23 = vpop.f32.mrb[77].mxu0 }
 0x194   : > { %v2528_v7 = vadd.f32 %v2527_v30, %v2526_v15  ;;  %v1639_v58 = vadd.f32 %v1638_v23, %v1478_v44  ;;  %v2529_v33 = vpop.f32.mrb[78].mxu1  ;;  %v2591_v10 = vpop.f32.mrb[78].mxu0 }
 0x195   : > { %v2296_v18 = vpack.c.bf16 %v1811_v56, %v1811_v56  ;;  %v1812_v38 = vmax.f32 %v1780_v17, 0.0  ;;  %1974 = vst.msk [vmem:[%s3192_s29 + $0x58] sm:$0xf] %vm1951_vm1, %v2298_v12  ;;  %v2299_v25 = vpack.c.bf16 %v1814_v59, %v1814_v59  ;;  %v2530_v26 = vpop.f32.mrb[79].mxu1  ;;  %v1641_v31 = vpop.f32.mrb[79].mxu0 }
 0x196   : > { %v1486_v28 = vadd.f32 %v2528_v7, %v3101_v29  ;;  %v1681_v49 = vadd.f32 %v1639_v58, %v333_v6  ;;  %v2531_v4 = vadd.f32 %v2530_v26, %v2529_v33  ;;  %v1642_v50 = vadd.f32 %v1641_v31, %v1481_v32 }
 0x197   : > { %1972 = vst.msk [vmem:[%s3192_s29 + $0x50] sm:$0xf] %vm1951_vm1, %v2296_v18  ;;  %v2297_v27 = vpack.c.bf16 %v1812_v38, %v1812_v38  ;;  %v1746_v0 = vld [vmem:[#allocation2 + $0xd0] sm:$0xff]  ;;  %1975 = vst.msk [vmem:[%s3192_s29 + $0x5c] sm:$0xf] %vm1951_vm1, %v2299_v25  ;;  %v1744_v37 = vld [vmem:[#allocation2 + $0xc0] sm:$0xff] }
 0x198   : > { %v1785_v2 = vadd.f32 %v3171_v24, %v1746_v0  ;;  %v1783_v46 = vadd.f32 %v3171_v24, %v1744_v37  ;;  %v1647_v11 = vadd.f32 %v2590_v22, %v1486_v28  ;;  %1713 = vst.msk [vmem:[#allocation2 + $0xe0] sm:$0xff] %vm272_vm0, %v1681_v49  ;;  %v1489_v29 = vadd.f32 %v2531_v4, %v3103_v35 }
 0x199   : > { %1973 = vst.msk [vmem:[%s3192_s29 + $0x54] sm:$0xf] %vm1951_vm1, %v2297_v27  ;;  %v1747_v19 = vld [vmem:[#allocation2 + $0xd8] sm:$0xff]  ;;  %v1745_v54 = vld [vmem:[#allocation2 + $0xc8] sm:$0xff]  ;;  %v1682_v45 = vadd.f32 %v1642_v50, %v334_v5 }
 0x19a   : > { %v1817_v16 = vmax.f32 %v1785_v2, 0.0  ;;  %v1786_v36 = vadd.f32 %v3171_v24, %v1747_v19  ;;  %v1815_v47 = vmax.f32 %v1783_v46, 0.0  ;;  %v1784_v51 = vadd.f32 %v3171_v24, %v1745_v54 }
 0x19b   : > { %v1683_v34 = vadd.f32 %v1647_v11, %v335_v3  ;;  %v1650_v57 = vadd.f32 %v2591_v10, %v1489_v29  ;;  %1714 = vst.msk [vmem:[#allocation2 + $0xe8] sm:$0xff] %vm272_vm0, %v1682_v45 }
 0x19c   : > { %v2302_v14 = vpack.c.bf16 %v1817_v16, %v1817_v16  ;;  %v1818_v52 = vmax.f32 %v1786_v36, 0.0  ;;  %v2300_v35 = vpack.c.bf16 %v1815_v47, %v1815_v47  ;;  %v1816_v20 = vmax.f32 %v1784_v51, 0.0 }
 0x19d   : > { %1715 = vst.msk [vmem:[#allocation2 + $0xf0] sm:$0xff] %vm272_vm0, %v1683_v34  ;;  %v1684_v13 = vadd.f32 %v1650_v57, %v336_v42 }
 0x19e   : > { %1978 = vst.msk [vmem:[%s3192_s29 + $0x68] sm:$0xf] %vm1951_vm1, %v2302_v14  ;;  %v2303_v39 = vpack.c.bf16 %v1818_v52, %v1818_v52  ;;  %1976 = vst.msk [vmem:[%s3192_s29 + $0x60] sm:$0xf] %vm1951_vm1, %v2300_v35  ;;  %v2301_v63 = vpack.c.bf16 %v1816_v20, %v1816_v20 }
 0x19f   : > { %1716 = vst.msk [vmem:[#allocation2 + $0xf8] sm:$0xff] %vm272_vm0, %v1684_v13  ;;  %v1748_v60 = vld [vmem:[#allocation2 + $0xe0] sm:$0xff] }
 0x1a0   : > { %1979 = vst.msk [vmem:[%s3192_s29 + $0x6c] sm:$0xf] %vm1951_vm1, %v2303_v39  ;;  %1977 = vst.msk [vmem:[%s3192_s29 + $0x64] sm:$0xf] %vm1951_vm1, %v2301_v63  ;;  %v1787_v55 = vadd.f32 %v3171_v24, %v1748_v60 }
 0x1a2   : > { %v1819_v61 = vmax.f32 %v1787_v55, 0.0  ;;  %v1749_v41 = vld [vmem:[#allocation2 + $0xe8] sm:$0xff] }
 0x1a3   : > { %v1788_v1 = vadd.f32 %v3171_v24, %v1749_v41 }
 0x1a4   : > { %v1750_v62 = vld [vmem:[#allocation2 + $0xf0] sm:$0xff]  ;;  %v2304_v44 = vpack.c.bf16 %v1819_v61, %v1819_v61 }
 0x1a5   : > { %v1789_v43 = vadd.f32 %v3171_v24, %v1750_v62  ;;  %v1820_v8 = vmax.f32 %v1788_v1, 0.0 }
 0x1a6   : > { %v1751_v21 = vld [vmem:[#allocation2 + $0xf8] sm:$0xff]  ;;  %1980 = vst.msk [vmem:[%s3192_s29 + $0x70] sm:$0xf] %vm1951_vm1, %v2304_v44 }
 0x1a7   : > { %v1821_v9 = vmax.f32 %v1789_v43, 0.0  ;;  %v1790_v32 = vadd.f32 %v3171_v24, %v1751_v21  ;;  %v2305_v40 = vpack.c.bf16 %v1820_v8, %v1820_v8 }
 0x1a9   : > { %v2306_v48 = vpack.c.bf16 %v1821_v9, %v1821_v9  ;;  %v1822_v53 = vmax.f32 %v1790_v32, 0.0  ;;  %1981 = vst.msk [vmem:[%s3192_s29 + $0x74] sm:$0xf] %vm1951_vm1, %v2305_v40 }
 0x1ab   : > { %1982 = vst.msk [vmem:[%s3192_s29 + $0x78] sm:$0xf] %vm1951_vm1, %v2306_v48  ;;  %v2307_v56 = vpack.c.bf16 %v1822_v53, %v1822_v53 }
 0x1ad   : > { %1983 = vst.msk [vmem:[%s3192_s29 + $0x7c] sm:$0xf] %vm1951_vm1, %v2307_v56 }
 0x1ae PF: > { %s13_s14 = sadd.s32 1, %s2804_s14   ;;  %s3367_s12 = smov %s2800_s13 }
 0x1af   : > { %p10_p5 = scmp.ge.s32.totalorder %s13_s14, 10   ;;  %s3368_s13 = smov %s3370_s15 }
 0x1b1   :  { %12 = sbr.rel (!%p10_p5) target bundleno = 2 (0x2), region = 76 }

// kernel: encoder_forward.14
= control target key start
LH: loop header
LB: loop body
LE: loop exit
PB: predicated region body
PF: predicated region fallthrough
CT: control target
= control target key end

     0   :  { %s381_s6 = smov 0   ;;  %s383_s7 = smov 0   ;;  %s437_s0 = inlined_call_operand.vmem [shape: bf16[2,32,16,128], index: 0, kind: input, shape index: {}]   ;;  %s438_s1 = inlined_call_operand.vmem [shape: bf16[2,16,16,64], index: 1, kind: output, shape index: {}]  }
   0x1   :  { %s385_s8 = smov 0   ;;  %s387_s9 = smov 0  }
   0x2   :  { %s389_s10 = smov 0  }
   0x3 LB: > { %s20_s11 = sadd.s32 1, %s360_s8  ;;  %s23_s12 = sadd.s32 1, %s364_s9  ;;  %s368_s10 = sphi %s389_s10, %s11_s10   ;;  %s364_s9 = sphi %s387_s9, %s442_s9   ;;  %s360_s8 = sphi %s385_s8, %s441_s8   ;;  %s356_s7 = sphi %s383_s7, %s440_s7   ;;  %s352_s6 = sphi %s381_s6, %s439_s6  }
   0x4   : > { %p21_p0 = scmp.ge.s32.totalorder %s20_s11, 16  ;;  %p277_p1 = scmp.ge.s32.totalorder %s368_s10, 1 }
   0x5   : > { %p109_p2 = scmp.lt.s32.totalorder %s368_s10, 33 }
   0x6   : > { %s444_s11 = smov (%p21_p0, %s20_s11), 0  ;;  %s446_s12 = smov (!%p21_p0, %s23_s12), %s364_s9 }
   0x7   : > { %p110_p3 = pnand %p277_p1, %p109_p2  ;;  %p25_p4 = scmp.ge.s32.totalorder %s446_s12, 2 }
   0x8   : > { %s278_s13 = sshll.u32 (!%p110_p3), %s352_s6, 1  ;;  %p139_p5 = scmp.lt.s32.totalorder (!%p110_p3), %s356_s7, 1  ;;  %vm175_vm0 = vcmask (!%p110_p3), 519168  }
   0x9   : > { %s448_s12 = smov (%p25_p4, %s446_s12), 0  ;;  %113 = sbr.rel (%p110_p3) target bundleno = 146 (0x92), region = 24 }
   0xa   : > { %p141_p6 = scmp.lt.s32.totalorder (!%p110_p3), %s278_s13, 31  ;;  %s370_s21 = smov (!%p110_p3), 64  }
   0xb   : > { %p151_p7 = scmp.lt.s32.totalorder (!%p110_p3), %s352_s6, 15 }
  0x10   : > { %s450_s7 = smov (!%p139_p5, %s356_s7), 1  ;;  %s452_s13 = smov (!%p141_p6, %s278_s13), 31 }
  0x11   : > { %s280_s14 = sshll.u32 %s450_s7, 6  ;;  %s279_s15 = sshll.u32 %s452_s13, 1 }
  0x12   : > { %s145_s16 = sadd.s32 %s280_s14, %s279_s15  ;;  %s454_s6 = smov (!%p151_p7, %s352_s6), 15 }
  0x13   : > { %s281_s17 = sshll.u32 %s145_s16, 2  ;;  %s282_s22 = sshll.u32 %s454_s6, 1 }
  0x14   : > { %s147_s20 = scalar_lea.vmem %s437_s0, %s281_s17  ;;  %s283_s23 = sshll.u32 %s450_s7, 5 }
  0x15   : > { %v158_v0 = vld [vmem:[%s147_s20] sm:$0xf]  ;;  %v285_v1 = vld [vmem:[%s147_s20 + $0x8] sm:$0xf]  ;;  %v159_v2 = vld [vmem:[%s147_s20 + $0x4] sm:$0xf]  ;;  %s155_s24 = sadd.s32 %s283_s23, %s282_s22 }
  0x16   : > { %v163_v3 = vmax.bf16 %v285_v1, %v158_v0  ;;  %v286_v4 = vld [vmem:[%s147_s20 + $0xc] sm:$0xf]  ;;  %s284_s25 = sshll.u32 %s155_s24, 2 }
  0x17   : > { %v164_v5 = vmax.bf16 %v286_v4, %v159_v2  ;;  %s157_s28 = scalar_lea.vmem %s438_s1, %s284_s25 }
  0x18   : > { %167 = vrot.lane.b32.xlu0 %v163_v3, %s370_s21 }
  0x1c   : > { %169 = vrot.lane.b32.xlu0 %v164_v5, %s370_s21 }
  0x8a   : > { %v168_v6 = vpop.permute.xlu0 %167 }
  0x8b   : > { %v173_v7 = vmax.bf16 %v168_v6, %v163_v3 }
  0x8d   : > { %176 = vst.msk [vmem:[%s157_s28] sm:$0xf] %vm175_vm0, %v173_v7 }
  0x8e   : > { %v170_v8 = vpop.permute.xlu0 %169 }
  0x8f   : > { %v174_v9 = vmax.bf16 %v170_v8, %v164_v5 }
  0x91   : > { %177 = vst.msk [vmem:[%s157_s28 + $0x4] sm:$0xf] %vm175_vm0, %v174_v9 }
  0x92 PF: > { %s11_s10 = sadd.s32 1, %s368_s10   ;;  %s439_s6 = smov %s360_s8 }
  0x93   : > { %p8_p8 = scmp.ge.s32.totalorder %s11_s10, 34   ;;  %s440_s7 = smov %s364_s9 }
  0x94   : > { %s441_s8 = smov %s444_s11  ;;  %s442_s9 = smov %s448_s12 }
  0x95   :  { %10 = sbr.rel (!%p8_p8) target bundleno = 3 (0x3), region = 55 }

// kernel: encoder_forward.15
= control target key start
LH: loop header
LB: loop body
LE: loop exit
PB: predicated region body
PF: predicated region fallthrough
CT: control target
= control target key end

     0   :  { %s2918_s12 = smov 0   ;;  %s2920_s13 = smov 0   ;;  %s3330_s0 = inlined_call_operand.vmem [shape: bf16[512,576], index: 0, kind: input, shape index: {}]   ;;  %s3331_s1 = inlined_call_operand.vmem [shape: bf16[576,128], index: 1, kind: input, shape index: {}]   ;;  %s3332_s2 = inlined_call_operand.vmem [shape: f32[1,128], index: 2, kind: input, shape index: {}]   ;;  %s3333_s3 = inlined_call_operand.vmem [shape: bf16[512,128], index: 3, kind: output, shape index: {}]  }
   0x1   :  { %s2922_s14 = smov 0  }
   0x2 LB: > { %s32_s15 = sadd.s32 1, %s2892_s13  ;;  %p2102_p0 = scmp.ge.s32.totalorder %s2896_s14, 1  ;;  %s2896_s14 = sphi %s2922_s14, %s13_s14   ;;  %s2892_s13 = sphi %s2920_s13, %s3335_s13   ;;  %s2888_s12 = sphi %s2918_s12, %s3334_s12  }
   0x3   : > { %p34_p1 = scmp.ge.s32.totalorder %s32_s15, 2  ;;  %p191_p2 = scmp.lt.s32.totalorder %s2896_s14, 3 }
   0x5   : > { %s3337_s15 = smov (%p34_p1, %s32_s15), 0  ;;  %p192_p3 = pnand %p2102_p0, %p191_p2 }
   0x6   : > { %v2726_v0 = vld [vmem:[%s3331_s1 + $0x40] sm:$0xff] (!%p192_p3)   ;;  %s2103_s18 = sshll.u32 (!%p192_p3), %s2888_s12, 5  ;;  %v2728_v2 = vld [vmem:[%s3331_s1 + $0x48] sm:$0xff] (!%p192_p3)   ;;  %v2730_v4 = vld [vmem:[%s3331_s1 + $0x50] sm:$0xff] (!%p192_p3)   ;;  %vm1120_vm0 = vcmask (!%p192_p3), 523264  }
   0x7   : > { %195 = sbr.rel (%p192_p3) target bundleno = 419 (0x1a3), region = 32  ;;  %v2727_v1 = vld [vmem:[%s3331_s1] sm:$0xff] (!%p192_p3)   ;;  %2401 = vmatprep.subr.bf16.mxu0 (!%p192_p3), %v2726_v0  ;;  %2685 = vmatprep.subr.bf16.mxu1 (!%p192_p3), %v2726_v0  ;;  %p236_p4 = scmp.lt.s32.totalorder (!%p192_p3), %s2103_s18, 63  ;;  %v2729_v3 = vld [vmem:[%s3331_s1 + $0x8] sm:$0xff] (!%p192_p3)   ;;  %v2731_v5 = vld [vmem:[%s3331_s1 + $0x10] sm:$0xff] (!%p192_p3)  }
   0x8   : > { %2402 = vmatpush3.bf16.msra.mxu0 (!%p192_p3), %v2727_v1  ;;  %2693 = vmatpush3.bf16.msra.mxu1 (!%p192_p3), %v2727_v1  ;;  %v2732_v6 = vld [vmem:[%s3331_s1 + $0x58] sm:$0xff] (!%p192_p3)   ;;  %v2734_v8 = vld [vmem:[%s3331_s1 + $0x60] sm:$0xff] (!%p192_p3)   ;;  %v2736_v10 = vld [vmem:[%s3331_s1 + $0x68] sm:$0xff] (!%p192_p3)  }
   0x9   : > { %2403 = vmatprep.subr.bf16.mxu0 (!%p192_p3), %v2728_v2  ;;  %2686 = vmatprep.subr.bf16.mxu1 (!%p192_p3), %v2728_v2  ;;  %v2733_v7 = vld [vmem:[%s3331_s1 + $0x18] sm:$0xff] (!%p192_p3)   ;;  %v2735_v9 = vld [vmem:[%s3331_s1 + $0x20] sm:$0xff] (!%p192_p3)   ;;  %v2737_v13 = vld [vmem:[%s3331_s1 + $0x28] sm:$0xff] (!%p192_p3)  }
   0xa   : > { %v2738_v14 = vld [vmem:[%s3331_s1 + $0x70] sm:$0xff] (!%p192_p3)   ;;  %v2740_v16 = vld [vmem:[%s3331_s1 + $0x78] sm:$0xff] (!%p192_p3)   ;;  %v2748_v18 = vld [vmem:[%s3331_s1 + $0xc0] sm:$0xff] (!%p192_p3)  }
   0xb   : > { %v2739_v15 = vld [vmem:[%s3331_s1 + $0x30] sm:$0xff] (!%p192_p3)   ;;  %v2741_v17 = vld [vmem:[%s3331_s1 + $0x38] sm:$0xff] (!%p192_p3)   ;;  %v2751_v19 = vld [vmem:[%s3331_s1 + $0x100] sm:$0xff] (!%p192_p3)  }
   0xc   : > { %2404 = vmatpush3.bf16.msra.mxu0 (!%p192_p3), %v2729_v3  ;;  %2694 = vmatpush3.bf16.msra.mxu1 (!%p192_p3), %v2729_v3  ;;  %v2749_v22 = vld [vmem:[%s3331_s1 + $0x80] sm:$0xff] (!%p192_p3)   ;;  %v2750_v23 = vld [vmem:[%s3331_s1 + $0xc8] sm:$0xff] (!%p192_p3)   ;;  %v2759_v28 = vld [vmem:[%s3331_s1 + $0xd0] sm:$0xff] (!%p192_p3)  }
   0xd   : > { %2405 = vmatprep.subr.bf16.mxu0 (!%p192_p3), %v2730_v4  ;;  %2687 = vmatprep.subr.bf16.mxu1 (!%p192_p3), %v2730_v4  ;;  %v2752_v26 = vld [vmem:[%s3331_s1 + $0x88] sm:$0xff] (!%p192_p3)   ;;  %v2760_v30 = vld [vmem:[%s3331_s1 + $0x90] sm:$0xff] (!%p192_p3)   ;;  %v2761_v31 = vld [vmem:[%s3331_s1 + $0xd8] sm:$0xff] (!%p192_p3)  }
   0xe   : > { %s3339_s18 = smov (!%p236_p4, %s2103_s18), 63  ;;  %v2762_v34 = vld [vmem:[%s3331_s1 + $0x98] sm:$0xff]   ;;  %v2782_v35 = vld [vmem:[%s3331_s1 + $0x108] sm:$0xff]   ;;  %v2769_v37 = vld [vmem:[%s3331_s1 + $0xe0] sm:$0xff]  }
   0xf   : > { %s2701_s4 = smul.u32 20, %s3339_s18  ;;  %v2770_v39 = vld [vmem:[%s3331_s1 + $0xa0] sm:$0xff]   ;;  %v2771_v40 = vld [vmem:[%s3331_s1 + $0xe8] sm:$0xff]   ;;  %v2779_v46 = vld [vmem:[%s3331_s1 + $0xf0] sm:$0xff]   ;;  %s2106_s27 = sshll.u32 %s3339_s18, 2 }
  0x10   : > { %2406 = vmatpush3.bf16.msra.mxu0 %v2731_v5  ;;  %2695 = vmatpush3.bf16.msra.mxu1 %v2731_v5  ;;  %v2772_v43 = vld [vmem:[%s3331_s1 + $0xa8] sm:$0xff]   ;;  %v2802_v47 = vld [vmem:[%s3331_s1 + $0x110] sm:$0xff]   ;;  %v2781_v49 = vld [vmem:[%s3331_s1 + $0xf8] sm:$0xff]   ;;  %s3235_s30 = scalar_lea.vmem %s3333_s3, %s2106_s27 }
  0x11   : > { %2407 = vmatprep.subr.bf16.mxu0 %v2732_v6  ;;  %2688 = vmatprep.subr.bf16.mxu1 %v2732_v6  ;;  %s2969_s11 = scalar_lea.vmem %s3330_s0, %s2701_s4  ;;  %v2780_v48 = vld [vmem:[%s3331_s1 + $0xb0] sm:$0xff]   ;;  %v2783_v52 = vld [vmem:[%s3331_s1 + $0xb8] sm:$0xff]  }
  0x12   : > { %v2744_v11 = vld [vmem:[%s2969_s11 + $0x4] ss:$20 sps:$4 sm:$0xff]   ;;  %v2742_v20 = vld [vmem:[%s2969_s11] ss:$20 sps:$4 sm:$0xff]   ;;  %v2757_v27 = vld [vmem:[%s2969_s11 + $0x28] ss:$20 sps:$4 sm:$0xff]  }
  0x13   : > { %v2747_v12 = vld [vmem:[%s2969_s11 + $0x1e4] ss:$20 sps:$4 sm:$0xff]   ;;  %1201 = vmatprep.mubr.bf16.mxu0 %v2744_v11  ;;  %v2745_v21 = vld [vmem:[%s2969_s11 + $0x1e0] ss:$20 sps:$4 sm:$0xff]   ;;  %v2758_v29 = vld [vmem:[%s2969_s11 + $0x208] ss:$20 sps:$4 sm:$0xff]  }
  0x14   : > { %2408 = vmatpush3.bf16.msra.mxu0 %v2733_v7  ;;  %2696 = vmatpush3.bf16.msra.mxu1 %v2733_v7  ;;  %v2753_v24 = vld [vmem:[%s2969_s11 + $0x2c] ss:$20 sps:$4 sm:$0xff]   ;;  %v2763_v32 = vld [vmem:[%s2969_s11 + $0x54] ss:$20 sps:$4 sm:$0xff]   ;;  %v2767_v36 = vld [vmem:[%s2969_s11 + $0x50] ss:$20 sps:$4 sm:$0xff]  }
  0x15   : > { %2409 = vmatprep.subr.bf16.mxu0 %v2734_v8  ;;  %2689 = vmatprep.subr.bf16.mxu1 %v2734_v8  ;;  %v2755_v25 = vld [vmem:[%s2969_s11 + $0x20c] ss:$20 sps:$4 sm:$0xff]   ;;  %v2765_v33 = vld [vmem:[%s2969_s11 + $0x234] ss:$20 sps:$4 sm:$0xff]   ;;  %v2768_v38 = vld [vmem:[%s2969_s11 + $0x230] ss:$20 sps:$4 sm:$0xff]  }
  0x16   : > { %1297 = vmatprep.mubr.bf16.mxu1 %v2747_v12  ;;  %v2773_v41 = vld [vmem:[%s2969_s11 + $0x7c] ss:$20 sps:$4 sm:$0xff]   ;;  %v2777_v44 = vld [vmem:[%s2969_s11 + $0x78] ss:$20 sps:$4 sm:$0xff]   ;;  %v2789_v54 = vld [vmem:[%s2969_s11 + $0xa0] ss:$20 sps:$4 sm:$0xff]  }
  0x17   : > { %v2775_v42 = vld [vmem:[%s2969_s11 + $0x25c] ss:$20 sps:$4 sm:$0xff]   ;;  %v2778_v45 = vld [vmem:[%s2969_s11 + $0x258] ss:$20 sps:$4 sm:$0xff]   ;;  %v2792_v57 = vld [vmem:[%s2969_s11 + $0x34] ss:$20 sps:$4 sm:$0xff]  }
  0x18   : > { %2410 = vmatpush3.bf16.msra.mxu0 %v2735_v9  ;;  %2697 = vmatpush3.bf16.msra.mxu1 %v2735_v9  ;;  %v2784_v50 = vld [vmem:[%s2969_s11 + $0xa4] ss:$20 sps:$4 sm:$0xff]   ;;  %v2788_v51 = vld [vmem:[%s2969_s11 + $0xc] ss:$20 sps:$4 sm:$0xff]   ;;  %v2786_v53 = vld [vmem:[%s2969_s11 + $0x8] ss:$20 sps:$4 sm:$0xff]  }
  0x19   : > { %2411 = vmatprep.subr.bf16.mxu0 %v2736_v10  ;;  %2690 = vmatprep.subr.bf16.mxu1 %v2736_v10  ;;  %v2790_v55 = vld [vmem:[%s2969_s11 + $0xcc] ss:$20 sps:$4 sm:$0xff]   ;;  %v2821_v56 = vld [vmem:[%s3331_s1 + $0x118] sm:$0xff]   ;;  %v2795_v59 = vld [vmem:[%s2969_s11 + $0x30] ss:$20 sps:$4 sm:$0xff]  }
  0x1a   : > { %v2794_v58 = vld [vmem:[%s2969_s11 + $0xc8] ss:$20 sps:$4 sm:$0xff]   ;;  %v2800_v62 = vld [vmem:[%s2969_s11 + $0xf0] ss:$20 sps:$4 sm:$0xff]   ;;  %v2801_v63 = vld [vmem:[%s2969_s11 + $0x58] ss:$20 sps:$4 sm:$0xff]  }
  0x1b   : > { %v2796_v60 = vld [vmem:[%s2969_s11 + $0xf4] ss:$20 sps:$4 sm:$0xff]   ;;  %v2798_v61 = vld [vmem:[%s2969_s11 + $0x5c] ss:$20 sps:$4 sm:$0xff]   ;;  %v2805_v1 = vld [vmem:[%s2969_s11 + $0x84] ss:$20 sps:$4 sm:$0xff]  }
  0x1c   : > { %2412 = vmatpush3.bf16.msra.mxu0 %v2737_v13  ;;  %2698 = vmatpush3.bf16.msra.mxu1 %v2737_v13  ;;  %v2803_v0 = vld [vmem:[%s2969_s11 + $0x11c] ss:$20 sps:$4 sm:$0xff]   ;;  %v2807_v2 = vld [vmem:[%s2969_s11 + $0x118] ss:$20 sps:$4 sm:$0xff]   ;;  %v2808_v3 = vld [vmem:[%s2969_s11 + $0x80] ss:$20 sps:$4 sm:$0xff]  }
  0x1d   : > { %2413 = vmatprep.subr.bf16.mxu0 %v2738_v14  ;;  %2691 = vmatprep.subr.bf16.mxu1 %v2738_v14  ;;  %v2809_v4 = vld [vmem:[%s2969_s11 + $0x144] ss:$20 sps:$4 sm:$0xff]   ;;  %v2811_v5 = vld [vmem:[%s2969_s11 + $0xac] ss:$20 sps:$4 sm:$0xff]   ;;  %v2814_v7 = vld [vmem:[%s2969_s11 + $0xa8] ss:$20 sps:$4 sm:$0xff]  }
  0x1e   : > { %v2813_v6 = vld [vmem:[%s2969_s11 + $0x140] ss:$20 sps:$4 sm:$0xff]   ;;  %v2819_v10 = vld [vmem:[%s2969_s11 + $0x168] ss:$20 sps:$4 sm:$0xff]   ;;  %v2820_v11 = vld [vmem:[%s2969_s11 + $0xd0] ss:$20 sps:$4 sm:$0xff]  }
  0x1f   : > { %v2815_v8 = vld [vmem:[%s2969_s11 + $0x16c] ss:$20 sps:$4 sm:$0xff]   ;;  %v2817_v9 = vld [vmem:[%s2969_s11 + $0xd4] ss:$20 sps:$4 sm:$0xff]   ;;  %v2824_v13 = vld [vmem:[%s2969_s11 + $0xfc] ss:$20 sps:$4 sm:$0xff]  }
  0x20   : > { %2414 = vmatpush3.bf16.msra.mxu0 %v2739_v15  ;;  %2699 = vmatpush3.bf16.msra.mxu1 %v2739_v15  ;;  %v2822_v12 = vld [vmem:[%s2969_s11 + $0x194] ss:$20 sps:$4 sm:$0xff]   ;;  %v2826_v14 = vld [vmem:[%s2969_s11 + $0x190] ss:$20 sps:$4 sm:$0xff]   ;;  %v2827_v15 = vld [vmem:[%s2969_s11 + $0xf8] ss:$20 sps:$4 sm:$0xff]  }
  0x21   : > { %2415 = vmatprep.subr.bf16.mxu0 %v2740_v16  ;;  %2692 = vmatprep.subr.bf16.mxu1 %v2740_v16  ;;  %v2828_v16 = vld [vmem:[%s2969_s11 + $0x1bc] ss:$20 sps:$4 sm:$0xff]  }
  0x24   : > { %2416 = vmatpush3.bf16.msra.mxu0 %v2741_v17  ;;  %2700 = vmatpush3.bf16.msra.mxu1 %v2741_v17  ;;  %v2830_v17 = vld [vmem:[%s2969_s11 + $0x124] ss:$20 sps:$4 sm:$0xff]  }
  0x25   : > { %2513 = vmatprep.subr.bf16.mxu1 %v2748_v18  ;;  %2645 = vmatprep.subr.bf16.mxu0 %v2751_v19  ;;  %v2832_v18 = vld [vmem:[%s2969_s11 + $0x1b8] ss:$20 sps:$4 sm:$0xff]  }
  0x27   : > { %1202 = vmatmul.mubr.bf16.vlgmr.msra.gmra.mrb[0].mxu0 %v2742_v20  ;;  %1298 = vmatmul.mubr.bf16.vlgmr.msra.gmra.mrb[0].mxu1 %v2745_v21  ;;  %v2834_v20 = vld [vmem:[%s2969_s11 + $0x14c] ss:$20 sps:$4 sm:$0xff]   ;;  %v2836_v21 = vld [vmem:[%s2969_s11 + $0x10] ss:$20 sps:$4 sm:$0xff]  }
  0x28   : > { %2514 = vmatpush3.bf16.msra.mxu1 %v2749_v22  ;;  %2646 = vmatpush3.bf16.msra.mxu0 %v2751_v19  ;;  %v2833_v19 = vld [vmem:[%s2969_s11 + $0x120] ss:$20 sps:$4 sm:$0xff]   ;;  %v2837_v22 = vld [vmem:[%s2969_s11 + $0x148] ss:$20 sps:$4 sm:$0xff]  }
  0x29   : > { %2515 = vmatprep.subr.bf16.mxu1 %v2750_v23  ;;  %1209 = vmatprep.mubr.bf16.mxu0 %v2753_v24  ;;  %v2838_v23 = vld [vmem:[%s2969_s11 + $0x38] ss:$20 sps:$4 sm:$0xff]   ;;  %v2839_v24 = vld [vmem:[%s2969_s11 + $0x174] ss:$20 sps:$4 sm:$0xff]  }
  0x2a   : > { %1305 = vmatprep.mubr.bf16.mxu1 %v2755_v25  ;;  %2647 = vmatprep.subr.bf16.mxu0 %v2782_v35  ;;  %v2841_v25 = vld [vmem:[%s2969_s11 + $0x60] ss:$20 sps:$4 sm:$0xff]  }
  0x2c   : > { %2516 = vmatpush3.bf16.msra.mxu1 %v2752_v26  ;;  %2648 = vmatpush3.bf16.msra.mxu0 %v2782_v35  ;;  %v2842_v26 = vld [vmem:[%s2969_s11 + $0x170] ss:$20 sps:$4 sm:$0xff]   ;;  %v2853_v35 = vld [vmem:[%s2969_s11 + $0x128] ss:$20 sps:$4 sm:$0xff]  }
  0x2d   : > { %2517 = vmatprep.subr.bf16.mxu1 %v2759_v28  ;;  %2649 = vmatprep.subr.bf16.mxu0 %v2802_v47  ;;  %v2844_v28 = vld [vmem:[%s2969_s11 + $0x19c] ss:$20 sps:$4 sm:$0xff]  }
  0x2f   : > { %1210 = vmatmul.mubr.bf16.gmra.mrb[4].mxu0 %v2757_v27  ;;  %1306 = vmatmul.mubr.bf16.gmra.mrb[4].mxu1 %v2758_v29  ;;  %v2843_v27 = vld [vmem:[%s2969_s11 + $0x88] ss:$20 sps:$4 sm:$0xff]   ;;  %v2846_v29 = vld [vmem:[%s2969_s11 + $0xb0] ss:$20 sps:$4 sm:$0xff]  }
  0x30   : > { %2518 = vmatpush3.bf16.msra.mxu1 %v2760_v30  ;;  %1217 = vmatprep.mubr.bf16.mxu0 %v2763_v32  ;;  %v2847_v30 = vld [vmem:[%s2969_s11 + $0x198] ss:$20 sps:$4 sm:$0xff]  }
  0x31   : > { %2519 = vmatprep.subr.bf16.mxu1 %v2761_v31  ;;  %1313 = vmatprep.mubr.bf16.mxu1 %v2765_v33  ;;  %v2848_v31 = vld [vmem:[%s2969_s11 + $0xd8] ss:$20 sps:$4 sm:$0xff]   ;;  %v2851_v33 = vld [vmem:[%s2969_s11 + $0x100] ss:$20 sps:$4 sm:$0xff]  }
  0x32   : > { %2650 = vmatpush3.bf16.msra.mxu0 %v2802_v47  ;;  %v2849_v32 = vld [vmem:[%s2969_s11 + $0x1c4] ss:$20 sps:$4 sm:$0xff]  }
  0x33   : > { %2651 = vmatprep.subr.bf16.mxu0 %v2821_v56  ;;  %v2868_v47 = vld [vmem:[%s2969_s11 + $0x218] ss:$20 sps:$4 sm:$0xff]  }
  0x34   : > { %2520 = vmatpush3.bf16.msra.mxu1 %v2762_v34  ;;  %v2852_v34 = vld [vmem:[%s2969_s11 + $0x1c0] ss:$20 sps:$4 sm:$0xff]  }
  0x35   : > { %2521 = vmatprep.subr.bf16.mxu1 %v2769_v37  ;;  %v2856_v37 = vld [vmem:[%s2969_s11 + $0x150] ss:$20 sps:$4 sm:$0xff]  }
  0x36   : > { %2652 = vmatpush3.bf16.msra.mxu0 %v2821_v56 }
  0x37   : > { %1218 = vmatmul.mubr.bf16.gmra.mrb[8].mxu0 %v2767_v36  ;;  %1314 = vmatmul.mubr.bf16.gmra.mrb[8].mxu1 %v2768_v38  ;;  %v2854_v36 = vld [vmem:[%s2969_s11 + $0x1ec] ss:$20 sps:$4 sm:$0xff]   ;;  %v2857_v38 = vld [vmem:[%s2969_s11 + $0x1e8] ss:$20 sps:$4 sm:$0xff]  }
  0x38   : > { %2522 = vmatpush3.bf16.msra.mxu1 %v2770_v39  ;;  %1225 = vmatprep.mubr.bf16.mxu0 %v2773_v41  ;;  %v2858_v39 = vld [vmem:[%s2969_s11 + $0x178] ss:$20 sps:$4 sm:$0xff]   ;;  %v2861_v41 = vld [vmem:[%s2969_s11 + $0x1a0] ss:$20 sps:$4 sm:$0xff]  }
  0x39   : > { %2523 = vmatprep.subr.bf16.mxu1 %v2771_v40  ;;  %1321 = vmatprep.mubr.bf16.mxu1 %v2775_v42  ;;  %v2859_v40 = vld [vmem:[%s2969_s11 + $0x214] ss:$20 sps:$4 sm:$0xff]   ;;  %v2862_v42 = vld [vmem:[%s2969_s11 + $0x210] ss:$20 sps:$4 sm:$0xff]  }
  0x3c   : > { %2524 = vmatpush3.bf16.msra.mxu1 %v2772_v43  ;;  %v2863_v43 = vld [vmem:[%s2969_s11 + $0x1c8] ss:$20 sps:$4 sm:$0xff]  }
  0x3d   : > { %2525 = vmatprep.subr.bf16.mxu1 %v2779_v46  ;;  %v2867_v46 = vld [vmem:[%s2969_s11 + $0x238] ss:$20 sps:$4 sm:$0xff]  }
  0x3f   : > { %1226 = vmatmul.mubr.bf16.gmra.mrb[12].mxu0 %v2777_v44  ;;  %1322 = vmatmul.mubr.bf16.gmra.mrb[12].mxu1 %v2778_v45  ;;  %v2864_v44 = vld [vmem:[%s2969_s11 + $0x23c] ss:$20 sps:$4 sm:$0xff]  }
  0x40   : > { %2526 = vmatpush3.bf16.msra.mxu1 %v2780_v48  ;;  %1233 = vmatprep.mubr.bf16.mxu0 %v2784_v50  ;;  %v2866_v45 = vld [vmem:[%s2969_s11 + $0x1f0] ss:$20 sps:$4 sm:$0xff]   ;;  %v2872_v50 = vld [vmem:[%s2969_s11 + $0x260] ss:$20 sps:$4 sm:$0xff]  }
  0x41   : > { %2527 = vmatprep.subr.bf16.mxu1 %v2781_v49  ;;  %1362 = vmatprep.mubr.bf16.mxu1 %v2788_v51  ;;  %v2869_v48 = vld [vmem:[%s2969_s11 + $0x264] ss:$20 sps:$4 sm:$0xff]   ;;  %v2871_v49 = vld [vmem:[%s2969_s11 + $0x240] ss:$20 sps:$4 sm:$0xff]   ;;  %v2873_v51 = vld [vmem:[%s2969_s11 + $0x268] ss:$20 sps:$4 sm:$0xff]  }
  0x44   : > { %2528 = vmatpush3.bf16.msra.mxu1 %v2783_v52 }
  0x47   : > { %1234 = vmatmul.mubr.bf16.gmra.mrb[16].mxu0 %v2789_v54  ;;  %1363 = vmatmul.mubr.bf16.vlgmr.msra.gmra.mrb[16].mxu1 %v2786_v53 }
  0x48   : > { %1241 = vmatprep.mubr.bf16.mxu0 %v2790_v55  ;;  %1370 = vmatprep.mubr.bf16.mxu1 %v2792_v57 }
  0x4f   : > { %1242 = vmatmul.mubr.bf16.gmra.mrb[20].mxu0 %v2794_v58  ;;  %1371 = vmatmul.mubr.bf16.gmra.mrb[20].mxu1 %v2795_v59 }
  0x50   : > { %1249 = vmatprep.mubr.bf16.mxu0 %v2796_v60  ;;  %1378 = vmatprep.mubr.bf16.mxu1 %v2798_v61 }
  0x57   : > { %1250 = vmatmul.mubr.bf16.gmra.mrb[24].mxu0 %v2800_v62  ;;  %1379 = vmatmul.mubr.bf16.gmra.mrb[24].mxu1 %v2801_v63 }
  0x58   : > { %1257 = vmatprep.mubr.bf16.mxu0 %v2803_v0  ;;  %1386 = vmatprep.mubr.bf16.mxu1 %v2805_v1 }
  0x5f   : > { %1258 = vmatmul.mubr.bf16.gmra.mrb[28].mxu0 %v2807_v2  ;;  %1387 = vmatmul.mubr.bf16.gmra.mrb[28].mxu1 %v2808_v3 }
  0x60   : > { %1265 = vmatprep.mubr.bf16.mxu0 %v2809_v4  ;;  %1394 = vmatprep.mubr.bf16.mxu1 %v2811_v5 }
  0x67   : > { %1266 = vmatmul.mubr.bf16.gmra.mrb[32].mxu0 %v2813_v6  ;;  %1395 = vmatmul.mubr.bf16.gmra.mrb[32].mxu1 %v2814_v7 }
  0x68   : > { %1273 = vmatprep.mubr.bf16.mxu0 %v2815_v8  ;;  %1402 = vmatprep.mubr.bf16.mxu1 %v2817_v9 }
  0x6f   : > { %1274 = vmatmul.mubr.bf16.gmra.mrb[36].mxu0 %v2819_v10  ;;  %1403 = vmatmul.mubr.bf16.gmra.mrb[36].mxu1 %v2820_v11 }
  0x70   : > { %1281 = vmatprep.mubr.bf16.mxu0 %v2822_v12  ;;  %1410 = vmatprep.mubr.bf16.mxu1 %v2824_v13 }
  0x77   : > { %1282 = vmatmul.mubr.bf16.gmra.mrb[40].mxu0 %v2826_v14  ;;  %1411 = vmatmul.mubr.bf16.gmra.mrb[40].mxu1 %v2827_v15 }
  0x78   : > { %1289 = vmatprep.mubr.bf16.mxu0 %v2828_v16  ;;  %1418 = vmatprep.mubr.bf16.mxu1 %v2830_v17 }
  0x7f   : > { %1290 = vmatmul.mubr.bf16.gmra.mrb[44].mxu0 %v2832_v18  ;;  %1419 = vmatmul.mubr.bf16.gmra.mrb[44].mxu1 %v2833_v19 }
  0x80   : > { %1426 = vmatprep.mubr.bf16.mxu1 %v2834_v20  ;;  %2653 = vmatprep.mubr.msk.bf16.mxu0 %vm1120_vm0, %v2836_v21 }
  0x87   : > { %1427 = vmatmul.mubr.bf16.gmra.mrb[48].mxu1 %v2837_v22  ;;  %2654 = vmatmul.mubr.msk.bf16.vlgmr.msra.gmra.mrb[48].mxu0 %vm1120_vm0, %v2838_v23 }
  0x88   : > { %1434 = vmatprep.mubr.bf16.mxu1 %v2839_v24  ;;  %2657 = vmatprep.mubr.msk.bf16.mxu0 %vm1120_vm0, %v2841_v25 }
  0x8f   : > { %1435 = vmatmul.mubr.bf16.gmra.mrb[52].mxu1 %v2842_v26  ;;  %2658 = vmatmul.mubr.msk.bf16.gmra.mrb[52].mxu0 %vm1120_vm0, %v2843_v27 }
  0x90   : > { %1442 = vmatprep.mubr.bf16.mxu1 %v2844_v28  ;;  %2661 = vmatprep.mubr.msk.bf16.mxu0 %vm1120_vm0, %v2846_v29 }
  0x97   : > { %1443 = vmatmul.mubr.bf16.gmra.mrb[56].mxu1 %v2847_v30  ;;  %2662 = vmatmul.mubr.msk.bf16.gmra.mrb[56].mxu0 %vm1120_vm0, %v2848_v31 }
  0x98   : > { %1450 = vmatprep.mubr.bf16.mxu1 %v2849_v32  ;;  %2665 = vmatprep.mubr.msk.bf16.mxu0 %vm1120_vm0, %v2851_v33 }
  0x9f   : > { %1451 = vmatmul.mubr.bf16.gmra.mrb[60].mxu1 %v2852_v34  ;;  %2666 = vmatmul.mubr.msk.bf16.gmra.mrb[60].mxu0 %vm1120_vm0, %v2853_v35 }
  0xa0   : > { %1458 = vmatprep.mubr.bf16.mxu1 %v2854_v36  ;;  %2669 = vmatprep.mubr.msk.bf16.mxu0 %vm1120_vm0, %v2856_v37 }
  0xa7   : > { %1459 = vmatmul.mubr.bf16.gmra.mrb[64].mxu1 %v2857_v38  ;;  %2670 = vmatmul.mubr.msk.bf16.gmra.mrb[64].mxu0 %vm1120_vm0, %v2858_v39 }
  0xa8   : > { %1466 = vmatprep.mubr.bf16.mxu1 %v2859_v40  ;;  %2673 = vmatprep.mubr.msk.bf16.mxu0 %vm1120_vm0, %v2861_v41 }
  0xaf   : > { %1467 = vmatmul.mubr.bf16.gmra.mrb[68].mxu1 %v2862_v42  ;;  %2674 = vmatmul.mubr.msk.bf16.gmra.mrb[68].mxu0 %vm1120_vm0, %v2863_v43 }
  0xb0   : > { %1474 = vmatprep.mubr.bf16.mxu1 %v2864_v44  ;;  %2677 = vmatprep.mubr.msk.bf16.mxu0 %vm1120_vm0, %v2866_v45 }
  0xb7   : > { %1475 = vmatmul.mubr.bf16.gmra.mrb[72].mxu1 %v2867_v46  ;;  %2678 = vmatmul.mubr.msk.bf16.gmra.mrb[72].mxu0 %vm1120_vm0, %v2868_v47 }
  0xb8   : > { %1482 = vmatprep.mubr.bf16.mxu1 %v2869_v48  ;;  %2681 = vmatprep.mubr.msk.bf16.mxu0 %vm1120_vm0, %v2871_v49 }
  0xbf   : > { %1483 = vmatmul.mubr.bf16.gmra.mrb[76].mxu1 %v2872_v50  ;;  %2682 = vmatmul.mubr.msk.bf16.gmra.mrb[76].mxu0 %vm1120_vm0, %v2873_v51 }
  0xfa   : > { %v2489_v52 = vpop.f32.mrb[0].mxu1  ;;  %v2417_v53 = vpop.f32.mrb[0].mxu0 }
  0xfb   : > { %v2490_v54 = vpop.f32.mrb[1].mxu1  ;;  %v2418_v55 = vpop.f32.mrb[1].mxu0 }
  0xfc   : > { %v3148_v56 = vadd.f32 %v2490_v54, %v2489_v52  ;;  %v2492_v57 = vpop.f32.mrb[2].mxu1  ;;  %v2419_v58 = vadd.f32 %v2418_v55, %v2417_v53  ;;  %v2420_v59 = vpop.f32.mrb[2].mxu0 }
  0xfd   : > { %v2493_v60 = vpop.f32.mrb[3].mxu1  ;;  %v2421_v61 = vpop.f32.mrb[3].mxu0 }
  0xfe   : > { %v3150_v62 = vadd.f32 %v2493_v60, %v2492_v57  ;;  %v2422_v63 = vadd.f32 %v2421_v61, %v2420_v59 }
 0x102   : > { %v2495_v0 = vpop.f32.mrb[4].mxu1  ;;  %v2423_v1 = vpop.f32.mrb[4].mxu0 }
 0x103   : > { %v2496_v2 = vpop.f32.mrb[5].mxu1  ;;  %v2424_v3 = vpop.f32.mrb[5].mxu0 }
 0x104   : > { %v3152_v4 = vadd.f32 %v2496_v2, %v2495_v0  ;;  %v2498_v5 = vpop.f32.mrb[6].mxu1  ;;  %v2425_v6 = vadd.f32 %v2424_v3, %v2423_v1  ;;  %v2426_v7 = vpop.f32.mrb[6].mxu0 }
 0x105   : > { %v2499_v8 = vpop.f32.mrb[7].mxu1  ;;  %v2427_v9 = vpop.f32.mrb[7].mxu0 }
 0x106   : > { %v3154_v10 = vadd.f32 %v2499_v8, %v2498_v5  ;;  %v2428_v11 = vadd.f32 %v2427_v9, %v2426_v7 }
 0x10a   : > { %v2501_v12 = vpop.f32.mrb[8].mxu1  ;;  %v2429_v13 = vpop.f32.mrb[8].mxu0 }
 0x10b   : > { %v2502_v14 = vpop.f32.mrb[9].mxu1  ;;  %v2430_v15 = vpop.f32.mrb[9].mxu0 }
 0x10c   : > { %v3156_v16 = vadd.f32 %v2502_v14, %v2501_v12  ;;  %v2504_v17 = vpop.f32.mrb[10].mxu1  ;;  %v2431_v18 = vadd.f32 %v2430_v15, %v2429_v13  ;;  %v2432_v19 = vpop.f32.mrb[10].mxu0 }
 0x10d   : > { %v2505_v20 = vpop.f32.mrb[11].mxu1  ;;  %v2433_v21 = vpop.f32.mrb[11].mxu0 }
 0x10e   : > { %v3158_v22 = vadd.f32 %v2505_v20, %v2504_v17  ;;  %v2434_v23 = vadd.f32 %v2433_v21, %v2432_v19 }
 0x112   : > { %v2507_v24 = vpop.f32.mrb[12].mxu1  ;;  %v2435_v25 = vpop.f32.mrb[12].mxu0 }
 0x113   : > { %v2508_v26 = vpop.f32.mrb[13].mxu1  ;;  %v2436_v27 = vpop.f32.mrb[13].mxu0 }
 0x114   : > { %v3160_v28 = vadd.f32 %v2508_v26, %v2507_v24  ;;  %v2510_v29 = vpop.f32.mrb[14].mxu1  ;;  %v2437_v30 = vadd.f32 %v2436_v27, %v2435_v25  ;;  %v2438_v31 = vpop.f32.mrb[14].mxu0 }
 0x115   : > { %v2511_v32 = vpop.f32.mrb[15].mxu1  ;;  %v2439_v33 = vpop.f32.mrb[15].mxu0 }
 0x116   : > { %v3162_v34 = vadd.f32 %v2511_v32, %v2510_v29  ;;  %v2440_v35 = vadd.f32 %v2439_v33, %v2438_v31 }
 0x11a   : > { %v2529_v36 = vpop.f32.mrb[16].mxu1  ;;  %v2441_v37 = vpop.f32.mrb[16].mxu0 }
 0x11b   : > { %v2530_v38 = vpop.f32.mrb[17].mxu1  ;;  %v2442_v39 = vpop.f32.mrb[17].mxu0 }
 0x11c   : > { %v2531_v40 = vadd.f32 %v2530_v38, %v2529_v36  ;;  %v2532_v41 = vpop.f32.mrb[18].mxu1  ;;  %v2443_v42 = vadd.f32 %v2442_v39, %v2441_v37  ;;  %v2444_v43 = vpop.f32.mrb[18].mxu0 }
 0x11d   : > { %v2533_v44 = vpop.f32.mrb[19].mxu1  ;;  %v2445_v45 = vpop.f32.mrb[19].mxu0 }
 0x11e   : > { %v2534_v46 = vadd.f32 %v2533_v44, %v2532_v41  ;;  %v2446_v47 = vadd.f32 %v2445_v45, %v2444_v43  ;;  %v3164_v48 = vadd.f32 %v2531_v40, %v2419_v58 }
 0x120   : > { %v3166_v49 = vadd.f32 %v2534_v46, %v2422_v63 }
 0x122   : > { %v2535_v50 = vpop.f32.mrb[20].mxu1  ;;  %v2447_v51 = vpop.f32.mrb[20].mxu0 }
 0x123   : > { %v2536_v52 = vpop.f32.mrb[21].mxu1  ;;  %v2448_v53 = vpop.f32.mrb[21].mxu0 }
 0x124   : > { %v2537_v54 = vadd.f32 %v2536_v52, %v2535_v50  ;;  %v2538_v55 = vpop.f32.mrb[22].mxu1  ;;  %v2449_v57 = vadd.f32 %v2448_v53, %v2447_v51  ;;  %v2450_v59 = vpop.f32.mrb[22].mxu0 }
 0x125   : > { %v2539_v60 = vpop.f32.mrb[23].mxu1  ;;  %v2451_v61 = vpop.f32.mrb[23].mxu0 }
 0x126   : > { %v2540_v0 = vadd.f32 %v2539_v60, %v2538_v55  ;;  %v2452_v1 = vadd.f32 %v2451_v61, %v2450_v59  ;;  %v3168_v2 = vadd.f32 %v2537_v54, %v2425_v6 }
 0x128   : > { %v3170_v3 = vadd.f32 %v2540_v0, %v2428_v11 }
 0x12a   : > { %v2541_v58 = vpop.f32.mrb[24].mxu1  ;;  %v2453_v5 = vpop.f32.mrb[24].mxu0 }
 0x12b   : > { %v2542_v63 = vpop.f32.mrb[25].mxu1  ;;  %v2454_v7 = vpop.f32.mrb[25].mxu0 }
 0x12c   : > { %v2543_v8 = vadd.f32 %v2542_v63, %v2541_v58  ;;  %v2544_v9 = vpop.f32.mrb[26].mxu1  ;;  %v2455_v12 = vadd.f32 %v2454_v7, %v2453_v5  ;;  %v2456_v13 = vpop.f32.mrb[26].mxu0 }
 0x12d   : > { %v2545_v14 = vpop.f32.mrb[27].mxu1  ;;  %v2457_v15 = vpop.f32.mrb[27].mxu0 }
 0x12e   : > { %v2546_v17 = vadd.f32 %v2545_v14, %v2544_v9  ;;  %v2458_v19 = vadd.f32 %v2457_v15, %v2456_v13  ;;  %v3172_v20 = vadd.f32 %v2543_v8, %v2431_v18 }
 0x130   : > { %v3174_v21 = vadd.f32 %v2546_v17, %v2434_v23 }
 0x132   : > { %v2547_v6 = vpop.f32.mrb[28].mxu1  ;;  %v2459_v24 = vpop.f32.mrb[28].mxu0 }
 0x133   : > { %v2548_v11 = vpop.f32.mrb[29].mxu1  ;;  %v2460_v25 = vpop.f32.mrb[29].mxu0 }
 0x134   : > { %v2549_v26 = vadd.f32 %v2548_v11, %v2547_v6  ;;  %v2550_v27 = vpop.f32.mrb[30].mxu1  ;;  %v2461_v29 = vadd.f32 %v2460_v25, %v2459_v24  ;;  %v2462_v31 = vpop.f32.mrb[30].mxu0 }
 0x135   : > { %v2551_v32 = vpop.f32.mrb[31].mxu1  ;;  %v2463_v33 = vpop.f32.mrb[31].mxu0 }
 0x136   : > { %v2552_v36 = vadd.f32 %v2551_v32, %v2550_v27  ;;  %v2464_v37 = vadd.f32 %v2463_v33, %v2462_v31  ;;  %v3176_v38 = vadd.f32 %v2549_v26, %v2437_v30 }
 0x138   : > { %v3178_v39 = vadd.f32 %v2552_v36, %v2440_v35 }
 0x13a   : > { %v2553_v18 = vpop.f32.mrb[32].mxu1  ;;  %v2465_v40 = vpop.f32.mrb[32].mxu0 }
 0x13b   : > { %v2554_v23 = vpop.f32.mrb[33].mxu1  ;;  %v2466_v41 = vpop.f32.mrb[33].mxu0 }
 0x13c   : > { %v2555_v43 = vadd.f32 %v2554_v23, %v2553_v18  ;;  %v2556_v44 = vpop.f32.mrb[34].mxu1  ;;  %v3180_v45 = vadd.f32 %v2466_v41, %v2465_v40  ;;  %v2468_v46 = vpop.f32.mrb[34].mxu0 }
 0x13d   : > { %v2557_v50 = vpop.f32.mrb[35].mxu1  ;;  %v2469_v51 = vpop.f32.mrb[35].mxu0 }
 0x13e   : > { %v2558_v52 = vadd.f32 %v2557_v50, %v2556_v44  ;;  %v3182_v53 = vadd.f32 %v2469_v51, %v2468_v46  ;;  %v3184_v54 = vadd.f32 %v2555_v43, %v2443_v42 }
 0x140   : > { %v3186_v30 = vadd.f32 %v2558_v52, %v2446_v47 }
 0x142   : > { %v2559_v35 = vpop.f32.mrb[36].mxu1  ;;  %v2471_v55 = vpop.f32.mrb[36].mxu0 }
 0x143   : > { %v2560_v59 = vpop.f32.mrb[37].mxu1  ;;  %v2472_v60 = vpop.f32.mrb[37].mxu0 }
 0x144   : > { %v2561_v61 = vadd.f32 %v2560_v59, %v2559_v35  ;;  %v2562_v0 = vpop.f32.mrb[38].mxu1  ;;  %v3188_v58 = vadd.f32 %v2472_v60, %v2471_v55  ;;  %v2474_v5 = vpop.f32.mrb[38].mxu0  ;;  %v3215_v59 = vld [vmem:[%s3332_s2] ss:$0 sm:$0xff] }
 0x145   : > { %v2563_v63 = vpop.f32.mrb[39].mxu1  ;;  %v2475_v7 = vpop.f32.mrb[39].mxu0 }
 0x146   : > { %v2564_v8 = vadd.f32 %v2563_v63, %v2562_v0  ;;  %v3190_v9 = vadd.f32 %v2475_v7, %v2474_v5  ;;  %v3192_v13 = vadd.f32 %v2561_v61, %v2449_v57 }
 0x148   : > { %v3194_v42 = vadd.f32 %v2564_v8, %v2452_v1 }
 0x14a   : > { %v2565_v47 = vpop.f32.mrb[40].mxu1  ;;  %v2477_v14 = vpop.f32.mrb[40].mxu0 }
 0x14b   : > { %v2566_v15 = vpop.f32.mrb[41].mxu1  ;;  %v2478_v17 = vpop.f32.mrb[41].mxu0 }
 0x14c   : > { %v2567_v6 = vadd.f32 %v2566_v15, %v2565_v47  ;;  %v2568_v24 = vpop.f32.mrb[42].mxu1  ;;  %v3196_v11 = vadd.f32 %v2478_v17, %v2477_v14  ;;  %v2480_v25 = vpop.f32.mrb[42].mxu0 }
 0x14d   : > { %v2569_v26 = vpop.f32.mrb[43].mxu1  ;;  %v2481_v27 = vpop.f32.mrb[43].mxu0 }
 0x14e   : > { %v2570_v31 = vadd.f32 %v2569_v26, %v2568_v24  ;;  %v3198_v32 = vadd.f32 %v2481_v27, %v2480_v25  ;;  %v3200_v33 = vadd.f32 %v2567_v6, %v2455_v12 }
 0x150   : > { %v3202_v57 = vadd.f32 %v2570_v31, %v2458_v19 }
 0x152   : > { %v2571_v1 = vpop.f32.mrb[44].mxu1  ;;  %v2483_v36 = vpop.f32.mrb[44].mxu0 }
 0x153   : > { %v2572_v18 = vpop.f32.mrb[45].mxu1  ;;  %v2484_v40 = vpop.f32.mrb[45].mxu0 }
 0x154   : > { %v2573_v23 = vadd.f32 %v2572_v18, %v2571_v1  ;;  %v2574_v41 = vpop.f32.mrb[46].mxu1  ;;  %v3204_v43 = vadd.f32 %v2484_v40, %v2483_v36  ;;  %v2486_v44 = vpop.f32.mrb[46].mxu0 }
 0x155   : > { %v2575_v46 = vpop.f32.mrb[47].mxu1  ;;  %v2487_v50 = vpop.f32.mrb[47].mxu0 }
 0x156   : > { %v2576_v51 = vadd.f32 %v2575_v46, %v2574_v41  ;;  %v3206_v52 = vadd.f32 %v2487_v50, %v2486_v44  ;;  %v3208_v35 = vadd.f32 %v2573_v23, %v2461_v29 }
 0x158   : > { %v3210_v12 = vadd.f32 %v2576_v51, %v2464_v37 }
 0x15a   : > { %v2577_v19 = vpop.f32.mrb[48].mxu1  ;;  %v2655_v55 = vpop.f32.mrb[48].mxu0 }
 0x15b   : > { %v1534_v60 = vadd.f32 %v2655_v55, %v3168_v2  ;;  %v2578_v61 = vpop.f32.mrb[49].mxu1  ;;  %v1525_v0 = vpop.f32.mrb[49].mxu0 }
 0x15c   : > { %v2579_v5 = vadd.f32 %v2578_v61, %v2577_v19  ;;  %v1526_v63 = vadd.f32 %v1525_v0, %v3164_v48  ;;  %v2580_v7 = vpop.f32.mrb[50].mxu1  ;;  %v2656_v29 = vpop.f32.mrb[50].mxu0 }
 0x15d   : > { %v1760_v37 = vadd.f32 %v3215_v59, %v1534_v60  ;;  %v1537_v8 = vadd.f32 %v2656_v29, %v3170_v3  ;;  %v2581_v47 = vpop.f32.mrb[51].mxu1  ;;  %v1528_v14 = vpop.f32.mrb[51].mxu0 }
 0x15e   : > { %v1758_v15 = vadd.f32 %v3215_v59, %v1526_v63  ;;  %v2582_v17 = vadd.f32 %v2581_v47, %v2580_v7  ;;  %v1529_v6 = vadd.f32 %v1528_v14, %v3166_v49  ;;  %v3224_v2 = vadd.f32 %v2579_v5, %v3180_v45 }
 0x15f   : > { %v1761_v24 = vadd.f32 %v3215_v59, %v1537_v8  ;;  %v1792_v26 = vmax.f32 %v1760_v37, 0.0 }
 0x160   : > { %v1759_v48 = vadd.f32 %v3215_v59, %v1529_v6  ;;  %v3230_v25 = vadd.f32 %v2582_v17, %v3182_v53  ;;  %v1790_v27 = vmax.f32 %v1758_v15, 0.0 }
 0x161   : > { %v1793_v3 = vmax.f32 %v1761_v24, 0.0 }
 0x162   : > { %v1791_v49 = vmax.f32 %v1759_v48, 0.0  ;;  %v2583_v45 = vpop.f32.mrb[52].mxu1  ;;  %v2659_v31 = vpop.f32.mrb[52].mxu0 }
 0x163   : > { %v2314_v1 = vpack.c.bf16 %v1793_v3, %v1792_v26  ;;  %v1550_v36 = vadd.f32 %v2659_v31, %v3176_v38  ;;  %v2584_v18 = vpop.f32.mrb[53].mxu1  ;;  %v1541_v40 = vpop.f32.mrb[53].mxu0 }
 0x164   : > { %v2309_v53 = vpack.c.bf16 %v1791_v49, %v1790_v27  ;;  %v2585_v23 = vadd.f32 %v2584_v18, %v2583_v45  ;;  %v1542_v41 = vadd.f32 %v1541_v40, %v3172_v20  ;;  %v2586_v44 = vpop.f32.mrb[54].mxu1  ;;  %v2660_v46 = vpop.f32.mrb[54].mxu0 }
 0x165   : > { %2386 = vst [vmem:[%s3235_s30 + $0x8] sm:$0xff] %v2314_v1   ;;  %v1764_v50 = vadd.f32 %v3215_v59, %v1550_v36  ;;  %v1553_v51 = vadd.f32 %v2660_v46, %v3178_v39  ;;  %v2587_v19 = vpop.f32.mrb[55].mxu1  ;;  %v1544_v55 = vpop.f32.mrb[55].mxu0 }
 0x166   : > { %2310 = vst [vmem:[%s3235_s30] sm:$0xff] %v2309_v53   ;;  %v1762_v60 = vadd.f32 %v3215_v59, %v1542_v41  ;;  %v2588_v61 = vadd.f32 %v2587_v19, %v2586_v44  ;;  %v1545_v38 = vadd.f32 %v1544_v55, %v3174_v21  ;;  %v3246_v0 = vadd.f32 %v2585_v23, %v3188_v58 }
 0x167   : > { %v1765_v20 = vadd.f32 %v3215_v59, %v1553_v51  ;;  %v1796_v39 = vmax.f32 %v1764_v50, 0.0 }
 0x168   : > { %v1763_v5 = vadd.f32 %v3215_v59, %v1545_v38  ;;  %v3251_v63 = vadd.f32 %v2588_v61, %v3190_v9  ;;  %v1794_v29 = vmax.f32 %v1762_v60, 0.0 }
 0x169   : > { %v1797_v7 = vmax.f32 %v1765_v20, 0.0 }
 0x16a   : > { %v1795_v37 = vmax.f32 %v1763_v5, 0.0  ;;  %v2589_v8 = vpop.f32.mrb[56].mxu1  ;;  %v2663_v47 = vpop.f32.mrb[56].mxu0 }
 0x16b   : > { %v2324_v14 = vpack.c.bf16 %v1797_v7, %v1796_v39  ;;  %v1566_v21 = vadd.f32 %v2663_v47, %v3192_v13  ;;  %v2590_v58 = vpop.f32.mrb[57].mxu1  ;;  %v1557_v15 = vpop.f32.mrb[57].mxu0 }
 0x16c   : > { %v2319_v17 = vpack.c.bf16 %v1795_v37, %v1794_v29  ;;  %v2591_v6 = vadd.f32 %v2590_v58, %v2589_v8  ;;  %v1558_v24 = vadd.f32 %v1557_v15, %v3184_v54  ;;  %v2592_v48 = vpop.f32.mrb[58].mxu1  ;;  %v2664_v9 = vpop.f32.mrb[58].mxu0 }
 0x16d   : > { %2388 = vst [vmem:[%s3235_s30 + $0x18] sm:$0xff] %v2324_v14   ;;  %v1768_v26 = vadd.f32 %v3215_v59, %v1566_v21  ;;  %v1569_v3 = vadd.f32 %v2664_v9, %v3194_v42  ;;  %v2593_v27 = vpop.f32.mrb[59].mxu1  ;;  %v1560_v49 = vpop.f32.mrb[59].mxu0 }
 0x16e   : > { %2387 = vst [vmem:[%s3235_s30 + $0x10] sm:$0xff] %v2319_v17   ;;  %v1766_v45 = vadd.f32 %v3215_v59, %v1558_v24  ;;  %v2594_v31 = vadd.f32 %v2593_v27, %v2592_v48  ;;  %v1561_v13 = vadd.f32 %v1560_v49, %v3186_v30  ;;  %v3262_v1 = vadd.f32 %v2591_v6, %v3196_v11 }
 0x16f   : > { %v1769_v54 = vadd.f32 %v3215_v59, %v1569_v3  ;;  %v1800_v42 = vmax.f32 %v1768_v26, 0.0 }
 0x170   : > { %v1767_v36 = vadd.f32 %v3215_v59, %v1561_v13  ;;  %v3267_v18 = vadd.f32 %v2594_v31, %v3198_v32  ;;  %v1798_v53 = vmax.f32 %v1766_v45, 0.0 }
 0x171   : > { %v1801_v40 = vmax.f32 %v1769_v54, 0.0 }
 0x172   : > { %v1799_v23 = vmax.f32 %v1767_v36, 0.0  ;;  %v2595_v41 = vpop.f32.mrb[60].mxu1  ;;  %v2667_v44 = vpop.f32.mrb[60].mxu0 }
 0x173   : > { %v2334_v46 = vpack.c.bf16 %v1801_v40, %v1800_v42  ;;  %v1582_v30 = vadd.f32 %v2667_v44, %v3208_v35  ;;  %v2596_v11 = vpop.f32.mrb[61].mxu1  ;;  %v1573_v50 = vpop.f32.mrb[61].mxu0 }
 0x174   : > { %v2329_v51 = vpack.c.bf16 %v1799_v23, %v1798_v53  ;;  %v2597_v19 = vadd.f32 %v2596_v11, %v2595_v41  ;;  %v1574_v55 = vadd.f32 %v1573_v50, %v3200_v33  ;;  %v2598_v60 = vpop.f32.mrb[62].mxu1  ;;  %v2668_v32 = vpop.f32.mrb[62].mxu0 }
 0x175   : > { %2390 = vst [vmem:[%s3235_s30 + $0x28] sm:$0xff] %v2334_v46   ;;  %v1772_v61 = vadd.f32 %v3215_v59, %v1582_v30  ;;  %v1585_v38 = vadd.f32 %v2668_v32, %v3210_v12  ;;  %v2599_v20 = vpop.f32.mrb[63].mxu1  ;;  %v1576_v5 = vpop.f32.mrb[63].mxu0 }
 0x176   : > { %2389 = vst [vmem:[%s3235_s30 + $0x20] sm:$0xff] %v2329_v51   ;;  %v1770_v39 = vadd.f32 %v3215_v59, %v1574_v55  ;;  %v2600_v7 = vadd.f32 %v2599_v20, %v2598_v60  ;;  %v1577_v35 = vadd.f32 %v1576_v5, %v3202_v57  ;;  %v1453_v29 = vadd.f32 %v2597_v19, %v3204_v43 }
 0x177   : > { %v1773_v37 = vadd.f32 %v3215_v59, %v1585_v38  ;;  %v1804_v47 = vmax.f32 %v1772_v61, 0.0 }
 0x178   : > { %v1771_v33 = vadd.f32 %v3215_v59, %v1577_v35  ;;  %v1456_v8 = vadd.f32 %v2600_v7, %v3206_v52  ;;  %v1802_v12 = vmax.f32 %v1770_v39, 0.0 }
 0x179   : > { %v1805_v14 = vmax.f32 %v1773_v37, 0.0 }
 0x17a   : > { %v1803_v21 = vmax.f32 %v1771_v33, 0.0  ;;  %v2601_v58 = vpop.f32.mrb[64].mxu1  ;;  %v2671_v15 = vpop.f32.mrb[64].mxu0 }
 0x17b   : > { %v2344_v17 = vpack.c.bf16 %v1805_v14, %v1804_v47  ;;  %v1598_v6 = vadd.f32 %v2671_v15, %v3246_v0  ;;  %v2602_v57 = vpop.f32.mrb[65].mxu1  ;;  %v1589_v24 = vpop.f32.mrb[65].mxu0 }
 0x17c   : > { %v2339_v43 = vpack.c.bf16 %v1803_v21, %v1802_v12  ;;  %v2603_v48 = vadd.f32 %v2602_v57, %v2601_v58  ;;  %v1590_v9 = vadd.f32 %v1589_v24, %v3224_v2  ;;  %v2604_v26 = vpop.f32.mrb[66].mxu1  ;;  %v2672_v3 = vpop.f32.mrb[66].mxu0 }
 0x17d   : > { %2392 = vst [vmem:[%s3235_s30 + $0x38] sm:$0xff] %v2344_v17   ;;  %v1776_v52 = vadd.f32 %v3215_v59, %v1598_v6  ;;  %v1601_v27 = vadd.f32 %v2672_v3, %v3251_v63  ;;  %v2605_v49 = vpop.f32.mrb[67].mxu1  ;;  %v1592_v45 = vpop.f32.mrb[67].mxu0 }
 0x17e   : > { %2391 = vst [vmem:[%s3235_s30 + $0x30] sm:$0xff] %v2339_v43   ;;  %v1774_v31 = vadd.f32 %v3215_v59, %v1590_v9  ;;  %v2606_v13 = vadd.f32 %v2605_v49, %v2604_v26  ;;  %v1593_v0 = vadd.f32 %v1592_v45, %v3230_v25  ;;  %v1461_v54 = vadd.f32 %v2603_v48, %v3148_v56 }
 0x17f   : > { %v1777_v36 = vadd.f32 %v3215_v59, %v1601_v27  ;;  %v1808_v40 = vmax.f32 %v1776_v52, 0.0 }
 0x180   : > { %v1775_v2 = vadd.f32 %v3215_v59, %v1593_v0  ;;  %v1464_v42 = vadd.f32 %v2606_v13, %v3150_v62  ;;  %v1806_v63 = vmax.f32 %v1774_v31, 0.0 }
 0x181   : > { %v1809_v53 = vmax.f32 %v1777_v36, 0.0 }
 0x182   : > { %v1807_v23 = vmax.f32 %v1775_v2, 0.0  ;;  %v2607_v41 = vpop.f32.mrb[68].mxu1  ;;  %v2675_v44 = vpop.f32.mrb[68].mxu0 }
 0x183   : > { %v2354_v46 = vpack.c.bf16 %v1809_v53, %v1808_v40  ;;  %v1614_v30 = vadd.f32 %v2675_v44, %v1453_v29  ;;  %v2608_v11 = vpop.f32.mrb[69].mxu1  ;;  %v1605_v25 = vpop.f32.mrb[69].mxu0 }
 0x184   : > { %v2349_v50 = vpack.c.bf16 %v1807_v23, %v1806_v63  ;;  %v2609_v56 = vadd.f32 %v2608_v11, %v2607_v41  ;;  %v1606_v51 = vadd.f32 %v1605_v25, %v3262_v1  ;;  %v2610_v19 = vpop.f32.mrb[70].mxu1  ;;  %v2676_v55 = vpop.f32.mrb[70].mxu0 }
 0x185   : > { %2394 = vst [vmem:[%s3235_s30 + $0x48] sm:$0xff] %v2354_v46   ;;  %v1780_v62 = vadd.f32 %v3215_v59, %v1614_v30  ;;  %v1617_v60 = vadd.f32 %v2676_v55, %v1456_v8  ;;  %v2611_v32 = vpop.f32.mrb[71].mxu1  ;;  %v1608_v61 = vpop.f32.mrb[71].mxu0 }
 0x186   : > { %2393 = vst [vmem:[%s3235_s30 + $0x40] sm:$0xff] %v2349_v50   ;;  %v1778_v38 = vadd.f32 %v3215_v59, %v1606_v51  ;;  %v2612_v20 = vadd.f32 %v2611_v32, %v2610_v19  ;;  %v1609_v5 = vadd.f32 %v1608_v61, %v3267_v18  ;;  %v1469_v39 = vadd.f32 %v2609_v56, %v3152_v4 }
 0x187   : > { %v1781_v7 = vadd.f32 %v3215_v59, %v1617_v60  ;;  %v1812_v29 = vmax.f32 %v1780_v62, 0.0 }
 0x188   : > { %v1779_v1 = vadd.f32 %v3215_v59, %v1609_v5  ;;  %v1472_v35 = vadd.f32 %v2612_v20, %v3154_v10  ;;  %v1810_v33 = vmax.f32 %v1778_v38, 0.0 }
 0x189   : > { %v1813_v37 = vmax.f32 %v1781_v7, 0.0 }
 0x18a   : > { %v1811_v8 = vmax.f32 %v1779_v1, 0.0  ;;  %v2613_v47 = vpop.f32.mrb[72].mxu1  ;;  %v2679_v14 = vpop.f32.mrb[72].mxu0 }
 0x18b   : > { %v2364_v12 = vpack.c.bf16 %v1813_v37, %v1812_v29  ;;  %v1630_v21 = vadd.f32 %v2679_v14, %v1469_v39  ;;  %v2614_v58 = vpop.f32.mrb[73].mxu1  ;;  %v1621_v18 = vpop.f32.mrb[73].mxu0 }
 0x18c   : > { %v2359_v15 = vpack.c.bf16 %v1811_v8, %v1810_v33  ;;  %v2615_v4 = vadd.f32 %v2614_v58, %v2613_v47  ;;  %v1622_v17 = vadd.f32 %v1621_v18, %v1461_v54  ;;  %v2616_v6 = vpop.f32.mrb[74].mxu1  ;;  %v2680_v57 = vpop.f32.mrb[74].mxu0 }
 0x18d   : > { %2396 = vst [vmem:[%s3235_s30 + $0x58] sm:$0xff] %v2364_v12   ;;  %v1784_v10 = vadd.f32 %v3215_v59, %v1630_v21  ;;  %v1633_v24 = vadd.f32 %v2680_v57, %v1472_v35  ;;  %v2617_v43 = vpop.f32.mrb[75].mxu1  ;;  %v1624_v48 = vpop.f32.mrb[75].mxu0 }
 0x18e   : > { %2395 = vst [vmem:[%s3235_s30 + $0x50] sm:$0xff] %v2359_v15   ;;  %v1782_v9 = vadd.f32 %v3215_v59, %v1622_v17  ;;  %v2618_v26 = vadd.f32 %v2617_v43, %v2616_v6  ;;  %v1625_v3 = vadd.f32 %v1624_v48, %v1464_v42  ;;  %v1477_v52 = vadd.f32 %v2615_v4, %v3156_v16 }
 0x18f   : > { %v1785_v27 = vadd.f32 %v3215_v59, %v1633_v24  ;;  %v1816_v31 = vmax.f32 %v1784_v10, 0.0 }
 0x190   : > { %v1783_v49 = vadd.f32 %v3215_v59, %v1625_v3  ;;  %v1480_v45 = vadd.f32 %v2618_v26, %v3158_v22  ;;  %v1814_v0 = vmax.f32 %v1782_v9, 0.0 }
 0x191   : > { %v1817_v13 = vmax.f32 %v1785_v27, 0.0 }
 0x192   : > { %v1815_v54 = vmax.f32 %v1783_v49, 0.0  ;;  %v2619_v36 = vpop.f32.mrb[76].mxu1  ;;  %v2683_v2 = vpop.f32.mrb[76].mxu0 }
 0x193   : > { %v2374_v40 = vpack.c.bf16 %v1817_v13, %v1816_v31  ;;  %v2620_v53 = vpop.f32.mrb[77].mxu1  ;;  %v1637_v63 = vpop.f32.mrb[77].mxu0 }
 0x194   : > { %v2369_v42 = vpack.c.bf16 %v1815_v54, %v1814_v0  ;;  %v2621_v23 = vadd.f32 %v2620_v53, %v2619_v36  ;;  %v1638_v16 = vadd.f32 %v1637_v63, %v1477_v52  ;;  %v2622_v41 = vpop.f32.mrb[78].mxu1  ;;  %v2684_v44 = vpop.f32.mrb[78].mxu0 }
 0x195   : > { %2398 = vst [vmem:[%s3235_s30 + $0x68] sm:$0xff] %v2374_v40   ;;  %v2623_v46 = vpop.f32.mrb[79].mxu1  ;;  %v1640_v30 = vpop.f32.mrb[79].mxu0 }
 0x196   : > { %2397 = vst [vmem:[%s3235_s30 + $0x60] sm:$0xff] %v2369_v42   ;;  %v1485_v22 = vadd.f32 %v2621_v23, %v3160_v28  ;;  %v1786_v11 = vadd.f32 %v3215_v59, %v1638_v16  ;;  %v2624_v25 = vadd.f32 %v2623_v46, %v2622_v41  ;;  %v1641_v50 = vadd.f32 %v1640_v30, %v1480_v45 }
 0x198   : > { %v1646_v56 = vadd.f32 %v2683_v2, %v1485_v22  ;;  %v1488_v51 = vadd.f32 %v2624_v25, %v3162_v34  ;;  %v1787_v19 = vadd.f32 %v3215_v59, %v1641_v50  ;;  %v1818_v62 = vmax.f32 %v1786_v11, 0.0 }
 0x19a   : > { %v1788_v55 = vadd.f32 %v3215_v59, %v1646_v56  ;;  %v1649_v60 = vadd.f32 %v2684_v44, %v1488_v51  ;;  %v1819_v32 = vmax.f32 %v1787_v19, 0.0 }
 0x19c   : > { %v1789_v61 = vadd.f32 %v3215_v59, %v1649_v60  ;;  %v2379_v38 = vpack.c.bf16 %v1819_v32, %v1818_v62  ;;  %v1820_v20 = vmax.f32 %v1788_v55, 0.0 }
 0x19e   : > { %v1821_v28 = vmax.f32 %v1789_v61, 0.0  ;;  %2399 = vst [vmem:[%s3235_s30 + $0x70] sm:$0xff] %v2379_v38  }
 0x1a0   : > { %v2384_v5 = vpack.c.bf16 %v1821_v28, %v1820_v20 }
 0x1a2   : > { %2400 = vst [vmem:[%s3235_s30 + $0x78] sm:$0xff] %v2384_v5  }
 0x1a3 PF: > { %s13_s14 = sadd.s32 1, %s2896_s14   ;;  %s3334_s12 = smov %s2892_s13 }
 0x1a4   : > { %p10_p5 = scmp.ge.s32.totalorder %s13_s14, 4   ;;  %s3335_s13 = smov %s3337_s15 }
 0x1a6   :  { %12 = sbr.rel (!%p10_p5) target bundleno = 2 (0x2), region = 76 }

// kernel: encoder_forward.17
= control target key start
LH: loop header
LB: loop body
LE: loop exit
PB: predicated region body
PF: predicated region fallthrough
CT: control target
= control target key end

     0   :  { %s358_s6 = smov 0   ;;  %s360_s7 = smov 0   ;;  %s409_s0 = inlined_call_operand.vmem [shape: bf16[2,16,8,256], index: 0, kind: input, shape index: {}]   ;;  %s410_s1 = inlined_call_operand.vmem [shape: bf16[2,8,8,128], index: 1, kind: output, shape index: {}]  }
   0x1   :  { %s362_s8 = smov 0   ;;  %s364_s9 = smov 0  }
   0x2   :  { %s366_s10 = smov 0  }
   0x3 LB: > { %s20_s11 = sadd.s32 1, %s338_s8  ;;  %s23_s12 = sadd.s32 1, %s342_s9  ;;  %s346_s10 = sphi %s366_s10, %s11_s10   ;;  %s342_s9 = sphi %s364_s9, %s414_s9   ;;  %s338_s8 = sphi %s362_s8, %s413_s8   ;;  %s334_s7 = sphi %s360_s7, %s412_s7   ;;  %s330_s6 = sphi %s358_s6, %s411_s6  }
   0x4   : > { %p21_p0 = scmp.ge.s32.totalorder %s20_s11, 8  ;;  %p258_p1 = scmp.ge.s32.totalorder %s346_s10, 1 }
   0x5   : > { %p109_p2 = scmp.lt.s32.totalorder %s346_s10, 17 }
   0x6   : > { %s416_s11 = smov (%p21_p0, %s20_s11), 0  ;;  %s418_s12 = smov (!%p21_p0, %s23_s12), %s342_s9 }
   0x7   : > { %p110_p3 = pnand %p258_p1, %p109_p2  ;;  %p25_p4 = scmp.ge.s32.totalorder %s418_s12, 2 }
   0x8   : > { %s259_s13 = sshll.u32 (!%p110_p3), %s330_s6, 1  ;;  %p138_p5 = scmp.lt.s32.totalorder (!%p110_p3), %s334_s7, 1 }
   0x9   : > { %s420_s12 = smov (%p25_p4, %s418_s12), 0  ;;  %113 = sbr.rel (%p110_p3) target bundleno = 29 (0x1d), region = 24 }
   0xa   : > { %p140_p6 = scmp.lt.s32.totalorder (!%p110_p3), %s259_s13, 15  ;;  %p150_p7 = scmp.lt.s32.totalorder (!%p110_p3), %s330_s6, 7 }
  0x10   : > { %s422_s7 = smov (!%p138_p5, %s334_s7), 1  ;;  %s424_s13 = smov (!%p140_p6, %s259_s13), 15 }
  0x11   : > { %s261_s14 = sshll.u32 %s422_s7, 5  ;;  %s260_s15 = sshll.u32 %s424_s13, 1 }
  0x12   : > { %s144_s16 = sadd.s32 %s261_s14, %s260_s15  ;;  %s263_s21 = sshll.u32 %s422_s7, 3 }
  0x13   : > { %s262_s17 = sshll.u32 %s144_s16, 2  ;;  %s426_s6 = smov (!%p150_p7, %s330_s6), 7 }
  0x14   : > { %s146_s20 = scalar_lea.vmem %s409_s0, %s262_s17  ;;  %s153_s22 = sadd.s32 %s263_s21, %s426_s6 }
  0x15   : > { %v156_v0 = vld [vmem:[%s146_s20] sm:$0xff]  ;;  %v265_v1 = vld [vmem:[%s146_s20 + $0x8] sm:$0xff]  ;;  %s264_s23 = sshll.u32 %s153_s22, 2 }
  0x16   : > { %v159_v2 = vmax.bf16 %v265_v1, %v156_v0  ;;  %s155_s26 = scalar_lea.vmem %s410_s1, %s264_s23 }
  0x18   : > { %v161_v3 = vrot.slane %v159_v2, 4 }
  0x1a   : > { %v163_v4 = vmax.bf16 %v161_v3, %v159_v2 }
  0x1c   : > { %164 = vst [vmem:[%s155_s26] sm:$0xf] %v163_v4 }
  0x1d PF: > { %s11_s10 = sadd.s32 1, %s346_s10   ;;  %s411_s6 = smov %s338_s8 }
  0x1e   : > { %p8_p8 = scmp.ge.s32.totalorder %s11_s10, 18   ;;  %s412_s7 = smov %s342_s9 }
  0x1f   : > { %s413_s8 = smov %s416_s11  ;;  %s414_s9 = smov %s420_s12 }
  0x20   :  { %10 = sbr.rel (!%p8_p8) target bundleno = 3 (0x3), region = 55 }

// kernel: encoder_forward.16
= control target key start
LH: loop header
LB: loop body
LE: loop exit
PB: predicated region body
PF: predicated region fallthrough
CT: control target
= control target key end

     0   :  { %s4331_s12 = smov 0   ;;  %s4333_s13 = smov 0   ;;  %s5124_s0 = inlined_call_operand.vmem [shape: bf16[512,1152], index: 0, kind: input, shape index: {}]   ;;  %s5125_s1 = inlined_call_operand.vmem [shape: bf16[1152,128], index: 1, kind: input, shape index: {}]   ;;  %s5126_s2 = inlined_call_operand.vmem [shape: f32[1,128], index: 2, kind: input, shape index: {}]   ;;  %s5127_s3 = inlined_call_operand.vmem [shape: bf16[512,128], index: 3, kind: output, shape index: {}]  }
   0x1   :  { %s4335_s14 = smov 0  }
   0x2 LB: > { %s32_s15 = sadd.s32 1, %s4305_s13  ;;  %p3063_p0 = scmp.ge.s32.totalorder %s4309_s14, 1  ;;  %s4309_s14 = sphi %s4335_s14, %s13_s14   ;;  %s4305_s13 = sphi %s4333_s13, %s5129_s13   ;;  %s4301_s12 = sphi %s4331_s12, %s5128_s12  }
   0x3   : > { %p34_p1 = scmp.ge.s32.totalorder %s32_s15, 2  ;;  %p191_p2 = scmp.lt.s32.totalorder %s4309_s14, 3 }
   0x5   : > { %s5131_s15 = smov (%p34_p1, %s32_s15), 0  ;;  %p192_p3 = pnand %p3063_p0, %p191_p2 }
   0x6   : > { %v4007_v0 = vld [vmem:[%s5125_s1 + $0x40] sm:$0xff] (!%p192_p3)   ;;  %s3064_s18 = sshll.u32 (!%p192_p3), %s4301_s12, 5  ;;  %v4009_v2 = vld [vmem:[%s5125_s1 + $0x48] sm:$0xff] (!%p192_p3)   ;;  %v4011_v4 = vld [vmem:[%s5125_s1 + $0x50] sm:$0xff] (!%p192_p3)  }
   0x7   : > { %195 = sbr.rel (%p192_p3) target bundleno = 547 (0x223), region = 32  ;;  %v4008_v1 = vld [vmem:[%s5125_s1] sm:$0xff] (!%p192_p3)   ;;  %3446 = vmatprep.subr.bf16.mxu0 (!%p192_p3), %v4007_v0  ;;  %3966 = vmatprep.subr.bf16.mxu1 (!%p192_p3), %v4007_v0  ;;  %p236_p4 = scmp.lt.s32.totalorder (!%p192_p3), %s3064_s18, 63  ;;  %v4010_v3 = vld [vmem:[%s5125_s1 + $0x8] sm:$0xff] (!%p192_p3)   ;;  %v4012_v5 = vld [vmem:[%s5125_s1 + $0x10] sm:$0xff] (!%p192_p3)  }
   0x8   : > { %3447 = vmatpush3.bf16.msra.mxu0 (!%p192_p3), %v4008_v1  ;;  %3974 = vmatpush3.bf16.msra.mxu1 (!%p192_p3), %v4008_v1  ;;  %v4013_v6 = vld [vmem:[%s5125_s1 + $0x58] sm:$0xff] (!%p192_p3)   ;;  %v4015_v8 = vld [vmem:[%s5125_s1 + $0x60] sm:$0xff] (!%p192_p3)   ;;  %v4017_v10 = vld [vmem:[%s5125_s1 + $0x68] sm:$0xff] (!%p192_p3)  }
   0x9   : > { %3448 = vmatprep.subr.bf16.mxu0 (!%p192_p3), %v4009_v2  ;;  %3967 = vmatprep.subr.bf16.mxu1 (!%p192_p3), %v4009_v2  ;;  %v4014_v7 = vld [vmem:[%s5125_s1 + $0x18] sm:$0xff] (!%p192_p3)   ;;  %v4016_v9 = vld [vmem:[%s5125_s1 + $0x20] sm:$0xff] (!%p192_p3)   ;;  %v4018_v13 = vld [vmem:[%s5125_s1 + $0x28] sm:$0xff] (!%p192_p3)  }
   0xa   : > { %v4019_v14 = vld [vmem:[%s5125_s1 + $0x70] sm:$0xff] (!%p192_p3)   ;;  %v4021_v16 = vld [vmem:[%s5125_s1 + $0x78] sm:$0xff] (!%p192_p3)   ;;  %v4029_v18 = vld [vmem:[%s5125_s1 + $0xc0] sm:$0xff] (!%p192_p3)  }
   0xb   : > { %v4020_v15 = vld [vmem:[%s5125_s1 + $0x30] sm:$0xff] (!%p192_p3)   ;;  %v4022_v17 = vld [vmem:[%s5125_s1 + $0x38] sm:$0xff] (!%p192_p3)   ;;  %v4032_v21 = vld [vmem:[%s5125_s1 + $0x140] sm:$0xff] (!%p192_p3)  }
   0xc   : > { %3449 = vmatpush3.bf16.msra.mxu0 (!%p192_p3), %v4010_v3  ;;  %3975 = vmatpush3.bf16.msra.mxu1 (!%p192_p3), %v4010_v3  ;;  %v4030_v22 = vld [vmem:[%s5125_s1 + $0x80] sm:$0xff] (!%p192_p3)   ;;  %v4031_v23 = vld [vmem:[%s5125_s1 + $0xc8] sm:$0xff] (!%p192_p3)   ;;  %v4041_v31 = vld [vmem:[%s5125_s1 + $0xd0] sm:$0xff] (!%p192_p3)  }
   0xd   : > { %3450 = vmatprep.subr.bf16.mxu0 (!%p192_p3), %v4011_v4  ;;  %3968 = vmatprep.subr.bf16.mxu1 (!%p192_p3), %v4011_v4  ;;  %v4034_v24 = vld [vmem:[%s5125_s1 + $0x100] sm:$0xff] (!%p192_p3)   ;;  %v4033_v27 = vld [vmem:[%s5125_s1 + $0x88] sm:$0xff] (!%p192_p3)   ;;  %v4042_v32 = vld [vmem:[%s5125_s1 + $0x90] sm:$0xff] (!%p192_p3)  }
   0xe   : > { %s5133_s18 = smov (!%p236_p4, %s3064_s18), 63  ;;  %v4052_v28 = vld [vmem:[%s5125_s1 + $0x148] sm:$0xff]   ;;  %v4043_v34 = vld [vmem:[%s5125_s1 + $0xd8] sm:$0xff]   ;;  %v4051_v40 = vld [vmem:[%s5125_s1 + $0xe0] sm:$0xff]  }
   0xf   : > { %s3982_s4 = smul.u32 36, %s5133_s18  ;;  %v4054_v33 = vld [vmem:[%s5125_s1 + $0x108] sm:$0xff]   ;;  %v4044_v37 = vld [vmem:[%s5125_s1 + $0x98] sm:$0xff]   ;;  %v4053_v41 = vld [vmem:[%s5125_s1 + $0xa0] sm:$0xff]   ;;  %s3067_s6 = sshll.u32 %s5133_s18, 2 }
  0x10   : > { %3451 = vmatpush3.bf16.msra.mxu0 %v4012_v5  ;;  %3976 = vmatpush3.bf16.msra.mxu1 %v4012_v5  ;;  %v4055_v42 = vld [vmem:[%s5125_s1 + $0xe8] sm:$0xff]   ;;  %v4066_v43 = vld [vmem:[%s5125_s1 + $0x150] sm:$0xff]   ;;  %v4065_v52 = vld [vmem:[%s5125_s1 + $0xf8] sm:$0xff]   ;;  %s5029_s9 = scalar_lea.vmem %s5127_s3, %s3067_s6 }
  0x11   : > { %3452 = vmatprep.subr.bf16.mxu0 %v4013_v6  ;;  %3969 = vmatprep.subr.bf16.mxu1 %v4013_v6  ;;  %s4382_s11 = scalar_lea.vmem %s5124_s0, %s3982_s4  ;;  %v4068_v46 = vld [vmem:[%s5125_s1 + $0x110] sm:$0xff]   ;;  %v4056_v47 = vld [vmem:[%s5125_s1 + $0xa8] sm:$0xff]   ;;  %v4083_v55 = vld [vmem:[%s5125_s1 + $0x158] sm:$0xff]  }
  0x12   : > { %v4025_v11 = vld [vmem:[%s4382_s11 + $0x4] ss:$36 sps:$4 sm:$0xff]   ;;  %v4035_v25 = vld [vmem:[%s4382_s11 + $0x4c] ss:$36 sps:$4 sm:$0xff]   ;;  %v4045_v35 = vld [vmem:[%s4382_s11 + $0x94] ss:$36 sps:$4 sm:$0xff]  }
  0x13   : > { %v4028_v12 = vld [vmem:[%s4382_s11 + $0x364] ss:$36 sps:$4 sm:$0xff]   ;;  %1840 = vmatprep.mubr.bf16.mxu0 %v4025_v11  ;;  %v4037_v26 = vld [vmem:[%s4382_s11 + $0x3ac] ss:$36 sps:$4 sm:$0xff]   ;;  %v4047_v36 = vld [vmem:[%s4382_s11 + $0x3f4] ss:$36 sps:$4 sm:$0xff]  }
  0x14   : > { %3453 = vmatpush3.bf16.msra.mxu0 %v4014_v7  ;;  %3977 = vmatpush3.bf16.msra.mxu1 %v4014_v7  ;;  %v4023_v19 = vld [vmem:[%s4382_s11] ss:$36 sps:$4 sm:$0xff]   ;;  %v4039_v29 = vld [vmem:[%s4382_s11 + $0x48] ss:$36 sps:$4 sm:$0xff]   ;;  %v4049_v38 = vld [vmem:[%s4382_s11 + $0x90] ss:$36 sps:$4 sm:$0xff]  }
  0x15   : > { %3454 = vmatprep.subr.bf16.mxu0 %v4015_v8  ;;  %3970 = vmatprep.subr.bf16.mxu1 %v4015_v8  ;;  %v4026_v20 = vld [vmem:[%s4382_s11 + $0x360] ss:$36 sps:$4 sm:$0xff]   ;;  %v4040_v30 = vld [vmem:[%s4382_s11 + $0x3a8] ss:$36 sps:$4 sm:$0xff]   ;;  %v4050_v39 = vld [vmem:[%s4382_s11 + $0x3f0] ss:$36 sps:$4 sm:$0xff]  }
  0x16   : > { %1936 = vmatprep.mubr.bf16.mxu1 %v4028_v12  ;;  %v4057_v44 = vld [vmem:[%s4382_s11 + $0xdc] ss:$36 sps:$4 sm:$0xff]   ;;  %v4063_v48 = vld [vmem:[%s5125_s1 + $0xf0] sm:$0xff]   ;;  %v4069_v53 = vld [vmem:[%s4382_s11 + $0x124] ss:$36 sps:$4 sm:$0xff]  }
  0x17   : > { %v4059_v45 = vld [vmem:[%s4382_s11 + $0x43c] ss:$36 sps:$4 sm:$0xff]   ;;  %v4064_v51 = vld [vmem:[%s5125_s1 + $0xb0] sm:$0xff]   ;;  %v4071_v58 = vld [vmem:[%s4382_s11 + $0x8] ss:$36 sps:$4 sm:$0xff]  }
  0x18   : > { %3455 = vmatpush3.bf16.msra.mxu0 %v4016_v9  ;;  %3978 = vmatpush3.bf16.msra.mxu1 %v4016_v9  ;;  %v4061_v49 = vld [vmem:[%s4382_s11 + $0xd8] ss:$36 sps:$4 sm:$0xff]   ;;  %v4073_v54 = vld [vmem:[%s4382_s11 + $0xc] ss:$36 sps:$4 sm:$0xff]   ;;  %v4074_v59 = vld [vmem:[%s4382_s11 + $0x120] ss:$36 sps:$4 sm:$0xff]  }
  0x19   : > { %3456 = vmatprep.subr.bf16.mxu0 %v4017_v10  ;;  %3971 = vmatprep.subr.bf16.mxu1 %v4017_v10  ;;  %v4062_v50 = vld [vmem:[%s4382_s11 + $0x438] ss:$36 sps:$4 sm:$0xff]   ;;  %v4075_v60 = vld [vmem:[%s5125_s1 + $0x1c0] sm:$0xff]   ;;  %v4077_v62 = vld [vmem:[%s4382_s11 + $0x16c] ss:$36 sps:$4 sm:$0xff]  }
  0x1a   : > { %v4084_v56 = vld [vmem:[%s5125_s1 + $0x118] sm:$0xff]   ;;  %v4076_v61 = vld [vmem:[%s5125_s1 + $0x180] sm:$0xff]   ;;  %v4091_v1 = vld [vmem:[%s5125_s1 + $0x1c8] sm:$0xff]  }
  0x1b   : > { %v4067_v57 = vld [vmem:[%s5125_s1 + $0xb8] sm:$0xff]   ;;  %v4093_v0 = vld [vmem:[%s5125_s1 + $0x160] sm:$0xff]   ;;  %v4092_v3 = vld [vmem:[%s5125_s1 + $0x188] sm:$0xff]  }
  0x1c   : > { %3457 = vmatpush3.bf16.msra.mxu0 %v4018_v13  ;;  %3979 = vmatpush3.bf16.msra.mxu1 %v4018_v13  ;;  %v4079_v63 = vld [vmem:[%s4382_s11 + $0x54] ss:$36 sps:$4 sm:$0xff]   ;;  %v4094_v2 = vld [vmem:[%s5125_s1 + $0x120] sm:$0xff]   ;;  %v4081_v4 = vld [vmem:[%s4382_s11 + $0x168] ss:$36 sps:$4 sm:$0xff]  }
  0x1d   : > { %3458 = vmatprep.subr.bf16.mxu0 %v4019_v14  ;;  %3972 = vmatprep.subr.bf16.mxu1 %v4019_v14  ;;  %v4082_v5 = vld [vmem:[%s4382_s11 + $0x50] ss:$36 sps:$4 sm:$0xff]   ;;  %v4087_v7 = vld [vmem:[%s4382_s11 + $0x9c] ss:$36 sps:$4 sm:$0xff]   ;;  %v4107_v8 = vld [vmem:[%s5125_s1 + $0x168] sm:$0xff]  }
  0x1e   : > { %v4085_v6 = vld [vmem:[%s4382_s11 + $0x1b4] ss:$36 sps:$4 sm:$0xff]   ;;  %v4109_v10 = vld [vmem:[%s5125_s1 + $0x128] sm:$0xff]   ;;  %v4095_v14 = vld [vmem:[%s4382_s11 + $0x1fc] ss:$36 sps:$4 sm:$0xff]  }
  0x1f   : > { %v4108_v9 = vld [vmem:[%s5125_s1 + $0x1d0] sm:$0xff]   ;;  %v4090_v13 = vld [vmem:[%s4382_s11 + $0x98] ss:$36 sps:$4 sm:$0xff]  }
  0x20   : > { %3459 = vmatpush3.bf16.msra.mxu0 %v4020_v15  ;;  %3980 = vmatpush3.bf16.msra.mxu1 %v4020_v15  ;;  %v4110_v11 = vld [vmem:[%s5125_s1 + $0x190] sm:$0xff]  }
  0x21   : > { %3460 = vmatprep.subr.bf16.mxu0 %v4021_v16  ;;  %3973 = vmatprep.subr.bf16.mxu1 %v4021_v16  ;;  %v4089_v12 = vld [vmem:[%s4382_s11 + $0x1b0] ss:$36 sps:$4 sm:$0xff]  }
  0x22   : > { %v4117_v15 = vld [vmem:[%s5125_s1 + $0x170] sm:$0xff]  }
  0x23   : > { %v4118_v16 = vld [vmem:[%s5125_s1 + $0x130] sm:$0xff]  }
  0x24   : > { %3461 = vmatpush3.bf16.msra.mxu0 %v4022_v17  ;;  %3981 = vmatpush3.bf16.msra.mxu1 %v4022_v17  ;;  %v4097_v17 = vld [vmem:[%s4382_s11 + $0xe4] ss:$36 sps:$4 sm:$0xff]  }
  0x25   : > { %3558 = vmatprep.subr.bf16.mxu1 %v4029_v18  ;;  %3670 = vmatprep.subr.bf16.mxu0 %v4032_v21  ;;  %v4125_v18 = vld [vmem:[%s5125_s1 + $0x1d8] sm:$0xff]   ;;  %v4100_v21 = vld [vmem:[%s4382_s11 + $0xe0] ss:$36 sps:$4 sm:$0xff]  }
  0x27   : > { %1841 = vmatmul.mubr.bf16.vlgmr.msra.gmra.mrb[0].mxu0 %v4023_v19  ;;  %1937 = vmatmul.mubr.bf16.vlgmr.msra.gmra.mrb[0].mxu1 %v4026_v20  ;;  %v4126_v19 = vld [vmem:[%s5125_s1 + $0x198] sm:$0xff]  }
  0x28   : > { %3559 = vmatpush3.bf16.msra.mxu1 %v4030_v22  ;;  %3671 = vmatpush3.bf16.msra.mxu0 %v4034_v24  ;;  %v4099_v20 = vld [vmem:[%s4382_s11 + $0x1f8] ss:$36 sps:$4 sm:$0xff]   ;;  %v4101_v22 = vld [vmem:[%s4382_s11 + $0x244] ss:$36 sps:$4 sm:$0xff]  }
  0x29   : > { %3560 = vmatprep.subr.bf16.mxu1 %v4031_v23  ;;  %1848 = vmatprep.mubr.bf16.mxu0 %v4035_v25  ;;  %v4103_v23 = vld [vmem:[%s4382_s11 + $0x12c] ss:$36 sps:$4 sm:$0xff]   ;;  %v4133_v24 = vld [vmem:[%s5125_s1 + $0x178] sm:$0xff]  }
  0x2a   : > { %1944 = vmatprep.mubr.bf16.mxu1 %v4037_v26  ;;  %3672 = vmatprep.subr.bf16.mxu0 %v4052_v28  ;;  %v4134_v25 = vld [vmem:[%s5125_s1 + $0x138] sm:$0xff]   ;;  %v4141_v26 = vld [vmem:[%s5125_s1 + $0x1e0] sm:$0xff]  }
  0x2b   : > { %v4142_v28 = vld [vmem:[%s5125_s1 + $0x1a0] sm:$0xff]  }
  0x2c   : > { %3561 = vmatpush3.bf16.msra.mxu1 %v4033_v27  ;;  %3673 = vmatpush3.bf16.msra.mxu0 %v4054_v33  ;;  %v4105_v27 = vld [vmem:[%s4382_s11 + $0x240] ss:$36 sps:$4 sm:$0xff]   ;;  %v4156_v33 = vld [vmem:[%s5125_s1 + $0x1e8] sm:$0xff]  }
  0x2d   : > { %3562 = vmatprep.subr.bf16.mxu1 %v4041_v31  ;;  %3674 = vmatprep.subr.bf16.mxu0 %v4066_v43  ;;  %v4111_v31 = vld [vmem:[%s4382_s11 + $0x28c] ss:$36 sps:$4 sm:$0xff]   ;;  %v4127_v43 = vld [vmem:[%s4382_s11 + $0x31c] ss:$36 sps:$4 sm:$0xff]  }
  0x2f   : > { %1849 = vmatmul.mubr.bf16.gmra.mrb[4].mxu0 %v4039_v29  ;;  %1945 = vmatmul.mubr.bf16.gmra.mrb[4].mxu1 %v4040_v30  ;;  %v4143_v29 = vld [vmem:[%s5125_s1 + $0x200] sm:$0xff]   ;;  %v4106_v30 = vld [vmem:[%s4382_s11 + $0x128] ss:$36 sps:$4 sm:$0xff]  }
  0x30   : > { %3563 = vmatpush3.bf16.msra.mxu1 %v4042_v32  ;;  %1856 = vmatprep.mubr.bf16.mxu0 %v4045_v35  ;;  %v4113_v32 = vld [vmem:[%s4382_s11 + $0x174] ss:$36 sps:$4 sm:$0xff]   ;;  %v4157_v35 = vld [vmem:[%s5125_s1 + $0x1a8] sm:$0xff]  }
  0x31   : > { %3564 = vmatprep.subr.bf16.mxu1 %v4043_v34  ;;  %1952 = vmatprep.mubr.bf16.mxu1 %v4047_v36  ;;  %v4115_v34 = vld [vmem:[%s4382_s11 + $0x288] ss:$36 sps:$4 sm:$0xff]   ;;  %v4116_v36 = vld [vmem:[%s4382_s11 + $0x170] ss:$36 sps:$4 sm:$0xff]  }
  0x32   : > { %3675 = vmatpush3.bf16.msra.mxu0 %v4068_v46  ;;  %v4132_v46 = vld [vmem:[%s4382_s11 + $0x200] ss:$36 sps:$4 sm:$0xff]  }
  0x33   : > { %3676 = vmatprep.subr.bf16.mxu0 %v4083_v55  ;;  %v4158_v55 = vld [vmem:[%s5125_s1 + $0x208] sm:$0xff]  }
  0x34   : > { %3565 = vmatpush3.bf16.msra.mxu1 %v4044_v37  ;;  %v4119_v37 = vld [vmem:[%s4382_s11 + $0x2d4] ss:$36 sps:$4 sm:$0xff]  }
  0x35   : > { %3566 = vmatprep.subr.bf16.mxu1 %v4051_v40  ;;  %v4124_v40 = vld [vmem:[%s4382_s11 + $0x1b8] ss:$36 sps:$4 sm:$0xff]  }
  0x36   : > { %3677 = vmatpush3.bf16.msra.mxu0 %v4084_v56  ;;  %v4173_v56 = vld [vmem:[%s5125_s1 + $0x210] sm:$0xff]  }
  0x37   : > { %1857 = vmatmul.mubr.bf16.gmra.mrb[8].mxu0 %v4049_v38  ;;  %1953 = vmatmul.mubr.bf16.gmra.mrb[8].mxu1 %v4050_v39  ;;  %v4121_v38 = vld [vmem:[%s4382_s11 + $0x1bc] ss:$36 sps:$4 sm:$0xff]   ;;  %v4123_v39 = vld [vmem:[%s4382_s11 + $0x2d0] ss:$36 sps:$4 sm:$0xff]  }
  0x38   : > { %3567 = vmatpush3.bf16.msra.mxu1 %v4053_v41  ;;  %1864 = vmatprep.mubr.bf16.mxu0 %v4057_v44  ;;  %v4171_v41 = vld [vmem:[%s5125_s1 + $0x1f0] sm:$0xff]   ;;  %v4129_v44 = vld [vmem:[%s4382_s11 + $0x204] ss:$36 sps:$4 sm:$0xff]  }
  0x39   : > { %3568 = vmatprep.subr.bf16.mxu1 %v4055_v42  ;;  %1960 = vmatprep.mubr.bf16.mxu1 %v4059_v45  ;;  %v4172_v42 = vld [vmem:[%s5125_s1 + $0x1b0] sm:$0xff]   ;;  %v4131_v45 = vld [vmem:[%s4382_s11 + $0x318] ss:$36 sps:$4 sm:$0xff]  }
  0x3a   : > { %3678 = vmatprep.subr.bf16.mxu0 %v4093_v0  ;;  %v4155_v0 = vld [vmem:[%s4382_s11 + $0xa0] ss:$36 sps:$4 sm:$0xff]  }
  0x3b   : > { %3679 = vmatpush3.bf16.msra.mxu0 %v4094_v2  ;;  %v4161_v2 = vld [vmem:[%s4382_s11 + $0xec] ss:$36 sps:$4 sm:$0xff]  }
  0x3c   : > { %3569 = vmatpush3.bf16.msra.mxu1 %v4056_v47  ;;  %3680 = vmatprep.subr.bf16.mxu0 %v4107_v8  ;;  %v4186_v47 = vld [vmem:[%s5125_s1 + $0x1f8] sm:$0xff]  }
  0x3d   : > { %3570 = vmatprep.subr.bf16.mxu1 %v4063_v48  ;;  %v4187_v48 = vld [vmem:[%s5125_s1 + $0x1b8] sm:$0xff]  }
  0x3e   : > { %v4167_v8 = vld [vmem:[%s4382_s11 + $0x134] ss:$36 sps:$4 sm:$0xff]  }
  0x3f   : > { %1865 = vmatmul.mubr.bf16.gmra.mrb[12].mxu0 %v4061_v49  ;;  %1961 = vmatmul.mubr.bf16.gmra.mrb[12].mxu1 %v4062_v50  ;;  %v4135_v49 = vld [vmem:[%s4382_s11 + $0x24c] ss:$36 sps:$4 sm:$0xff]   ;;  %v4139_v50 = vld [vmem:[%s4382_s11 + $0x14] ss:$36 sps:$4 sm:$0xff]  }
  0x40   : > { %3571 = vmatpush3.bf16.msra.mxu1 %v4064_v51  ;;  %1872 = vmatprep.mubr.bf16.mxu0 %v4069_v53  ;;  %v4137_v51 = vld [vmem:[%s4382_s11 + $0x10] ss:$36 sps:$4 sm:$0xff]  }
  0x41   : > { %3572 = vmatprep.subr.bf16.mxu1 %v4065_v52  ;;  %2001 = vmatprep.mubr.bf16.mxu1 %v4073_v54  ;;  %v4140_v52 = vld [vmem:[%s4382_s11 + $0x248] ss:$36 sps:$4 sm:$0xff]   ;;  %v4144_v53 = vld [vmem:[%s4382_s11 + $0x294] ss:$36 sps:$4 sm:$0xff]   ;;  %v4146_v54 = vld [vmem:[%s4382_s11 + $0x5c] ss:$36 sps:$4 sm:$0xff]  }
  0x42   : > { %3681 = vmatpush3.bf16.msra.mxu0 %v4109_v10  ;;  %v4169_v10 = vld [vmem:[%s4382_s11 + $0x368] ss:$36 sps:$4 sm:$0xff]  }
  0x43   : > { %3682 = vmatprep.subr.bf16.mxu0 %v4117_v15  ;;  %v4179_v15 = vld [vmem:[%s4382_s11 + $0x178] ss:$36 sps:$4 sm:$0xff]  }
  0x44   : > { %3573 = vmatpush3.bf16.msra.mxu1 %v4067_v57  ;;  %v4148_v57 = vld [vmem:[%s4382_s11 + $0x290] ss:$36 sps:$4 sm:$0xff]  }
  0x45   : > { %3782 = vmatprep.subr.bf16.mxu1 %v4075_v60  ;;  %v4152_v60 = vld [vmem:[%s4382_s11 + $0xa4] ss:$36 sps:$4 sm:$0xff]  }
  0x46   : > { %3683 = vmatpush3.bf16.msra.mxu0 %v4118_v16  ;;  %v4180_v16 = vld [vmem:[%s4382_s11 + $0x3fc] ss:$36 sps:$4 sm:$0xff]  }
  0x47   : > { %1873 = vmatmul.mubr.bf16.gmra.mrb[16].mxu0 %v4074_v59  ;;  %2002 = vmatmul.mubr.bf16.vlgmr.msra.gmra.mrb[16].mxu1 %v4071_v58  ;;  %v4149_v58 = vld [vmem:[%s4382_s11 + $0x58] ss:$36 sps:$4 sm:$0xff]  }
  0x48   : > { %3783 = vmatpush3.bf16.msra.mxu1 %v4076_v61  ;;  %1880 = vmatprep.mubr.bf16.mxu0 %v4077_v62  ;;  %v4150_v59 = vld [vmem:[%s4382_s11 + $0x2dc] ss:$36 sps:$4 sm:$0xff]  }
  0x49   : > { %2009 = vmatprep.mubr.bf16.mxu1 %v4079_v63  ;;  %3784 = vmatprep.subr.bf16.mxu1 %v4091_v1  ;;  %v4188_v61 = vld [vmem:[%s5125_s1 + $0x218] sm:$0xff]   ;;  %v4201_v62 = vld [vmem:[%s5125_s1 + $0x220] sm:$0xff]  }
  0x4a   : > { %3684 = vmatprep.subr.bf16.mxu0 %v4133_v24  ;;  %v4154_v63 = vld [vmem:[%s4382_s11 + $0x2d8] ss:$36 sps:$4 sm:$0xff]   ;;  %v4159_v1 = vld [vmem:[%s4382_s11 + $0x324] ss:$36 sps:$4 sm:$0xff]  }
  0x4b   : > { %3685 = vmatpush3.bf16.msra.mxu0 %v4134_v25  ;;  %v4195_v24 = vld [vmem:[%s4382_s11 + $0x254] ss:$36 sps:$4 sm:$0xff]   ;;  %v4199_v25 = vld [vmem:[%s4382_s11 + $0x1c] ss:$36 sps:$4 sm:$0xff]  }
  0x4c   : > { %3785 = vmatpush3.bf16.msra.mxu1 %v4092_v3  ;;  %3918 = vmatprep.subr.bf16.mxu0 %v4143_v29  ;;  %v4214_v3 = vld [vmem:[%s5125_s1 + $0x228] sm:$0xff]  }
  0x4d   : > { %3786 = vmatprep.subr.bf16.mxu1 %v4108_v9  ;;  %v4240_v9 = vld [vmem:[%s5125_s1 + $0x238] sm:$0xff]  }
  0x4f   : > { %1881 = vmatmul.mubr.bf16.gmra.mrb[20].mxu0 %v4081_v4  ;;  %2010 = vmatmul.mubr.bf16.gmra.mrb[20].mxu1 %v4082_v5  ;;  %v4163_v4 = vld [vmem:[%s4382_s11 + $0x320] ss:$36 sps:$4 sm:$0xff]   ;;  %v4164_v5 = vld [vmem:[%s4382_s11 + $0xe8] ss:$36 sps:$4 sm:$0xff]  }
  0x50   : > { %1888 = vmatprep.mubr.bf16.mxu0 %v4085_v6  ;;  %2017 = vmatprep.mubr.bf16.mxu1 %v4087_v7  ;;  %v4227_v6 = vld [vmem:[%s5125_s1 + $0x230] sm:$0xff]  }
  0x51   : > { %3787 = vmatpush3.bf16.msra.mxu1 %v4110_v11  ;;  %v4165_v7 = vld [vmem:[%s4382_s11 + $0x36c] ss:$36 sps:$4 sm:$0xff]  }
  0x52   : > { %3788 = vmatprep.subr.bf16.mxu1 %v4125_v18  ;;  %v4170_v11 = vld [vmem:[%s4382_s11 + $0x130] ss:$36 sps:$4 sm:$0xff]   ;;  %v4184_v18 = vld [vmem:[%s4382_s11 + $0x3f8] ss:$36 sps:$4 sm:$0xff]  }
  0x55   : > { %3789 = vmatpush3.bf16.msra.mxu1 %v4126_v19  ;;  %v4185_v19 = vld [vmem:[%s4382_s11 + $0x1c0] ss:$36 sps:$4 sm:$0xff]  }
  0x56   : > { %3790 = vmatprep.subr.bf16.mxu1 %v4141_v26  ;;  %v4197_v26 = vld [vmem:[%s4382_s11 + $0x18] ss:$36 sps:$4 sm:$0xff]  }
  0x57   : > { %1889 = vmatmul.mubr.bf16.gmra.mrb[24].mxu0 %v4089_v12  ;;  %2018 = vmatmul.mubr.bf16.gmra.mrb[24].mxu1 %v4090_v13  ;;  %v4174_v12 = vld [vmem:[%s4382_s11 + $0x3b4] ss:$36 sps:$4 sm:$0xff]   ;;  %v4176_v13 = vld [vmem:[%s4382_s11 + $0x17c] ss:$36 sps:$4 sm:$0xff]  }
  0x58   : > { %1896 = vmatprep.mubr.bf16.mxu0 %v4095_v14  ;;  %2025 = vmatprep.mubr.bf16.mxu1 %v4097_v17  ;;  %v4178_v14 = vld [vmem:[%s4382_s11 + $0x3b0] ss:$36 sps:$4 sm:$0xff]   ;;  %v4182_v17 = vld [vmem:[%s4382_s11 + $0x1c4] ss:$36 sps:$4 sm:$0xff]  }
  0x59   : > { %3791 = vmatpush3.bf16.msra.mxu1 %v4142_v28  ;;  %v4202_v28 = vld [vmem:[%s4382_s11 + $0x29c] ss:$36 sps:$4 sm:$0xff]  }
  0x5a   : > { %3792 = vmatprep.subr.bf16.mxu1 %v4156_v33  ;;  %v4210_v33 = vld [vmem:[%s4382_s11 + $0xac] ss:$36 sps:$4 sm:$0xff]  }
  0x5d   : > { %3793 = vmatpush3.bf16.msra.mxu1 %v4157_v35  ;;  %v4213_v35 = vld [vmem:[%s4382_s11 + $0xa8] ss:$36 sps:$4 sm:$0xff]  }
  0x5e   : > { %3794 = vmatprep.subr.bf16.mxu1 %v4171_v41  ;;  %v4223_v41 = vld [vmem:[%s4382_s11 + $0x13c] ss:$36 sps:$4 sm:$0xff]  }
  0x5f   : > { %1897 = vmatmul.mubr.bf16.gmra.mrb[28].mxu0 %v4099_v20  ;;  %2026 = vmatmul.mubr.bf16.gmra.mrb[28].mxu1 %v4100_v21  ;;  %v4189_v20 = vld [vmem:[%s4382_s11 + $0x444] ss:$36 sps:$4 sm:$0xff]   ;;  %v4191_v21 = vld [vmem:[%s4382_s11 + $0x20c] ss:$36 sps:$4 sm:$0xff]  }
  0x60   : > { %1904 = vmatprep.mubr.bf16.mxu0 %v4101_v22  ;;  %2033 = vmatprep.mubr.bf16.mxu1 %v4103_v23  ;;  %v4193_v22 = vld [vmem:[%s4382_s11 + $0x440] ss:$36 sps:$4 sm:$0xff]   ;;  %v4194_v23 = vld [vmem:[%s4382_s11 + $0x208] ss:$36 sps:$4 sm:$0xff]  }
  0x61   : > { %3795 = vmatpush3.bf16.msra.mxu1 %v4172_v42  ;;  %v4225_v42 = vld [vmem:[%s4382_s11 + $0x370] ss:$36 sps:$4 sm:$0xff]  }
  0x62   : > { %3796 = vmatprep.subr.bf16.mxu1 %v4186_v47  ;;  %v4233_v47 = vld [vmem:[%s4382_s11 + $0x180] ss:$36 sps:$4 sm:$0xff]  }
  0x65   : > { %3797 = vmatpush3.bf16.msra.mxu1 %v4187_v48  ;;  %v4234_v48 = vld [vmem:[%s4382_s11 + $0x404] ss:$36 sps:$4 sm:$0xff]  }
  0x67   : > { %1905 = vmatmul.mubr.bf16.gmra.mrb[32].mxu0 %v4105_v27  ;;  %2034 = vmatmul.mubr.bf16.gmra.mrb[32].mxu1 %v4106_v30  ;;  %v4200_v27 = vld [vmem:[%s4382_s11 + $0x250] ss:$36 sps:$4 sm:$0xff]   ;;  %v4206_v30 = vld [vmem:[%s4382_s11 + $0x298] ss:$36 sps:$4 sm:$0xff]  }
  0x68   : > { %1912 = vmatprep.mubr.bf16.mxu0 %v4111_v31  ;;  %2041 = vmatprep.mubr.bf16.mxu1 %v4113_v32  ;;  %v4207_v31 = vld [vmem:[%s4382_s11 + $0x60] ss:$36 sps:$4 sm:$0xff]  }
  0x69   : > { %v4208_v32 = vld [vmem:[%s4382_s11 + $0x2e4] ss:$36 sps:$4 sm:$0xff]  }
  0x6f   : > { %1913 = vmatmul.mubr.bf16.gmra.mrb[36].mxu0 %v4115_v34  ;;  %2042 = vmatmul.mubr.bf16.gmra.mrb[36].mxu1 %v4116_v36  ;;  %v4212_v34 = vld [vmem:[%s4382_s11 + $0x2e0] ss:$36 sps:$4 sm:$0xff]   ;;  %v4215_v36 = vld [vmem:[%s4382_s11 + $0x32c] ss:$36 sps:$4 sm:$0xff]  }
  0x70   : > { %1920 = vmatprep.mubr.bf16.mxu0 %v4119_v37  ;;  %2049 = vmatprep.mubr.bf16.mxu1 %v4121_v38  ;;  %v4217_v37 = vld [vmem:[%s4382_s11 + $0xf4] ss:$36 sps:$4 sm:$0xff]   ;;  %v4219_v38 = vld [vmem:[%s4382_s11 + $0x328] ss:$36 sps:$4 sm:$0xff]  }
  0x77   : > { %1921 = vmatmul.mubr.bf16.gmra.mrb[40].mxu0 %v4123_v39  ;;  %2050 = vmatmul.mubr.bf16.gmra.mrb[40].mxu1 %v4124_v40  ;;  %v4220_v39 = vld [vmem:[%s4382_s11 + $0xf0] ss:$36 sps:$4 sm:$0xff]  }
  0x78   : > { %1928 = vmatprep.mubr.bf16.mxu0 %v4127_v43  ;;  %2057 = vmatprep.mubr.bf16.mxu1 %v4129_v44  ;;  %v4221_v40 = vld [vmem:[%s4382_s11 + $0x374] ss:$36 sps:$4 sm:$0xff]   ;;  %v4228_v44 = vld [vmem:[%s4382_s11 + $0x3bc] ss:$36 sps:$4 sm:$0xff]  }
  0x79   : > { %v4226_v43 = vld [vmem:[%s4382_s11 + $0x138] ss:$36 sps:$4 sm:$0xff]  }
  0x7f   : > { %1929 = vmatmul.mubr.bf16.gmra.mrb[44].mxu0 %v4131_v45  ;;  %2058 = vmatmul.mubr.bf16.gmra.mrb[44].mxu1 %v4132_v46  ;;  %v4230_v45 = vld [vmem:[%s4382_s11 + $0x184] ss:$36 sps:$4 sm:$0xff]   ;;  %v4232_v46 = vld [vmem:[%s4382_s11 + $0x3b8] ss:$36 sps:$4 sm:$0xff]  }
  0x80   : > { %2065 = vmatprep.mubr.bf16.mxu1 %v4135_v49  ;;  %2162 = vmatprep.mubr.bf16.mxu0 %v4139_v50  ;;  %v4236_v49 = vld [vmem:[%s4382_s11 + $0x1cc] ss:$36 sps:$4 sm:$0xff]   ;;  %v4238_v50 = vld [vmem:[%s4382_s11 + $0x400] ss:$36 sps:$4 sm:$0xff]  }
  0x87   : > { %2066 = vmatmul.mubr.bf16.gmra.mrb[48].mxu1 %v4140_v52  ;;  %2163 = vmatmul.mubr.bf16.vlgmr.msra.gmra.mrb[48].mxu0 %v4137_v51  ;;  %v4239_v51 = vld [vmem:[%s4382_s11 + $0x1c8] ss:$36 sps:$4 sm:$0xff]  }
  0x88   : > { %3919 = vmatpush3.bf16.msra.mxu0 %v4143_v29  ;;  %2073 = vmatprep.mubr.bf16.mxu1 %v4144_v53  ;;  %v4204_v29 = vld [vmem:[%s4382_s11 + $0x64] ss:$36 sps:$4 sm:$0xff]   ;;  %v4241_v52 = vld [vmem:[%s4382_s11 + $0x44c] ss:$36 sps:$4 sm:$0xff]   ;;  %v4243_v53 = vld [vmem:[%s4382_s11 + $0x214] ss:$36 sps:$4 sm:$0xff]  }
  0x89   : > { %2170 = vmatprep.mubr.bf16.mxu0 %v4146_v54  ;;  %3920 = vmatprep.subr.bf16.mxu0 %v4158_v55 }
  0x8c   : > { %3921 = vmatpush3.bf16.msra.mxu0 %v4158_v55 }
  0x8d   : > { %3922 = vmatprep.subr.bf16.mxu0 %v4173_v56 }
  0x8f   : > { %2074 = vmatmul.mubr.bf16.gmra.mrb[52].mxu1 %v4148_v57  ;;  %2171 = vmatmul.mubr.bf16.gmra.mrb[52].mxu0 %v4149_v58  ;;  %v4245_v58 = vld [vmem:[%s4382_s11 + $0x448] ss:$36 sps:$4 sm:$0xff]  }
  0x90   : > { %2081 = vmatprep.mubr.bf16.mxu1 %v4150_v59  ;;  %2178 = vmatprep.mubr.bf16.mxu0 %v4152_v60  ;;  %v4246_v59 = vld [vmem:[%s4382_s11 + $0x210] ss:$36 sps:$4 sm:$0xff]  }
  0x91   : > { %3923 = vmatpush3.bf16.msra.mxu0 %v4173_v56 }
  0x92   : > { %3924 = vmatprep.subr.bf16.mxu0 %v4188_v61 }
  0x95   : > { %3925 = vmatpush3.bf16.msra.mxu0 %v4188_v61 }
  0x96   : > { %3926 = vmatprep.subr.bf16.mxu0 %v4201_v62 }
  0x97   : > { %2082 = vmatmul.mubr.bf16.gmra.mrb[56].mxu1 %v4154_v63  ;;  %2179 = vmatmul.mubr.bf16.gmra.mrb[56].mxu0 %v4155_v0  ;;  %v4247_v0 = vld [vmem:[%s4382_s11 + $0x25c] ss:$36 sps:$4 sm:$0xff]  }
  0x98   : > { %2089 = vmatprep.mubr.bf16.mxu1 %v4159_v1  ;;  %2186 = vmatprep.mubr.bf16.mxu0 %v4161_v2  ;;  %v4249_v1 = vld [vmem:[%s4382_s11 + $0x20] ss:$36 sps:$4 sm:$0xff]  }
  0x99   : > { %3927 = vmatpush3.bf16.msra.mxu0 %v4201_v62 }
  0x9a   : > { %3928 = vmatprep.subr.bf16.mxu0 %v4214_v3 }
  0x9d   : > { %3929 = vmatpush3.bf16.msra.mxu0 %v4214_v3 }
  0x9e   : > { %3930 = vmatprep.subr.bf16.mxu0 %v4227_v6 }
  0x9f   : > { %2090 = vmatmul.mubr.bf16.gmra.mrb[60].mxu1 %v4163_v4  ;;  %2187 = vmatmul.mubr.bf16.gmra.mrb[60].mxu0 %v4164_v5 }
  0xa0   : > { %2097 = vmatprep.mubr.bf16.mxu1 %v4165_v7  ;;  %2194 = vmatprep.mubr.bf16.mxu0 %v4167_v8 }
  0xa1   : > { %3931 = vmatpush3.bf16.msra.mxu0 %v4227_v6 }
  0xa2   : > { %3932 = vmatprep.subr.bf16.mxu0 %v4240_v9 }
  0xa5   : > { %3933 = vmatpush3.bf16.msra.mxu0 %v4240_v9 }
  0xa7   : > { %2098 = vmatmul.mubr.bf16.gmra.mrb[64].mxu1 %v4169_v10  ;;  %2195 = vmatmul.mubr.bf16.gmra.mrb[64].mxu0 %v4170_v11  ;;  %v4250_v10 = vld [vmem:[%s4382_s11 + $0x258] ss:$36 sps:$4 sm:$0xff]   ;;  %v4251_v11 = vld [vmem:[%s4382_s11 + $0x68] ss:$36 sps:$4 sm:$0xff]  }
  0xa8   : > { %2105 = vmatprep.mubr.bf16.mxu1 %v4174_v12  ;;  %2202 = vmatprep.mubr.bf16.mxu0 %v4176_v13 }
  0xaf   : > { %2106 = vmatmul.mubr.bf16.gmra.mrb[68].mxu1 %v4178_v14  ;;  %2203 = vmatmul.mubr.bf16.gmra.mrb[68].mxu0 %v4179_v15 }
  0xb0   : > { %2113 = vmatprep.mubr.bf16.mxu1 %v4180_v16  ;;  %2210 = vmatprep.mubr.bf16.mxu0 %v4182_v17  ;;  %v4252_v16 = vld [vmem:[%s4382_s11 + $0x2a4] ss:$36 sps:$4 sm:$0xff]   ;;  %v4254_v17 = vld [vmem:[%s4382_s11 + $0xb0] ss:$36 sps:$4 sm:$0xff]  }
  0xb7   : > { %2114 = vmatmul.mubr.bf16.gmra.mrb[72].mxu1 %v4184_v18  ;;  %2211 = vmatmul.mubr.bf16.gmra.mrb[72].mxu0 %v4185_v19 }
  0xb8   : > { %2121 = vmatprep.mubr.bf16.mxu1 %v4189_v20  ;;  %2218 = vmatprep.mubr.bf16.mxu0 %v4191_v21 }
  0xbf   : > { %2122 = vmatmul.mubr.bf16.gmra.mrb[76].mxu1 %v4193_v22  ;;  %2219 = vmatmul.mubr.bf16.gmra.mrb[76].mxu0 %v4194_v23 }
  0xc0   : > { %2226 = vmatprep.mubr.bf16.mxu0 %v4195_v24  ;;  %2323 = vmatprep.mubr.bf16.mxu1 %v4199_v25 }
  0xc7   : > { %2227 = vmatmul.mubr.bf16.gmra.mrb[80].mxu0 %v4200_v27  ;;  %2324 = vmatmul.mubr.bf16.vlgmr.msra.gmra.mrb[80].mxu1 %v4197_v26  ;;  %v4255_v26 = vld [vmem:[%s4382_s11 + $0x2a0] ss:$36 sps:$4 sm:$0xff]   ;;  %v4256_v27 = vld [vmem:[%s4382_s11 + $0xf8] ss:$36 sps:$4 sm:$0xff]  }
  0xc8   : > { %2234 = vmatprep.mubr.bf16.mxu0 %v4202_v28  ;;  %2331 = vmatprep.mubr.bf16.mxu1 %v4204_v29 }
  0xcf   : > { %2235 = vmatmul.mubr.bf16.gmra.mrb[84].mxu0 %v4206_v30  ;;  %2332 = vmatmul.mubr.bf16.gmra.mrb[84].mxu1 %v4207_v31 }
  0xd0   : > { %2242 = vmatprep.mubr.bf16.mxu0 %v4208_v32  ;;  %2339 = vmatprep.mubr.bf16.mxu1 %v4210_v33  ;;  %v4257_v32 = vld [vmem:[%s4382_s11 + $0x2ec] ss:$36 sps:$4 sm:$0xff]   ;;  %v4259_v33 = vld [vmem:[%s4382_s11 + $0x140] ss:$36 sps:$4 sm:$0xff]  }
  0xd7   : > { %2243 = vmatmul.mubr.bf16.gmra.mrb[88].mxu0 %v4212_v34  ;;  %2340 = vmatmul.mubr.bf16.gmra.mrb[88].mxu1 %v4213_v35 }
  0xd8   : > { %2250 = vmatprep.mubr.bf16.mxu0 %v4215_v36  ;;  %2347 = vmatprep.mubr.bf16.mxu1 %v4217_v37 }
  0xdf   : > { %2251 = vmatmul.mubr.bf16.gmra.mrb[92].mxu0 %v4219_v38  ;;  %2348 = vmatmul.mubr.bf16.gmra.mrb[92].mxu1 %v4220_v39 }
  0xe0   : > { %2258 = vmatprep.mubr.bf16.mxu0 %v4221_v40  ;;  %2355 = vmatprep.mubr.bf16.mxu1 %v4223_v41 }
  0xe7   : > { %2259 = vmatmul.mubr.bf16.gmra.mrb[96].mxu0 %v4225_v42  ;;  %2356 = vmatmul.mubr.bf16.gmra.mrb[96].mxu1 %v4226_v43  ;;  %v4260_v42 = vld [vmem:[%s4382_s11 + $0x2e8] ss:$36 sps:$4 sm:$0xff]  }
  0xe8   : > { %2266 = vmatprep.mubr.bf16.mxu0 %v4228_v44  ;;  %2363 = vmatprep.mubr.bf16.mxu1 %v4230_v45  ;;  %v4261_v43 = vld [vmem:[%s4382_s11 + $0x188] ss:$36 sps:$4 sm:$0xff]  }
  0xef   : > { %2267 = vmatmul.mubr.bf16.gmra.mrb[100].mxu0 %v4232_v46  ;;  %2364 = vmatmul.mubr.bf16.gmra.mrb[100].mxu1 %v4233_v47 }
  0xf0   : > { %2274 = vmatprep.mubr.bf16.mxu0 %v4234_v48  ;;  %2371 = vmatprep.mubr.bf16.mxu1 %v4236_v49  ;;  %v4262_v48 = vld [vmem:[%s4382_s11 + $0x334] ss:$36 sps:$4 sm:$0xff]  }
  0xf1   : > { %v4264_v49 = vld [vmem:[%s4382_s11 + $0x1d0] ss:$36 sps:$4 sm:$0xff]  }
  0xf7   : > { %2275 = vmatmul.mubr.bf16.gmra.mrb[104].mxu0 %v4238_v50  ;;  %2372 = vmatmul.mubr.bf16.gmra.mrb[104].mxu1 %v4239_v51 }
  0xf8   : > { %2282 = vmatprep.mubr.bf16.mxu0 %v4241_v52  ;;  %2379 = vmatprep.mubr.bf16.mxu1 %v4243_v53 }
  0xfa   : > { %v3534_v54 = vpop.f32.mrb[0].mxu1  ;;  %v3462_v55 = vpop.f32.mrb[0].mxu0 }
  0xfb   : > { %v3535_v56 = vpop.f32.mrb[1].mxu1  ;;  %v3463_v57 = vpop.f32.mrb[1].mxu0 }
  0xfc   : > { %v4685_v60 = vadd.f32 %v3535_v56, %v3534_v54  ;;  %v3537_v61 = vpop.f32.mrb[2].mxu1  ;;  %v4687_v62 = vadd.f32 %v3463_v57, %v3462_v55  ;;  %v3465_v63 = vpop.f32.mrb[2].mxu0 }
  0xfd   : > { %v3538_v2 = vpop.f32.mrb[3].mxu1  ;;  %v3466_v3 = vpop.f32.mrb[3].mxu0 }
  0xfe   : > { %v4691_v4 = vadd.f32 %v3538_v2, %v3537_v61  ;;  %v4693_v5 = vadd.f32 %v3466_v3, %v3465_v63  ;;  %v4267_v2 = vld [vmem:[%s4382_s11 + $0x37c] ss:$36 sps:$4 sm:$0xff]  }
  0xff   : > { %2283 = vmatmul.mubr.bf16.gmra.mrb[108].mxu0 %v4245_v58  ;;  %2380 = vmatmul.mubr.bf16.gmra.mrb[108].mxu1 %v4246_v59  ;;  %v4265_v58 = vld [vmem:[%s4382_s11 + $0x330] ss:$36 sps:$4 sm:$0xff]   ;;  %v4266_v59 = vld [vmem:[%s4382_s11 + $0x218] ss:$36 sps:$4 sm:$0xff]   ;;  %v4269_v3 = vld [vmem:[%s4382_s11 + $0x260] ss:$36 sps:$4 sm:$0xff]  }
 0x100   : > { %2387 = vmatprep.mubr.bf16.mxu1 %v4247_v0  ;;  %3934 = vmatprep.mubr.bf16.mxu0 %v4249_v1 }
 0x102   : > { %v3540_v6 = vpop.f32.mrb[4].mxu1  ;;  %v3468_v7 = vpop.f32.mrb[4].mxu0 }
 0x103   : > { %v3541_v8 = vpop.f32.mrb[5].mxu1  ;;  %v3469_v9 = vpop.f32.mrb[5].mxu0 }
 0x104   : > { %v4697_v12 = vadd.f32 %v3541_v8, %v3540_v6  ;;  %v3543_v13 = vpop.f32.mrb[6].mxu1  ;;  %v4699_v14 = vadd.f32 %v3469_v9, %v3468_v7  ;;  %v3471_v15 = vpop.f32.mrb[6].mxu0 }
 0x105   : > { %v3544_v18 = vpop.f32.mrb[7].mxu1  ;;  %v3472_v19 = vpop.f32.mrb[7].mxu0 }
 0x106   : > { %v4703_v20 = vadd.f32 %v3544_v18, %v3543_v13  ;;  %v4705_v21 = vadd.f32 %v3472_v19, %v3471_v15  ;;  %v4270_v18 = vld [vmem:[%s4382_s11 + $0x378] ss:$36 sps:$4 sm:$0xff]   ;;  %v4271_v19 = vld [vmem:[%s4382_s11 + $0x2a8] ss:$36 sps:$4 sm:$0xff]  }
 0x107   : > { %2388 = vmatmul.mubr.bf16.gmra.mrb[112].mxu1 %v4250_v10  ;;  %3935 = vmatmul.mubr.bf16.vlgmr.msra.gmra.mrb[112].mxu0 %v4251_v11 }
 0x108   : > { %2395 = vmatprep.mubr.bf16.mxu1 %v4252_v16  ;;  %3938 = vmatprep.mubr.bf16.mxu0 %v4254_v17 }
 0x10a   : > { %v3546_v22 = vpop.f32.mrb[8].mxu1  ;;  %v3474_v23 = vpop.f32.mrb[8].mxu0 }
 0x10b   : > { %v3547_v24 = vpop.f32.mrb[9].mxu1  ;;  %v3475_v25 = vpop.f32.mrb[9].mxu0 }
 0x10c   : > { %v4709_v28 = vadd.f32 %v3547_v24, %v3546_v22  ;;  %v3549_v29 = vpop.f32.mrb[10].mxu1  ;;  %v4711_v30 = vadd.f32 %v3475_v25, %v3474_v23  ;;  %v3477_v31 = vpop.f32.mrb[10].mxu0  ;;  %v4272_v25 = vld [vmem:[%s4382_s11 + $0x3c4] ss:$36 sps:$4 sm:$0xff]  }
 0x10d   : > { %v3550_v34 = vpop.f32.mrb[11].mxu1  ;;  %v3478_v35 = vpop.f32.mrb[11].mxu0 }
 0x10e   : > { %v4715_v36 = vadd.f32 %v3550_v34, %v3549_v29  ;;  %v4717_v37 = vadd.f32 %v3478_v35, %v3477_v31 }
 0x10f   : > { %2396 = vmatmul.mubr.bf16.gmra.mrb[116].mxu1 %v4255_v26  ;;  %3939 = vmatmul.mubr.bf16.gmra.mrb[116].mxu0 %v4256_v27  ;;  %v4274_v26 = vld [vmem:[%s4382_s11 + $0x2f0] ss:$36 sps:$4 sm:$0xff]  }
 0x110   : > { %2403 = vmatprep.mubr.bf16.mxu1 %v4257_v32  ;;  %3942 = vmatprep.mubr.bf16.mxu0 %v4259_v33 }
 0x112   : > { %v3552_v38 = vpop.f32.mrb[12].mxu1  ;;  %v3480_v39 = vpop.f32.mrb[12].mxu0 }
 0x113   : > { %v3553_v40 = vpop.f32.mrb[13].mxu1  ;;  %v3481_v41 = vpop.f32.mrb[13].mxu0 }
 0x114   : > { %v4721_v44 = vadd.f32 %v3553_v40, %v3552_v38  ;;  %v3555_v45 = vpop.f32.mrb[14].mxu1  ;;  %v4723_v46 = vadd.f32 %v3481_v41, %v3480_v39  ;;  %v3483_v47 = vpop.f32.mrb[14].mxu0  ;;  %v4275_v40 = vld [vmem:[%s4382_s11 + $0x3c0] ss:$36 sps:$4 sm:$0xff]   ;;  %v4276_v41 = vld [vmem:[%s4382_s11 + $0x338] ss:$36 sps:$4 sm:$0xff]  }
 0x115   : > { %v3556_v50 = vpop.f32.mrb[15].mxu1  ;;  %v3484_v51 = vpop.f32.mrb[15].mxu0 }
 0x116   : > { %v4727_v52 = vadd.f32 %v3556_v50, %v3555_v45  ;;  %v4729_v53 = vadd.f32 %v3484_v51, %v3483_v47  ;;  %v4277_v47 = vld [vmem:[%s4382_s11 + $0x40c] ss:$36 sps:$4 sm:$0xff]  }
 0x117   : > { %2404 = vmatmul.mubr.bf16.gmra.mrb[120].mxu1 %v4260_v42  ;;  %3943 = vmatmul.mubr.bf16.gmra.mrb[120].mxu0 %v4261_v43 }
 0x118   : > { %2411 = vmatprep.mubr.bf16.mxu1 %v4262_v48  ;;  %3946 = vmatprep.mubr.bf16.mxu0 %v4264_v49  ;;  %v4279_v48 = vld [vmem:[%s4382_s11 + $0x380] ss:$36 sps:$4 sm:$0xff]  }
 0x11a   : > { %v3574_v54 = vpop.f32.mrb[16].mxu1  ;;  %v3486_v55 = vpop.f32.mrb[16].mxu0 }
 0x11b   : > { %v3575_v56 = vpop.f32.mrb[17].mxu1  ;;  %v3487_v57 = vpop.f32.mrb[17].mxu0 }
 0x11c   : > { %v3576_v61 = vadd.f32 %v3575_v56, %v3574_v54  ;;  %v3577_v63 = vpop.f32.mrb[18].mxu1  ;;  %v4733_v0 = vadd.f32 %v3487_v57, %v3486_v55  ;;  %v3489_v1 = vpop.f32.mrb[18].mxu0 }
 0x11d   : > { %v3578_v6 = vpop.f32.mrb[19].mxu1  ;;  %v3490_v7 = vpop.f32.mrb[19].mxu0 }
 0x11e   : > { %v4738_v8 = vadd.f32 %v3576_v61, %v4687_v62  ;;  %v3579_v9 = vadd.f32 %v3578_v6, %v3577_v63  ;;  %v4740_v10 = vadd.f32 %v3490_v7, %v3489_v1  ;;  %v4280_v61 = vld [vmem:[%s4382_s11 + $0x408] ss:$36 sps:$4 sm:$0xff]   ;;  %v4282_v6 = vld [vmem:[%s4382_s11 + $0x454] ss:$36 sps:$4 sm:$0xff]  }
 0x11f   : > { %2412 = vmatmul.mubr.bf16.gmra.mrb[124].mxu1 %v4265_v58  ;;  %3947 = vmatmul.mubr.bf16.gmra.mrb[124].mxu0 %v4266_v59  ;;  %v4281_v63 = vld [vmem:[%s4382_s11 + $0x3c8] ss:$36 sps:$4 sm:$0xff]   ;;  %v4284_v7 = vld [vmem:[%s4382_s11 + $0x410] ss:$36 sps:$4 sm:$0xff]  }
 0x120   : > { %v4743_v11 = vadd.f32 %v3579_v9, %v4693_v5  ;;  %2419 = vmatprep.mubr.bf16.mxu1 %v4267_v2  ;;  %3950 = vmatprep.mubr.bf16.mxu0 %v4269_v3 }
 0x122   : > { %v3580_v13 = vpop.f32.mrb[20].mxu1  ;;  %v3492_v15 = vpop.f32.mrb[20].mxu0 }
 0x123   : > { %v3581_v16 = vpop.f32.mrb[21].mxu1  ;;  %v3493_v17 = vpop.f32.mrb[21].mxu0 }
 0x124   : > { %v3582_v62 = vadd.f32 %v3581_v16, %v3580_v13  ;;  %v3583_v22 = vpop.f32.mrb[22].mxu1  ;;  %v4747_v23 = vadd.f32 %v3493_v17, %v3492_v15  ;;  %v3495_v24 = vpop.f32.mrb[22].mxu0 }
 0x125   : > { %v3584_v27 = vpop.f32.mrb[23].mxu1  ;;  %v3496_v5 = vpop.f32.mrb[23].mxu0 }
 0x126   : > { %v4752_v29 = vadd.f32 %v3582_v62, %v4699_v14  ;;  %v3585_v31 = vadd.f32 %v3584_v27, %v3583_v22  ;;  %v4754_v32 = vadd.f32 %v3496_v5, %v3495_v24  ;;  %v4285_v24 = vld [vmem:[%s4382_s11 + $0x450] ss:$36 sps:$4 sm:$0xff]  }
 0x127   : > { %2420 = vmatmul.mubr.bf16.gmra.mrb[128].mxu1 %v4270_v18  ;;  %3951 = vmatmul.mubr.bf16.gmra.mrb[128].mxu0 %v4271_v19 }
 0x128   : > { %v4757_v33 = vadd.f32 %v3585_v31, %v4705_v21  ;;  %2427 = vmatprep.mubr.bf16.mxu1 %v4272_v25  ;;  %3954 = vmatprep.mubr.bf16.mxu0 %v4274_v26  ;;  %v4286_v25 = vld [vmem:[%s4382_s11 + $0x458] ss:$36 sps:$4 sm:$0xff]  }
 0x12a   : > { %v3586_v34 = vpop.f32.mrb[24].mxu1  ;;  %v3498_v35 = vpop.f32.mrb[24].mxu0 }
 0x12b   : > { %v3587_v38 = vpop.f32.mrb[25].mxu1  ;;  %v3499_v39 = vpop.f32.mrb[25].mxu0 }
 0x12c   : > { %v3588_v14 = vadd.f32 %v3587_v38, %v3586_v34  ;;  %v3589_v42 = vpop.f32.mrb[26].mxu1  ;;  %v4761_v43 = vadd.f32 %v3499_v39, %v3498_v35  ;;  %v3501_v45 = vpop.f32.mrb[26].mxu0 }
 0x12d   : > { %v3590_v49 = vpop.f32.mrb[27].mxu1  ;;  %v3502_v21 = vpop.f32.mrb[27].mxu0 }
 0x12e   : > { %v4766_v50 = vadd.f32 %v3588_v14, %v4711_v30  ;;  %v3591_v51 = vadd.f32 %v3590_v49, %v3589_v42  ;;  %v4768_v54 = vadd.f32 %v3502_v21, %v3501_v45 }
 0x12f   : > { %2428 = vmatmul.mubr.bf16.gmra.mrb[132].mxu1 %v4275_v40  ;;  %3955 = vmatmul.mubr.bf16.gmra.mrb[132].mxu0 %v4276_v41 }
 0x130   : > { %v4771_v55 = vadd.f32 %v3591_v51, %v4717_v37  ;;  %2435 = vmatprep.mubr.bf16.mxu1 %v4277_v47  ;;  %3958 = vmatprep.mubr.bf16.mxu0 %v4279_v48 }
 0x132   : > { %v3592_v56 = vpop.f32.mrb[28].mxu1  ;;  %v3504_v57 = vpop.f32.mrb[28].mxu0 }
 0x133   : > { %v3593_v58 = vpop.f32.mrb[29].mxu1  ;;  %v3505_v59 = vpop.f32.mrb[29].mxu0 }
 0x134   : > { %v3594_v30 = vadd.f32 %v3593_v58, %v3592_v56  ;;  %v3595_v1 = vpop.f32.mrb[30].mxu1  ;;  %v4775_v2 = vadd.f32 %v3505_v59, %v3504_v57  ;;  %v3507_v3 = vpop.f32.mrb[30].mxu0 }
 0x135   : > { %v3596_v9 = vpop.f32.mrb[31].mxu1  ;;  %v3508_v37 = vpop.f32.mrb[31].mxu0 }
 0x136   : > { %v4780_v13 = vadd.f32 %v3594_v30, %v4723_v46  ;;  %v3597_v15 = vadd.f32 %v3596_v9, %v3595_v1  ;;  %v4782_v16 = vadd.f32 %v3508_v37, %v3507_v3 }
 0x137   : > { %2436 = vmatmul.mubr.bf16.gmra.mrb[136].mxu1 %v4280_v61  ;;  %3959 = vmatmul.mubr.bf16.gmra.mrb[136].mxu0 %v4281_v63 }
 0x138   : > { %v4785_v17 = vadd.f32 %v3597_v15, %v4729_v53  ;;  %2443 = vmatprep.mubr.bf16.mxu1 %v4282_v6  ;;  %3962 = vmatprep.mubr.bf16.mxu0 %v4284_v7 }
 0x13a   : > { %v3598_v18 = vpop.f32.mrb[32].mxu1  ;;  %v3510_v19 = vpop.f32.mrb[32].mxu0 }
 0x13b   : > { %v3599_v62 = vpop.f32.mrb[33].mxu1  ;;  %v3511_v22 = vpop.f32.mrb[33].mxu0 }
 0x13c   : > { %v3600_v26 = vadd.f32 %v3599_v62, %v3598_v18  ;;  %v3601_v27 = vpop.f32.mrb[34].mxu1  ;;  %v3512_v46 = vadd.f32 %v3511_v22, %v3510_v19  ;;  %v3513_v5 = vpop.f32.mrb[34].mxu0 }
 0x13d   : > { %v3602_v31 = vpop.f32.mrb[35].mxu1  ;;  %v3514_v34 = vpop.f32.mrb[35].mxu0 }
 0x13e   : > { %v4790_v35 = vadd.f32 %v3600_v26, %v4733_v0  ;;  %v3603_v38 = vadd.f32 %v3602_v31, %v3601_v27  ;;  %v3515_v53 = vadd.f32 %v3514_v34, %v3513_v5 }
 0x13f   : > { %2444 = vmatmul.mubr.bf16.gmra.mrb[140].mxu1 %v4285_v24  ;;  %3963 = vmatmul.mubr.bf16.gmra.mrb[140].mxu0 %v4286_v25 }
 0x140   : > { %v4793_v39 = vadd.f32 %v3603_v38, %v4740_v10 }
 0x142   : > { %v3604_v40 = vpop.f32.mrb[36].mxu1  ;;  %v3516_v41 = vpop.f32.mrb[36].mxu0 }
 0x143   : > { %v3605_v14 = vpop.f32.mrb[37].mxu1  ;;  %v3517_v42 = vpop.f32.mrb[37].mxu0 }
 0x144   : > { %v3606_v45 = vadd.f32 %v3605_v14, %v3604_v40  ;;  %v3607_v47 = vpop.f32.mrb[38].mxu1  ;;  %v3518_v48 = vadd.f32 %v3517_v42, %v3516_v41  ;;  %v3519_v49 = vpop.f32.mrb[38].mxu0 }
 0x145   : > { %v3608_v21 = vpop.f32.mrb[39].mxu1  ;;  %v3520_v51 = vpop.f32.mrb[39].mxu0 }
 0x146   : > { %v4796_v0 = vadd.f32 %v3606_v45, %v4747_v23  ;;  %v3609_v56 = vadd.f32 %v3608_v21, %v3607_v47  ;;  %v3521_v57 = vadd.f32 %v3520_v51, %v3519_v49 }
 0x148   : > { %v4799_v58 = vadd.f32 %v3609_v56, %v4754_v32 }
 0x14a   : > { %v3610_v10 = vpop.f32.mrb[40].mxu1  ;;  %v3522_v59 = vpop.f32.mrb[40].mxu0 }
 0x14b   : > { %v3611_v61 = vpop.f32.mrb[41].mxu1  ;;  %v3523_v63 = vpop.f32.mrb[41].mxu0 }
 0x14c   : > { %v3612_v30 = vadd.f32 %v3611_v61, %v3610_v10  ;;  %v3613_v1 = vpop.f32.mrb[42].mxu1  ;;  %v4801_v3 = vadd.f32 %v3523_v63, %v3522_v59  ;;  %v3525_v6 = vpop.f32.mrb[42].mxu0 }
 0x14d   : > { %v3614_v7 = vpop.f32.mrb[43].mxu1  ;;  %v3526_v9 = vpop.f32.mrb[43].mxu0 }
 0x14e   : > { %v4804_v37 = vadd.f32 %v3612_v30, %v4761_v43  ;;  %v3615_v23 = vadd.f32 %v3614_v7, %v3613_v1  ;;  %v3527_v15 = vadd.f32 %v3526_v9, %v3525_v6 }
 0x150   : > { %v4807_v18 = vadd.f32 %v3615_v23, %v4768_v54 }
 0x152   : > { %v3616_v32 = vpop.f32.mrb[44].mxu1  ;;  %v3528_v19 = vpop.f32.mrb[44].mxu0 }
 0x153   : > { %v3617_v62 = vpop.f32.mrb[45].mxu1  ;;  %v3529_v22 = vpop.f32.mrb[45].mxu0 }
 0x154   : > { %v3618_v24 = vadd.f32 %v3617_v62, %v3616_v32  ;;  %v3619_v25 = vpop.f32.mrb[46].mxu1  ;;  %v4809_v26 = vadd.f32 %v3529_v22, %v3528_v19  ;;  %v3531_v27 = vpop.f32.mrb[46].mxu0 }
 0x155   : > { %v3620_v5 = vpop.f32.mrb[47].mxu1  ;;  %v3532_v31 = vpop.f32.mrb[47].mxu0 }
 0x156   : > { %v4812_v34 = vadd.f32 %v3618_v24, %v4775_v2  ;;  %v3621_v43 = vadd.f32 %v3620_v5, %v3619_v25  ;;  %v4814_v38 = vadd.f32 %v3532_v31, %v3531_v27 }
 0x158   : > { %v4817_v54 = vadd.f32 %v3621_v43, %v4782_v16 }
 0x15a   : > { %v3622_v40 = vpop.f32.mrb[48].mxu1  ;;  %v3686_v41 = vpop.f32.mrb[48].mxu0 }
 0x15b   : > { %v3623_v14 = vpop.f32.mrb[49].mxu1  ;;  %v3687_v42 = vpop.f32.mrb[49].mxu0 }
 0x15c   : > { %v3624_v45 = vadd.f32 %v3623_v14, %v3622_v40  ;;  %v3688_v47 = vadd.f32 %v3687_v42, %v3686_v41  ;;  %v3625_v49 = vpop.f32.mrb[50].mxu1  ;;  %v3689_v21 = vpop.f32.mrb[50].mxu0 }
 0x15d   : > { %v3626_v51 = vpop.f32.mrb[51].mxu1  ;;  %v3690_v56 = vpop.f32.mrb[51].mxu0 }
 0x15e   : > { %v4819_v10 = vadd.f32 %v3624_v45, %v3512_v46  ;;  %v4822_v2 = vadd.f32 %v3688_v47, %v4738_v8  ;;  %v3627_v59 = vadd.f32 %v3626_v51, %v3625_v49  ;;  %v3691_v61 = vadd.f32 %v3690_v56, %v3689_v21 }
 0x160   : > { %v4824_v63 = vadd.f32 %v3627_v59, %v3515_v53  ;;  %v4827_v16 = vadd.f32 %v3691_v61, %v4743_v11 }
 0x162   : > { %v3628_v30 = vpop.f32.mrb[52].mxu1  ;;  %v3692_v1 = vpop.f32.mrb[52].mxu0 }
 0x163   : > { %v3629_v6 = vpop.f32.mrb[53].mxu1  ;;  %v3693_v7 = vpop.f32.mrb[53].mxu0 }
 0x164   : > { %v3630_v9 = vadd.f32 %v3629_v6, %v3628_v30  ;;  %v3694_v23 = vadd.f32 %v3693_v7, %v3692_v1  ;;  %v3631_v32 = vpop.f32.mrb[54].mxu1  ;;  %v3695_v19 = vpop.f32.mrb[54].mxu0 }
 0x165   : > { %v3632_v46 = vpop.f32.mrb[55].mxu1  ;;  %v3696_v62 = vpop.f32.mrb[55].mxu0 }
 0x166   : > { %v4829_v22 = vadd.f32 %v3630_v9, %v3518_v48  ;;  %v4832_v8 = vadd.f32 %v3694_v23, %v4752_v29  ;;  %v3633_v53 = vadd.f32 %v3632_v46, %v3631_v32  ;;  %v3697_v24 = vadd.f32 %v3696_v62, %v3695_v19 }
 0x168   : > { %v4834_v25 = vadd.f32 %v3633_v53, %v3521_v57  ;;  %v4837_v11 = vadd.f32 %v3697_v24, %v4757_v33 }
 0x16a   : > { %v3634_v27 = vpop.f32.mrb[56].mxu1  ;;  %v3698_v5 = vpop.f32.mrb[56].mxu0 }
 0x16b   : > { %v3635_v31 = vpop.f32.mrb[57].mxu1  ;;  %v3699_v43 = vpop.f32.mrb[57].mxu0 }
 0x16c   : > { %v3636_v40 = vadd.f32 %v3635_v31, %v3634_v27  ;;  %v3700_v41 = vadd.f32 %v3699_v43, %v3698_v5  ;;  %v3637_v14 = vpop.f32.mrb[58].mxu1  ;;  %v3701_v42 = vpop.f32.mrb[58].mxu0 }
 0x16d   : > { %v3638_v48 = vpop.f32.mrb[59].mxu1  ;;  %v3702_v45 = vpop.f32.mrb[59].mxu0 }
 0x16e   : > { %v4840_v29 = vadd.f32 %v3636_v40, %v4801_v3  ;;  %v4843_v47 = vadd.f32 %v3700_v41, %v4766_v50  ;;  %v3639_v57 = vadd.f32 %v3638_v48, %v3637_v14  ;;  %v3703_v49 = vadd.f32 %v3702_v45, %v3701_v42 }
 0x170   : > { %v4845_v33 = vadd.f32 %v3639_v57, %v3527_v15  ;;  %v4848_v21 = vadd.f32 %v3703_v49, %v4771_v55 }
 0x172   : > { %v3640_v51 = vpop.f32.mrb[60].mxu1  ;;  %v3704_v56 = vpop.f32.mrb[60].mxu0 }
 0x173   : > { %v3641_v59 = vpop.f32.mrb[61].mxu1  ;;  %v3705_v61 = vpop.f32.mrb[61].mxu0 }
 0x174   : > { %v3642_v30 = vadd.f32 %v3641_v59, %v3640_v51  ;;  %v3706_v1 = vadd.f32 %v3705_v61, %v3704_v56  ;;  %v3643_v6 = vpop.f32.mrb[62].mxu1  ;;  %v3707_v7 = vpop.f32.mrb[62].mxu0 }
 0x175   : > { %v3644_v3 = vpop.f32.mrb[63].mxu1  ;;  %v3708_v9 = vpop.f32.mrb[63].mxu0 }
 0x176   : > { %v4851_v50 = vadd.f32 %v3642_v30, %v4809_v26  ;;  %v4854_v23 = vadd.f32 %v3706_v1, %v4780_v13  ;;  %v3645_v15 = vadd.f32 %v3644_v3, %v3643_v6  ;;  %v3709_v32 = vadd.f32 %v3708_v9, %v3707_v7 }
 0x178   : > { %v4857_v55 = vadd.f32 %v3645_v15, %v4814_v38  ;;  %v4860_v19 = vadd.f32 %v3709_v32, %v4785_v17 }
 0x17a   : > { %v3646_v46 = vpop.f32.mrb[64].mxu1  ;;  %v3710_v62 = vpop.f32.mrb[64].mxu0 }
 0x17b   : > { %v3647_v53 = vpop.f32.mrb[65].mxu1  ;;  %v3711_v24 = vpop.f32.mrb[65].mxu0 }
 0x17c   : > { %v3648_v27 = vadd.f32 %v3647_v53, %v3646_v46  ;;  %v3712_v5 = vadd.f32 %v3711_v24, %v3710_v62  ;;  %v3649_v31 = vpop.f32.mrb[66].mxu1  ;;  %v3713_v26 = vpop.f32.mrb[66].mxu0 }
 0x17d   : > { %v3650_v43 = vpop.f32.mrb[67].mxu1  ;;  %v3714_v40 = vpop.f32.mrb[67].mxu0 }
 0x17e   : > { %v4863_v13 = vadd.f32 %v3648_v27, %v4685_v60  ;;  %v4866_v41 = vadd.f32 %v3712_v5, %v4790_v35  ;;  %v3651_v38 = vadd.f32 %v3650_v43, %v3649_v31  ;;  %v3715_v14 = vadd.f32 %v3714_v40, %v3713_v26 }
 0x180   : > { %v4869_v17 = vadd.f32 %v3651_v38, %v4691_v4  ;;  %v4872_v42 = vadd.f32 %v3715_v14, %v4793_v39 }
 0x182   : > { %v3652_v48 = vpop.f32.mrb[68].mxu1  ;;  %v3716_v45 = vpop.f32.mrb[68].mxu0 }
 0x183   : > { %v3653_v57 = vpop.f32.mrb[69].mxu1  ;;  %v3717_v49 = vpop.f32.mrb[69].mxu0 }
 0x184   : > { %v3654_v51 = vadd.f32 %v3653_v57, %v3652_v48  ;;  %v3718_v56 = vadd.f32 %v3717_v49, %v3716_v45  ;;  %v3655_v59 = vpop.f32.mrb[70].mxu1  ;;  %v3719_v60 = vpop.f32.mrb[70].mxu0 }
 0x185   : > { %v3656_v61 = vpop.f32.mrb[71].mxu1  ;;  %v3720_v30 = vpop.f32.mrb[71].mxu0 }
 0x186   : > { %v4875_v35 = vadd.f32 %v3654_v51, %v4697_v12  ;;  %v4878_v1 = vadd.f32 %v3718_v56, %v4796_v0  ;;  %v3657_v4 = vadd.f32 %v3656_v61, %v3655_v59  ;;  %v3721_v6 = vadd.f32 %v3720_v30, %v3719_v60 }
 0x188   : > { %v4881_v39 = vadd.f32 %v3657_v4, %v4703_v20  ;;  %v4884_v7 = vadd.f32 %v3721_v6, %v4799_v58 }
 0x18a   : > { %v3658_v3 = vpop.f32.mrb[72].mxu1  ;;  %v3722_v9 = vpop.f32.mrb[72].mxu0 }
 0x18b   : > { %v3659_v15 = vpop.f32.mrb[73].mxu1  ;;  %v3723_v32 = vpop.f32.mrb[73].mxu0 }
 0x18c   : > { %v3660_v46 = vadd.f32 %v3659_v15, %v3658_v3  ;;  %v3724_v62 = vadd.f32 %v3723_v32, %v3722_v9  ;;  %v3661_v53 = vpop.f32.mrb[74].mxu1  ;;  %v3725_v12 = vpop.f32.mrb[74].mxu0 }
 0x18d   : > { %v3662_v24 = vpop.f32.mrb[75].mxu1  ;;  %v3726_v27 = vpop.f32.mrb[75].mxu0 }
 0x18e   : > { %v4887_v0 = vadd.f32 %v3660_v46, %v4709_v28  ;;  %v4890_v5 = vadd.f32 %v3724_v62, %v4804_v37  ;;  %v3663_v20 = vadd.f32 %v3662_v24, %v3661_v53  ;;  %v3727_v31 = vadd.f32 %v3726_v27, %v3725_v12 }
 0x190   : > { %v4893_v58 = vadd.f32 %v3663_v20, %v4715_v36  ;;  %v4896_v26 = vadd.f32 %v3727_v31, %v4807_v18 }
 0x192   : > { %v3664_v43 = vpop.f32.mrb[76].mxu1  ;;  %v3728_v40 = vpop.f32.mrb[76].mxu0 }
 0x193   : > { %v3665_v38 = vpop.f32.mrb[77].mxu1  ;;  %v3729_v14 = vpop.f32.mrb[77].mxu0 }
 0x194   : > { %v3666_v48 = vadd.f32 %v3665_v38, %v3664_v43  ;;  %v3730_v45 = vadd.f32 %v3729_v14, %v3728_v40  ;;  %v3667_v57 = vpop.f32.mrb[78].mxu1  ;;  %v3731_v28 = vpop.f32.mrb[78].mxu0 }
 0x195   : > { %v3668_v49 = vpop.f32.mrb[79].mxu1  ;;  %v3732_v51 = vpop.f32.mrb[79].mxu0 }
 0x196   : > { %v4899_v37 = vadd.f32 %v3666_v48, %v4721_v44  ;;  %v4902_v56 = vadd.f32 %v3730_v45, %v4812_v34  ;;  %v3669_v36 = vadd.f32 %v3668_v49, %v3667_v57  ;;  %v3733_v59 = vadd.f32 %v3732_v51, %v3731_v28 }
 0x198   : > { %v4905_v18 = vadd.f32 %v3669_v36, %v4727_v52  ;;  %v4908_v60 = vadd.f32 %v3733_v59, %v4817_v54 }
 0x19a   : > { %v3734_v61 = vpop.f32.mrb[80].mxu0  ;;  %v3798_v30 = vpop.f32.mrb[80].mxu1 }
 0x19b   : > { %v3735_v4 = vpop.f32.mrb[81].mxu0  ;;  %v3799_v6 = vpop.f32.mrb[81].mxu1 }
 0x19c   : > { %v3736_v3 = vadd.f32 %v3735_v4, %v3734_v61  ;;  %v3800_v9 = vadd.f32 %v3799_v6, %v3798_v30  ;;  %v3737_v15 = vpop.f32.mrb[82].mxu0  ;;  %v3801_v44 = vpop.f32.mrb[82].mxu1 }
 0x19d   : > { %v3738_v32 = vpop.f32.mrb[83].mxu0  ;;  %v3802_v46 = vpop.f32.mrb[83].mxu1 }
 0x19e   : > { %v4911_v34 = vadd.f32 %v3736_v3, %v4819_v10  ;;  %v3739_v62 = vadd.f32 %v3738_v32, %v3737_v15  ;;  %v3803_v53 = vadd.f32 %v3802_v46, %v3801_v44  ;;  %v4914_v52 = vadd.f32 %v3800_v9, %v4822_v2 }
 0x1a0   : > { %v4917_v54 = vadd.f32 %v3739_v62, %v4824_v63  ;;  %v4920_v12 = vadd.f32 %v3803_v53, %v4827_v16 }
 0x1a2   : > { %v3740_v24 = vpop.f32.mrb[84].mxu0  ;;  %v3804_v27 = vpop.f32.mrb[84].mxu1 }
 0x1a3   : > { %v3741_v20 = vpop.f32.mrb[85].mxu0  ;;  %v3805_v31 = vpop.f32.mrb[85].mxu1 }
 0x1a4   : > { %v3742_v43 = vadd.f32 %v3741_v20, %v3740_v24  ;;  %v3806_v40 = vadd.f32 %v3805_v31, %v3804_v27  ;;  %v3743_v38 = vpop.f32.mrb[86].mxu0  ;;  %v3807_v10 = vpop.f32.mrb[86].mxu1 }
 0x1a5   : > { %v3744_v14 = vpop.f32.mrb[87].mxu0  ;;  %v3808_v48 = vpop.f32.mrb[87].mxu1 }
 0x1a6   : > { %v4923_v45 = vadd.f32 %v3742_v43, %v4829_v22  ;;  %v3745_v2 = vadd.f32 %v3744_v14, %v3743_v38  ;;  %v3809_v57 = vadd.f32 %v3808_v48, %v3807_v10  ;;  %v4926_v63 = vadd.f32 %v3806_v40, %v4832_v8 }
 0x1a8   : > { %v4929_v16 = vadd.f32 %v3745_v2, %v4834_v25  ;;  %v4932_v28 = vadd.f32 %v3809_v57, %v4837_v11 }
 0x1aa   : > { %v3746_v49 = vpop.f32.mrb[88].mxu0  ;;  %v3810_v51 = vpop.f32.mrb[88].mxu1 }
 0x1ab   : > { %v3747_v36 = vpop.f32.mrb[89].mxu0  ;;  %v3811_v59 = vpop.f32.mrb[89].mxu1 }
 0x1ac   : > { %v3748_v61 = vadd.f32 %v3747_v36, %v3746_v49  ;;  %v3812_v30 = vadd.f32 %v3811_v59, %v3810_v51  ;;  %v3749_v4 = vpop.f32.mrb[90].mxu0  ;;  %v3813_v22 = vpop.f32.mrb[90].mxu1 }
 0x1ad   : > { %v3750_v6 = vpop.f32.mrb[91].mxu0  ;;  %v3814_v3 = vpop.f32.mrb[91].mxu1 }
 0x1ae   : > { %v4935_v9 = vadd.f32 %v3748_v61, %v4840_v29  ;;  %v3751_v8 = vadd.f32 %v3750_v6, %v3749_v4  ;;  %v3815_v15 = vadd.f32 %v3814_v3, %v3813_v22  ;;  %v4938_v25 = vadd.f32 %v3812_v30, %v4843_v47 }
 0x1b0   : > { %v4941_v11 = vadd.f32 %v3751_v8, %v4845_v33  ;;  %v4944_v44 = vadd.f32 %v3815_v15, %v4848_v21 }
 0x1b2   : > { %v3752_v32 = vpop.f32.mrb[92].mxu0  ;;  %v3816_v46 = vpop.f32.mrb[92].mxu1 }
 0x1b3   : > { %v3753_v62 = vpop.f32.mrb[93].mxu0  ;;  %v3817_v53 = vpop.f32.mrb[93].mxu1 }
 0x1b4   : > { %v3754_v24 = vadd.f32 %v3753_v62, %v3752_v32  ;;  %v3818_v27 = vadd.f32 %v3817_v53, %v3816_v46  ;;  %v3755_v20 = vpop.f32.mrb[94].mxu0  ;;  %v3819_v29 = vpop.f32.mrb[94].mxu1 }
 0x1b5   : > { %v3756_v31 = vpop.f32.mrb[95].mxu0  ;;  %v3820_v43 = vpop.f32.mrb[95].mxu1 }
 0x1b6   : > { %v4947_v40 = vadd.f32 %v3754_v24, %v4851_v50  ;;  %v3757_v47 = vadd.f32 %v3756_v31, %v3755_v20  ;;  %v3821_v38 = vadd.f32 %v3820_v43, %v3819_v29  ;;  %v4950_v33 = vadd.f32 %v3818_v27, %v4854_v23 }
 0x1b8   : > { %v4953_v21 = vadd.f32 %v3757_v47, %v4857_v55  ;;  %v4956_v10 = vadd.f32 %v3821_v38, %v4860_v19 }
 0x1ba   : > { %v3758_v14 = vpop.f32.mrb[96].mxu0  ;;  %v3822_v48 = vpop.f32.mrb[96].mxu1 }
 0x1bb   : > { %v3759_v2 = vpop.f32.mrb[97].mxu0  ;;  %v3823_v57 = vpop.f32.mrb[97].mxu1 }
 0x1bc   : > { %v3760_v49 = vadd.f32 %v3759_v2, %v3758_v14  ;;  %v3824_v51 = vadd.f32 %v3823_v57, %v3822_v48  ;;  %v3761_v36 = vpop.f32.mrb[98].mxu0  ;;  %v3825_v50 = vpop.f32.mrb[98].mxu1 }
 0x1bd   : > { %v3762_v59 = vpop.f32.mrb[99].mxu0  ;;  %v3826_v61 = vpop.f32.mrb[99].mxu1 }
 0x1be   : > { %v4959_v30 = vadd.f32 %v3760_v49, %v4863_v13  ;;  %v3763_v23 = vadd.f32 %v3762_v59, %v3761_v36  ;;  %v3827_v4 = vadd.f32 %v3826_v61, %v3825_v50  ;;  %v4962_v55 = vadd.f32 %v3824_v51, %v4866_v41 }
 0x1c0   : > { %v4965_v19 = vadd.f32 %v3763_v23, %v4869_v17  ;;  %v4968_v22 = vadd.f32 %v3827_v4, %v4872_v42 }
 0x1c2   : > { %v3764_v6 = vpop.f32.mrb[100].mxu0  ;;  %v3828_v3 = vpop.f32.mrb[100].mxu1 }
 0x1c3   : > { %v3765_v8 = vpop.f32.mrb[101].mxu0  ;;  %v3829_v15 = vpop.f32.mrb[101].mxu1 }
 0x1c4   : > { %v3766_v32 = vadd.f32 %v3765_v8, %v3764_v6  ;;  %v3830_v46 = vadd.f32 %v3829_v15, %v3828_v3  ;;  %v3767_v62 = vpop.f32.mrb[102].mxu0  ;;  %v3831_v13 = vpop.f32.mrb[102].mxu1 }
 0x1c5   : > { %v3768_v53 = vpop.f32.mrb[103].mxu0  ;;  %v3832_v24 = vpop.f32.mrb[103].mxu1 }
 0x1c6   : > { %v4971_v27 = vadd.f32 %v3766_v32, %v4875_v35  ;;  %v3769_v41 = vadd.f32 %v3768_v53, %v3767_v62  ;;  %v3833_v20 = vadd.f32 %v3832_v24, %v3831_v13  ;;  %v4974_v17 = vadd.f32 %v3830_v46, %v4878_v1 }
 0x1c8   : > { %v4977_v42 = vadd.f32 %v3769_v41, %v4881_v39  ;;  %v4980_v29 = vadd.f32 %v3833_v20, %v4884_v7  ;;  %v5009_v41 = vld [vmem:[%s5126_s2] ss:$0 sm:$0xff] }
 0x1ca   : > { %v3770_v31 = vpop.f32.mrb[104].mxu0  ;;  %v3834_v43 = vpop.f32.mrb[104].mxu1 }
 0x1cb   : > { %v3771_v47 = vpop.f32.mrb[105].mxu0  ;;  %v3835_v38 = vpop.f32.mrb[105].mxu1 }
 0x1cc   : > { %v3772_v14 = vadd.f32 %v3771_v47, %v3770_v31  ;;  %v3836_v48 = vadd.f32 %v3835_v38, %v3834_v43  ;;  %v3773_v2 = vpop.f32.mrb[106].mxu0  ;;  %v3837_v35 = vpop.f32.mrb[106].mxu1 }
 0x1cd   : > { %v3774_v57 = vpop.f32.mrb[107].mxu0  ;;  %v3838_v49 = vpop.f32.mrb[107].mxu1 }
 0x1ce   : > { %v4983_v51 = vadd.f32 %v3772_v14, %v4887_v0  ;;  %v3775_v1 = vadd.f32 %v3774_v57, %v3773_v2  ;;  %v3839_v36 = vadd.f32 %v3838_v49, %v3837_v35  ;;  %v4986_v39 = vadd.f32 %v3836_v48, %v4890_v5 }
 0x1d0   : > { %v4989_v7 = vadd.f32 %v3775_v1, %v4893_v58  ;;  %v4992_v50 = vadd.f32 %v3839_v36, %v4896_v26 }
 0x1d2   : > { %v3776_v59 = vpop.f32.mrb[108].mxu0  ;;  %v3840_v61 = vpop.f32.mrb[108].mxu1 }
 0x1d3   : > { %v3777_v23 = vpop.f32.mrb[109].mxu0  ;;  %v3841_v4 = vpop.f32.mrb[109].mxu1 }
 0x1d4   : > { %v3778_v6 = vadd.f32 %v3777_v23, %v3776_v59  ;;  %v3842_v3 = vadd.f32 %v3841_v4, %v3840_v61  ;;  %v3779_v8 = vpop.f32.mrb[110].mxu0  ;;  %v3843_v0 = vpop.f32.mrb[110].mxu1 }
 0x1d5   : > { %v3780_v15 = vpop.f32.mrb[111].mxu0  ;;  %v3844_v32 = vpop.f32.mrb[111].mxu1 }
 0x1d6   : > { %v4995_v46 = vadd.f32 %v3778_v6, %v4899_v37  ;;  %v3781_v5 = vadd.f32 %v3780_v15, %v3779_v8  ;;  %v3845_v62 = vadd.f32 %v3844_v32, %v3843_v0  ;;  %v4998_v58 = vadd.f32 %v3842_v3, %v4902_v56 }
 0x1d8   : > { %v5001_v26 = vadd.f32 %v3781_v5, %v4905_v18  ;;  %v5004_v13 = vadd.f32 %v3845_v62, %v4908_v60 }
 0x1da   : > { %v3846_v53 = vpop.f32.mrb[112].mxu1  ;;  %v3936_v24 = vpop.f32.mrb[112].mxu0 }
 0x1db   : > { %v2495_v37 = vadd.f32 %v3936_v24, %v4926_v63  ;;  %v3847_v20 = vpop.f32.mrb[113].mxu1  ;;  %v2486_v31 = vpop.f32.mrb[113].mxu0 }
 0x1dc   : > { %v3848_v56 = vadd.f32 %v3847_v20, %v3846_v53  ;;  %v2487_v43 = vadd.f32 %v2486_v31, %v4914_v52  ;;  %v3849_v18 = vpop.f32.mrb[114].mxu1  ;;  %v3937_v47 = vpop.f32.mrb[114].mxu0 }
 0x1dd   : > { %v2721_v60 = vadd.f32 %v5009_v41, %v2495_v37  ;;  %v2498_v38 = vadd.f32 %v3937_v47, %v4932_v28  ;;  %v3850_v14 = vpop.f32.mrb[115].mxu1  ;;  %v2489_v48 = vpop.f32.mrb[115].mxu0 }
 0x1de   : > { %v2719_v2 = vadd.f32 %v5009_v41, %v2487_v43  ;;  %v3851_v35 = vadd.f32 %v3850_v14, %v3849_v18  ;;  %v2490_v57 = vadd.f32 %v2489_v48, %v4920_v12  ;;  %v5018_v63 = vadd.f32 %v3848_v56, %v4911_v34 }
 0x1df   : > { %v2722_v49 = vadd.f32 %v5009_v41, %v2498_v38  ;;  %v2753_v36 = vmax.f32 %v2721_v60, 0.0 }
 0x1e0   : > { %v2720_v52 = vadd.f32 %v5009_v41, %v2490_v57  ;;  %v5024_v1 = vadd.f32 %v3851_v35, %v4917_v54  ;;  %v2751_v59 = vmax.f32 %v2719_v2, 0.0 }
 0x1e1   : > { %v2754_v28 = vmax.f32 %v2722_v49, 0.0 }
 0x1e2   : > { %v2752_v12 = vmax.f32 %v2720_v52, 0.0  ;;  %v3852_v34 = vpop.f32.mrb[116].mxu1  ;;  %v3940_v61 = vpop.f32.mrb[116].mxu0 }
 0x1e3   : > { %v3359_v23 = vpack.c.bf16 %v2754_v28, %v2753_v36  ;;  %v2511_v4 = vadd.f32 %v3940_v61, %v4950_v33  ;;  %v3853_v6 = vpop.f32.mrb[117].mxu1  ;;  %v2502_v3 = vpop.f32.mrb[117].mxu0 }
 0x1e4   : > { %v3354_v54 = vpack.c.bf16 %v2752_v12, %v2751_v59  ;;  %v3854_v8 = vadd.f32 %v3853_v6, %v3852_v34  ;;  %v2503_v0 = vadd.f32 %v2502_v3, %v4938_v25  ;;  %v3855_v15 = vpop.f32.mrb[118].mxu1  ;;  %v3941_v32 = vpop.f32.mrb[118].mxu0 }
 0x1e5   : > { %3431 = vst [vmem:[%s5029_s9 + $0x8] sm:$0xff] %v3359_v23   ;;  %v2725_v5 = vadd.f32 %v5009_v41, %v2511_v4  ;;  %v2514_v62 = vadd.f32 %v3941_v32, %v4956_v10  ;;  %v3856_v53 = vpop.f32.mrb[119].mxu1  ;;  %v2505_v24 = vpop.f32.mrb[119].mxu0 }
 0x1e6   : > { %3355 = vst [vmem:[%s5029_s9] sm:$0xff] %v3354_v54   ;;  %v2723_v37 = vadd.f32 %v5009_v41, %v2503_v0  ;;  %v3857_v20 = vadd.f32 %v3856_v53, %v3855_v15  ;;  %v2506_v33 = vadd.f32 %v2505_v24, %v4944_v44  ;;  %v5040_v31 = vadd.f32 %v3854_v8, %v4923_v45 }
 0x1e7   : > { %v2726_v25 = vadd.f32 %v5009_v41, %v2514_v62  ;;  %v2757_v10 = vmax.f32 %v2725_v5, 0.0 }
 0x1e8   : > { %v2724_v56 = vadd.f32 %v5009_v41, %v2506_v33  ;;  %v5045_v43 = vadd.f32 %v3857_v20, %v4929_v16  ;;  %v2755_v47 = vmax.f32 %v2723_v37, 0.0 }
 0x1e9   : > { %v2758_v18 = vmax.f32 %v2726_v25, 0.0 }
 0x1ea   : > { %v2756_v60 = vmax.f32 %v2724_v56, 0.0  ;;  %v3858_v38 = vpop.f32.mrb[120].mxu1  ;;  %v3944_v14 = vpop.f32.mrb[120].mxu0 }
 0x1eb   : > { %v3369_v48 = vpack.c.bf16 %v2758_v18, %v2757_v10  ;;  %v2527_v44 = vadd.f32 %v3944_v14, %v4974_v17  ;;  %v3859_v45 = vpop.f32.mrb[121].mxu1  ;;  %v2518_v2 = vpop.f32.mrb[121].mxu0 }
 0x1ec   : > { %v3364_v35 = vpack.c.bf16 %v2756_v60, %v2755_v47  ;;  %v3860_v57 = vadd.f32 %v3859_v45, %v3858_v38  ;;  %v2519_v49 = vadd.f32 %v2518_v2, %v4962_v55  ;;  %v3861_v52 = vpop.f32.mrb[122].mxu1  ;;  %v3945_v16 = vpop.f32.mrb[122].mxu0 }
 0x1ed   : > { %3433 = vst [vmem:[%s5029_s9 + $0x18] sm:$0xff] %v3369_v48   ;;  %v2729_v36 = vadd.f32 %v5009_v41, %v2527_v44  ;;  %v2530_v28 = vadd.f32 %v3945_v16, %v4980_v29  ;;  %v3862_v59 = vpop.f32.mrb[123].mxu1  ;;  %v2521_v12 = vpop.f32.mrb[123].mxu0 }
 0x1ee   : > { %3432 = vst [vmem:[%s5029_s9 + $0x10] sm:$0xff] %v3364_v35   ;;  %v2727_v34 = vadd.f32 %v5009_v41, %v2519_v49  ;;  %v3863_v61 = vadd.f32 %v3862_v59, %v3861_v52  ;;  %v2522_v17 = vadd.f32 %v2521_v12, %v4968_v22  ;;  %v5056_v23 = vadd.f32 %v3860_v57, %v4935_v9 }
 0x1ef   : > { %v2730_v55 = vadd.f32 %v5009_v41, %v2530_v28  ;;  %v2761_v29 = vmax.f32 %v2729_v36, 0.0 }
 0x1f0   : > { %v2728_v4 = vadd.f32 %v5009_v41, %v2522_v17  ;;  %v5061_v6 = vadd.f32 %v3863_v61, %v4941_v11  ;;  %v2759_v54 = vmax.f32 %v2727_v34, 0.0 }
 0x1f1   : > { %v2762_v3 = vmax.f32 %v2730_v55, 0.0 }
 0x1f2   : > { %v2760_v8 = vmax.f32 %v2728_v4, 0.0  ;;  %v3864_v0 = vpop.f32.mrb[124].mxu1  ;;  %v3948_v15 = vpop.f32.mrb[124].mxu0 }
 0x1f3   : > { %v3379_v32 = vpack.c.bf16 %v2762_v3, %v2761_v29  ;;  %v2543_v22 = vadd.f32 %v3948_v15, %v4998_v58  ;;  %v3865_v9 = vpop.f32.mrb[125].mxu1  ;;  %v2534_v5 = vpop.f32.mrb[125].mxu0 }
 0x1f4   : > { %v3374_v62 = vpack.c.bf16 %v2760_v8, %v2759_v54  ;;  %v3866_v53 = vadd.f32 %v3865_v9, %v3864_v0  ;;  %v2535_v24 = vadd.f32 %v2534_v5, %v4986_v39  ;;  %v3867_v37 = vpop.f32.mrb[126].mxu1  ;;  %v3949_v11 = vpop.f32.mrb[126].mxu0 }
 0x1f5   : > { %3435 = vst [vmem:[%s5029_s9 + $0x28] sm:$0xff] %v3379_v32   ;;  %v2733_v20 = vadd.f32 %v5009_v41, %v2543_v22  ;;  %v2546_v33 = vadd.f32 %v3949_v11, %v5004_v13  ;;  %v3868_v25 = vpop.f32.mrb[127].mxu1  ;;  %v2537_v56 = vpop.f32.mrb[127].mxu0 }
 0x1f6   : > { %3434 = vst [vmem:[%s5029_s9 + $0x20] sm:$0xff] %v3374_v62   ;;  %v2731_v10 = vadd.f32 %v5009_v41, %v2535_v24  ;;  %v3869_v18 = vadd.f32 %v3868_v25, %v3867_v37  ;;  %v2538_v58 = vadd.f32 %v2537_v56, %v4992_v50  ;;  %v2414_v47 = vadd.f32 %v3866_v53, %v4947_v40 }
 0x1f7   : > { %v2734_v60 = vadd.f32 %v5009_v41, %v2546_v33  ;;  %v2765_v14 = vmax.f32 %v2733_v20, 0.0 }
 0x1f8   : > { %v2732_v39 = vadd.f32 %v5009_v41, %v2538_v58  ;;  %v2417_v38 = vadd.f32 %v3869_v18, %v4953_v21  ;;  %v2763_v13 = vmax.f32 %v2731_v10, 0.0 }
 0x1f9   : > { %v2766_v48 = vmax.f32 %v2734_v60, 0.0 }
 0x1fa   : > { %v2764_v44 = vmax.f32 %v2732_v39, 0.0  ;;  %v3870_v45 = vpop.f32.mrb[128].mxu1  ;;  %v3952_v2 = vpop.f32.mrb[128].mxu0 }
 0x1fb   : > { %v3389_v35 = vpack.c.bf16 %v2766_v48, %v2765_v14  ;;  %v2559_v57 = vadd.f32 %v3952_v2, %v5040_v31  ;;  %v3871_v50 = vpop.f32.mrb[129].mxu1  ;;  %v2550_v49 = vpop.f32.mrb[129].mxu0 }
 0x1fc   : > { %v3384_v40 = vpack.c.bf16 %v2764_v44, %v2763_v13  ;;  %v3872_v52 = vadd.f32 %v3871_v50, %v3870_v45  ;;  %v2551_v16 = vadd.f32 %v2550_v49, %v5018_v63  ;;  %v3873_v36 = vpop.f32.mrb[130].mxu1  ;;  %v3953_v28 = vpop.f32.mrb[130].mxu0 }
 0x1fd   : > { %3437 = vst [vmem:[%s5029_s9 + $0x38] sm:$0xff] %v3389_v35   ;;  %v2737_v21 = vadd.f32 %v5009_v41, %v2559_v57  ;;  %v2562_v59 = vadd.f32 %v3953_v28, %v5045_v43  ;;  %v3874_v12 = vpop.f32.mrb[131].mxu1  ;;  %v2553_v34 = vpop.f32.mrb[131].mxu0 }
 0x1fe   : > { %3436 = vst [vmem:[%s5029_s9 + $0x30] sm:$0xff] %v3384_v40   ;;  %v2735_v61 = vadd.f32 %v5009_v41, %v2551_v16  ;;  %v3875_v17 = vadd.f32 %v3874_v12, %v3873_v36  ;;  %v2554_v31 = vadd.f32 %v2553_v34, %v5024_v1  ;;  %v2422_v55 = vadd.f32 %v3872_v52, %v4959_v30 }
 0x1ff   : > { %v2738_v4 = vadd.f32 %v5009_v41, %v2562_v59  ;;  %v2769_v3 = vmax.f32 %v2737_v21, 0.0 }
 0x200   : > { %v2736_v63 = vadd.f32 %v5009_v41, %v2554_v31  ;;  %v2425_v29 = vadd.f32 %v3875_v17, %v4965_v19  ;;  %v2767_v43 = vmax.f32 %v2735_v61, 0.0 }
 0x201   : > { %v2770_v54 = vmax.f32 %v2738_v4, 0.0 }
 0x202   : > { %v2768_v8 = vmax.f32 %v2736_v63, 0.0  ;;  %v3876_v0 = vpop.f32.mrb[132].mxu1  ;;  %v3956_v15 = vpop.f32.mrb[132].mxu0 }
 0x203   : > { %v3399_v32 = vpack.c.bf16 %v2770_v54, %v2769_v3  ;;  %v2575_v22 = vadd.f32 %v3956_v15, %v2414_v47  ;;  %v3877_v9 = vpop.f32.mrb[133].mxu1  ;;  %v2566_v1 = vpop.f32.mrb[133].mxu0 }
 0x204   : > { %v3394_v5 = vpack.c.bf16 %v2768_v8, %v2767_v43  ;;  %v3878_v30 = vadd.f32 %v3877_v9, %v3876_v0  ;;  %v2567_v62 = vadd.f32 %v2566_v1, %v5056_v23  ;;  %v3879_v53 = vpop.f32.mrb[134].mxu1  ;;  %v3957_v24 = vpop.f32.mrb[134].mxu0 }
 0x205   : > { %3439 = vst [vmem:[%s5029_s9 + $0x48] sm:$0xff] %v3399_v32   ;;  %v2741_v19 = vadd.f32 %v5009_v41, %v2575_v22  ;;  %v2578_v37 = vadd.f32 %v3957_v24, %v2417_v38  ;;  %v3880_v11 = vpop.f32.mrb[135].mxu1  ;;  %v2569_v20 = vpop.f32.mrb[135].mxu0 }
 0x206   : > { %3438 = vst [vmem:[%s5029_s9 + $0x40] sm:$0xff] %v3394_v5   ;;  %v2739_v33 = vadd.f32 %v5009_v41, %v2567_v62  ;;  %v3881_v25 = vadd.f32 %v3880_v11, %v3879_v53  ;;  %v2570_v56 = vadd.f32 %v2569_v20, %v5061_v6  ;;  %v2430_v10 = vadd.f32 %v3878_v30, %v4971_v27 }
 0x207   : > { %v2742_v18 = vadd.f32 %v5009_v41, %v2578_v37  ;;  %v2773_v47 = vmax.f32 %v2741_v19, 0.0 }
 0x208   : > { %v2740_v23 = vadd.f32 %v5009_v41, %v2570_v56  ;;  %v2433_v58 = vadd.f32 %v3881_v25, %v4977_v42  ;;  %v2771_v39 = vmax.f32 %v2739_v33, 0.0 }
 0x209   : > { %v2774_v60 = vmax.f32 %v2742_v18, 0.0 }
 0x20a   : > { %v2772_v38 = vmax.f32 %v2740_v23, 0.0  ;;  %v3882_v14 = vpop.f32.mrb[136].mxu1  ;;  %v3960_v48 = vpop.f32.mrb[136].mxu0 }
 0x20b   : > { %v3409_v13 = vpack.c.bf16 %v2774_v60, %v2773_v47  ;;  %v2591_v44 = vadd.f32 %v3960_v48, %v2430_v10  ;;  %v3883_v45 = vpop.f32.mrb[137].mxu1  ;;  %v2582_v6 = vpop.f32.mrb[137].mxu0 }
 0x20c   : > { %v3404_v2 = vpack.c.bf16 %v2772_v38, %v2771_v39  ;;  %v3884_v27 = vadd.f32 %v3883_v45, %v3882_v14  ;;  %v2583_v35 = vadd.f32 %v2582_v6, %v2422_v55  ;;  %v3885_v57 = vpop.f32.mrb[138].mxu1  ;;  %v3961_v50 = vpop.f32.mrb[138].mxu0 }
 0x20d   : > { %3441 = vst [vmem:[%s5029_s9 + $0x58] sm:$0xff] %v3409_v13   ;;  %v2745_v42 = vadd.f32 %v5009_v41, %v2591_v44  ;;  %v2594_v49 = vadd.f32 %v3961_v50, %v2433_v58  ;;  %v3886_v40 = vpop.f32.mrb[139].mxu1  ;;  %v2585_v52 = vpop.f32.mrb[139].mxu0 }
 0x20e   : > { %3440 = vst [vmem:[%s5029_s9 + $0x50] sm:$0xff] %v3404_v2   ;;  %v2743_v16 = vadd.f32 %v5009_v41, %v2583_v35  ;;  %v3887_v36 = vadd.f32 %v3886_v40, %v3885_v57  ;;  %v2586_v28 = vadd.f32 %v2585_v52, %v2425_v29  ;;  %v2438_v21 = vadd.f32 %v3884_v27, %v4983_v51 }
 0x20f   : > { %v2746_v59 = vadd.f32 %v5009_v41, %v2594_v49  ;;  %v2777_v61 = vmax.f32 %v2745_v42, 0.0 }
 0x210   : > { %v2744_v12 = vadd.f32 %v5009_v41, %v2586_v28  ;;  %v2441_v34 = vadd.f32 %v3887_v36, %v4989_v7  ;;  %v2775_v31 = vmax.f32 %v2743_v16, 0.0 }
 0x211   : > { %v2778_v17 = vmax.f32 %v2746_v59, 0.0 }
 0x212   : > { %v2776_v55 = vmax.f32 %v2744_v12, 0.0  ;;  %v3888_v4 = vpop.f32.mrb[140].mxu1  ;;  %v3964_v63 = vpop.f32.mrb[140].mxu0 }
 0x213   : > { %v3419_v3 = vpack.c.bf16 %v2778_v17, %v2777_v61  ;;  %v3889_v54 = vpop.f32.mrb[141].mxu1  ;;  %v2598_v43 = vpop.f32.mrb[141].mxu0 }
 0x214   : > { %v3414_v29 = vpack.c.bf16 %v2776_v55, %v2775_v31  ;;  %v3890_v8 = vadd.f32 %v3889_v54, %v3888_v4  ;;  %v2599_v51 = vadd.f32 %v2598_v43, %v2438_v21  ;;  %v3891_v0 = vpop.f32.mrb[142].mxu1  ;;  %v3965_v15 = vpop.f32.mrb[142].mxu0 }
 0x215   : > { %3443 = vst [vmem:[%s5029_s9 + $0x68] sm:$0xff] %v3419_v3   ;;  %v3892_v32 = vpop.f32.mrb[143].mxu1  ;;  %v2601_v22 = vpop.f32.mrb[143].mxu0 }
 0x216   : > { %3442 = vst [vmem:[%s5029_s9 + $0x60] sm:$0xff] %v3414_v29   ;;  %v2446_v7 = vadd.f32 %v3890_v8, %v4995_v46  ;;  %v2747_v9 = vadd.f32 %v5009_v41, %v2599_v51  ;;  %v3893_v1 = vadd.f32 %v3892_v32, %v3891_v0  ;;  %v2602_v5 = vadd.f32 %v2601_v22, %v2441_v34 }
 0x218   : > { %v2607_v30 = vadd.f32 %v3964_v63, %v2446_v7  ;;  %v2449_v62 = vadd.f32 %v3893_v1, %v5001_v26  ;;  %v2748_v53 = vadd.f32 %v5009_v41, %v2602_v5  ;;  %v2779_v19 = vmax.f32 %v2747_v9, 0.0 }
 0x21a   : > { %v2749_v24 = vadd.f32 %v5009_v41, %v2607_v30  ;;  %v2610_v37 = vadd.f32 %v3965_v15, %v2449_v62  ;;  %v2780_v11 = vmax.f32 %v2748_v53, 0.0 }
 0x21c   : > { %v2750_v20 = vadd.f32 %v5009_v41, %v2610_v37  ;;  %v3424_v33 = vpack.c.bf16 %v2780_v11, %v2779_v19  ;;  %v2781_v25 = vmax.f32 %v2749_v24, 0.0 }
 0x21e   : > { %v2782_v46 = vmax.f32 %v2750_v20, 0.0  ;;  %3444 = vst [vmem:[%s5029_s9 + $0x70] sm:$0xff] %v3424_v33  }
 0x220   : > { %v3429_v56 = vpack.c.bf16 %v2782_v46, %v2781_v25 }
 0x222   : > { %3445 = vst [vmem:[%s5029_s9 + $0x78] sm:$0xff] %v3429_v56  }
 0x223 PF: > { %s13_s14 = sadd.s32 1, %s4309_s14   ;;  %s5128_s12 = smov %s4305_s13 }
 0x224   : > { %p10_p5 = scmp.ge.s32.totalorder %s13_s14, 4   ;;  %s5129_s13 = smov %s5131_s15 }
 0x226   :  { %12 = sbr.rel (!%p10_p5) target bundleno = 2 (0x2), region = 76 }

// kernel: encoder_forward.18
= control target key start
LH: loop header
LB: loop body
LE: loop exit
PB: predicated region body
PF: predicated region fallthrough
CT: control target
= control target key end

     0   :  { %s3624_s12 = smov 0   ;;  %s3626_s13 = smov 0   ;;  %s4415_s0 = inlined_call_operand.vmem [shape: bf16[128,1152], index: 0, kind: input, shape index: {}]   ;;  %s4416_s1 = inlined_call_operand.vmem [shape: bf16[1152,256], index: 1, kind: input, shape index: {}]   ;;  %s4417_s2 = inlined_call_operand.vmem [shape: f32[1,256], index: 2, kind: input, shape index: {}]   ;;  %s4418_s3 = inlined_call_operand.vmem [shape: bf16[128,256], index: 3, kind: output, shape index: {}]  }
   0x1   :  { %s3628_s14 = smov 0   ;;  %s3630_s15 = smov 0  }
   0x2   :  { %s3632_s16 = smov 0  }
   0x3 LB: > { %s28_s17 = sadd.s32 1, %s3598_s15  ;;  %s2790_s18 = sadd.s32 4294967295, %s3602_s16   ;;  %s3602_s16 = sphi %s3632_s16, %s13_s16   ;;  %s3598_s15 = sphi %s3630_s15, %s4423_s15   ;;  %s3594_s14 = sphi %s3628_s14, %s4422_s14   ;;  %s3590_s13 = sphi %s3626_s13, %s4421_s13   ;;  %s3586_s12 = sphi %s3624_s12, %s4420_s12  }
   0x4   : > { %p30_p0 = scmp.ge.s32.totalorder %s28_s17, 2  ;;  %p76_p1 = scmp.ne.s32.totalorder %s3590_s13, %s3586_s12 }
   0x5   : > { %p77_p2 = scmp.eq.s32.totalorder %s3602_s16, 0  ;;  %p134_p4 = scmp.eq.s32.totalorder %s2790_s18, 1 }
   0x6   : > { %s4425_s17 = smov (%p30_p0, %s28_s17), 0  ;;  %s69_s20 = sadd.s32 1, %s3590_s13 }
   0x7   : > { %p78_p3 = por %p77_p2, %p76_p1  ;;  %s65_s19 = ssub.s32 %s3598_s15, %s4425_s17 }
   0x8   : > { %p67_p5 = scmp.eq.s32.totalorder %s65_s19, 0  ;;  %p3659_p6 = por %p134_p4, %p76_p1 }
   0x9   : > { %p2794_p7 = scmp.ge.s32.totalorder %s3602_s16, 2 }
   0xa   : > { %s3664_s22 = scalar_select %p67_p5, %s3590_s13, %s69_s20  }
   0xb   : > { %171 = sbr.rel (%p2794_p7) target bundleno = 118 (0x76), region = 20 }
  0x12   : > { %174 = sbr.rel (!%p78_p3) target bundleno = 118 (0x76), region = 24  ;;  %s176_s23 = sand.u32 (%p78_p3), 1, %s3590_s13  }
  0x13   : > { %s2795_s24 = sshll.u32 (%p78_p3), %s3598_s15, 2  ;;  %s3346_s25 = smul.u32 (%p78_p3), 576, %s176_s23 }
  0x14   : > { %s3672_s28 = scalar_lea.vmem (%p78_p3), %s4416_s1, %s2795_s24 }
  0x15   : > { %v199_v0 = vld [vmem:[%s3672_s28] sm:$0xf] (%p78_p3)  ;;  %v201_v1 = vld [vmem:[%s3672_s28 + $0x8] sm:$0xf] (%p78_p3)  ;;  %v203_v2 = vld [vmem:[%s3672_s28 + $0x10] sm:$0xf] (%p78_p3) }
  0x16   : > { %v205_v3 = vld [vmem:[%s3672_s28 + $0x18] sm:$0xf] (%p78_p3)  ;;  %v207_v4 = vld [vmem:[%s3672_s28 + $0x20] sm:$0xf] (%p78_p3)  ;;  %s3679_s29 = scalar_lea.vmem (%p78_p3), [#allocation3], %s3346_s25 }
  0x17   : > { %200 = vst [vmem:[%s3679_s29] sm:$0xf] (%p78_p3), %v199_v0  ;;  %202 = vst [vmem:[%s3679_s29 + $0x4] sm:$0xf] (%p78_p3), %v201_v1  ;;  %v209_v5 = vld [vmem:[%s3672_s28 + $0x28] sm:$0xf] (%p78_p3) }
  0x18   : > { %204 = vst [vmem:[%s3679_s29 + $0x8] sm:$0xf] (%p78_p3), %v203_v2  ;;  %206 = vst [vmem:[%s3679_s29 + $0xc] sm:$0xf] (%p78_p3), %v205_v3  ;;  %v211_v6 = vld [vmem:[%s3672_s28 + $0x30] sm:$0xf] (%p78_p3) }
  0x19   : > { %208 = vst [vmem:[%s3679_s29 + $0x10] sm:$0xf] %v207_v4  ;;  %v213_v7 = vld [vmem:[%s3672_s28 + $0x38] sm:$0xf]  ;;  %210 = vst [vmem:[%s3679_s29 + $0x14] sm:$0xf] %v209_v5 }
  0x1a   : > { %212 = vst [vmem:[%s3679_s29 + $0x18] sm:$0xf] %v211_v6  ;;  %214 = vst [vmem:[%s3679_s29 + $0x1c] sm:$0xf] %v213_v7  ;;  %v215_v8 = vld [vmem:[%s3672_s28 + $0x40] sm:$0xf] }
  0x1b   : > { %v217_v9 = vld [vmem:[%s3672_s28 + $0x48] sm:$0xf]  ;;  %v219_v10 = vld [vmem:[%s3672_s28 + $0x50] sm:$0xf]  ;;  %216 = vst [vmem:[%s3679_s29 + $0x20] sm:$0xf] %v215_v8 }
  0x1c   : > { %218 = vst [vmem:[%s3679_s29 + $0x24] sm:$0xf] %v217_v9  ;;  %220 = vst [vmem:[%s3679_s29 + $0x28] sm:$0xf] %v219_v10  ;;  %v221_v11 = vld [vmem:[%s3672_s28 + $0x58] sm:$0xf] }
  0x1d   : > { %v223_v12 = vld [vmem:[%s3672_s28 + $0x60] sm:$0xf]  ;;  %v225_v13 = vld [vmem:[%s3672_s28 + $0x68] sm:$0xf]  ;;  %222 = vst [vmem:[%s3679_s29 + $0x2c] sm:$0xf] %v221_v11 }
  0x1e   : > { %224 = vst [vmem:[%s3679_s29 + $0x30] sm:$0xf] %v223_v12  ;;  %226 = vst [vmem:[%s3679_s29 + $0x34] sm:$0xf] %v225_v13  ;;  %v227_v14 = vld [vmem:[%s3672_s28 + $0x70] sm:$0xf] }
  0x1f   : > { %v229_v15 = vld [vmem:[%s3672_s28 + $0x78] sm:$0xf]  ;;  %v231_v16 = vld [vmem:[%s3672_s28 + $0x80] sm:$0xf]  ;;  %228 = vst [vmem:[%s3679_s29 + $0x38] sm:$0xf] %v227_v14 }
  0x20   : > { %230 = vst [vmem:[%s3679_s29 + $0x3c] sm:$0xf] %v229_v15  ;;  %232 = vst [vmem:[%s3679_s29 + $0x40] sm:$0xf] %v231_v16  ;;  %v233_v17 = vld [vmem:[%s3672_s28 + $0x88] sm:$0xf] }
  0x21   : > { %v235_v18 = vld [vmem:[%s3672_s28 + $0x90] sm:$0xf]  ;;  %v237_v19 = vld [vmem:[%s3672_s28 + $0x98] sm:$0xf]  ;;  %234 = vst [vmem:[%s3679_s29 + $0x44] sm:$0xf] %v233_v17 }
  0x22   : > { %236 = vst [vmem:[%s3679_s29 + $0x48] sm:$0xf] %v235_v18  ;;  %238 = vst [vmem:[%s3679_s29 + $0x4c] sm:$0xf] %v237_v19  ;;  %v239_v20 = vld [vmem:[%s3672_s28 + $0xa0] sm:$0xf] }
  0x23   : > { %v241_v21 = vld [vmem:[%s3672_s28 + $0xa8] sm:$0xf]  ;;  %v243_v22 = vld [vmem:[%s3672_s28 + $0xb0] sm:$0xf]  ;;  %240 = vst [vmem:[%s3679_s29 + $0x50] sm:$0xf] %v239_v20 }
  0x24   : > { %242 = vst [vmem:[%s3679_s29 + $0x54] sm:$0xf] %v241_v21  ;;  %244 = vst [vmem:[%s3679_s29 + $0x58] sm:$0xf] %v243_v22  ;;  %v245_v23 = vld [vmem:[%s3672_s28 + $0xb8] sm:$0xf] }
  0x25   : > { %v247_v24 = vld [vmem:[%s3672_s28 + $0xc0] sm:$0xf]  ;;  %v249_v25 = vld [vmem:[%s3672_s28 + $0xc8] sm:$0xf]  ;;  %246 = vst [vmem:[%s3679_s29 + $0x5c] sm:$0xf] %v245_v23 }
  0x26   : > { %248 = vst [vmem:[%s3679_s29 + $0x60] sm:$0xf] %v247_v24  ;;  %250 = vst [vmem:[%s3679_s29 + $0x64] sm:$0xf] %v249_v25  ;;  %v251_v26 = vld [vmem:[%s3672_s28 + $0xd0] sm:$0xf] }
  0x27   : > { %v253_v27 = vld [vmem:[%s3672_s28 + $0xd8] sm:$0xf]  ;;  %v255_v28 = vld [vmem:[%s3672_s28 + $0xe0] sm:$0xf]  ;;  %252 = vst [vmem:[%s3679_s29 + $0x68] sm:$0xf] %v251_v26 }
  0x28   : > { %254 = vst [vmem:[%s3679_s29 + $0x6c] sm:$0xf] %v253_v27  ;;  %256 = vst [vmem:[%s3679_s29 + $0x70] sm:$0xf] %v255_v28  ;;  %v257_v29 = vld [vmem:[%s3672_s28 + $0xe8] sm:$0xf] }
  0x29   : > { %v259_v30 = vld [vmem:[%s3672_s28 + $0xf0] sm:$0xf]  ;;  %v261_v31 = vld [vmem:[%s3672_s28 + $0xf8] sm:$0xf]  ;;  %258 = vst [vmem:[%s3679_s29 + $0x74] sm:$0xf] %v257_v29 }
  0x2a   : > { %260 = vst [vmem:[%s3679_s29 + $0x78] sm:$0xf] %v259_v30  ;;  %262 = vst [vmem:[%s3679_s29 + $0x7c] sm:$0xf] %v261_v31  ;;  %v263_v32 = vld [vmem:[%s3672_s28 + $0x100] sm:$0xf] }
  0x2b   : > { %v265_v33 = vld [vmem:[%s3672_s28 + $0x108] sm:$0xf]  ;;  %v267_v34 = vld [vmem:[%s3672_s28 + $0x110] sm:$0xf]  ;;  %264 = vst [vmem:[%s3679_s29 + $0x80] sm:$0xf] %v263_v32 }
  0x2c   : > { %266 = vst [vmem:[%s3679_s29 + $0x84] sm:$0xf] %v265_v33  ;;  %268 = vst [vmem:[%s3679_s29 + $0x88] sm:$0xf] %v267_v34  ;;  %v269_v35 = vld [vmem:[%s3672_s28 + $0x118] sm:$0xf] }
  0x2d   : > { %v271_v36 = vld [vmem:[%s3672_s28 + $0x120] sm:$0xf]  ;;  %v273_v37 = vld [vmem:[%s3672_s28 + $0x128] sm:$0xf]  ;;  %270 = vst [vmem:[%s3679_s29 + $0x8c] sm:$0xf] %v269_v35 }
  0x2e   : > { %272 = vst [vmem:[%s3679_s29 + $0x90] sm:$0xf] %v271_v36  ;;  %274 = vst [vmem:[%s3679_s29 + $0x94] sm:$0xf] %v273_v37  ;;  %v275_v38 = vld [vmem:[%s3672_s28 + $0x130] sm:$0xf] }
  0x2f   : > { %v277_v39 = vld [vmem:[%s3672_s28 + $0x138] sm:$0xf]  ;;  %v279_v40 = vld [vmem:[%s3672_s28 + $0x140] sm:$0xf]  ;;  %276 = vst [vmem:[%s3679_s29 + $0x98] sm:$0xf] %v275_v38 }
  0x30   : > { %278 = vst [vmem:[%s3679_s29 + $0x9c] sm:$0xf] %v277_v39  ;;  %280 = vst [vmem:[%s3679_s29 + $0xa0] sm:$0xf] %v279_v40  ;;  %v281_v41 = vld [vmem:[%s3672_s28 + $0x148] sm:$0xf] }
  0x31   : > { %v283_v42 = vld [vmem:[%s3672_s28 + $0x150] sm:$0xf]  ;;  %v285_v43 = vld [vmem:[%s3672_s28 + $0x158] sm:$0xf]  ;;  %282 = vst [vmem:[%s3679_s29 + $0xa4] sm:$0xf] %v281_v41 }
  0x32   : > { %284 = vst [vmem:[%s3679_s29 + $0xa8] sm:$0xf] %v283_v42  ;;  %286 = vst [vmem:[%s3679_s29 + $0xac] sm:$0xf] %v285_v43  ;;  %v287_v44 = vld [vmem:[%s3672_s28 + $0x160] sm:$0xf] }
  0x33   : > { %v289_v45 = vld [vmem:[%s3672_s28 + $0x168] sm:$0xf]  ;;  %v291_v46 = vld [vmem:[%s3672_s28 + $0x170] sm:$0xf]  ;;  %288 = vst [vmem:[%s3679_s29 + $0xb0] sm:$0xf] %v287_v44 }
  0x34   : > { %290 = vst [vmem:[%s3679_s29 + $0xb4] sm:$0xf] %v289_v45  ;;  %292 = vst [vmem:[%s3679_s29 + $0xb8] sm:$0xf] %v291_v46  ;;  %v293_v47 = vld [vmem:[%s3672_s28 + $0x178] sm:$0xf] }
  0x35   : > { %v295_v48 = vld [vmem:[%s3672_s28 + $0x180] sm:$0xf]  ;;  %v297_v49 = vld [vmem:[%s3672_s28 + $0x188] sm:$0xf]  ;;  %294 = vst [vmem:[%s3679_s29 + $0xbc] sm:$0xf] %v293_v47 }
  0x36   : > { %296 = vst [vmem:[%s3679_s29 + $0xc0] sm:$0xf] %v295_v48  ;;  %298 = vst [vmem:[%s3679_s29 + $0xc4] sm:$0xf] %v297_v49  ;;  %v299_v50 = vld [vmem:[%s3672_s28 + $0x190] sm:$0xf] }
  0x37   : > { %v301_v51 = vld [vmem:[%s3672_s28 + $0x198] sm:$0xf]  ;;  %v303_v52 = vld [vmem:[%s3672_s28 + $0x1a0] sm:$0xf]  ;;  %300 = vst [vmem:[%s3679_s29 + $0xc8] sm:$0xf] %v299_v50 }
  0x38   : > { %302 = vst [vmem:[%s3679_s29 + $0xcc] sm:$0xf] %v301_v51  ;;  %304 = vst [vmem:[%s3679_s29 + $0xd0] sm:$0xf] %v303_v52  ;;  %v305_v53 = vld [vmem:[%s3672_s28 + $0x1a8] sm:$0xf] }
  0x39   : > { %v307_v54 = vld [vmem:[%s3672_s28 + $0x1b0] sm:$0xf]  ;;  %v309_v55 = vld [vmem:[%s3672_s28 + $0x1b8] sm:$0xf]  ;;  %306 = vst [vmem:[%s3679_s29 + $0xd4] sm:$0xf] %v305_v53 }
  0x3a   : > { %308 = vst [vmem:[%s3679_s29 + $0xd8] sm:$0xf] %v307_v54  ;;  %310 = vst [vmem:[%s3679_s29 + $0xdc] sm:$0xf] %v309_v55  ;;  %v311_v56 = vld [vmem:[%s3672_s28 + $0x1c0] sm:$0xf] }
  0x3b   : > { %v313_v57 = vld [vmem:[%s3672_s28 + $0x1c8] sm:$0xf]  ;;  %v315_v58 = vld [vmem:[%s3672_s28 + $0x1d0] sm:$0xf]  ;;  %312 = vst [vmem:[%s3679_s29 + $0xe0] sm:$0xf] %v311_v56 }
  0x3c   : > { %314 = vst [vmem:[%s3679_s29 + $0xe4] sm:$0xf] %v313_v57  ;;  %316 = vst [vmem:[%s3679_s29 + $0xe8] sm:$0xf] %v315_v58  ;;  %v317_v59 = vld [vmem:[%s3672_s28 + $0x1d8] sm:$0xf] }
  0x3d   : > { %v319_v60 = vld [vmem:[%s3672_s28 + $0x1e0] sm:$0xf]  ;;  %v321_v61 = vld [vmem:[%s3672_s28 + $0x1e8] sm:$0xf]  ;;  %318 = vst [vmem:[%s3679_s29 + $0xec] sm:$0xf] %v317_v59 }
  0x3e   : > { %320 = vst [vmem:[%s3679_s29 + $0xf0] sm:$0xf] %v319_v60  ;;  %322 = vst [vmem:[%s3679_s29 + $0xf4] sm:$0xf] %v321_v61  ;;  %v323_v62 = vld [vmem:[%s3672_s28 + $0x1f0] sm:$0xf] }
  0x3f   : > { %v325_v63 = vld [vmem:[%s3672_s28 + $0x1f8] sm:$0xf]  ;;  %v327_v0 = vld [vmem:[%s3672_s28 + $0x200] sm:$0xf]  ;;  %324 = vst [vmem:[%s3679_s29 + $0xf8] sm:$0xf] %v323_v62 }
  0x40   : > { %326 = vst [vmem:[%s3679_s29 + $0xfc] sm:$0xf] %v325_v63  ;;  %328 = vst [vmem:[%s3679_s29 + $0x100] sm:$0xf] %v327_v0  ;;  %v329_v1 = vld [vmem:[%s3672_s28 + $0x208] sm:$0xf] }
  0x41   : > { %v331_v2 = vld [vmem:[%s3672_s28 + $0x210] sm:$0xf]  ;;  %v333_v3 = vld [vmem:[%s3672_s28 + $0x218] sm:$0xf]  ;;  %330 = vst [vmem:[%s3679_s29 + $0x104] sm:$0xf] %v329_v1 }
  0x42   : > { %332 = vst [vmem:[%s3679_s29 + $0x108] sm:$0xf] %v331_v2  ;;  %334 = vst [vmem:[%s3679_s29 + $0x10c] sm:$0xf] %v333_v3  ;;  %v335_v4 = vld [vmem:[%s3672_s28 + $0x220] sm:$0xf] }
  0x43   : > { %v337_v5 = vld [vmem:[%s3672_s28 + $0x228] sm:$0xf]  ;;  %v339_v6 = vld [vmem:[%s3672_s28 + $0x230] sm:$0xf]  ;;  %336 = vst [vmem:[%s3679_s29 + $0x110] sm:$0xf] %v335_v4 }
  0x44   : > { %338 = vst [vmem:[%s3679_s29 + $0x114] sm:$0xf] %v337_v5  ;;  %340 = vst [vmem:[%s3679_s29 + $0x118] sm:$0xf] %v339_v6  ;;  %v341_v7 = vld [vmem:[%s3672_s28 + $0x238] sm:$0xf] }
  0x45   : > { %v343_v8 = vld [vmem:[%s3672_s28 + $0x240] sm:$0xf]  ;;  %v345_v9 = vld [vmem:[%s3672_s28 + $0x248] sm:$0xf]  ;;  %342 = vst [vmem:[%s3679_s29 + $0x11c] sm:$0xf] %v341_v7 }
  0x46   : > { %344 = vst [vmem:[%s3679_s29 + $0x120] sm:$0xf] %v343_v8  ;;  %346 = vst [vmem:[%s3679_s29 + $0x124] sm:$0xf] %v345_v9  ;;  %v347_v10 = vld [vmem:[%s3672_s28 + $0x250] sm:$0xf] }
  0x47   : > { %v349_v11 = vld [vmem:[%s3672_s28 + $0x258] sm:$0xf]  ;;  %v351_v12 = vld [vmem:[%s3672_s28 + $0x260] sm:$0xf]  ;;  %348 = vst [vmem:[%s3679_s29 + $0x128] sm:$0xf] %v347_v10 }
  0x48   : > { %350 = vst [vmem:[%s3679_s29 + $0x12c] sm:$0xf] %v349_v11  ;;  %352 = vst [vmem:[%s3679_s29 + $0x130] sm:$0xf] %v351_v12  ;;  %v353_v13 = vld [vmem:[%s3672_s28 + $0x268] sm:$0xf] }
  0x49   : > { %v355_v14 = vld [vmem:[%s3672_s28 + $0x270] sm:$0xf]  ;;  %v357_v15 = vld [vmem:[%s3672_s28 + $0x278] sm:$0xf]  ;;  %354 = vst [vmem:[%s3679_s29 + $0x134] sm:$0xf] %v353_v13 }
  0x4a   : > { %356 = vst [vmem:[%s3679_s29 + $0x138] sm:$0xf] %v355_v14  ;;  %358 = vst [vmem:[%s3679_s29 + $0x13c] sm:$0xf] %v357_v15  ;;  %v359_v16 = vld [vmem:[%s3672_s28 + $0x280] sm:$0xf] }
  0x4b   : > { %v361_v17 = vld [vmem:[%s3672_s28 + $0x288] sm:$0xf]  ;;  %v363_v18 = vld [vmem:[%s3672_s28 + $0x290] sm:$0xf]  ;;  %360 = vst [vmem:[%s3679_s29 + $0x140] sm:$0xf] %v359_v16 }
  0x4c   : > { %362 = vst [vmem:[%s3679_s29 + $0x144] sm:$0xf] %v361_v17  ;;  %364 = vst [vmem:[%s3679_s29 + $0x148] sm:$0xf] %v363_v18  ;;  %v365_v19 = vld [vmem:[%s3672_s28 + $0x298] sm:$0xf] }
  0x4d   : > { %v367_v20 = vld [vmem:[%s3672_s28 + $0x2a0] sm:$0xf]  ;;  %v369_v21 = vld [vmem:[%s3672_s28 + $0x2a8] sm:$0xf]  ;;  %366 = vst [vmem:[%s3679_s29 + $0x14c] sm:$0xf] %v365_v19 }
  0x4e   : > { %368 = vst [vmem:[%s3679_s29 + $0x150] sm:$0xf] %v367_v20  ;;  %370 = vst [vmem:[%s3679_s29 + $0x154] sm:$0xf] %v369_v21  ;;  %v371_v22 = vld [vmem:[%s3672_s28 + $0x2b0] sm:$0xf] }
  0x4f   : > { %v373_v23 = vld [vmem:[%s3672_s28 + $0x2b8] sm:$0xf]  ;;  %v375_v24 = vld [vmem:[%s3672_s28 + $0x2c0] sm:$0xf]  ;;  %372 = vst [vmem:[%s3679_s29 + $0x158] sm:$0xf] %v371_v22 }
  0x50   : > { %374 = vst [vmem:[%s3679_s29 + $0x15c] sm:$0xf] %v373_v23  ;;  %376 = vst [vmem:[%s3679_s29 + $0x160] sm:$0xf] %v375_v24  ;;  %v377_v25 = vld [vmem:[%s3672_s28 + $0x2c8] sm:$0xf] }
  0x51   : > { %v379_v26 = vld [vmem:[%s3672_s28 + $0x2d0] sm:$0xf]  ;;  %v381_v27 = vld [vmem:[%s3672_s28 + $0x2d8] sm:$0xf]  ;;  %378 = vst [vmem:[%s3679_s29 + $0x164] sm:$0xf] %v377_v25 }
  0x52   : > { %380 = vst [vmem:[%s3679_s29 + $0x168] sm:$0xf] %v379_v26  ;;  %382 = vst [vmem:[%s3679_s29 + $0x16c] sm:$0xf] %v381_v27  ;;  %v383_v28 = vld [vmem:[%s3672_s28 + $0x2e0] sm:$0xf] }
  0x53   : > { %v385_v29 = vld [vmem:[%s3672_s28 + $0x2e8] sm:$0xf]  ;;  %v387_v30 = vld [vmem:[%s3672_s28 + $0x2f0] sm:$0xf]  ;;  %384 = vst [vmem:[%s3679_s29 + $0x170] sm:$0xf] %v383_v28 }
  0x54   : > { %386 = vst [vmem:[%s3679_s29 + $0x174] sm:$0xf] %v385_v29  ;;  %388 = vst [vmem:[%s3679_s29 + $0x178] sm:$0xf] %v387_v30  ;;  %v389_v31 = vld [vmem:[%s3672_s28 + $0x2f8] sm:$0xf] }
  0x55   : > { %v391_v32 = vld [vmem:[%s3672_s28 + $0x300] sm:$0xf]  ;;  %v393_v33 = vld [vmem:[%s3672_s28 + $0x308] sm:$0xf]  ;;  %390 = vst [vmem:[%s3679_s29 + $0x17c] sm:$0xf] %v389_v31 }
  0x56   : > { %392 = vst [vmem:[%s3679_s29 + $0x180] sm:$0xf] %v391_v32  ;;  %394 = vst [vmem:[%s3679_s29 + $0x184] sm:$0xf] %v393_v33  ;;  %v395_v34 = vld [vmem:[%s3672_s28 + $0x310] sm:$0xf] }
  0x57   : > { %v397_v35 = vld [vmem:[%s3672_s28 + $0x318] sm:$0xf]  ;;  %v399_v36 = vld [vmem:[%s3672_s28 + $0x320] sm:$0xf]  ;;  %396 = vst [vmem:[%s3679_s29 + $0x188] sm:$0xf] %v395_v34 }
  0x58   : > { %398 = vst [vmem:[%s3679_s29 + $0x18c] sm:$0xf] %v397_v35  ;;  %400 = vst [vmem:[%s3679_s29 + $0x190] sm:$0xf] %v399_v36  ;;  %v401_v37 = vld [vmem:[%s3672_s28 + $0x328] sm:$0xf] }
  0x59   : > { %v403_v38 = vld [vmem:[%s3672_s28 + $0x330] sm:$0xf]  ;;  %v405_v39 = vld [vmem:[%s3672_s28 + $0x338] sm:$0xf]  ;;  %402 = vst [vmem:[%s3679_s29 + $0x194] sm:$0xf] %v401_v37 }
  0x5a   : > { %404 = vst [vmem:[%s3679_s29 + $0x198] sm:$0xf] %v403_v38  ;;  %406 = vst [vmem:[%s3679_s29 + $0x19c] sm:$0xf] %v405_v39  ;;  %v407_v40 = vld [vmem:[%s3672_s28 + $0x340] sm:$0xf] }
  0x5b   : > { %v409_v41 = vld [vmem:[%s3672_s28 + $0x348] sm:$0xf]  ;;  %v411_v42 = vld [vmem:[%s3672_s28 + $0x350] sm:$0xf]  ;;  %408 = vst [vmem:[%s3679_s29 + $0x1a0] sm:$0xf] %v407_v40 }
  0x5c   : > { %410 = vst [vmem:[%s3679_s29 + $0x1a4] sm:$0xf] %v409_v41  ;;  %412 = vst [vmem:[%s3679_s29 + $0x1a8] sm:$0xf] %v411_v42  ;;  %v413_v43 = vld [vmem:[%s3672_s28 + $0x358] sm:$0xf] }
  0x5d   : > { %v415_v44 = vld [vmem:[%s3672_s28 + $0x360] sm:$0xf]  ;;  %v417_v45 = vld [vmem:[%s3672_s28 + $0x368] sm:$0xf]  ;;  %414 = vst [vmem:[%s3679_s29 + $0x1ac] sm:$0xf] %v413_v43 }
  0x5e   : > { %416 = vst [vmem:[%s3679_s29 + $0x1b0] sm:$0xf] %v415_v44  ;;  %418 = vst [vmem:[%s3679_s29 + $0x1b4] sm:$0xf] %v417_v45  ;;  %v419_v46 = vld [vmem:[%s3672_s28 + $0x370] sm:$0xf] }
  0x5f   : > { %v421_v47 = vld [vmem:[%s3672_s28 + $0x378] sm:$0xf]  ;;  %v423_v48 = vld [vmem:[%s3672_s28 + $0x380] sm:$0xf]  ;;  %420 = vst [vmem:[%s3679_s29 + $0x1b8] sm:$0xf] %v419_v46 }
  0x60   : > { %422 = vst [vmem:[%s3679_s29 + $0x1bc] sm:$0xf] %v421_v47  ;;  %424 = vst [vmem:[%s3679_s29 + $0x1c0] sm:$0xf] %v423_v48  ;;  %v425_v49 = vld [vmem:[%s3672_s28 + $0x388] sm:$0xf] }
  0x61   : > { %v427_v50 = vld [vmem:[%s3672_s28 + $0x390] sm:$0xf]  ;;  %v429_v51 = vld [vmem:[%s3672_s28 + $0x398] sm:$0xf]  ;;  %426 = vst [vmem:[%s3679_s29 + $0x1c4] sm:$0xf] %v425_v49 }
  0x62   : > { %428 = vst [vmem:[%s3679_s29 + $0x1c8] sm:$0xf] %v427_v50  ;;  %430 = vst [vmem:[%s3679_s29 + $0x1cc] sm:$0xf] %v429_v51  ;;  %v431_v52 = vld [vmem:[%s3672_s28 + $0x3a0] sm:$0xf] }
  0x63   : > { %v433_v53 = vld [vmem:[%s3672_s28 + $0x3a8] sm:$0xf]  ;;  %v435_v54 = vld [vmem:[%s3672_s28 + $0x3b0] sm:$0xf]  ;;  %432 = vst [vmem:[%s3679_s29 + $0x1d0] sm:$0xf] %v431_v52 }
  0x64   : > { %434 = vst [vmem:[%s3679_s29 + $0x1d4] sm:$0xf] %v433_v53  ;;  %436 = vst [vmem:[%s3679_s29 + $0x1d8] sm:$0xf] %v435_v54  ;;  %v437_v55 = vld [vmem:[%s3672_s28 + $0x3b8] sm:$0xf] }
  0x65   : > { %v439_v56 = vld [vmem:[%s3672_s28 + $0x3c0] sm:$0xf]  ;;  %v441_v57 = vld [vmem:[%s3672_s28 + $0x3c8] sm:$0xf]  ;;  %438 = vst [vmem:[%s3679_s29 + $0x1dc] sm:$0xf] %v437_v55 }
  0x66   : > { %440 = vst [vmem:[%s3679_s29 + $0x1e0] sm:$0xf] %v439_v56  ;;  %442 = vst [vmem:[%s3679_s29 + $0x1e4] sm:$0xf] %v441_v57  ;;  %v443_v58 = vld [vmem:[%s3672_s28 + $0x3d0] sm:$0xf] }
  0x67   : > { %v445_v59 = vld [vmem:[%s3672_s28 + $0x3d8] sm:$0xf]  ;;  %v447_v60 = vld [vmem:[%s3672_s28 + $0x3e0] sm:$0xf]  ;;  %444 = vst [vmem:[%s3679_s29 + $0x1e8] sm:$0xf] %v443_v58 }
  0x68   : > { %446 = vst [vmem:[%s3679_s29 + $0x1ec] sm:$0xf] %v445_v59  ;;  %448 = vst [vmem:[%s3679_s29 + $0x1f0] sm:$0xf] %v447_v60  ;;  %v449_v61 = vld [vmem:[%s3672_s28 + $0x3e8] sm:$0xf] }
  0x69   : > { %v451_v62 = vld [vmem:[%s3672_s28 + $0x3f0] sm:$0xf]  ;;  %v453_v63 = vld [vmem:[%s3672_s28 + $0x3f8] sm:$0xf]  ;;  %450 = vst [vmem:[%s3679_s29 + $0x1f4] sm:$0xf] %v449_v61 }
  0x6a   : > { %452 = vst [vmem:[%s3679_s29 + $0x1f8] sm:$0xf] %v451_v62  ;;  %454 = vst [vmem:[%s3679_s29 + $0x1fc] sm:$0xf] %v453_v63  ;;  %v455_v0 = vld [vmem:[%s3672_s28 + $0x400] sm:$0xf] }
  0x6b   : > { %v457_v1 = vld [vmem:[%s3672_s28 + $0x408] sm:$0xf]  ;;  %v459_v2 = vld [vmem:[%s3672_s28 + $0x410] sm:$0xf]  ;;  %456 = vst [vmem:[%s3679_s29 + $0x200] sm:$0xf] %v455_v0 }
  0x6c   : > { %458 = vst [vmem:[%s3679_s29 + $0x204] sm:$0xf] %v457_v1  ;;  %460 = vst [vmem:[%s3679_s29 + $0x208] sm:$0xf] %v459_v2  ;;  %v461_v3 = vld [vmem:[%s3672_s28 + $0x418] sm:$0xf] }
  0x6d   : > { %v463_v4 = vld [vmem:[%s3672_s28 + $0x420] sm:$0xf]  ;;  %v465_v5 = vld [vmem:[%s3672_s28 + $0x428] sm:$0xf]  ;;  %462 = vst [vmem:[%s3679_s29 + $0x20c] sm:$0xf] %v461_v3 }
  0x6e   : > { %464 = vst [vmem:[%s3679_s29 + $0x210] sm:$0xf] %v463_v4  ;;  %466 = vst [vmem:[%s3679_s29 + $0x214] sm:$0xf] %v465_v5  ;;  %v467_v6 = vld [vmem:[%s3672_s28 + $0x430] sm:$0xf] }
  0x6f   : > { %v469_v7 = vld [vmem:[%s3672_s28 + $0x438] sm:$0xf]  ;;  %v471_v8 = vld [vmem:[%s3672_s28 + $0x440] sm:$0xf]  ;;  %468 = vst [vmem:[%s3679_s29 + $0x218] sm:$0xf] %v467_v6 }
  0x70   : > { %470 = vst [vmem:[%s3679_s29 + $0x21c] sm:$0xf] %v469_v7  ;;  %472 = vst [vmem:[%s3679_s29 + $0x220] sm:$0xf] %v471_v8  ;;  %v473_v9 = vld [vmem:[%s3672_s28 + $0x448] sm:$0xf] }
  0x71   : > { %v475_v10 = vld [vmem:[%s3672_s28 + $0x450] sm:$0xf]  ;;  %v477_v11 = vld [vmem:[%s3672_s28 + $0x458] sm:$0xf]  ;;  %474 = vst [vmem:[%s3679_s29 + $0x224] sm:$0xf] %v473_v9 }
  0x72   : > { %476 = vst [vmem:[%s3679_s29 + $0x228] sm:$0xf] %v475_v10  ;;  %478 = vst [vmem:[%s3679_s29 + $0x22c] sm:$0xf] %v477_v11  ;;  %v479_v12 = vld [vmem:[%s3672_s28 + $0x460] sm:$0xf] }
  0x73   : > { %v481_v13 = vld [vmem:[%s3672_s28 + $0x468] sm:$0xf]  ;;  %v483_v14 = vld [vmem:[%s3672_s28 + $0x470] sm:$0xf]  ;;  %480 = vst [vmem:[%s3679_s29 + $0x230] sm:$0xf] %v479_v12 }
  0x74   : > { %482 = vst [vmem:[%s3679_s29 + $0x234] sm:$0xf] %v481_v13  ;;  %484 = vst [vmem:[%s3679_s29 + $0x238] sm:$0xf] %v483_v14  ;;  %v485_v15 = vld [vmem:[%s3672_s28 + $0x478] sm:$0xf] }
  0x75   : > { %486 = vst [vmem:[%s3679_s29 + $0x23c] sm:$0xf] %v485_v15 }
  0x76 PF: > { %p2796_p8 = scmp.ge.s32.totalorder %s3602_s16, 1  ;;  %p802_p9 = scmp.lt.s32.totalorder %s3602_s16, 3 }
  0x78   : > { %p803_p10 = pnand %p2796_p8, %p802_p9 }
  0x79   : > { %s809_s30 = sand.u32 (!%p803_p10), 1, %s3586_s12   ;;  %v3422_v16 = vld [vmem:[%s4415_s0 + $0x4] ss:$36 sps:$4 sm:$0xff] (!%p803_p10)   ;;  %v3425_v17 = vld [vmem:[%s4415_s0 + $0xc] ss:$36 sps:$4 sm:$0xff] (!%p803_p10)   ;;  %p857_p11 = scmp.lt.s32.totalorder (!%p803_p10), %s3594_s14, 1 }
  0x7a   : > { %806 = sbr.rel (%p803_p10) target bundleno = 531 (0x213), region = 69  ;;  %1954 = vmatprep.mubr.bf16.mxu0 (!%p803_p10), %v3422_v16  ;;  %2051 = vmatprep.mubr.bf16.mxu1 (!%p803_p10), %v3425_v17  ;;  %v3420_v48 = vld [vmem:[%s4415_s0] ss:$36 sps:$4 sm:$0xff] (!%p803_p10)   ;;  %v3423_v50 = vld [vmem:[%s4415_s0 + $0x8] ss:$36 sps:$4 sm:$0xff] (!%p803_p10)   ;;  %s2797_s23 = sshll.u32 (!%p803_p10), %s809_s30, 6 }
  0x7b   : > { %s3347_s4 = smul.u32 (!%p803_p10), 576, %s809_s30  ;;  %v3430_v52 = vld [vmem:[%s4415_s0 + $0x4c] ss:$36 sps:$4 sm:$0xff] (!%p803_p10)   ;;  %v3432_v57 = vld [vmem:[%s4415_s0 + $0x54] ss:$36 sps:$4 sm:$0xff] (!%p803_p10)   ;;  %s4356_s12 = scalar_lea.vmem (!%p803_p10), [#allocation4], %s2797_s23 }
  0x7c   : > { %v3434_v58 = vld [vmem:[%s4415_s0 + $0x48] ss:$36 sps:$4 sm:$0xff] (!%p803_p10)   ;;  %v3435_v59 = vld [vmem:[%s4415_s0 + $0x50] ss:$36 sps:$4 sm:$0xff] (!%p803_p10)   ;;  %v3442_v1 = vld [vmem:[%s4415_s0 + $0x9c] ss:$36 sps:$4 sm:$0xff] (!%p803_p10)  }
  0x7d   : > { %s3975_s9 = scalar_lea.vmem (!%p803_p10), [#allocation3], %s3347_s4  ;;  %v3440_v0 = vld [vmem:[%s4415_s0 + $0x94] ss:$36 sps:$4 sm:$0xff] (!%p803_p10)   ;;  %v3450_v8 = vld [vmem:[%s4415_s0 + $0xdc] ss:$36 sps:$4 sm:$0xff] (!%p803_p10)  }
  0x7e   : > { %v3388_v18 = vld [vmem:[%s3975_s9 + $0x40] sm:$0xff] (!%p803_p10)   ;;  %v3392_v22 = vld [vmem:[%s3975_s9 + $0x48] sm:$0xff] (!%p803_p10)   ;;  %v3396_v26 = vld [vmem:[%s3975_s9 + $0x50] sm:$0xff] (!%p803_p10)  }
  0x7f   : > { %v3389_v19 = vld [vmem:[%s3975_s9 + $0xc0] sm:$0xff] (!%p803_p10)   ;;  %3026 = vmatprep.subr.bf16.mxu0 (!%p803_p10), %v3388_v18  ;;  %v3393_v23 = vld [vmem:[%s3975_s9 + $0xc8] sm:$0xff] (!%p803_p10)   ;;  %v3397_v27 = vld [vmem:[%s3975_s9 + $0xd0] sm:$0xff] (!%p803_p10)  }
  0x80   : > { %v3390_v20 = vld [vmem:[%s3975_s9] sm:$0xff] (!%p803_p10)   ;;  %3090 = vmatprep.subr.bf16.mxu1 (!%p803_p10), %v3389_v19  ;;  %v3394_v24 = vld [vmem:[%s3975_s9 + $0x8] sm:$0xff] (!%p803_p10)   ;;  %v3398_v28 = vld [vmem:[%s3975_s9 + $0x10] sm:$0xff] (!%p803_p10)  }
  0x81   : > { %v3391_v21 = vld [vmem:[%s3975_s9 + $0x80] sm:$0xff]   ;;  %3027 = vmatpush3.bf16.msra.mxu0 %v3390_v20  ;;  %v3395_v25 = vld [vmem:[%s3975_s9 + $0x88] sm:$0xff]   ;;  %v3399_v29 = vld [vmem:[%s3975_s9 + $0x90] sm:$0xff]   ;;  %s858_s11 = scalar_select %p857_p11, %s3594_s14, 1 }
  0x82   : > { %3091 = vmatpush3.bf16.msra.mxu1 %v3391_v21  ;;  %3028 = vmatprep.subr.bf16.mxu0 %v3392_v22  ;;  %v3400_v30 = vld [vmem:[%s3975_s9 + $0x58] sm:$0xff]   ;;  %v3404_v34 = vld [vmem:[%s3975_s9 + $0x60] sm:$0xff]   ;;  %v3408_v38 = vld [vmem:[%s3975_s9 + $0x68] sm:$0xff]   ;;  %s2960_s30 = sshll.u32 (%p3659_p6), %s3594_s14, 2 }
  0x83   : > { %3092 = vmatprep.subr.bf16.mxu1 %v3393_v23  ;;  %v3401_v31 = vld [vmem:[%s3975_s9 + $0xd8] sm:$0xff]   ;;  %v3405_v35 = vld [vmem:[%s3975_s9 + $0xe0] sm:$0xff]   ;;  %v3409_v39 = vld [vmem:[%s3975_s9 + $0xe8] sm:$0xff]   ;;  %s859_s20 = scalar_lea.vmem %s4417_s2, %s858_s11  ;;  %s2588_s26 = scalar_lea.vmem (%p3659_p6), %s4418_s3, %s2960_s30 }
  0x84   : > { %v3402_v32 = vld [vmem:[%s3975_s9 + $0x18] sm:$0xff]   ;;  %v3406_v36 = vld [vmem:[%s3975_s9 + $0x20] sm:$0xff]   ;;  %v3410_v40 = vld [vmem:[%s3975_s9 + $0x28] sm:$0xff]  }
  0x85   : > { %3029 = vmatpush3.bf16.msra.mxu0 %v3394_v24  ;;  %v3403_v33 = vld [vmem:[%s3975_s9 + $0x98] sm:$0xff]   ;;  %v3407_v37 = vld [vmem:[%s3975_s9 + $0xa0] sm:$0xff]   ;;  %v3411_v41 = vld [vmem:[%s3975_s9 + $0xa8] sm:$0xff]  }
  0x86   : > { %3093 = vmatpush3.bf16.msra.mxu1 %v3395_v25  ;;  %3030 = vmatprep.subr.bf16.mxu0 %v3396_v26  ;;  %v3412_v42 = vld [vmem:[%s3975_s9 + $0x70] sm:$0xff]   ;;  %v3416_v46 = vld [vmem:[%s3975_s9 + $0x78] sm:$0xff]   ;;  %v3426_v53 = vld [vmem:[%s3975_s9 + $0x140] sm:$0xff]  }
  0x87   : > { %3094 = vmatprep.subr.bf16.mxu1 %v3397_v27  ;;  %v3413_v43 = vld [vmem:[%s3975_s9 + $0xf0] sm:$0xff]   ;;  %v3417_v47 = vld [vmem:[%s3975_s9 + $0xf8] sm:$0xff]   ;;  %v3427_v54 = vld [vmem:[%s3975_s9 + $0x1c0] sm:$0xff]  }
  0x88   : > { %v3414_v44 = vld [vmem:[%s3975_s9 + $0x30] sm:$0xff]   ;;  %v3418_v49 = vld [vmem:[%s3975_s9 + $0x38] sm:$0xff]   ;;  %v3428_v55 = vld [vmem:[%s3975_s9 + $0x100] sm:$0xff]  }
  0x89   : > { %3031 = vmatpush3.bf16.msra.mxu0 %v3398_v28  ;;  %v3415_v45 = vld [vmem:[%s3975_s9 + $0xb0] sm:$0xff]   ;;  %v3419_v51 = vld [vmem:[%s3975_s9 + $0xb8] sm:$0xff]   ;;  %v3429_v56 = vld [vmem:[%s3975_s9 + $0x180] sm:$0xff]  }
  0x8a   : > { %3095 = vmatpush3.bf16.msra.mxu1 %v3399_v29  ;;  %3032 = vmatprep.subr.bf16.mxu0 %v3400_v30  ;;  %v3436_v60 = vld [vmem:[%s3975_s9 + $0x148] sm:$0xff]   ;;  %v3446_v2 = vld [vmem:[%s3975_s9 + $0x150] sm:$0xff]   ;;  %v3445_v5 = vld [vmem:[%s4415_s0 + $0x98] ss:$36 sps:$4 sm:$0xff]  }
  0x8b   : > { %3096 = vmatprep.subr.bf16.mxu1 %v3401_v31  ;;  %v3437_v61 = vld [vmem:[%s3975_s9 + $0x1c8] sm:$0xff]   ;;  %v3444_v3 = vld [vmem:[%s4415_s0 + $0x90] ss:$36 sps:$4 sm:$0xff]   ;;  %v3456_v10 = vld [vmem:[%s3975_s9 + $0x158] sm:$0xff]  }
  0x8c   : > { %v3438_v62 = vld [vmem:[%s3975_s9 + $0x108] sm:$0xff]   ;;  %v3447_v4 = vld [vmem:[%s3975_s9 + $0x1d0] sm:$0xff]   ;;  %v3457_v11 = vld [vmem:[%s3975_s9 + $0x1d8] sm:$0xff]  }
  0x8d   : > { %3033 = vmatpush3.bf16.msra.mxu0 %v3402_v32  ;;  %v3439_v63 = vld [vmem:[%s3975_s9 + $0x188] sm:$0xff]   ;;  %v3448_v6 = vld [vmem:[%s3975_s9 + $0x110] sm:$0xff]   ;;  %v3458_v12 = vld [vmem:[%s3975_s9 + $0x118] sm:$0xff]  }
  0x8e   : > { %3097 = vmatpush3.bf16.msra.mxu1 %v3403_v33  ;;  %3034 = vmatprep.subr.bf16.mxu0 %v3404_v34  ;;  %v3449_v7 = vld [vmem:[%s3975_s9 + $0x190] sm:$0xff]   ;;  %v3452_v9 = vld [vmem:[%s4415_s0 + $0xe4] ss:$36 sps:$4 sm:$0xff]   ;;  %v3459_v13 = vld [vmem:[%s3975_s9 + $0x198] sm:$0xff]  }
  0x8f   : > { %3098 = vmatprep.subr.bf16.mxu1 %v3405_v35  ;;  %v3454_v14 = vld [vmem:[%s4415_s0 + $0xd8] ss:$36 sps:$4 sm:$0xff]   ;;  %v3455_v15 = vld [vmem:[%s4415_s0 + $0xe0] ss:$36 sps:$4 sm:$0xff]   ;;  %v3462_v17 = vld [vmem:[%s4415_s0 + $0x12c] ss:$36 sps:$4 sm:$0xff]  }
  0x90   : > { %v3460_v16 = vld [vmem:[%s4415_s0 + $0x124] ss:$36 sps:$4 sm:$0xff]   ;;  %v3470_v24 = vld [vmem:[%s4415_s0 + $0x16c] ss:$36 sps:$4 sm:$0xff]   ;;  %v3472_v25 = vld [vmem:[%s4415_s0 + $0x174] ss:$36 sps:$4 sm:$0xff]  }
  0x91   : > { %3035 = vmatpush3.bf16.msra.mxu0 %v3406_v36  ;;  %v3466_v18 = vld [vmem:[%s3975_s9 + $0x160] sm:$0xff]   ;;  %v3465_v23 = vld [vmem:[%s4415_s0 + $0x128] ss:$36 sps:$4 sm:$0xff]   ;;  %v3475_v31 = vld [vmem:[%s4415_s0 + $0x170] ss:$36 sps:$4 sm:$0xff]  }
  0x92   : > { %3099 = vmatpush3.bf16.msra.mxu1 %v3407_v37  ;;  %3036 = vmatprep.subr.bf16.mxu0 %v3408_v38  ;;  %v3467_v19 = vld [vmem:[%s3975_s9 + $0x1e0] sm:$0xff]   ;;  %v3476_v26 = vld [vmem:[%s3975_s9 + $0x168] sm:$0xff]   ;;  %v3480_v32 = vld [vmem:[%s4415_s0 + $0x1b4] ss:$36 sps:$4 sm:$0xff]  }
  0x93   : > { %3100 = vmatprep.subr.bf16.mxu1 %v3409_v39  ;;  %v3468_v20 = vld [vmem:[%s3975_s9 + $0x120] sm:$0xff]   ;;  %v3477_v27 = vld [vmem:[%s3975_s9 + $0x1e8] sm:$0xff]   ;;  %v3486_v34 = vld [vmem:[%s3975_s9 + $0x170] sm:$0xff]  }
  0x94   : > { %v3469_v21 = vld [vmem:[%s3975_s9 + $0x1a0] sm:$0xff]   ;;  %v3478_v28 = vld [vmem:[%s3975_s9 + $0x128] sm:$0xff]   ;;  %v3487_v35 = vld [vmem:[%s3975_s9 + $0x1f0] sm:$0xff]  }
  0x95   : > { %3037 = vmatpush3.bf16.msra.mxu0 %v3410_v40  ;;  %v3464_v22 = vld [vmem:[%s4415_s0 + $0x120] ss:$36 sps:$4 sm:$0xff]   ;;  %v3479_v29 = vld [vmem:[%s3975_s9 + $0x1a8] sm:$0xff]   ;;  %v3488_v36 = vld [vmem:[%s3975_s9 + $0x130] sm:$0xff]  }
  0x96   : > { %3101 = vmatpush3.bf16.msra.mxu1 %v3411_v41  ;;  %3038 = vmatprep.subr.bf16.mxu0 %v3412_v42  ;;  %v3474_v30 = vld [vmem:[%s4415_s0 + $0x168] ss:$36 sps:$4 sm:$0xff]   ;;  %v3482_v33 = vld [vmem:[%s4415_s0 + $0x1bc] ss:$36 sps:$4 sm:$0xff]   ;;  %v3489_v37 = vld [vmem:[%s3975_s9 + $0x1b0] sm:$0xff]  }
  0x97   : > { %3102 = vmatprep.subr.bf16.mxu1 %v3413_v43  ;;  %v3484_v38 = vld [vmem:[%s4415_s0 + $0x1b0] ss:$36 sps:$4 sm:$0xff]   ;;  %v3485_v39 = vld [vmem:[%s4415_s0 + $0x1b8] ss:$36 sps:$4 sm:$0xff]   ;;  %v3492_v42 = vld [vmem:[%s4415_s0 + $0x204] ss:$36 sps:$4 sm:$0xff]  }
  0x98   : > { %v3490_v40 = vld [vmem:[%s4415_s0 + $0x1fc] ss:$36 sps:$4 sm:$0xff]  }
  0x99   : > { %3039 = vmatpush3.bf16.msra.mxu0 %v3414_v44  ;;  %v3496_v41 = vld [vmem:[%s3975_s9 + $0x178] sm:$0xff]  }
  0x9a   : > { %3103 = vmatpush3.bf16.msra.mxu1 %v3415_v45  ;;  %3040 = vmatprep.subr.bf16.mxu0 %v3416_v46  ;;  %v3497_v43 = vld [vmem:[%s3975_s9 + $0x1f8] sm:$0xff]   ;;  %v3506_v46 = vld [vmem:[%s3975_s9 + $0x200] sm:$0xff]  }
  0x9b   : > { %3104 = vmatprep.subr.bf16.mxu1 %v3417_v47  ;;  %v3498_v44 = vld [vmem:[%s3975_s9 + $0x138] sm:$0xff]  }
  0x9c   : > { %v3499_v45 = vld [vmem:[%s3975_s9 + $0x1b8] sm:$0xff]  }
  0x9d   : > { %3041 = vmatpush3.bf16.msra.mxu0 %v3418_v49  ;;  %v3494_v47 = vld [vmem:[%s4415_s0 + $0x1f8] ss:$36 sps:$4 sm:$0xff]  }
  0x9e   : > { %3105 = vmatpush3.bf16.msra.mxu1 %v3419_v51  ;;  %3154 = vmatprep.subr.bf16.mxu0 %v3426_v53  ;;  %v3502_v49 = vld [vmem:[%s4415_s0 + $0x14] ss:$36 sps:$4 sm:$0xff]   ;;  %v3507_v53 = vld [vmem:[%s4415_s0 + $0x5c] ss:$36 sps:$4 sm:$0xff]  }
  0x9f   : > { %3218 = vmatprep.subr.bf16.mxu1 %v3427_v54  ;;  %v3500_v51 = vld [vmem:[%s4415_s0 + $0x10] ss:$36 sps:$4 sm:$0xff]   ;;  %v3509_v54 = vld [vmem:[%s4415_s0 + $0x64] ss:$36 sps:$4 sm:$0xff]  }
  0xa0   : > { %1955 = vmatmul.mubr.bf16.vlgmr.msra.gmra.mrb[0].mxu0 %v3420_v48  ;;  %v3495_v48 = vld [vmem:[%s4415_s0 + $0x200] ss:$36 sps:$4 sm:$0xff]  }
  0xa1   : > { %2052 = vmatmul.mubr.bf16.vlgmr.msra.gmra.mrb[0].mxu1 %v3423_v50  ;;  %3155 = vmatpush3.bf16.msra.mxu0 %v3428_v55  ;;  %v3505_v50 = vld [vmem:[%s4415_s0 + $0x1c] ss:$36 sps:$4 sm:$0xff]   ;;  %v3513_v55 = vld [vmem:[%s3975_s9 + $0x208] sm:$0xff]  }
  0xa2   : > { %3219 = vmatpush3.bf16.msra.mxu1 %v3429_v56  ;;  %1962 = vmatprep.mubr.bf16.mxu0 %v3430_v52  ;;  %v3503_v52 = vld [vmem:[%s4415_s0 + $0x18] ss:$36 sps:$4 sm:$0xff]   ;;  %v3520_v56 = vld [vmem:[%s3975_s9 + $0x210] sm:$0xff]  }
  0xa3   : > { %2059 = vmatprep.mubr.bf16.mxu1 %v3432_v57  ;;  %3156 = vmatprep.subr.bf16.mxu0 %v3436_v60  ;;  %v3511_v57 = vld [vmem:[%s4415_s0 + $0x58] ss:$36 sps:$4 sm:$0xff]   ;;  %v3516_v60 = vld [vmem:[%s4415_s0 + $0xac] ss:$36 sps:$4 sm:$0xff]  }
  0xa4   : > { %3220 = vmatprep.subr.bf16.mxu1 %v3437_v61  ;;  %v3527_v61 = vld [vmem:[%s3975_s9 + $0x218] sm:$0xff]  }
  0xa5   : > { %3157 = vmatpush3.bf16.msra.mxu0 %v3438_v62  ;;  %v3518_v62 = vld [vmem:[%s4415_s0 + $0xa0] ss:$36 sps:$4 sm:$0xff]  }
  0xa6   : > { %3221 = vmatpush3.bf16.msra.mxu1 %v3439_v63  ;;  %3158 = vmatprep.subr.bf16.mxu0 %v3446_v2  ;;  %v3534_v63 = vld [vmem:[%s3975_s9 + $0x220] sm:$0xff]   ;;  %v3523_v2 = vld [vmem:[%s4415_s0 + $0xf4] ss:$36 sps:$4 sm:$0xff]  }
  0xa7   : > { %3222 = vmatprep.subr.bf16.mxu1 %v3447_v4  ;;  %v3548_v4 = vld [vmem:[%s3975_s9 + $0x230] sm:$0xff]  }
  0xa8   : > { %1963 = vmatmul.mubr.bf16.gmra.mrb[4].mxu0 %v3434_v58  ;;  %v3512_v58 = vld [vmem:[%s4415_s0 + $0x60] ss:$36 sps:$4 sm:$0xff]  }
  0xa9   : > { %2060 = vmatmul.mubr.bf16.gmra.mrb[4].mxu1 %v3435_v59  ;;  %1970 = vmatprep.mubr.bf16.mxu0 %v3440_v0  ;;  %v3514_v59 = vld [vmem:[%s4415_s0 + $0xa4] ss:$36 sps:$4 sm:$0xff]  }
  0xaa   : > { %2067 = vmatprep.mubr.bf16.mxu1 %v3442_v1  ;;  %3159 = vmatpush3.bf16.msra.mxu0 %v3448_v6  ;;  %v3519_v0 = vld [vmem:[%s4415_s0 + $0xa8] ss:$36 sps:$4 sm:$0xff]   ;;  %v3526_v6 = vld [vmem:[%s4415_s0 + $0xf0] ss:$36 sps:$4 sm:$0xff]  }
  0xab   : > { %3223 = vmatpush3.bf16.msra.mxu1 %v3449_v7  ;;  %3160 = vmatprep.subr.bf16.mxu0 %v3456_v10  ;;  %v3521_v1 = vld [vmem:[%s4415_s0 + $0xec] ss:$36 sps:$4 sm:$0xff]   ;;  %v3528_v7 = vld [vmem:[%s4415_s0 + $0x134] ss:$36 sps:$4 sm:$0xff]  }
  0xac   : > { %3224 = vmatprep.subr.bf16.mxu1 %v3457_v11  ;;  %v3532_v10 = vld [vmem:[%s4415_s0 + $0x130] ss:$36 sps:$4 sm:$0xff]   ;;  %v3533_v11 = vld [vmem:[%s4415_s0 + $0x138] ss:$36 sps:$4 sm:$0xff]  }
  0xae   : > { %3161 = vmatpush3.bf16.msra.mxu0 %v3458_v12  ;;  %v3535_v12 = vld [vmem:[%s4415_s0 + $0x17c] ss:$36 sps:$4 sm:$0xff]  }
  0xaf   : > { %3225 = vmatpush3.bf16.msra.mxu1 %v3459_v13  ;;  %3162 = vmatprep.subr.bf16.mxu0 %v3466_v18  ;;  %v3537_v13 = vld [vmem:[%s4415_s0 + $0x184] ss:$36 sps:$4 sm:$0xff]  }
  0xb0   : > { %1971 = vmatmul.mubr.bf16.gmra.mrb[8].mxu0 %v3444_v3  ;;  %3226 = vmatprep.subr.bf16.mxu1 %v3467_v19  ;;  %v3541_v3 = vld [vmem:[%s3975_s9 + $0x228] sm:$0xff]   ;;  %v3546_v18 = vld [vmem:[%s4415_s0 + $0x1c0] ss:$36 sps:$4 sm:$0xff]  }
  0xb1   : > { %2068 = vmatmul.mubr.bf16.gmra.mrb[8].mxu1 %v3445_v5  ;;  %1978 = vmatprep.mubr.bf16.mxu0 %v3450_v8  ;;  %v3525_v5 = vld [vmem:[%s4415_s0 + $0xe8] ss:$36 sps:$4 sm:$0xff]   ;;  %v3530_v8 = vld [vmem:[%s4415_s0 + $0x13c] ss:$36 sps:$4 sm:$0xff]  }
  0xb2   : > { %2075 = vmatprep.mubr.bf16.mxu1 %v3452_v9  ;;  %3163 = vmatpush3.bf16.msra.mxu0 %v3468_v20  ;;  %v3555_v9 = vld [vmem:[%s3975_s9 + $0x238] sm:$0xff]   ;;  %v3547_v19 = vld [vmem:[%s4415_s0 + $0x1c8] ss:$36 sps:$4 sm:$0xff]  }
  0xb3   : > { %3227 = vmatpush3.bf16.msra.mxu1 %v3469_v21  ;;  %3164 = vmatprep.subr.bf16.mxu0 %v3476_v26  ;;  %v3549_v20 = vld [vmem:[%s4415_s0 + $0x20c] ss:$36 sps:$4 sm:$0xff]   ;;  %v3551_v21 = vld [vmem:[%s4415_s0 + $0x214] ss:$36 sps:$4 sm:$0xff]  }
  0xb4   : > { %3228 = vmatprep.subr.bf16.mxu1 %v3477_v27  ;;  %v3558_v26 = vld [vmem:[%s4415_s0 + $0x68] ss:$36 sps:$4 sm:$0xff]  }
  0xb5   : > { %v3559_v27 = vld [vmem:[%s4415_s0 + $0x188] ss:$36 sps:$4 sm:$0xff]  }
  0xb6   : > { %3165 = vmatpush3.bf16.msra.mxu0 %v3478_v28  ;;  %v3560_v28 = vld [vmem:[%s4415_s0 + $0xb0] ss:$36 sps:$4 sm:$0xff]  }
  0xb7   : > { %3229 = vmatpush3.bf16.msra.mxu1 %v3479_v29  ;;  %3166 = vmatprep.subr.bf16.mxu0 %v3486_v34  ;;  %v3561_v29 = vld [vmem:[%s4415_s0 + $0x1d0] ss:$36 sps:$4 sm:$0xff]  }
  0xb8   : > { %1979 = vmatmul.mubr.bf16.gmra.mrb[12].mxu0 %v3454_v14  ;;  %3230 = vmatprep.subr.bf16.mxu1 %v3487_v35  ;;  %v3539_v14 = vld [vmem:[%s4415_s0 + $0x178] ss:$36 sps:$4 sm:$0xff]  }
  0xb9   : > { %2076 = vmatmul.mubr.bf16.gmra.mrb[12].mxu1 %v3455_v15  ;;  %1986 = vmatprep.mubr.bf16.mxu0 %v3460_v16  ;;  %v3540_v15 = vld [vmem:[%s4415_s0 + $0x180] ss:$36 sps:$4 sm:$0xff]  }
  0xba   : > { %2083 = vmatprep.mubr.bf16.mxu1 %v3462_v17  ;;  %3167 = vmatpush3.bf16.msra.mxu0 %v3488_v36  ;;  %v3542_v16 = vld [vmem:[%s4415_s0 + $0x1c4] ss:$36 sps:$4 sm:$0xff]   ;;  %v3544_v17 = vld [vmem:[%s4415_s0 + $0x1cc] ss:$36 sps:$4 sm:$0xff]  }
  0xbb   : > { %3231 = vmatpush3.bf16.msra.mxu1 %v3489_v37  ;;  %3168 = vmatprep.subr.bf16.mxu0 %v3496_v41 }
  0xbc   : > { %3232 = vmatprep.subr.bf16.mxu1 %v3497_v43 }
  0xbe   : > { %3169 = vmatpush3.bf16.msra.mxu0 %v3498_v44 }
  0xbf   : > { %3233 = vmatpush3.bf16.msra.mxu1 %v3499_v45  ;;  %3298 = vmatprep.subr.bf16.mxu0 %v3506_v46 }
  0xc0   : > { %1987 = vmatmul.mubr.bf16.gmra.mrb[16].mxu0 %v3464_v22  ;;  %3330 = vmatprep.subr.bf16.mxu1 %v3506_v46  ;;  %v3553_v22 = vld [vmem:[%s4415_s0 + $0x208] ss:$36 sps:$4 sm:$0xff]  }
  0xc1   : > { %2084 = vmatmul.mubr.bf16.gmra.mrb[16].mxu1 %v3465_v23  ;;  %1994 = vmatprep.mubr.bf16.mxu0 %v3470_v24  ;;  %v3554_v23 = vld [vmem:[%s4415_s0 + $0x210] ss:$36 sps:$4 sm:$0xff]   ;;  %v3556_v24 = vld [vmem:[%s4415_s0 + $0x20] ss:$36 sps:$4 sm:$0xff]  }
  0xc2   : > { %2091 = vmatprep.mubr.bf16.mxu1 %v3472_v25  ;;  %v3557_v25 = vld [vmem:[%s4415_s0 + $0x140] ss:$36 sps:$4 sm:$0xff]  }
  0xc8   : > { %1995 = vmatmul.mubr.bf16.gmra.mrb[20].mxu0 %v3474_v30  ;;  %v3562_v30 = vld [vmem:[%s4415_s0 + $0xf8] ss:$36 sps:$4 sm:$0xff]  }
  0xc9   : > { %2092 = vmatmul.mubr.bf16.gmra.mrb[20].mxu1 %v3475_v31  ;;  %2002 = vmatprep.mubr.bf16.mxu0 %v3480_v32  ;;  %v3563_v31 = vld [vmem:[%s4415_s0 + $0x218] ss:$36 sps:$4 sm:$0xff]  }
  0xca   : > { %2099 = vmatprep.mubr.bf16.mxu1 %v3482_v33 }
  0xd0   : > { %2003 = vmatmul.mubr.bf16.gmra.mrb[24].mxu0 %v3484_v38 }
  0xd1   : > { %2100 = vmatmul.mubr.bf16.gmra.mrb[24].mxu1 %v3485_v39  ;;  %2010 = vmatprep.mubr.bf16.mxu0 %v3490_v40 }
  0xd2   : > { %2107 = vmatprep.mubr.bf16.mxu1 %v3492_v42 }
  0xd8   : > { %2011 = vmatmul.mubr.bf16.gmra.mrb[28].mxu0 %v3494_v47 }
  0xd9   : > { %2108 = vmatmul.mubr.bf16.gmra.mrb[28].mxu1 %v3495_v48  ;;  %2148 = vmatprep.mubr.bf16.mxu0 %v3502_v49 }
  0xda   : > { %2245 = vmatprep.mubr.bf16.mxu1 %v3505_v50 }
  0xe0   : > { %2149 = vmatmul.mubr.bf16.vlgmr.msra.gmra.mrb[32].mxu0 %v3500_v51 }
  0xe1   : > { %2246 = vmatmul.mubr.bf16.vlgmr.msra.gmra.mrb[32].mxu1 %v3503_v52  ;;  %3299 = vmatpush3.bf16.msra.mxu0 %v3506_v46 }
  0xe2   : > { %3338 = vmatpush3.bf16.msra.mxu1 %v3506_v46  ;;  %2156 = vmatprep.mubr.bf16.mxu0 %v3507_v53 }
  0xe3   : > { %2253 = vmatprep.mubr.bf16.mxu1 %v3509_v54  ;;  %3300 = vmatprep.subr.bf16.mxu0 %v3513_v55 }
  0xe4   : > { %3331 = vmatprep.subr.bf16.mxu1 %v3513_v55 }
  0xe5   : > { %3301 = vmatpush3.bf16.msra.mxu0 %v3513_v55 }
  0xe6   : > { %3339 = vmatpush3.bf16.msra.mxu1 %v3513_v55  ;;  %3302 = vmatprep.subr.bf16.mxu0 %v3520_v56 }
  0xe7   : > { %3332 = vmatprep.subr.bf16.mxu1 %v3520_v56 }
  0xe8   : > { %2157 = vmatmul.mubr.bf16.gmra.mrb[36].mxu0 %v3511_v57 }
  0xe9   : > { %2254 = vmatmul.mubr.bf16.gmra.mrb[36].mxu1 %v3512_v58  ;;  %2164 = vmatprep.mubr.bf16.mxu0 %v3514_v59 }
  0xea   : > { %2261 = vmatprep.mubr.bf16.mxu1 %v3516_v60  ;;  %3303 = vmatpush3.bf16.msra.mxu0 %v3520_v56 }
  0xeb   : > { %3340 = vmatpush3.bf16.msra.mxu1 %v3520_v56  ;;  %3304 = vmatprep.subr.bf16.mxu0 %v3527_v61 }
  0xec   : > { %3333 = vmatprep.subr.bf16.mxu1 %v3527_v61 }
  0xee   : > { %3305 = vmatpush3.bf16.msra.mxu0 %v3527_v61 }
  0xef   : > { %3341 = vmatpush3.bf16.msra.mxu1 %v3527_v61  ;;  %3306 = vmatprep.subr.bf16.mxu0 %v3534_v63 }
  0xf0   : > { %2165 = vmatmul.mubr.bf16.gmra.mrb[40].mxu0 %v3518_v62  ;;  %3334 = vmatprep.subr.bf16.mxu1 %v3534_v63 }
  0xf1   : > { %2262 = vmatmul.mubr.bf16.gmra.mrb[40].mxu1 %v3519_v0  ;;  %2172 = vmatprep.mubr.bf16.mxu0 %v3521_v1 }
  0xf2   : > { %2269 = vmatprep.mubr.bf16.mxu1 %v3523_v2  ;;  %3307 = vmatpush3.bf16.msra.mxu0 %v3534_v63 }
  0xf3   : > { %3342 = vmatpush3.bf16.msra.mxu1 %v3534_v63  ;;  %3308 = vmatprep.subr.bf16.mxu0 %v3541_v3 }
  0xf4   : > { %3335 = vmatprep.subr.bf16.mxu1 %v3541_v3 }
  0xf6   : > { %3309 = vmatpush3.bf16.msra.mxu0 %v3541_v3 }
  0xf7   : > { %3343 = vmatpush3.bf16.msra.mxu1 %v3541_v3  ;;  %3310 = vmatprep.subr.bf16.mxu0 %v3548_v4 }
  0xf8   : > { %2173 = vmatmul.mubr.bf16.gmra.mrb[44].mxu0 %v3525_v5  ;;  %3336 = vmatprep.subr.bf16.mxu1 %v3548_v4 }
  0xf9   : > { %2270 = vmatmul.mubr.bf16.gmra.mrb[44].mxu1 %v3526_v6  ;;  %2180 = vmatprep.mubr.bf16.mxu0 %v3528_v7 }
  0xfa   : > { %2277 = vmatprep.mubr.bf16.mxu1 %v3530_v8  ;;  %3311 = vmatpush3.bf16.msra.mxu0 %v3548_v4 }
  0xfb   : > { %3344 = vmatpush3.bf16.msra.mxu1 %v3548_v4  ;;  %3312 = vmatprep.subr.bf16.mxu0 %v3555_v9 }
  0xfc   : > { %3337 = vmatprep.subr.bf16.mxu1 %v3555_v9 }
  0xfe   : > { %3313 = vmatpush3.bf16.msra.mxu0 %v3555_v9 }
  0xff   : > { %3345 = vmatpush3.bf16.msra.mxu1 %v3555_v9 }
 0x100   : > { %2181 = vmatmul.mubr.bf16.gmra.mrb[48].mxu0 %v3532_v10 }
 0x101   : > { %2278 = vmatmul.mubr.bf16.gmra.mrb[48].mxu1 %v3533_v11  ;;  %2188 = vmatprep.mubr.bf16.mxu0 %v3535_v12 }
 0x102   : > { %2285 = vmatprep.mubr.bf16.mxu1 %v3537_v13 }
 0x108   : > { %2189 = vmatmul.mubr.bf16.gmra.mrb[52].mxu0 %v3539_v14 }
 0x109   : > { %2286 = vmatmul.mubr.bf16.gmra.mrb[52].mxu1 %v3540_v15  ;;  %2196 = vmatprep.mubr.bf16.mxu0 %v3542_v16 }
 0x10a   : > { %2293 = vmatprep.mubr.bf16.mxu1 %v3544_v17 }
 0x110   : > { %2197 = vmatmul.mubr.bf16.gmra.mrb[56].mxu0 %v3546_v18 }
 0x111   : > { %2294 = vmatmul.mubr.bf16.gmra.mrb[56].mxu1 %v3547_v19  ;;  %2204 = vmatprep.mubr.bf16.mxu0 %v3549_v20 }
 0x112   : > { %2301 = vmatprep.mubr.bf16.mxu1 %v3551_v21 }
 0x118   : > { %2205 = vmatmul.mubr.bf16.gmra.mrb[60].mxu0 %v3553_v22 }
 0x119   : > { %2302 = vmatmul.mubr.bf16.gmra.mrb[60].mxu1 %v3554_v23  ;;  %3314 = vmatprep.mubr.bf16.mxu0 %v3556_v24 }
 0x11a   : > { %3322 = vmatprep.mubr.bf16.mxu1 %v3557_v25 }
 0x120   : > { %3315 = vmatmul.mubr.bf16.vlgmr.msra.gmra.mrb[64].mxu0 %v3558_v26 }
 0x121   : > { %3323 = vmatmul.mubr.bf16.vlgmr.msra.gmra.mrb[64].mxu1 %v3559_v27  ;;  %3318 = vmatprep.mubr.bf16.mxu0 %v3560_v28 }
 0x122   : > { %3326 = vmatprep.mubr.bf16.mxu1 %v3561_v29 }
 0x128   : > { %3319 = vmatmul.mubr.bf16.gmra.mrb[68].mxu0 %v3562_v30 }
 0x129   : > { %3327 = vmatmul.mubr.bf16.gmra.mrb[68].mxu1 %v3563_v31 }
 0x173   : > { %v3042_v32 = vpop.f32.mrb[0].mxu0 }
 0x174   : > { %v3106_v33 = vpop.f32.mrb[0].mxu1  ;;  %v3043_v34 = vpop.f32.mrb[1].mxu0 }
 0x175   : > { %v3044_v35 = vadd.f32 %v3043_v34, %v3042_v32  ;;  %v3107_v36 = vpop.f32.mrb[1].mxu1  ;;  %v3045_v37 = vpop.f32.mrb[2].mxu0 }
 0x176   : > { %v3108_v38 = vadd.f32 %v3107_v36, %v3106_v33  ;;  %v3109_v39 = vpop.f32.mrb[2].mxu1  ;;  %v3046_v40 = vpop.f32.mrb[3].mxu0 }
 0x177   : > { %v3047_v41 = vadd.f32 %v3046_v40, %v3045_v37  ;;  %v3110_v42 = vpop.f32.mrb[3].mxu1 }
 0x178   : > { %v4259_v43 = vadd.f32 %v3108_v38, %v3044_v35  ;;  %v3111_v44 = vadd.f32 %v3110_v42, %v3109_v39 }
 0x17a   : > { %v4261_v45 = vadd.f32 %v3111_v44, %v3047_v41 }
 0x17b   : > { %v3048_v46 = vpop.f32.mrb[4].mxu0 }
 0x17c   : > { %v3112_v47 = vpop.f32.mrb[4].mxu1  ;;  %v3049_v48 = vpop.f32.mrb[5].mxu0 }
 0x17d   : > { %v3050_v49 = vadd.f32 %v3049_v48, %v3048_v46  ;;  %v3113_v50 = vpop.f32.mrb[5].mxu1  ;;  %v3051_v51 = vpop.f32.mrb[6].mxu0 }
 0x17e   : > { %v3114_v52 = vadd.f32 %v3113_v50, %v3112_v47  ;;  %v3115_v53 = vpop.f32.mrb[6].mxu1  ;;  %v3052_v54 = vpop.f32.mrb[7].mxu0 }
 0x17f   : > { %v3053_v55 = vadd.f32 %v3052_v54, %v3051_v51  ;;  %v3116_v56 = vpop.f32.mrb[7].mxu1 }
 0x180   : > { %v4263_v57 = vadd.f32 %v3114_v52, %v3050_v49  ;;  %v3117_v58 = vadd.f32 %v3116_v56, %v3115_v53 }
 0x182   : > { %v4265_v59 = vadd.f32 %v3117_v58, %v3053_v55 }
 0x183   : > { %v3054_v60 = vpop.f32.mrb[8].mxu0 }
 0x184   : > { %v3118_v61 = vpop.f32.mrb[8].mxu1  ;;  %v3055_v62 = vpop.f32.mrb[9].mxu0 }
 0x185   : > { %v3056_v63 = vadd.f32 %v3055_v62, %v3054_v60  ;;  %v3119_v0 = vpop.f32.mrb[9].mxu1  ;;  %v3057_v1 = vpop.f32.mrb[10].mxu0 }
 0x186   : > { %v3120_v2 = vadd.f32 %v3119_v0, %v3118_v61  ;;  %v3121_v3 = vpop.f32.mrb[10].mxu1  ;;  %v3058_v4 = vpop.f32.mrb[11].mxu0 }
 0x187   : > { %v3059_v5 = vadd.f32 %v3058_v4, %v3057_v1  ;;  %v3122_v6 = vpop.f32.mrb[11].mxu1 }
 0x188   : > { %v4267_v7 = vadd.f32 %v3120_v2, %v3056_v63  ;;  %v3123_v8 = vadd.f32 %v3122_v6, %v3121_v3 }
 0x18a   : > { %v4269_v9 = vadd.f32 %v3123_v8, %v3059_v5 }
 0x18b   : > { %v3060_v10 = vpop.f32.mrb[12].mxu0 }
 0x18c   : > { %v3124_v11 = vpop.f32.mrb[12].mxu1  ;;  %v3061_v12 = vpop.f32.mrb[13].mxu0 }
 0x18d   : > { %v3062_v13 = vadd.f32 %v3061_v12, %v3060_v10  ;;  %v3125_v14 = vpop.f32.mrb[13].mxu1  ;;  %v3063_v15 = vpop.f32.mrb[14].mxu0 }
 0x18e   : > { %v3126_v16 = vadd.f32 %v3125_v14, %v3124_v11  ;;  %v3127_v17 = vpop.f32.mrb[14].mxu1  ;;  %v3064_v18 = vpop.f32.mrb[15].mxu0 }
 0x18f   : > { %v3065_v19 = vadd.f32 %v3064_v18, %v3063_v15  ;;  %v3128_v20 = vpop.f32.mrb[15].mxu1 }
 0x190   : > { %v4271_v21 = vadd.f32 %v3126_v16, %v3062_v13  ;;  %v3129_v22 = vadd.f32 %v3128_v20, %v3127_v17 }
 0x192   : > { %v4273_v23 = vadd.f32 %v3129_v22, %v3065_v19 }
 0x193   : > { %v3066_v24 = vpop.f32.mrb[16].mxu0 }
 0x194   : > { %v3130_v25 = vpop.f32.mrb[16].mxu1  ;;  %v3067_v26 = vpop.f32.mrb[17].mxu0 }
 0x195   : > { %v3068_v27 = vadd.f32 %v3067_v26, %v3066_v24  ;;  %v3131_v28 = vpop.f32.mrb[17].mxu1  ;;  %v3069_v29 = vpop.f32.mrb[18].mxu0 }
 0x196   : > { %v3132_v30 = vadd.f32 %v3131_v28, %v3130_v25  ;;  %v3133_v31 = vpop.f32.mrb[18].mxu1  ;;  %v3070_v32 = vpop.f32.mrb[19].mxu0 }
 0x197   : > { %v3071_v33 = vadd.f32 %v3070_v32, %v3069_v29  ;;  %v3134_v34 = vpop.f32.mrb[19].mxu1 }
 0x198   : > { %v4275_v35 = vadd.f32 %v3132_v30, %v3068_v27  ;;  %v3135_v36 = vadd.f32 %v3134_v34, %v3133_v31 }
 0x19a   : > { %v4277_v37 = vadd.f32 %v3135_v36, %v3071_v33 }
 0x19b   : > { %v3072_v38 = vpop.f32.mrb[20].mxu0 }
 0x19c   : > { %v3136_v39 = vpop.f32.mrb[20].mxu1  ;;  %v3073_v40 = vpop.f32.mrb[21].mxu0 }
 0x19d   : > { %v3074_v41 = vadd.f32 %v3073_v40, %v3072_v38  ;;  %v3137_v42 = vpop.f32.mrb[21].mxu1  ;;  %v3075_v44 = vpop.f32.mrb[22].mxu0 }
 0x19e   : > { %v3138_v46 = vadd.f32 %v3137_v42, %v3136_v39  ;;  %v3139_v47 = vpop.f32.mrb[22].mxu1  ;;  %v3076_v48 = vpop.f32.mrb[23].mxu0 }
 0x19f   : > { %v3077_v49 = vadd.f32 %v3076_v48, %v3075_v44  ;;  %v3140_v50 = vpop.f32.mrb[23].mxu1 }
 0x1a0   : > { %v4279_v51 = vadd.f32 %v3138_v46, %v3074_v41  ;;  %v3141_v52 = vadd.f32 %v3140_v50, %v3139_v47 }
 0x1a2   : > { %v4281_v53 = vadd.f32 %v3141_v52, %v3077_v49 }
 0x1a3   : > { %v3078_v54 = vpop.f32.mrb[24].mxu0 }
 0x1a4   : > { %v3142_v55 = vpop.f32.mrb[24].mxu1  ;;  %v3079_v56 = vpop.f32.mrb[25].mxu0 }
 0x1a5   : > { %v3080_v58 = vadd.f32 %v3079_v56, %v3078_v54  ;;  %v3143_v60 = vpop.f32.mrb[25].mxu1  ;;  %v3081_v61 = vpop.f32.mrb[26].mxu0 }
 0x1a6   : > { %v3144_v62 = vadd.f32 %v3143_v60, %v3142_v55  ;;  %v3145_v63 = vpop.f32.mrb[26].mxu1  ;;  %v3082_v0 = vpop.f32.mrb[27].mxu0 }
 0x1a7   : > { %v3083_v1 = vadd.f32 %v3082_v0, %v3081_v61  ;;  %v3146_v2 = vpop.f32.mrb[27].mxu1 }
 0x1a8   : > { %v4283_v3 = vadd.f32 %v3144_v62, %v3080_v58  ;;  %v3147_v4 = vadd.f32 %v3146_v2, %v3145_v63 }
 0x1aa   : > { %v4285_v5 = vadd.f32 %v3147_v4, %v3083_v1 }
 0x1ab   : > { %v3084_v6 = vpop.f32.mrb[28].mxu0 }
 0x1ac   : > { %v3148_v8 = vpop.f32.mrb[28].mxu1  ;;  %v3085_v10 = vpop.f32.mrb[29].mxu0 }
 0x1ad   : > { %v3086_v11 = vadd.f32 %v3085_v10, %v3084_v6  ;;  %v3149_v12 = vpop.f32.mrb[29].mxu1  ;;  %v3087_v13 = vpop.f32.mrb[30].mxu0 }
 0x1ae   : > { %v3150_v14 = vadd.f32 %v3149_v12, %v3148_v8  ;;  %v3151_v15 = vpop.f32.mrb[30].mxu1  ;;  %v3088_v16 = vpop.f32.mrb[31].mxu0 }
 0x1af   : > { %v3089_v17 = vadd.f32 %v3088_v16, %v3087_v13  ;;  %v3152_v18 = vpop.f32.mrb[31].mxu1 }
 0x1b0   : > { %v4287_v19 = vadd.f32 %v3150_v14, %v3086_v11  ;;  %v3153_v20 = vadd.f32 %v3152_v18, %v3151_v15 }
 0x1b2   : > { %v4289_v22 = vadd.f32 %v3153_v20, %v3089_v17 }
 0x1b3   : > { %v3170_v24 = vpop.f32.mrb[32].mxu0 }
 0x1b4   : > { %v3234_v25 = vpop.f32.mrb[32].mxu1  ;;  %v3171_v26 = vpop.f32.mrb[33].mxu0 }
 0x1b5   : > { %v3172_v27 = vadd.f32 %v3171_v26, %v3170_v24  ;;  %v3235_v28 = vpop.f32.mrb[33].mxu1  ;;  %v3173_v29 = vpop.f32.mrb[34].mxu0 }
 0x1b6   : > { %v3236_v30 = vadd.f32 %v3235_v28, %v3234_v25  ;;  %v3237_v31 = vpop.f32.mrb[34].mxu1  ;;  %v3174_v32 = vpop.f32.mrb[35].mxu0 }
 0x1b7   : > { %v2151_v33 = vadd.f32 %v3172_v27, %v4259_v43  ;;  %v3175_v34 = vadd.f32 %v3174_v32, %v3173_v29  ;;  %v3238_v36 = vpop.f32.mrb[35].mxu1 }
 0x1b8   : > { %v3239_v38 = vadd.f32 %v3238_v36, %v3237_v31 }
 0x1b9   : > { %v2154_v39 = vadd.f32 %v3175_v34, %v4261_v45  ;;  %v4293_v40 = vadd.f32 %v3236_v30, %v2151_v33 }
 0x1bb   : > { %v3176_v41 = vpop.f32.mrb[36].mxu0  ;;  %v4295_v42 = vadd.f32 %v3239_v38, %v2154_v39 }
 0x1bc   : > { %v3240_v44 = vpop.f32.mrb[36].mxu1  ;;  %v3177_v46 = vpop.f32.mrb[37].mxu0 }
 0x1bd   : > { %v3178_v47 = vadd.f32 %v3177_v46, %v3176_v41  ;;  %v3241_v48 = vpop.f32.mrb[37].mxu1  ;;  %v3179_v49 = vpop.f32.mrb[38].mxu0 }
 0x1be   : > { %v3242_v50 = vadd.f32 %v3241_v48, %v3240_v44  ;;  %v3243_v52 = vpop.f32.mrb[38].mxu1  ;;  %v3180_v54 = vpop.f32.mrb[39].mxu0 }
 0x1bf   : > { %v2159_v43 = vadd.f32 %v3178_v47, %v4263_v57  ;;  %v3181_v55 = vadd.f32 %v3180_v54, %v3179_v49  ;;  %v3244_v56 = vpop.f32.mrb[39].mxu1 }
 0x1c0   : > { %v3245_v58 = vadd.f32 %v3244_v56, %v3243_v52 }
 0x1c1   : > { %v2162_v45 = vadd.f32 %v3181_v55, %v4265_v59  ;;  %v4299_v60 = vadd.f32 %v3242_v50, %v2159_v43 }
 0x1c3   : > { %v3182_v61 = vpop.f32.mrb[40].mxu0  ;;  %v4301_v62 = vadd.f32 %v3245_v58, %v2162_v45 }
 0x1c4   : > { %v3246_v63 = vpop.f32.mrb[40].mxu1  ;;  %v3183_v0 = vpop.f32.mrb[41].mxu0 }
 0x1c5   : > { %v3184_v1 = vadd.f32 %v3183_v0, %v3182_v61  ;;  %v3247_v2 = vpop.f32.mrb[41].mxu1  ;;  %v3185_v4 = vpop.f32.mrb[42].mxu0 }
 0x1c6   : > { %v3248_v6 = vadd.f32 %v3247_v2, %v3246_v63  ;;  %v3249_v8 = vpop.f32.mrb[42].mxu1  ;;  %v3186_v10 = vpop.f32.mrb[43].mxu0 }
 0x1c7   : > { %v2167_v57 = vadd.f32 %v3184_v1, %v4267_v7  ;;  %v3187_v11 = vadd.f32 %v3186_v10, %v3185_v4  ;;  %v3250_v12 = vpop.f32.mrb[43].mxu1 }
 0x1c8   : > { %v3251_v13 = vadd.f32 %v3250_v12, %v3249_v8 }
 0x1c9   : > { %v2170_v59 = vadd.f32 %v3187_v11, %v4269_v9  ;;  %v4305_v14 = vadd.f32 %v3248_v6, %v2167_v57 }
 0x1cb   : > { %v3188_v15 = vpop.f32.mrb[44].mxu0  ;;  %v4307_v16 = vadd.f32 %v3251_v13, %v2170_v59 }
 0x1cc   : > { %v3252_v17 = vpop.f32.mrb[44].mxu1  ;;  %v3189_v18 = vpop.f32.mrb[45].mxu0 }
 0x1cd   : > { %v3190_v20 = vadd.f32 %v3189_v18, %v3188_v15  ;;  %v3253_v24 = vpop.f32.mrb[45].mxu1  ;;  %v3191_v25 = vpop.f32.mrb[46].mxu0 }
 0x1ce   : > { %v3254_v26 = vadd.f32 %v3253_v24, %v3252_v17  ;;  %v3255_v27 = vpop.f32.mrb[46].mxu1  ;;  %v3192_v28 = vpop.f32.mrb[47].mxu0 }
 0x1cf   : > { %v2175_v7 = vadd.f32 %v3190_v20, %v4271_v21  ;;  %v3193_v29 = vadd.f32 %v3192_v28, %v3191_v25  ;;  %v3256_v30 = vpop.f32.mrb[47].mxu1 }
 0x1d0   : > { %v3257_v31 = vadd.f32 %v3256_v30, %v3255_v27 }
 0x1d1   : > { %v2178_v9 = vadd.f32 %v3193_v29, %v4273_v23  ;;  %v4311_v32 = vadd.f32 %v3254_v26, %v2175_v7 }
 0x1d3   : > { %v3194_v33 = vpop.f32.mrb[48].mxu0  ;;  %v4313_v34 = vadd.f32 %v3257_v31, %v2178_v9 }
 0x1d4   : > { %v3258_v36 = vpop.f32.mrb[48].mxu1  ;;  %v3195_v38 = vpop.f32.mrb[49].mxu0 }
 0x1d5   : > { %v3196_v39 = vadd.f32 %v3195_v38, %v3194_v33  ;;  %v3259_v41 = vpop.f32.mrb[49].mxu1  ;;  %v3197_v44 = vpop.f32.mrb[50].mxu0 }
 0x1d6   : > { %v3260_v46 = vadd.f32 %v3259_v41, %v3258_v36  ;;  %v3261_v47 = vpop.f32.mrb[50].mxu1  ;;  %v3198_v48 = vpop.f32.mrb[51].mxu0 }
 0x1d7   : > { %v2183_v21 = vadd.f32 %v3196_v39, %v4275_v35  ;;  %v3199_v49 = vadd.f32 %v3198_v48, %v3197_v44  ;;  %v3262_v50 = vpop.f32.mrb[51].mxu1 }
 0x1d8   : > { %v3263_v52 = vadd.f32 %v3262_v50, %v3261_v47 }
 0x1d9   : > { %v2186_v23 = vadd.f32 %v3199_v49, %v4277_v37  ;;  %v4317_v54 = vadd.f32 %v3260_v46, %v2183_v21  ;;  %v4336_v49 = vld [vmem:[%s859_s20] ss:$0 sm:$0xff] }
 0x1db   : > { %v3200_v43 = vpop.f32.mrb[52].mxu0  ;;  %v4319_v55 = vadd.f32 %v3263_v52, %v2186_v23 }
 0x1dc   : > { %v3264_v56 = vpop.f32.mrb[52].mxu1  ;;  %v3201_v58 = vpop.f32.mrb[53].mxu0 }
 0x1dd   : > { %v3202_v45 = vadd.f32 %v3201_v58, %v3200_v43  ;;  %v3265_v61 = vpop.f32.mrb[53].mxu1  ;;  %v3203_v63 = vpop.f32.mrb[54].mxu0 }
 0x1de   : > { %v3266_v0 = vadd.f32 %v3265_v61, %v3264_v56  ;;  %v3267_v1 = vpop.f32.mrb[54].mxu1  ;;  %v3204_v2 = vpop.f32.mrb[55].mxu0 }
 0x1df   : > { %v2191_v35 = vadd.f32 %v3202_v45, %v4279_v51  ;;  %v3205_v4 = vadd.f32 %v3204_v2, %v3203_v63  ;;  %v3268_v6 = vpop.f32.mrb[55].mxu1 }
 0x1e0   : > { %v3269_v8 = vadd.f32 %v3268_v6, %v3267_v1 }
 0x1e1   : > { %v2194_v37 = vadd.f32 %v3205_v4, %v4281_v53  ;;  %v2288_v10 = vadd.f32 %v3266_v0, %v2191_v35 }
 0x1e3   : > { %v3206_v57 = vpop.f32.mrb[56].mxu0  ;;  %v2291_v11 = vadd.f32 %v3269_v8, %v2194_v37 }
 0x1e4   : > { %v3270_v12 = vpop.f32.mrb[56].mxu1  ;;  %v3207_v13 = vpop.f32.mrb[57].mxu0 }
 0x1e5   : > { %v3208_v59 = vadd.f32 %v3207_v13, %v3206_v57  ;;  %v3271_v15 = vpop.f32.mrb[57].mxu1  ;;  %v3209_v17 = vpop.f32.mrb[58].mxu0 }
 0x1e6   : > { %v3272_v18 = vadd.f32 %v3271_v15, %v3270_v12  ;;  %v3273_v20 = vpop.f32.mrb[58].mxu1  ;;  %v3210_v24 = vpop.f32.mrb[59].mxu0 }
 0x1e7   : > { %v2199_v51 = vadd.f32 %v3208_v59, %v4283_v3  ;;  %v3211_v25 = vadd.f32 %v3210_v24, %v3209_v17  ;;  %v3274_v26 = vpop.f32.mrb[59].mxu1 }
 0x1e8   : > { %v3275_v27 = vadd.f32 %v3274_v26, %v3273_v20 }
 0x1e9   : > { %v2202_v53 = vadd.f32 %v3211_v25, %v4285_v5  ;;  %v4326_v28 = vadd.f32 %v3272_v18, %v2199_v51 }
 0x1eb   : > { %v3212_v7 = vpop.f32.mrb[60].mxu0  ;;  %v4328_v29 = vadd.f32 %v3275_v27, %v2202_v53 }
 0x1ec   : > { %v3276_v30 = vpop.f32.mrb[60].mxu1  ;;  %v3213_v31 = vpop.f32.mrb[61].mxu0 }
 0x1ed   : > { %v3214_v9 = vadd.f32 %v3213_v31, %v3212_v7  ;;  %v3277_v33 = vpop.f32.mrb[61].mxu1  ;;  %v3215_v36 = vpop.f32.mrb[62].mxu0 }
 0x1ee   : > { %v3278_v38 = vadd.f32 %v3277_v33, %v3276_v30  ;;  %v3279_v39 = vpop.f32.mrb[62].mxu1  ;;  %v3216_v3 = vpop.f32.mrb[63].mxu0 }
 0x1ef   : > { %v2207_v41 = vadd.f32 %v3214_v9, %v4287_v19  ;;  %v3217_v44 = vadd.f32 %v3216_v3, %v3215_v36  ;;  %v3280_v46 = vpop.f32.mrb[63].mxu1 }
 0x1f0   : > { %v3281_v47 = vadd.f32 %v3280_v46, %v3279_v39 }
 0x1f1   : > { %v2210_v5 = vadd.f32 %v3217_v44, %v4289_v22  ;;  %v2304_v48 = vadd.f32 %v3278_v38, %v2207_v41 }
 0x1f3   : > { %v3316_v21 = vpop.f32.mrb[64].mxu0  ;;  %v2307_v50 = vadd.f32 %v3281_v47, %v2210_v5 }
 0x1f4   : > { %v2353_v52 = vadd.f32 %v3316_v21, %v4299_v60  ;;  %v3324_v23 = vpop.f32.mrb[64].mxu1  ;;  %v2344_v43 = vpop.f32.mrb[65].mxu0 }
 0x1f5   : > { %v2385_v19 = vadd.f32 %v3324_v23, %v2288_v10  ;;  %v2345_v56 = vadd.f32 %v2344_v43, %v4293_v40  ;;  %v2376_v58 = vpop.f32.mrb[65].mxu1  ;;  %v3317_v45 = vpop.f32.mrb[66].mxu0 }
 0x1f6   : > { %v2467_v61 = vadd.f32 %v4336_v49, %v2353_v52  ;;  %v2377_v63 = vadd.f32 %v2376_v58, %v4317_v54  ;;  %v2356_v22 = vadd.f32 %v3317_v45, %v4301_v62  ;;  %v3325_v0 = vpop.f32.mrb[66].mxu1  ;;  %v2347_v1 = vpop.f32.mrb[67].mxu0 }
 0x1f7   : > { %v2475_v2 = vadd.f32 %v4336_v49, %v2385_v19  ;;  %v2465_v60 = vadd.f32 %v4336_v49, %v2345_v56  ;;  %v2388_v35 = vadd.f32 %v3325_v0, %v2291_v11  ;;  %v2348_v4 = vadd.f32 %v2347_v1, %v4295_v42  ;;  %v2379_v6 = vpop.f32.mrb[67].mxu1 }
 0x1f8   : > { %v2473_v40 = vadd.f32 %v4336_v49, %v2377_v63  ;;  %v2468_v8 = vadd.f32 %v4336_v49, %v2356_v22  ;;  %v2380_v54 = vadd.f32 %v2379_v6, %v4319_v55  ;;  %v2483_v10 = vmax.f32 %v2467_v61, 0.0 }
 0x1f9   : > { %v2476_v62 = vadd.f32 %v4336_v49, %v2388_v35  ;;  %v2466_v37 = vadd.f32 %v4336_v49, %v2348_v4  ;;  %v2491_v11 = vmax.f32 %v2475_v2, 0.0  ;;  %v2481_v13 = vmax.f32 %v2465_v60, 0.0 }
 0x1fa   : > { %v2484_v57 = vmax.f32 %v2468_v8, 0.0  ;;  %v2474_v12 = vadd.f32 %v4336_v49, %v2380_v54  ;;  %v2489_v17 = vmax.f32 %v2473_v40, 0.0 }
 0x1fb   : > { %v2492_v42 = vmax.f32 %v2476_v62, 0.0  ;;  %v2482_v59 = vmax.f32 %v2466_v37, 0.0  ;;  %v3320_v15 = vpop.f32.mrb[68].mxu0 }
 0x1fc   : > { %v2987_v18 = vpack.c.bf16 %v2484_v57, %v2483_v10  ;;  %v2490_v20 = vmax.f32 %v2474_v12, 0.0  ;;  %v2369_v24 = vadd.f32 %v3320_v15, %v4311_v32  ;;  %v3328_v51 = vpop.f32.mrb[68].mxu1  ;;  %v2360_v55 = vpop.f32.mrb[69].mxu0 }
 0x1fd   : > { %v3007_v25 = vpack.c.bf16 %v2492_v42, %v2491_v11  ;;  %v2982_v26 = vpack.c.bf16 %v2482_v59, %v2481_v13  ;;  %v2401_v27 = vadd.f32 %v3328_v51, %v2304_v48  ;;  %v2361_v53 = vadd.f32 %v2360_v55, %v4305_v14  ;;  %v2392_v7 = vpop.f32.mrb[69].mxu1  ;;  %v3321_v30 = vpop.f32.mrb[70].mxu0 }
 0x1fe   : > { %3019 = vst [vmem:[%s4356_s12 + $0x8] sm:$0xff] %v2987_v18   ;;  %v3002_v31 = vpack.c.bf16 %v2490_v20, %v2489_v17  ;;  %v2471_v9 = vadd.f32 %v4336_v49, %v2369_v24  ;;  %v2393_v32 = vadd.f32 %v2392_v7, %v4326_v28  ;;  %v2372_v33 = vadd.f32 %v3321_v30, %v4313_v34  ;;  %v3329_v36 = vpop.f32.mrb[70].mxu1  ;;  %v2363_v38 = vpop.f32.mrb[71].mxu0 }
 0x1ff   : > { %3023 = vst [vmem:[%s4356_s12 + $0x28] sm:$0xff] %v3007_v25   ;;  %2983 = vst [vmem:[%s4356_s12] sm:$0xff] %v2982_v26   ;;  %v2479_v14 = vadd.f32 %v4336_v49, %v2401_v27  ;;  %v2469_v39 = vadd.f32 %v4336_v49, %v2361_v53  ;;  %v2404_v3 = vadd.f32 %v3329_v36, %v2307_v50  ;;  %v2395_v44 = vpop.f32.mrb[71].mxu1 }
 0x200   : > { %v2364_v41 = vadd.f32 %v2363_v38, %v4307_v16  ;;  %3022 = vst [vmem:[%s4356_s12 + $0x20] sm:$0xff] %v3002_v31   ;;  %v2477_v46 = vadd.f32 %v4336_v49, %v2393_v32  ;;  %v2472_v47 = vadd.f32 %v4336_v49, %v2372_v33  ;;  %v2396_v34 = vadd.f32 %v2395_v44, %v4328_v29 }
 0x201   : > { %v2480_v28 = vadd.f32 %v4336_v49, %v2404_v3  ;;  %v2487_v48 = vmax.f32 %v2471_v9, 0.0  ;;  %v2495_v50 = vmax.f32 %v2479_v14, 0.0  ;;  %v2485_v52 = vmax.f32 %v2469_v39, 0.0 }
 0x202   : > { %v2470_v5 = vadd.f32 %v4336_v49, %v2364_v41  ;;  %v2488_v21 = vmax.f32 %v2472_v47, 0.0  ;;  %v2478_v16 = vadd.f32 %v4336_v49, %v2396_v34  ;;  %v2493_v19 = vmax.f32 %v2477_v46, 0.0  ;;  %2583 = sbr.rel (!%p3659_p6) target bundleno = 531 (0x213), region = 85 }
 0x203   : > { %v2496_v23 = vmax.f32 %v2480_v28, 0.0 }
 0x204   : > { %v2486_v43 = vmax.f32 %v2470_v5, 0.0  ;;  %v2997_v56 = vpack.c.bf16 %v2488_v21, %v2487_v48  ;;  %v2494_v58 = vmax.f32 %v2478_v16, 0.0 }
 0x205   : > { %v3017_v45 = vpack.c.bf16 %v2496_v23, %v2495_v50  ;;  %v2608_v22 = vld [vmem:[%s4356_s12 + $0x8] sm:$0xf] (%p3659_p6)  ;;  %v2610_v0 = vld [vmem:[%s4356_s12 + $0xc] sm:$0xf] (%p3659_p6) }
 0x206   : > { %v2992_v29 = vpack.c.bf16 %v2486_v43, %v2485_v52  ;;  %3021 = vst [vmem:[%s4356_s12 + $0x18] sm:$0xff] %v2997_v56   ;;  %v3012_v61 = vpack.c.bf16 %v2494_v58, %v2493_v19  ;;  %v2604_v49 = vld [vmem:[%s4356_s12] sm:$0xf] (%p3659_p6)  ;;  %v2606_v63 = vld [vmem:[%s4356_s12 + $0x4] sm:$0xf] (%p3659_p6) }
 0x207   : > { %3025 = vst [vmem:[%s4356_s12 + $0x38] sm:$0xff] %v3017_v45   ;;  %2605 = vst [vmem:[%s2588_s26] sm:$0xf] (%p3659_p6), %v2604_v49  ;;  %v2620_v4 = vld [vmem:[%s4356_s12 + $0x20] sm:$0xf] (%p3659_p6)  ;;  %v2622_v6 = vld [vmem:[%s4356_s12 + $0x24] sm:$0xf] (%p3659_p6) }
 0x208   : > { %3020 = vst [vmem:[%s4356_s12 + $0x10] sm:$0xff] %v2992_v29   ;;  %3024 = vst [vmem:[%s4356_s12 + $0x30] sm:$0xff] %v3012_v61   ;;  %v2624_v40 = vld [vmem:[%s4356_s12 + $0x28] sm:$0xf] (%p3659_p6)  ;;  %v2626_v8 = vld [vmem:[%s4356_s12 + $0x2c] sm:$0xf] (%p3659_p6) }
 0x209   : > { %2607 = vst [vmem:[%s2588_s26 + $0x8] sm:$0xf] %v2606_v63  ;;  %2609 = vst [vmem:[%s2588_s26 + $0x10] sm:$0xf] %v2608_v22 }
 0x20a   : > { %2611 = vst [vmem:[%s2588_s26 + $0x18] sm:$0xf] %v2610_v0  ;;  %2621 = vst [vmem:[%s2588_s26 + $0x40] sm:$0xf] %v2620_v4 }
 0x20b   : > { %2623 = vst [vmem:[%s2588_s26 + $0x48] sm:$0xf] %v2622_v6  ;;  %2625 = vst [vmem:[%s2588_s26 + $0x50] sm:$0xf] %v2624_v40 }
 0x20c   : > { %2627 = vst [vmem:[%s2588_s26 + $0x58] sm:$0xf] %v2626_v8 }
 0x20d   : > { %v2616_v60 = vld [vmem:[%s4356_s12 + $0x18] sm:$0xf]  ;;  %v2618_v35 = vld [vmem:[%s4356_s12 + $0x1c] sm:$0xf] }
 0x20e   : > { %2617 = vst [vmem:[%s2588_s26 + $0x30] sm:$0xf] %v2616_v60  ;;  %2619 = vst [vmem:[%s2588_s26 + $0x38] sm:$0xf] %v2618_v35  ;;  %v2632_v37 = vld [vmem:[%s4356_s12 + $0x38] sm:$0xf] }
 0x20f   : > { %v2612_v1 = vld [vmem:[%s4356_s12 + $0x10] sm:$0xf]  ;;  %v2614_v2 = vld [vmem:[%s4356_s12 + $0x14] sm:$0xf]  ;;  %v2634_v10 = vld [vmem:[%s4356_s12 + $0x3c] sm:$0xf] }
 0x210   : > { %2613 = vst [vmem:[%s2588_s26 + $0x20] sm:$0xf] %v2612_v1  ;;  %2615 = vst [vmem:[%s2588_s26 + $0x28] sm:$0xf] %v2614_v2  ;;  %v2628_v54 = vld [vmem:[%s4356_s12 + $0x30] sm:$0xf] }
 0x211   : > { %v2630_v62 = vld [vmem:[%s4356_s12 + $0x34] sm:$0xf]  ;;  %2629 = vst [vmem:[%s2588_s26 + $0x60] sm:$0xf] %v2628_v54  ;;  %2633 = vst [vmem:[%s2588_s26 + $0x70] sm:$0xf] %v2632_v37 }
 0x212   : > { %2631 = vst [vmem:[%s2588_s26 + $0x68] sm:$0xf] %v2630_v62  ;;  %2635 = vst [vmem:[%s2588_s26 + $0x78] sm:$0xf] %v2634_v10 }
 0x213 PF: > { %s13_s16 = sadd.s32 1, %s3602_s16   ;;  %s4420_s12 = smov %s3590_s13 }
 0x214   : > { %p10_p12 = scmp.ge.s32.totalorder %s13_s16, 4   ;;  %s4421_s13 = smov %s3664_s22 }
 0x215   : > { %s4422_s14 = smov %s3598_s15  ;;  %s4423_s15 = smov %s4425_s17 }
 0x216   :  { %12 = sbr.rel (!%p10_p12) target bundleno = 3 (0x3), region = 163 }

// kernel: encoder_forward.22
= control target key start
LH: loop header
LB: loop body
LE: loop exit
PB: predicated region body
PF: predicated region fallthrough
CT: control target
= control target key end

     0   :  { %s367_s6 = smov 0   ;;  %s369_s7 = smov 0   ;;  %s418_s0 = inlined_call_operand.vmem [shape: bf16[2,8,4,512], index: 0, kind: input, shape index: {}]   ;;  %s419_s1 = inlined_call_operand.vmem [shape: bf16[2,4,4,256], index: 1, kind: output, shape index: {}]  }
   0x1   :  { %s371_s8 = smov 0   ;;  %s373_s9 = smov 0  }
   0x2   :  { %s375_s10 = smov 0  }
   0x3 LB: > { %s20_s11 = sadd.s32 1, %s347_s8  ;;  %s23_s12 = sadd.s32 1, %s351_s9  ;;  %s355_s10 = sphi %s375_s10, %s11_s10   ;;  %s351_s9 = sphi %s373_s9, %s423_s9   ;;  %s347_s8 = sphi %s371_s8, %s422_s8   ;;  %s343_s7 = sphi %s369_s7, %s421_s7   ;;  %s339_s6 = sphi %s367_s6, %s420_s6  }
   0x4   : > { %p21_p0 = scmp.ge.s32.totalorder %s20_s11, 4  ;;  %p266_p1 = scmp.ge.s32.totalorder %s355_s10, 1 }
   0x5   : > { %p109_p2 = scmp.lt.s32.totalorder %s355_s10, 9 }
   0x6   : > { %s425_s11 = smov (%p21_p0, %s20_s11), 0  ;;  %s427_s12 = smov (!%p21_p0, %s23_s12), %s351_s9 }
   0x7   : > { %p110_p3 = pnand %p266_p1, %p109_p2  ;;  %p25_p4 = scmp.ge.s32.totalorder %s427_s12, 2 }
   0x8   : > { %s267_s13 = sshll.u32 (!%p110_p3), %s339_s6, 1  ;;  %p139_p5 = scmp.lt.s32.totalorder (!%p110_p3), %s343_s7, 1 }
   0x9   : > { %s429_s12 = smov (%p25_p4, %s427_s12), 0  ;;  %113 = sbr.rel (%p110_p3) target bundleno = 29 (0x1d), region = 24 }
   0xa   : > { %p141_p6 = scmp.lt.s32.totalorder (!%p110_p3), %s267_s13, 7  ;;  %p151_p7 = scmp.lt.s32.totalorder (!%p110_p3), %s339_s6, 3 }
  0x10   : > { %s431_s7 = smov (!%p139_p5, %s343_s7), 1  ;;  %s433_s13 = smov (!%p141_p6, %s267_s13), 7 }
  0x11   : > { %s269_s14 = sshll.u32 %s431_s7, 5  ;;  %s268_s15 = sshll.u32 %s433_s13, 2 }
  0x12   : > { %s145_s16 = sadd.s32 %s269_s14, %s268_s15  ;;  %s272_s21 = sshll.u32 %s431_s7, 3 }
  0x13   : > { %s270_s17 = sshll.u32 %s145_s16, 1  ;;  %s435_s6 = smov (!%p151_p7, %s339_s6), 3 }
  0x14   : > { %s147_s20 = scalar_lea.vmem %s418_s0, %s270_s17  ;;  %s271_s22 = sshll.u32 %s435_s6, 1 }
  0x15   : > { %v158_v0 = vld [vmem:[%s147_s20] sm:$0xff]  ;;  %v274_v1 = vld [vmem:[%s147_s20 + $0x8] sm:$0xff]  ;;  %s155_s23 = sadd.s32 %s272_s21, %s271_s22 }
  0x16   : > { %v161_v2 = vmax.bf16 %v274_v1, %v158_v0  ;;  %s273_s24 = sshll.u32 %s155_s23, 1 }
  0x17   : > { %s157_s27 = scalar_lea.vmem %s419_s1, %s273_s24 }
  0x18   : > { %v163_v3 = vrot.slane %v161_v2, 4 }
  0x1a   : > { %v165_v4 = vmax.bf16 %v163_v3, %v161_v2 }
  0x1c   : > { %166 = vst [vmem:[%s157_s27] sm:$0xf] %v165_v4 }
  0x1d PF: > { %s11_s10 = sadd.s32 1, %s355_s10   ;;  %s420_s6 = smov %s347_s8 }
  0x1e   : > { %p8_p8 = scmp.ge.s32.totalorder %s11_s10, 10   ;;  %s421_s7 = smov %s351_s9 }
  0x1f   : > { %s422_s8 = smov %s425_s11  ;;  %s423_s9 = smov %s429_s12 }
  0x20   :  { %10 = sbr.rel (!%p8_p8) target bundleno = 3 (0x3), region = 55 }

// kernel: encoder_forward.19
= control target key start
LH: loop header
LB: loop body
LE: loop exit
PB: predicated region body
PF: predicated region fallthrough
CT: control target
= control target key end

     0   :  { %s4829_s0 = inlined_call_operand.vmem [shape: bf16[128,2304], index: 0, kind: input, shape index: {}]   ;;  %s4830_s1 = inlined_call_operand.vmem [shape: bf16[2304,256], index: 1, kind: input, shape index: {}]   ;;  %s4831_s2 = inlined_call_operand.vmem [shape: f32[1,256], index: 2, kind: input, shape index: {}]   ;;  %s4832_s3 = inlined_call_operand.vmem [shape: bf16[128,256], index: 3, kind: output, shape index: {}]  }
   0x1   :  { %4834 = sst [smem:[#allocation7_spill]] %s4829_s0 }
   0x2   :  { %4835 = sst [smem:[#allocation8_spill]] %s4830_s1 }
   0x3   :  { %s3942_s12 = smov 0   ;;  %s3944_s13 = smov 0  }
   0x4   :  { %s3946_s14 = smov 0   ;;  %s3948_s15 = smov 0  }
   0x5   :  { %s3950_s16 = smov 0   ;;  %s3952_s17 = smov 0  }
   0x6   :  { %s3954_s18 = smov 0   ;;  %s3956_s19 = smov 0  }
   0x7   :  { %s3958_s20 = smov 0   ;;  %s3960_s21 = smov 0  }
   0x8   :  { %s3962_s22 = smov 0  }
   0x9 LB: > { %s2971_s23 = sadd.s32 4294967295, %s3919_s22   ;;  %s25_s24 = sadd.s32 1, %s3911_s20  ;;  %s3919_s22 = sphi %s3962_s22, %s13_s22   ;;  %s3915_s21 = sphi %s3960_s21, %s4852_s21   ;;  %s3911_s20 = sphi %s3958_s20, %s4851_s20   ;;  %s3907_s19 = sphi %s3956_s19, %s4850_s19   ;;  %s3903_s18 = sphi %s3954_s18, %s4849_s18   ;;  %s3899_s17 = sphi %s3952_s17, %s4848_s17   ;;  %s3895_s16 = sphi %s3950_s16, %s4847_s16   ;;  %s3891_s15 = sphi %s3948_s15, %s4846_s15   ;;  %s3887_s14 = sphi %s3946_s14, %s4845_s14   ;;  %s3883_s13 = sphi %s3944_s13, %s4844_s13   ;;  %s3879_s12 = sphi %s3942_s12, %s4843_s12  }
   0xa   : > { %p26_p0 = scmp.ge.s32.totalorder %s25_s24, 2  ;;  %s28_s25 = sadd.s32 1, %s3915_s21 }
   0xb   : > { %s41_s26 = sadd.s32 1, %s3899_s17  ;;  %p48_p1 = scmp.ne.s32.totalorder %s3899_s17, %s3895_s16 }
   0xc   : > { %s4854_s24 = smov (%p26_p0, %s25_s24), 0  ;;  %s4856_s25 = smov (!%p26_p0, %s28_s25), %s3915_s21 }
   0xd   : > { %s37_s27 = ssub.s32 %s3911_s20, %s4854_s24  ;;  %p49_p2 = scmp.eq.s32.totalorder %s3919_s22, 0 }
   0xe   : > { %p30_p3 = scmp.ge.s32.totalorder %s4856_s25, 2  ;;  %p39_p4 = scmp.eq.s32.totalorder %s37_s27, 0 }
   0xf   : > { %p4009_p5 = por %p49_p2, %p48_p1  ;;  %s69_s29 = sadd.s32 1, %s3891_s15 }
  0x10   : > { %s4858_s25 = smov (%p30_p3, %s4856_s25), 0  ;;  %p76_p6 = scmp.ne.s32.totalorder %s3891_s15, %s3887_s14 }
  0x11   : > { %4837 = sst [smem:[#allocation6_spill]] %s4858_s25  ;;  %s65_s4 = ssub.s32 %s3915_s21, %s4858_s25 }
  0x12   : > { %s4017_s30 = scalar_select %p39_p4, %s3899_s17, %s41_s26  }
  0x13   : > { %s66_s5 = sor.u32 %s65_s4, %s37_s27  ;;  %p121_p7 = scmp.eq.s32.totalorder %s65_s4, 0 }
  0x14   : > { %p67_p8 = scmp.eq.s32.totalorder %s66_s5, 0  ;;  %p4023_p9 = por %p76_p6, %p49_p2 }
  0x15   : > { %s123_s7 = sadd.s32 1, %s3883_s13  ;;  %p133_p10 = scmp.ne.s32.totalorder %s3883_s13, %s3879_s12 }
  0x16   : > { %s4031_s8 = scalar_select %p67_p8, %s3891_s15, %s69_s29  }
  0x17   : > { %s4034_s9 = scalar_select %p121_p7, %s3883_s13, %s123_s7  }
  0x18   : > { %p134_p11 = scmp.eq.s32.totalorder %s2971_s23, 3  ;;  %p2974_p13 = scmp.ge.s32.totalorder %s3919_s22, 4 }
  0x1a   : > { %p4036_p12 = por %p134_p11, %p133_p10  ;;  %156 = sbr.rel (%p2974_p13) target bundleno = 189 (0xbd), region = 16 }
  0x21   : > { %159 = sbr.rel (!%p4009_p5) target bundleno = 84 (0x54), region = 20  ;;  %s161_s11 = sand.u32 (%p4009_p5), 1, %s3899_s17  }
  0x22   : > { %s3179_s26 = smul.u32 (%p4009_p5), 36, %s3911_s20  ;;  %s4840_s0 = sld [smem:[#allocation7_spill]] (%p4009_p5) }
  0x23   : > { %s3564_s27 = smul.u32 (%p4009_p5), 576, %s161_s11 }
  0x25   : > { %s4053_s23 = scalar_lea.vmem (%p4009_p5), [#allocation3], %s3564_s27 }
  0x28   : > { %s4048_s5 = scalar_lea.vmem %s4840_s0, %s3179_s26 }
  0x29   : > { %v184_v0 = vld [vmem:[%s4048_s5] sm:$0xff]  ;;  %v186_v1 = vld [vmem:[%s4048_s5 + $0x8] sm:$0xff]  ;;  %v188_v2 = vld [vmem:[%s4048_s5 + $0x10] sm:$0xff] }
  0x2a   : > { %185 = vst [vmem:[%s4053_s23] sm:$0xff] %v184_v0  ;;  %187 = vst [vmem:[%s4053_s23 + $0x8] sm:$0xff] %v186_v1  ;;  %v190_v3 = vld [vmem:[%s4048_s5 + $0x18] sm:$0xff]  ;;  %v192_v4 = vld [vmem:[%s4048_s5 + $0x48] sm:$0xff] }
  0x2b   : > { %189 = vst [vmem:[%s4053_s23 + $0x10] sm:$0xff] %v188_v2  ;;  %v194_v5 = vld [vmem:[%s4048_s5 + $0x50] sm:$0xff]  ;;  %191 = vst [vmem:[%s4053_s23 + $0x18] sm:$0xff] %v190_v3  ;;  %v196_v6 = vld [vmem:[%s4048_s5 + $0x58] sm:$0xff] }
  0x2c   : > { %193 = vst [vmem:[%s4053_s23 + $0x24] sm:$0xff] %v192_v4  ;;  %195 = vst [vmem:[%s4053_s23 + $0x2c] sm:$0xff] %v194_v5  ;;  %v198_v7 = vld [vmem:[%s4048_s5 + $0x60] sm:$0xff]  ;;  %v200_v8 = vld [vmem:[%s4048_s5 + $0x90] sm:$0xff] }
  0x2d   : > { %197 = vst [vmem:[%s4053_s23 + $0x34] sm:$0xff] %v196_v6  ;;  %199 = vst [vmem:[%s4053_s23 + $0x3c] sm:$0xff] %v198_v7  ;;  %v202_v9 = vld [vmem:[%s4048_s5 + $0x98] sm:$0xff]  ;;  %v204_v10 = vld [vmem:[%s4048_s5 + $0xa0] sm:$0xff] }
  0x2e   : > { %201 = vst [vmem:[%s4053_s23 + $0x48] sm:$0xff] %v200_v8  ;;  %v206_v11 = vld [vmem:[%s4048_s5 + $0xa8] sm:$0xff]  ;;  %203 = vst [vmem:[%s4053_s23 + $0x50] sm:$0xff] %v202_v9  ;;  %v208_v12 = vld [vmem:[%s4048_s5 + $0xd8] sm:$0xff] }
  0x2f   : > { %205 = vst [vmem:[%s4053_s23 + $0x58] sm:$0xff] %v204_v10  ;;  %207 = vst [vmem:[%s4053_s23 + $0x60] sm:$0xff] %v206_v11  ;;  %v210_v13 = vld [vmem:[%s4048_s5 + $0xe0] sm:$0xff]  ;;  %v212_v14 = vld [vmem:[%s4048_s5 + $0xe8] sm:$0xff] }
  0x30   : > { %209 = vst [vmem:[%s4053_s23 + $0x6c] sm:$0xff] %v208_v12  ;;  %211 = vst [vmem:[%s4053_s23 + $0x74] sm:$0xff] %v210_v13  ;;  %v214_v15 = vld [vmem:[%s4048_s5 + $0xf0] sm:$0xff]  ;;  %v216_v16 = vld [vmem:[%s4048_s5 + $0x120] sm:$0xff] }
  0x31   : > { %213 = vst [vmem:[%s4053_s23 + $0x7c] sm:$0xff] %v212_v14  ;;  %v218_v17 = vld [vmem:[%s4048_s5 + $0x128] sm:$0xff]  ;;  %215 = vst [vmem:[%s4053_s23 + $0x84] sm:$0xff] %v214_v15  ;;  %v220_v18 = vld [vmem:[%s4048_s5 + $0x130] sm:$0xff] }
  0x32   : > { %217 = vst [vmem:[%s4053_s23 + $0x90] sm:$0xff] %v216_v16  ;;  %219 = vst [vmem:[%s4053_s23 + $0x98] sm:$0xff] %v218_v17  ;;  %v222_v19 = vld [vmem:[%s4048_s5 + $0x138] sm:$0xff]  ;;  %v224_v20 = vld [vmem:[%s4048_s5 + $0x168] sm:$0xff] }
  0x33   : > { %221 = vst [vmem:[%s4053_s23 + $0xa0] sm:$0xff] %v220_v18  ;;  %223 = vst [vmem:[%s4053_s23 + $0xa8] sm:$0xff] %v222_v19  ;;  %v226_v21 = vld [vmem:[%s4048_s5 + $0x170] sm:$0xff]  ;;  %v228_v22 = vld [vmem:[%s4048_s5 + $0x178] sm:$0xff] }
  0x34   : > { %225 = vst [vmem:[%s4053_s23 + $0xb4] sm:$0xff] %v224_v20  ;;  %v230_v23 = vld [vmem:[%s4048_s5 + $0x180] sm:$0xff]  ;;  %227 = vst [vmem:[%s4053_s23 + $0xbc] sm:$0xff] %v226_v21  ;;  %v232_v24 = vld [vmem:[%s4048_s5 + $0x1b0] sm:$0xff] }
  0x35   : > { %229 = vst [vmem:[%s4053_s23 + $0xc4] sm:$0xff] %v228_v22  ;;  %231 = vst [vmem:[%s4053_s23 + $0xcc] sm:$0xff] %v230_v23  ;;  %v234_v25 = vld [vmem:[%s4048_s5 + $0x1b8] sm:$0xff]  ;;  %v236_v26 = vld [vmem:[%s4048_s5 + $0x1c0] sm:$0xff] }
  0x36   : > { %233 = vst [vmem:[%s4053_s23 + $0xd8] sm:$0xff] %v232_v24  ;;  %235 = vst [vmem:[%s4053_s23 + $0xe0] sm:$0xff] %v234_v25  ;;  %v238_v27 = vld [vmem:[%s4048_s5 + $0x1c8] sm:$0xff]  ;;  %v240_v28 = vld [vmem:[%s4048_s5 + $0x1f8] sm:$0xff] }
  0x37   : > { %237 = vst [vmem:[%s4053_s23 + $0xe8] sm:$0xff] %v236_v26  ;;  %v242_v29 = vld [vmem:[%s4048_s5 + $0x200] sm:$0xff]  ;;  %239 = vst [vmem:[%s4053_s23 + $0xf0] sm:$0xff] %v238_v27  ;;  %v244_v30 = vld [vmem:[%s4048_s5 + $0x208] sm:$0xff] }
  0x38   : > { %241 = vst [vmem:[%s4053_s23 + $0xfc] sm:$0xff] %v240_v28  ;;  %243 = vst [vmem:[%s4053_s23 + $0x104] sm:$0xff] %v242_v29  ;;  %v246_v31 = vld [vmem:[%s4048_s5 + $0x210] sm:$0xff]  ;;  %v248_v32 = vld [vmem:[%s4048_s5 + $0x240] sm:$0xff] }
  0x39   : > { %245 = vst [vmem:[%s4053_s23 + $0x10c] sm:$0xff] %v244_v30  ;;  %247 = vst [vmem:[%s4053_s23 + $0x114] sm:$0xff] %v246_v31  ;;  %v250_v33 = vld [vmem:[%s4048_s5 + $0x248] sm:$0xff]  ;;  %v252_v34 = vld [vmem:[%s4048_s5 + $0x250] sm:$0xff] }
  0x3a   : > { %249 = vst [vmem:[%s4053_s23 + $0x120] sm:$0xff] %v248_v32  ;;  %v254_v35 = vld [vmem:[%s4048_s5 + $0x258] sm:$0xff]  ;;  %251 = vst [vmem:[%s4053_s23 + $0x128] sm:$0xff] %v250_v33  ;;  %v256_v36 = vld [vmem:[%s4048_s5 + $0x288] sm:$0xff] }
  0x3b   : > { %253 = vst [vmem:[%s4053_s23 + $0x130] sm:$0xff] %v252_v34  ;;  %255 = vst [vmem:[%s4053_s23 + $0x138] sm:$0xff] %v254_v35  ;;  %v258_v37 = vld [vmem:[%s4048_s5 + $0x290] sm:$0xff]  ;;  %v260_v38 = vld [vmem:[%s4048_s5 + $0x298] sm:$0xff] }
  0x3c   : > { %257 = vst [vmem:[%s4053_s23 + $0x144] sm:$0xff] %v256_v36  ;;  %259 = vst [vmem:[%s4053_s23 + $0x14c] sm:$0xff] %v258_v37  ;;  %v262_v39 = vld [vmem:[%s4048_s5 + $0x2a0] sm:$0xff]  ;;  %v264_v40 = vld [vmem:[%s4048_s5 + $0x2d0] sm:$0xff] }
  0x3d   : > { %261 = vst [vmem:[%s4053_s23 + $0x154] sm:$0xff] %v260_v38  ;;  %v266_v41 = vld [vmem:[%s4048_s5 + $0x2d8] sm:$0xff]  ;;  %263 = vst [vmem:[%s4053_s23 + $0x15c] sm:$0xff] %v262_v39  ;;  %v268_v42 = vld [vmem:[%s4048_s5 + $0x2e0] sm:$0xff] }
  0x3e   : > { %265 = vst [vmem:[%s4053_s23 + $0x168] sm:$0xff] %v264_v40  ;;  %267 = vst [vmem:[%s4053_s23 + $0x170] sm:$0xff] %v266_v41  ;;  %v270_v43 = vld [vmem:[%s4048_s5 + $0x2e8] sm:$0xff]  ;;  %v272_v44 = vld [vmem:[%s4048_s5 + $0x318] sm:$0xff] }
  0x3f   : > { %269 = vst [vmem:[%s4053_s23 + $0x178] sm:$0xff] %v268_v42  ;;  %271 = vst [vmem:[%s4053_s23 + $0x180] sm:$0xff] %v270_v43  ;;  %v274_v45 = vld [vmem:[%s4048_s5 + $0x320] sm:$0xff]  ;;  %v276_v46 = vld [vmem:[%s4048_s5 + $0x328] sm:$0xff] }
  0x40   : > { %273 = vst [vmem:[%s4053_s23 + $0x18c] sm:$0xff] %v272_v44  ;;  %v278_v47 = vld [vmem:[%s4048_s5 + $0x330] sm:$0xff]  ;;  %275 = vst [vmem:[%s4053_s23 + $0x194] sm:$0xff] %v274_v45  ;;  %v280_v48 = vld [vmem:[%s4048_s5 + $0x360] sm:$0xff] }
  0x41   : > { %277 = vst [vmem:[%s4053_s23 + $0x19c] sm:$0xff] %v276_v46  ;;  %279 = vst [vmem:[%s4053_s23 + $0x1a4] sm:$0xff] %v278_v47  ;;  %v282_v49 = vld [vmem:[%s4048_s5 + $0x368] sm:$0xff]  ;;  %v284_v50 = vld [vmem:[%s4048_s5 + $0x370] sm:$0xff] }
  0x42   : > { %281 = vst [vmem:[%s4053_s23 + $0x1b0] sm:$0xff] %v280_v48  ;;  %283 = vst [vmem:[%s4053_s23 + $0x1b8] sm:$0xff] %v282_v49  ;;  %v286_v51 = vld [vmem:[%s4048_s5 + $0x378] sm:$0xff]  ;;  %v288_v52 = vld [vmem:[%s4048_s5 + $0x3a8] sm:$0xff] }
  0x43   : > { %285 = vst [vmem:[%s4053_s23 + $0x1c0] sm:$0xff] %v284_v50  ;;  %v290_v53 = vld [vmem:[%s4048_s5 + $0x3b0] sm:$0xff]  ;;  %287 = vst [vmem:[%s4053_s23 + $0x1c8] sm:$0xff] %v286_v51  ;;  %v292_v54 = vld [vmem:[%s4048_s5 + $0x3b8] sm:$0xff] }
  0x44   : > { %289 = vst [vmem:[%s4053_s23 + $0x1d4] sm:$0xff] %v288_v52  ;;  %291 = vst [vmem:[%s4053_s23 + $0x1dc] sm:$0xff] %v290_v53  ;;  %v294_v55 = vld [vmem:[%s4048_s5 + $0x3c0] sm:$0xff]  ;;  %v296_v56 = vld [vmem:[%s4048_s5 + $0x3f0] sm:$0xff] }
  0x45   : > { %293 = vst [vmem:[%s4053_s23 + $0x1e4] sm:$0xff] %v292_v54  ;;  %295 = vst [vmem:[%s4053_s23 + $0x1ec] sm:$0xff] %v294_v55  ;;  %v298_v57 = vld [vmem:[%s4048_s5 + $0x3f8] sm:$0xff]  ;;  %v300_v58 = vld [vmem:[%s4048_s5 + $0x400] sm:$0xff] }
  0x46   : > { %297 = vst [vmem:[%s4053_s23 + $0x1f8] sm:$0xff] %v296_v56  ;;  %v302_v59 = vld [vmem:[%s4048_s5 + $0x408] sm:$0xff]  ;;  %299 = vst [vmem:[%s4053_s23 + $0x200] sm:$0xff] %v298_v57  ;;  %v304_v60 = vld [vmem:[%s4048_s5 + $0x438] sm:$0xff] }
  0x47   : > { %301 = vst [vmem:[%s4053_s23 + $0x208] sm:$0xff] %v300_v58  ;;  %303 = vst [vmem:[%s4053_s23 + $0x210] sm:$0xff] %v302_v59  ;;  %v306_v61 = vld [vmem:[%s4048_s5 + $0x440] sm:$0xff]  ;;  %v308_v62 = vld [vmem:[%s4048_s5 + $0x448] sm:$0xff] }
  0x48   : > { %305 = vst [vmem:[%s4053_s23 + $0x21c] sm:$0xff] %v304_v60  ;;  %307 = vst [vmem:[%s4053_s23 + $0x224] sm:$0xff] %v306_v61  ;;  %v310_v63 = vld [vmem:[%s4048_s5 + $0x450] sm:$0xff]  ;;  %v2976_v0 = vld [vmem:[%s4048_s5 + $0x20] sm:$0xf] }
  0x49   : > { %309 = vst [vmem:[%s4053_s23 + $0x22c] sm:$0xff] %v308_v62  ;;  %v2978_v1 = vld [vmem:[%s4048_s5 + $0x68] sm:$0xf]  ;;  %311 = vst [vmem:[%s4053_s23 + $0x234] sm:$0xff] %v310_v63  ;;  %v2980_v2 = vld [vmem:[%s4048_s5 + $0xb0] sm:$0xf] }
  0x4a   : > { %2977 = vst [vmem:[%s4053_s23 + $0x20] sm:$0xf] %v2976_v0  ;;  %2979 = vst [vmem:[%s4053_s23 + $0x44] sm:$0xf] %v2978_v1  ;;  %v2982_v3 = vld [vmem:[%s4048_s5 + $0xf8] sm:$0xf] }
  0x4b   : > { %v2984_v4 = vld [vmem:[%s4048_s5 + $0x140] sm:$0xf]  ;;  %2981 = vst [vmem:[%s4053_s23 + $0x68] sm:$0xf] %v2980_v2  ;;  %2983 = vst [vmem:[%s4053_s23 + $0x8c] sm:$0xf] %v2982_v3 }
  0x4c   : > { %2985 = vst [vmem:[%s4053_s23 + $0xb0] sm:$0xf] %v2984_v4  ;;  %v2986_v5 = vld [vmem:[%s4048_s5 + $0x188] sm:$0xf]  ;;  %v2988_v6 = vld [vmem:[%s4048_s5 + $0x1d0] sm:$0xf] }
  0x4d   : > { %v2990_v7 = vld [vmem:[%s4048_s5 + $0x218] sm:$0xf]  ;;  %2987 = vst [vmem:[%s4053_s23 + $0xd4] sm:$0xf] %v2986_v5  ;;  %2989 = vst [vmem:[%s4053_s23 + $0xf8] sm:$0xf] %v2988_v6 }
  0x4e   : > { %2991 = vst [vmem:[%s4053_s23 + $0x11c] sm:$0xf] %v2990_v7  ;;  %v2992_v8 = vld [vmem:[%s4048_s5 + $0x260] sm:$0xf]  ;;  %v2994_v9 = vld [vmem:[%s4048_s5 + $0x2a8] sm:$0xf] }
  0x4f   : > { %v2996_v10 = vld [vmem:[%s4048_s5 + $0x2f0] sm:$0xf]  ;;  %2993 = vst [vmem:[%s4053_s23 + $0x140] sm:$0xf] %v2992_v8  ;;  %2995 = vst [vmem:[%s4053_s23 + $0x164] sm:$0xf] %v2994_v9 }
  0x50   : > { %2997 = vst [vmem:[%s4053_s23 + $0x188] sm:$0xf] %v2996_v10  ;;  %v2998_v11 = vld [vmem:[%s4048_s5 + $0x338] sm:$0xf]  ;;  %v3000_v12 = vld [vmem:[%s4048_s5 + $0x380] sm:$0xf] }
  0x51   : > { %v3002_v13 = vld [vmem:[%s4048_s5 + $0x3c8] sm:$0xf]  ;;  %2999 = vst [vmem:[%s4053_s23 + $0x1ac] sm:$0xf] %v2998_v11  ;;  %3001 = vst [vmem:[%s4053_s23 + $0x1d0] sm:$0xf] %v3000_v12 }
  0x52   : > { %3003 = vst [vmem:[%s4053_s23 + $0x1f4] sm:$0xf] %v3002_v13  ;;  %v3004_v14 = vld [vmem:[%s4048_s5 + $0x410] sm:$0xf]  ;;  %v3006_v15 = vld [vmem:[%s4048_s5 + $0x458] sm:$0xf] }
  0x53   : > { %3005 = vst [vmem:[%s4053_s23 + $0x218] sm:$0xf] %v3004_v14  ;;  %3007 = vst [vmem:[%s4053_s23 + $0x23c] sm:$0xf] %v3006_v15 }
  0x54 PF: > { %356 = sbr.rel (!%p4023_p9) target bundleno = 189 (0xbd), region = 46  ;;  %s358_s28 = sand.u32 (%p4023_p9), 1, %s3891_s15  }
  0x55   : > { %s3180_s7 = smul.u32 (%p4023_p9), 288, %s3911_s20  ;;  %s4841_s1 = sld [smem:[#allocation8_spill]] (%p4023_p9) }
  0x56   : > { %s3565_s11 = smul.u32 (%p4023_p9), 576, %s358_s28 }
  0x57   : > { %s363_s26 = sadd.s32 (%p4023_p9), %s3915_s21, %s3180_s7 }
  0x58   : > { %s3009_s27 = sshll.u32 (%p4023_p9), %s363_s26, 2  ;;  %s4225_s6 = scalar_lea.vmem (%p4023_p9), [#allocation4], %s3565_s11 }
  0x5b   : > { %s4220_s0 = scalar_lea.vmem %s4841_s1, %s3009_s27 }
  0x5c   : > { %v381_v16 = vld [vmem:[%s4220_s0] sm:$0xf]  ;;  %v383_v17 = vld [vmem:[%s4220_s0 + $0x8] sm:$0xf]  ;;  %v385_v18 = vld [vmem:[%s4220_s0 + $0x10] sm:$0xf] }
  0x5d   : > { %382 = vst [vmem:[%s4225_s6] sm:$0xf] %v381_v16  ;;  %384 = vst [vmem:[%s4225_s6 + $0x4] sm:$0xf] %v383_v17  ;;  %v387_v19 = vld [vmem:[%s4220_s0 + $0x18] sm:$0xf] }
  0x5e   : > { %386 = vst [vmem:[%s4225_s6 + $0x8] sm:$0xf] %v385_v18  ;;  %v389_v20 = vld [vmem:[%s4220_s0 + $0x20] sm:$0xf]  ;;  %v391_v21 = vld [vmem:[%s4220_s0 + $0x28] sm:$0xf] }
  0x5f   : > { %388 = vst [vmem:[%s4225_s6 + $0xc] sm:$0xf] %v387_v19  ;;  %390 = vst [vmem:[%s4225_s6 + $0x10] sm:$0xf] %v389_v20  ;;  %v393_v22 = vld [vmem:[%s4220_s0 + $0x30] sm:$0xf] }
  0x60   : > { %392 = vst [vmem:[%s4225_s6 + $0x14] sm:$0xf] %v391_v21  ;;  %v395_v23 = vld [vmem:[%s4220_s0 + $0x38] sm:$0xf]  ;;  %v397_v24 = vld [vmem:[%s4220_s0 + $0x40] sm:$0xf] }
  0x61   : > { %394 = vst [vmem:[%s4225_s6 + $0x18] sm:$0xf] %v393_v22  ;;  %396 = vst [vmem:[%s4225_s6 + $0x1c] sm:$0xf] %v395_v23  ;;  %v399_v25 = vld [vmem:[%s4220_s0 + $0x48] sm:$0xf] }
  0x62   : > { %398 = vst [vmem:[%s4225_s6 + $0x20] sm:$0xf] %v397_v24  ;;  %v401_v26 = vld [vmem:[%s4220_s0 + $0x50] sm:$0xf]  ;;  %v403_v27 = vld [vmem:[%s4220_s0 + $0x58] sm:$0xf] }
  0x63   : > { %400 = vst [vmem:[%s4225_s6 + $0x24] sm:$0xf] %v399_v25  ;;  %402 = vst [vmem:[%s4225_s6 + $0x28] sm:$0xf] %v401_v26  ;;  %v405_v28 = vld [vmem:[%s4220_s0 + $0x60] sm:$0xf] }
  0x64   : > { %404 = vst [vmem:[%s4225_s6 + $0x2c] sm:$0xf] %v403_v27  ;;  %v407_v29 = vld [vmem:[%s4220_s0 + $0x68] sm:$0xf]  ;;  %v409_v30 = vld [vmem:[%s4220_s0 + $0x70] sm:$0xf] }
  0x65   : > { %406 = vst [vmem:[%s4225_s6 + $0x30] sm:$0xf] %v405_v28  ;;  %408 = vst [vmem:[%s4225_s6 + $0x34] sm:$0xf] %v407_v29  ;;  %v411_v31 = vld [vmem:[%s4220_s0 + $0x78] sm:$0xf] }
  0x66   : > { %410 = vst [vmem:[%s4225_s6 + $0x38] sm:$0xf] %v409_v30  ;;  %v413_v32 = vld [vmem:[%s4220_s0 + $0x80] sm:$0xf]  ;;  %v415_v33 = vld [vmem:[%s4220_s0 + $0x88] sm:$0xf] }
  0x67   : > { %412 = vst [vmem:[%s4225_s6 + $0x3c] sm:$0xf] %v411_v31  ;;  %414 = vst [vmem:[%s4225_s6 + $0x40] sm:$0xf] %v413_v32  ;;  %v417_v34 = vld [vmem:[%s4220_s0 + $0x90] sm:$0xf] }
  0x68   : > { %416 = vst [vmem:[%s4225_s6 + $0x44] sm:$0xf] %v415_v33  ;;  %v419_v35 = vld [vmem:[%s4220_s0 + $0x98] sm:$0xf]  ;;  %v421_v36 = vld [vmem:[%s4220_s0 + $0xa0] sm:$0xf] }
  0x69   : > { %418 = vst [vmem:[%s4225_s6 + $0x48] sm:$0xf] %v417_v34  ;;  %420 = vst [vmem:[%s4225_s6 + $0x4c] sm:$0xf] %v419_v35  ;;  %v423_v37 = vld [vmem:[%s4220_s0 + $0xa8] sm:$0xf] }
  0x6a   : > { %422 = vst [vmem:[%s4225_s6 + $0x50] sm:$0xf] %v421_v36  ;;  %v425_v38 = vld [vmem:[%s4220_s0 + $0xb0] sm:$0xf]  ;;  %v427_v39 = vld [vmem:[%s4220_s0 + $0xb8] sm:$0xf] }
  0x6b   : > { %424 = vst [vmem:[%s4225_s6 + $0x54] sm:$0xf] %v423_v37  ;;  %426 = vst [vmem:[%s4225_s6 + $0x58] sm:$0xf] %v425_v38  ;;  %v429_v40 = vld [vmem:[%s4220_s0 + $0xc0] sm:$0xf] }
  0x6c   : > { %428 = vst [vmem:[%s4225_s6 + $0x5c] sm:$0xf] %v427_v39  ;;  %v431_v41 = vld [vmem:[%s4220_s0 + $0xc8] sm:$0xf]  ;;  %v433_v42 = vld [vmem:[%s4220_s0 + $0xd0] sm:$0xf] }
  0x6d   : > { %430 = vst [vmem:[%s4225_s6 + $0x60] sm:$0xf] %v429_v40  ;;  %432 = vst [vmem:[%s4225_s6 + $0x64] sm:$0xf] %v431_v41  ;;  %v435_v43 = vld [vmem:[%s4220_s0 + $0xd8] sm:$0xf] }
  0x6e   : > { %434 = vst [vmem:[%s4225_s6 + $0x68] sm:$0xf] %v433_v42  ;;  %v437_v44 = vld [vmem:[%s4220_s0 + $0xe0] sm:$0xf]  ;;  %v439_v45 = vld [vmem:[%s4220_s0 + $0xe8] sm:$0xf] }
  0x6f   : > { %436 = vst [vmem:[%s4225_s6 + $0x6c] sm:$0xf] %v435_v43  ;;  %438 = vst [vmem:[%s4225_s6 + $0x70] sm:$0xf] %v437_v44  ;;  %v441_v46 = vld [vmem:[%s4220_s0 + $0xf0] sm:$0xf] }
  0x70   : > { %440 = vst [vmem:[%s4225_s6 + $0x74] sm:$0xf] %v439_v45  ;;  %v443_v47 = vld [vmem:[%s4220_s0 + $0xf8] sm:$0xf]  ;;  %v445_v48 = vld [vmem:[%s4220_s0 + $0x100] sm:$0xf] }
  0x71   : > { %442 = vst [vmem:[%s4225_s6 + $0x78] sm:$0xf] %v441_v46  ;;  %444 = vst [vmem:[%s4225_s6 + $0x7c] sm:$0xf] %v443_v47  ;;  %v447_v49 = vld [vmem:[%s4220_s0 + $0x108] sm:$0xf] }
  0x72   : > { %446 = vst [vmem:[%s4225_s6 + $0x80] sm:$0xf] %v445_v48  ;;  %v449_v50 = vld [vmem:[%s4220_s0 + $0x110] sm:$0xf]  ;;  %v451_v51 = vld [vmem:[%s4220_s0 + $0x118] sm:$0xf] }
  0x73   : > { %448 = vst [vmem:[%s4225_s6 + $0x84] sm:$0xf] %v447_v49  ;;  %450 = vst [vmem:[%s4225_s6 + $0x88] sm:$0xf] %v449_v50  ;;  %v453_v52 = vld [vmem:[%s4220_s0 + $0x120] sm:$0xf] }
  0x74   : > { %452 = vst [vmem:[%s4225_s6 + $0x8c] sm:$0xf] %v451_v51  ;;  %v455_v53 = vld [vmem:[%s4220_s0 + $0x128] sm:$0xf]  ;;  %v457_v54 = vld [vmem:[%s4220_s0 + $0x130] sm:$0xf] }
  0x75   : > { %454 = vst [vmem:[%s4225_s6 + $0x90] sm:$0xf] %v453_v52  ;;  %456 = vst [vmem:[%s4225_s6 + $0x94] sm:$0xf] %v455_v53  ;;  %v459_v55 = vld [vmem:[%s4220_s0 + $0x138] sm:$0xf] }
  0x76   : > { %458 = vst [vmem:[%s4225_s6 + $0x98] sm:$0xf] %v457_v54  ;;  %v461_v56 = vld [vmem:[%s4220_s0 + $0x140] sm:$0xf]  ;;  %v463_v57 = vld [vmem:[%s4220_s0 + $0x148] sm:$0xf] }
  0x77   : > { %460 = vst [vmem:[%s4225_s6 + $0x9c] sm:$0xf] %v459_v55  ;;  %462 = vst [vmem:[%s4225_s6 + $0xa0] sm:$0xf] %v461_v56  ;;  %v465_v58 = vld [vmem:[%s4220_s0 + $0x150] sm:$0xf] }
  0x78   : > { %464 = vst [vmem:[%s4225_s6 + $0xa4] sm:$0xf] %v463_v57  ;;  %v467_v59 = vld [vmem:[%s4220_s0 + $0x158] sm:$0xf]  ;;  %v469_v60 = vld [vmem:[%s4220_s0 + $0x160] sm:$0xf] }
  0x79   : > { %466 = vst [vmem:[%s4225_s6 + $0xa8] sm:$0xf] %v465_v58  ;;  %468 = vst [vmem:[%s4225_s6 + $0xac] sm:$0xf] %v467_v59  ;;  %v471_v61 = vld [vmem:[%s4220_s0 + $0x168] sm:$0xf] }
  0x7a   : > { %470 = vst [vmem:[%s4225_s6 + $0xb0] sm:$0xf] %v469_v60  ;;  %v473_v62 = vld [vmem:[%s4220_s0 + $0x170] sm:$0xf]  ;;  %v475_v63 = vld [vmem:[%s4220_s0 + $0x178] sm:$0xf] }
  0x7b   : > { %472 = vst [vmem:[%s4225_s6 + $0xb4] sm:$0xf] %v471_v61  ;;  %474 = vst [vmem:[%s4225_s6 + $0xb8] sm:$0xf] %v473_v62  ;;  %v477_v0 = vld [vmem:[%s4220_s0 + $0x180] sm:$0xf] }
  0x7c   : > { %476 = vst [vmem:[%s4225_s6 + $0xbc] sm:$0xf] %v475_v63  ;;  %v479_v1 = vld [vmem:[%s4220_s0 + $0x188] sm:$0xf]  ;;  %v481_v2 = vld [vmem:[%s4220_s0 + $0x190] sm:$0xf] }
  0x7d   : > { %478 = vst [vmem:[%s4225_s6 + $0xc0] sm:$0xf] %v477_v0  ;;  %480 = vst [vmem:[%s4225_s6 + $0xc4] sm:$0xf] %v479_v1  ;;  %v483_v3 = vld [vmem:[%s4220_s0 + $0x198] sm:$0xf] }
  0x7e   : > { %482 = vst [vmem:[%s4225_s6 + $0xc8] sm:$0xf] %v481_v2  ;;  %v485_v4 = vld [vmem:[%s4220_s0 + $0x1a0] sm:$0xf]  ;;  %v487_v5 = vld [vmem:[%s4220_s0 + $0x1a8] sm:$0xf] }
  0x7f   : > { %484 = vst [vmem:[%s4225_s6 + $0xcc] sm:$0xf] %v483_v3  ;;  %486 = vst [vmem:[%s4225_s6 + $0xd0] sm:$0xf] %v485_v4  ;;  %v489_v6 = vld [vmem:[%s4220_s0 + $0x1b0] sm:$0xf] }
  0x80   : > { %488 = vst [vmem:[%s4225_s6 + $0xd4] sm:$0xf] %v487_v5  ;;  %v491_v7 = vld [vmem:[%s4220_s0 + $0x1b8] sm:$0xf]  ;;  %v493_v8 = vld [vmem:[%s4220_s0 + $0x1c0] sm:$0xf] }
  0x81   : > { %490 = vst [vmem:[%s4225_s6 + $0xd8] sm:$0xf] %v489_v6  ;;  %492 = vst [vmem:[%s4225_s6 + $0xdc] sm:$0xf] %v491_v7  ;;  %v495_v9 = vld [vmem:[%s4220_s0 + $0x1c8] sm:$0xf] }
  0x82   : > { %494 = vst [vmem:[%s4225_s6 + $0xe0] sm:$0xf] %v493_v8  ;;  %v497_v10 = vld [vmem:[%s4220_s0 + $0x1d0] sm:$0xf]  ;;  %v499_v11 = vld [vmem:[%s4220_s0 + $0x1d8] sm:$0xf] }
  0x83   : > { %496 = vst [vmem:[%s4225_s6 + $0xe4] sm:$0xf] %v495_v9  ;;  %498 = vst [vmem:[%s4225_s6 + $0xe8] sm:$0xf] %v497_v10  ;;  %v501_v12 = vld [vmem:[%s4220_s0 + $0x1e0] sm:$0xf] }
  0x84   : > { %500 = vst [vmem:[%s4225_s6 + $0xec] sm:$0xf] %v499_v11  ;;  %v503_v13 = vld [vmem:[%s4220_s0 + $0x1e8] sm:$0xf]  ;;  %v505_v14 = vld [vmem:[%s4220_s0 + $0x1f0] sm:$0xf] }
  0x85   : > { %502 = vst [vmem:[%s4225_s6 + $0xf0] sm:$0xf] %v501_v12  ;;  %504 = vst [vmem:[%s4225_s6 + $0xf4] sm:$0xf] %v503_v13  ;;  %v507_v15 = vld [vmem:[%s4220_s0 + $0x1f8] sm:$0xf] }
  0x86   : > { %506 = vst [vmem:[%s4225_s6 + $0xf8] sm:$0xf] %v505_v14  ;;  %v509_v16 = vld [vmem:[%s4220_s0 + $0x200] sm:$0xf]  ;;  %v511_v17 = vld [vmem:[%s4220_s0 + $0x208] sm:$0xf] }
  0x87   : > { %508 = vst [vmem:[%s4225_s6 + $0xfc] sm:$0xf] %v507_v15  ;;  %510 = vst [vmem:[%s4225_s6 + $0x100] sm:$0xf] %v509_v16  ;;  %v513_v18 = vld [vmem:[%s4220_s0 + $0x210] sm:$0xf] }
  0x88   : > { %512 = vst [vmem:[%s4225_s6 + $0x104] sm:$0xf] %v511_v17  ;;  %v515_v19 = vld [vmem:[%s4220_s0 + $0x218] sm:$0xf]  ;;  %v517_v20 = vld [vmem:[%s4220_s0 + $0x220] sm:$0xf] }
  0x89   : > { %514 = vst [vmem:[%s4225_s6 + $0x108] sm:$0xf] %v513_v18  ;;  %516 = vst [vmem:[%s4225_s6 + $0x10c] sm:$0xf] %v515_v19  ;;  %v519_v21 = vld [vmem:[%s4220_s0 + $0x228] sm:$0xf] }
  0x8a   : > { %518 = vst [vmem:[%s4225_s6 + $0x110] sm:$0xf] %v517_v20  ;;  %v521_v22 = vld [vmem:[%s4220_s0 + $0x230] sm:$0xf]  ;;  %v523_v23 = vld [vmem:[%s4220_s0 + $0x238] sm:$0xf] }
  0x8b   : > { %520 = vst [vmem:[%s4225_s6 + $0x114] sm:$0xf] %v519_v21  ;;  %522 = vst [vmem:[%s4225_s6 + $0x118] sm:$0xf] %v521_v22  ;;  %v525_v24 = vld [vmem:[%s4220_s0 + $0x240] sm:$0xf] }
  0x8c   : > { %524 = vst [vmem:[%s4225_s6 + $0x11c] sm:$0xf] %v523_v23  ;;  %v527_v25 = vld [vmem:[%s4220_s0 + $0x248] sm:$0xf]  ;;  %v529_v26 = vld [vmem:[%s4220_s0 + $0x250] sm:$0xf] }
  0x8d   : > { %526 = vst [vmem:[%s4225_s6 + $0x120] sm:$0xf] %v525_v24  ;;  %528 = vst [vmem:[%s4225_s6 + $0x124] sm:$0xf] %v527_v25  ;;  %v531_v27 = vld [vmem:[%s4220_s0 + $0x258] sm:$0xf] }
  0x8e   : > { %530 = vst [vmem:[%s4225_s6 + $0x128] sm:$0xf] %v529_v26  ;;  %v533_v28 = vld [vmem:[%s4220_s0 + $0x260] sm:$0xf]  ;;  %v535_v29 = vld [vmem:[%s4220_s0 + $0x268] sm:$0xf] }
  0x8f   : > { %532 = vst [vmem:[%s4225_s6 + $0x12c] sm:$0xf] %v531_v27  ;;  %534 = vst [vmem:[%s4225_s6 + $0x130] sm:$0xf] %v533_v28  ;;  %v537_v30 = vld [vmem:[%s4220_s0 + $0x270] sm:$0xf] }
  0x90   : > { %536 = vst [vmem:[%s4225_s6 + $0x134] sm:$0xf] %v535_v29  ;;  %v539_v31 = vld [vmem:[%s4220_s0 + $0x278] sm:$0xf]  ;;  %v541_v32 = vld [vmem:[%s4220_s0 + $0x280] sm:$0xf] }
  0x91   : > { %538 = vst [vmem:[%s4225_s6 + $0x138] sm:$0xf] %v537_v30  ;;  %540 = vst [vmem:[%s4225_s6 + $0x13c] sm:$0xf] %v539_v31  ;;  %v543_v33 = vld [vmem:[%s4220_s0 + $0x288] sm:$0xf] }
  0x92   : > { %542 = vst [vmem:[%s4225_s6 + $0x140] sm:$0xf] %v541_v32  ;;  %v545_v34 = vld [vmem:[%s4220_s0 + $0x290] sm:$0xf]  ;;  %v547_v35 = vld [vmem:[%s4220_s0 + $0x298] sm:$0xf] }
  0x93   : > { %544 = vst [vmem:[%s4225_s6 + $0x144] sm:$0xf] %v543_v33  ;;  %546 = vst [vmem:[%s4225_s6 + $0x148] sm:$0xf] %v545_v34  ;;  %v549_v36 = vld [vmem:[%s4220_s0 + $0x2a0] sm:$0xf] }
  0x94   : > { %548 = vst [vmem:[%s4225_s6 + $0x14c] sm:$0xf] %v547_v35  ;;  %v551_v37 = vld [vmem:[%s4220_s0 + $0x2a8] sm:$0xf]  ;;  %v553_v38 = vld [vmem:[%s4220_s0 + $0x2b0] sm:$0xf] }
  0x95   : > { %550 = vst [vmem:[%s4225_s6 + $0x150] sm:$0xf] %v549_v36  ;;  %552 = vst [vmem:[%s4225_s6 + $0x154] sm:$0xf] %v551_v37  ;;  %v555_v39 = vld [vmem:[%s4220_s0 + $0x2b8] sm:$0xf] }
  0x96   : > { %554 = vst [vmem:[%s4225_s6 + $0x158] sm:$0xf] %v553_v38  ;;  %v557_v40 = vld [vmem:[%s4220_s0 + $0x2c0] sm:$0xf]  ;;  %v559_v41 = vld [vmem:[%s4220_s0 + $0x2c8] sm:$0xf] }
  0x97   : > { %556 = vst [vmem:[%s4225_s6 + $0x15c] sm:$0xf] %v555_v39  ;;  %558 = vst [vmem:[%s4225_s6 + $0x160] sm:$0xf] %v557_v40  ;;  %v561_v42 = vld [vmem:[%s4220_s0 + $0x2d0] sm:$0xf] }
  0x98   : > { %560 = vst [vmem:[%s4225_s6 + $0x164] sm:$0xf] %v559_v41  ;;  %v563_v43 = vld [vmem:[%s4220_s0 + $0x2d8] sm:$0xf]  ;;  %v565_v44 = vld [vmem:[%s4220_s0 + $0x2e0] sm:$0xf] }
  0x99   : > { %562 = vst [vmem:[%s4225_s6 + $0x168] sm:$0xf] %v561_v42  ;;  %564 = vst [vmem:[%s4225_s6 + $0x16c] sm:$0xf] %v563_v43  ;;  %v567_v45 = vld [vmem:[%s4220_s0 + $0x2e8] sm:$0xf] }
  0x9a   : > { %566 = vst [vmem:[%s4225_s6 + $0x170] sm:$0xf] %v565_v44  ;;  %v569_v46 = vld [vmem:[%s4220_s0 + $0x2f0] sm:$0xf]  ;;  %v571_v47 = vld [vmem:[%s4220_s0 + $0x2f8] sm:$0xf] }
  0x9b   : > { %568 = vst [vmem:[%s4225_s6 + $0x174] sm:$0xf] %v567_v45  ;;  %570 = vst [vmem:[%s4225_s6 + $0x178] sm:$0xf] %v569_v46  ;;  %v573_v48 = vld [vmem:[%s4220_s0 + $0x300] sm:$0xf] }
  0x9c   : > { %572 = vst [vmem:[%s4225_s6 + $0x17c] sm:$0xf] %v571_v47  ;;  %v575_v49 = vld [vmem:[%s4220_s0 + $0x308] sm:$0xf]  ;;  %v577_v50 = vld [vmem:[%s4220_s0 + $0x310] sm:$0xf] }
  0x9d   : > { %574 = vst [vmem:[%s4225_s6 + $0x180] sm:$0xf] %v573_v48  ;;  %576 = vst [vmem:[%s4225_s6 + $0x184] sm:$0xf] %v575_v49  ;;  %v579_v51 = vld [vmem:[%s4220_s0 + $0x318] sm:$0xf] }
  0x9e   : > { %578 = vst [vmem:[%s4225_s6 + $0x188] sm:$0xf] %v577_v50  ;;  %v581_v52 = vld [vmem:[%s4220_s0 + $0x320] sm:$0xf]  ;;  %v583_v53 = vld [vmem:[%s4220_s0 + $0x328] sm:$0xf] }
  0x9f   : > { %580 = vst [vmem:[%s4225_s6 + $0x18c] sm:$0xf] %v579_v51  ;;  %582 = vst [vmem:[%s4225_s6 + $0x190] sm:$0xf] %v581_v52  ;;  %v585_v54 = vld [vmem:[%s4220_s0 + $0x330] sm:$0xf] }
  0xa0   : > { %584 = vst [vmem:[%s4225_s6 + $0x194] sm:$0xf] %v583_v53  ;;  %v587_v55 = vld [vmem:[%s4220_s0 + $0x338] sm:$0xf]  ;;  %v589_v56 = vld [vmem:[%s4220_s0 + $0x340] sm:$0xf] }
  0xa1   : > { %586 = vst [vmem:[%s4225_s6 + $0x198] sm:$0xf] %v585_v54  ;;  %588 = vst [vmem:[%s4225_s6 + $0x19c] sm:$0xf] %v587_v55  ;;  %v591_v57 = vld [vmem:[%s4220_s0 + $0x348] sm:$0xf] }
  0xa2   : > { %590 = vst [vmem:[%s4225_s6 + $0x1a0] sm:$0xf] %v589_v56  ;;  %v593_v58 = vld [vmem:[%s4220_s0 + $0x350] sm:$0xf]  ;;  %v595_v59 = vld [vmem:[%s4220_s0 + $0x358] sm:$0xf] }
  0xa3   : > { %592 = vst [vmem:[%s4225_s6 + $0x1a4] sm:$0xf] %v591_v57  ;;  %594 = vst [vmem:[%s4225_s6 + $0x1a8] sm:$0xf] %v593_v58  ;;  %v597_v60 = vld [vmem:[%s4220_s0 + $0x360] sm:$0xf] }
  0xa4   : > { %596 = vst [vmem:[%s4225_s6 + $0x1ac] sm:$0xf] %v595_v59  ;;  %v599_v61 = vld [vmem:[%s4220_s0 + $0x368] sm:$0xf]  ;;  %v601_v62 = vld [vmem:[%s4220_s0 + $0x370] sm:$0xf] }
  0xa5   : > { %598 = vst [vmem:[%s4225_s6 + $0x1b0] sm:$0xf] %v597_v60  ;;  %600 = vst [vmem:[%s4225_s6 + $0x1b4] sm:$0xf] %v599_v61  ;;  %v603_v63 = vld [vmem:[%s4220_s0 + $0x378] sm:$0xf] }
  0xa6   : > { %602 = vst [vmem:[%s4225_s6 + $0x1b8] sm:$0xf] %v601_v62  ;;  %v605_v0 = vld [vmem:[%s4220_s0 + $0x380] sm:$0xf]  ;;  %v607_v1 = vld [vmem:[%s4220_s0 + $0x388] sm:$0xf] }
  0xa7   : > { %604 = vst [vmem:[%s4225_s6 + $0x1bc] sm:$0xf] %v603_v63  ;;  %606 = vst [vmem:[%s4225_s6 + $0x1c0] sm:$0xf] %v605_v0  ;;  %v609_v2 = vld [vmem:[%s4220_s0 + $0x390] sm:$0xf] }
  0xa8   : > { %608 = vst [vmem:[%s4225_s6 + $0x1c4] sm:$0xf] %v607_v1  ;;  %v611_v3 = vld [vmem:[%s4220_s0 + $0x398] sm:$0xf]  ;;  %v613_v4 = vld [vmem:[%s4220_s0 + $0x3a0] sm:$0xf] }
  0xa9   : > { %610 = vst [vmem:[%s4225_s6 + $0x1c8] sm:$0xf] %v609_v2  ;;  %612 = vst [vmem:[%s4225_s6 + $0x1cc] sm:$0xf] %v611_v3  ;;  %v615_v5 = vld [vmem:[%s4220_s0 + $0x3a8] sm:$0xf] }
  0xaa   : > { %614 = vst [vmem:[%s4225_s6 + $0x1d0] sm:$0xf] %v613_v4  ;;  %v617_v6 = vld [vmem:[%s4220_s0 + $0x3b0] sm:$0xf]  ;;  %v619_v7 = vld [vmem:[%s4220_s0 + $0x3b8] sm:$0xf] }
  0xab   : > { %616 = vst [vmem:[%s4225_s6 + $0x1d4] sm:$0xf] %v615_v5  ;;  %618 = vst [vmem:[%s4225_s6 + $0x1d8] sm:$0xf] %v617_v6  ;;  %v621_v8 = vld [vmem:[%s4220_s0 + $0x3c0] sm:$0xf] }
  0xac   : > { %620 = vst [vmem:[%s4225_s6 + $0x1dc] sm:$0xf] %v619_v7  ;;  %v623_v9 = vld [vmem:[%s4220_s0 + $0x3c8] sm:$0xf]  ;;  %v625_v10 = vld [vmem:[%s4220_s0 + $0x3d0] sm:$0xf] }
  0xad   : > { %622 = vst [vmem:[%s4225_s6 + $0x1e0] sm:$0xf] %v621_v8  ;;  %624 = vst [vmem:[%s4225_s6 + $0x1e4] sm:$0xf] %v623_v9  ;;  %v627_v11 = vld [vmem:[%s4220_s0 + $0x3d8] sm:$0xf] }
  0xae   : > { %626 = vst [vmem:[%s4225_s6 + $0x1e8] sm:$0xf] %v625_v10  ;;  %v629_v12 = vld [vmem:[%s4220_s0 + $0x3e0] sm:$0xf]  ;;  %v631_v13 = vld [vmem:[%s4220_s0 + $0x3e8] sm:$0xf] }
  0xaf   : > { %628 = vst [vmem:[%s4225_s6 + $0x1ec] sm:$0xf] %v627_v11  ;;  %630 = vst [vmem:[%s4225_s6 + $0x1f0] sm:$0xf] %v629_v12  ;;  %v633_v14 = vld [vmem:[%s4220_s0 + $0x3f0] sm:$0xf] }
  0xb0   : > { %632 = vst [vmem:[%s4225_s6 + $0x1f4] sm:$0xf] %v631_v13  ;;  %v635_v15 = vld [vmem:[%s4220_s0 + $0x3f8] sm:$0xf]  ;;  %v637_v16 = vld [vmem:[%s4220_s0 + $0x400] sm:$0xf] }
  0xb1   : > { %634 = vst [vmem:[%s4225_s6 + $0x1f8] sm:$0xf] %v633_v14  ;;  %636 = vst [vmem:[%s4225_s6 + $0x1fc] sm:$0xf] %v635_v15  ;;  %v639_v17 = vld [vmem:[%s4220_s0 + $0x408] sm:$0xf] }
  0xb2   : > { %638 = vst [vmem:[%s4225_s6 + $0x200] sm:$0xf] %v637_v16  ;;  %v641_v18 = vld [vmem:[%s4220_s0 + $0x410] sm:$0xf]  ;;  %v643_v19 = vld [vmem:[%s4220_s0 + $0x418] sm:$0xf] }
  0xb3   : > { %640 = vst [vmem:[%s4225_s6 + $0x204] sm:$0xf] %v639_v17  ;;  %642 = vst [vmem:[%s4225_s6 + $0x208] sm:$0xf] %v641_v18  ;;  %v645_v20 = vld [vmem:[%s4220_s0 + $0x420] sm:$0xf] }
  0xb4   : > { %644 = vst [vmem:[%s4225_s6 + $0x20c] sm:$0xf] %v643_v19  ;;  %v647_v21 = vld [vmem:[%s4220_s0 + $0x428] sm:$0xf]  ;;  %v649_v22 = vld [vmem:[%s4220_s0 + $0x430] sm:$0xf] }
  0xb5   : > { %646 = vst [vmem:[%s4225_s6 + $0x210] sm:$0xf] %v645_v20  ;;  %648 = vst [vmem:[%s4225_s6 + $0x214] sm:$0xf] %v647_v21  ;;  %v651_v23 = vld [vmem:[%s4220_s0 + $0x438] sm:$0xf] }
  0xb6   : > { %650 = vst [vmem:[%s4225_s6 + $0x218] sm:$0xf] %v649_v22  ;;  %v653_v24 = vld [vmem:[%s4220_s0 + $0x440] sm:$0xf]  ;;  %v655_v25 = vld [vmem:[%s4220_s0 + $0x448] sm:$0xf] }
  0xb7   : > { %652 = vst [vmem:[%s4225_s6 + $0x21c] sm:$0xf] %v651_v23  ;;  %654 = vst [vmem:[%s4225_s6 + $0x220] sm:$0xf] %v653_v24  ;;  %v657_v26 = vld [vmem:[%s4220_s0 + $0x450] sm:$0xf] }
  0xb8   : > { %656 = vst [vmem:[%s4225_s6 + $0x224] sm:$0xf] %v655_v25  ;;  %v659_v27 = vld [vmem:[%s4220_s0 + $0x458] sm:$0xf]  ;;  %v661_v28 = vld [vmem:[%s4220_s0 + $0x460] sm:$0xf] }
  0xb9   : > { %658 = vst [vmem:[%s4225_s6 + $0x228] sm:$0xf] %v657_v26  ;;  %660 = vst [vmem:[%s4225_s6 + $0x22c] sm:$0xf] %v659_v27  ;;  %v663_v29 = vld [vmem:[%s4220_s0 + $0x468] sm:$0xf] }
  0xba   : > { %662 = vst [vmem:[%s4225_s6 + $0x230] sm:$0xf] %v661_v28  ;;  %v665_v30 = vld [vmem:[%s4220_s0 + $0x470] sm:$0xf]  ;;  %v667_v31 = vld [vmem:[%s4220_s0 + $0x478] sm:$0xf] }
  0xbb   : > { %664 = vst [vmem:[%s4225_s6 + $0x234] sm:$0xf] %v663_v29  ;;  %666 = vst [vmem:[%s4225_s6 + $0x238] sm:$0xf] %v665_v30 }
  0xbc   : > { %668 = vst [vmem:[%s4225_s6 + $0x23c] sm:$0xf] %v667_v31 }
  0xbd PF: > { %p3010_p0 = scmp.ge.s32.totalorder %s3919_s22, 1  ;;  %p984_p1 = scmp.lt.s32.totalorder %s3919_s22, 5 }
  0xbf   : > { %p985_p2 = pnand %p3010_p0, %p984_p1 }
  0xc0   : > { %s991_s5 = sand.u32 (!%p985_p2), 1, %s3895_s16   ;;  %s998_s23 = sand.u32 (!%p985_p2), 1, %s3887_s14  }
  0xc1   : > { %988 = sbr.rel (%p985_p2) target bundleno = 627 (0x273), region = 91  ;;  %s1024_s0 = sand.u32 (!%p985_p2), 1, %s3879_s12  }
  0xc2   : > { %s3566_s28 = smul.u32 (!%p985_p2), 576, %s991_s5  ;;  %s3011_s11 = sshll.u32 (!%p985_p2), %s1024_s0, 6 }
  0xc3   : > { %s3567_s7 = smul.u32 (!%p985_p2), 576, %s998_s23  ;;  %p1030_p3 = scmp.lt.s32.totalorder (!%p985_p2), %s3907_s19, 1 }
  0xc4   : > { %s4525_s6 = scalar_lea.vmem (!%p985_p2), [#allocation3], %s3566_s28  ;;  %s4529_s25 = scalar_lea.vmem (!%p985_p2), [#allocation5], %s3011_s11 }
  0xc5   : > { %s4527_s1 = scalar_lea.vmem (!%p985_p2), [#allocation4], %s3567_s7  ;;  %p3012_p4 = scmp.ne.s32.totalorder (!%p985_p2), %s3903_s18, 0 }
  0xc8   : > { %s4519_s26 = scalar_select %p1030_p3, %s3907_s19, 1 }
  0xc9   : > { %1038 = sbr.rel (%p3012_p4) target bundleno = 210 (0xd2), region = 103  ;;  %v3921_v32 = vmov (!%p3012_p4), 0.0  }
  0xca   : > { %s1032_s4 = scalar_lea.vmem %s4831_s2, %s4519_s26  ;;  %1039 = vst [vmem:[#allocation2] sm:$0xff] (!%p3012_p4), %v3921_v32  ;;  %1040 = vst [vmem:[#allocation2 + $0x8] sm:$0xff] (!%p3012_p4), %v3921_v32 }
  0xcb   : > { %1041 = vst [vmem:[#allocation2 + $0x10] sm:$0xff] (!%p3012_p4), %v3921_v32  ;;  %1042 = vst [vmem:[#allocation2 + $0x18] sm:$0xff] (!%p3012_p4), %v3921_v32 }
  0xcc   : > { %1043 = vst [vmem:[#allocation2 + $0x20] sm:$0xff] (!%p3012_p4), %v3921_v32  ;;  %1044 = vst [vmem:[#allocation2 + $0x28] sm:$0xff] (!%p3012_p4), %v3921_v32 }
  0xcd   : > { %1045 = vst [vmem:[#allocation2 + $0x30] sm:$0xff] (!%p3012_p4), %v3921_v32  ;;  %1046 = vst [vmem:[#allocation2 + $0x38] sm:$0xff] (!%p3012_p4), %v3921_v32 }
  0xce   : > { %1047 = vst [vmem:[#allocation2 + $0x40] sm:$0xff] (!%p3012_p4), %v3921_v32  ;;  %1048 = vst [vmem:[#allocation2 + $0x48] sm:$0xff] (!%p3012_p4), %v3921_v32 }
  0xcf   : > { %1049 = vst [vmem:[#allocation2 + $0x50] sm:$0xff] (!%p3012_p4), %v3921_v32  ;;  %1050 = vst [vmem:[#allocation2 + $0x58] sm:$0xff] (!%p3012_p4), %v3921_v32 }
  0xd0   : > { %1051 = vst [vmem:[#allocation2 + $0x60] sm:$0xff] %v3921_v32  ;;  %1052 = vst [vmem:[#allocation2 + $0x68] sm:$0xff] %v3921_v32 }
  0xd1   : > { %1053 = vst [vmem:[#allocation2 + $0x70] sm:$0xff] %v3921_v32  ;;  %1054 = vst [vmem:[#allocation2 + $0x78] sm:$0xff] %v3921_v32 }
  0xd2 PF: > { %v3657_v33 = vld [vmem:[%s4527_s1 + $0x40] sm:$0xff]   ;;  %v3661_v37 = vld [vmem:[%s4527_s1 + $0x48] sm:$0xff]   ;;  %v3665_v41 = vld [vmem:[%s4527_s1 + $0x50] sm:$0xff]   ;;  %p3157_p5 = scmp.ne.s32.totalorder %s3903_s18, 1 }
  0xd3   : > { %v3658_v34 = vld [vmem:[%s4527_s1 + $0xc0] sm:$0xff]   ;;  %3244 = vmatprep.subr.bf16.mxu0 %v3657_v33  ;;  %v3662_v38 = vld [vmem:[%s4527_s1 + $0xc8] sm:$0xff]   ;;  %v3666_v42 = vld [vmem:[%s4527_s1 + $0xd0] sm:$0xff]  }
  0xd4   : > { %v3659_v35 = vld [vmem:[%s4527_s1] sm:$0xff]   ;;  %3308 = vmatprep.subr.bf16.mxu1 %v3658_v34  ;;  %v3663_v39 = vld [vmem:[%s4527_s1 + $0x8] sm:$0xff]   ;;  %v3667_v43 = vld [vmem:[%s4527_s1 + $0x10] sm:$0xff]  }
  0xd5   : > { %v3660_v36 = vld [vmem:[%s4527_s1 + $0x80] sm:$0xff]   ;;  %3245 = vmatpush3.bf16.msra.mxu0 %v3659_v35  ;;  %v3664_v40 = vld [vmem:[%s4527_s1 + $0x88] sm:$0xff]   ;;  %v3668_v44 = vld [vmem:[%s4527_s1 + $0x90] sm:$0xff]  }
  0xd6   : > { %3309 = vmatpush3.bf16.msra.mxu1 %v3660_v36  ;;  %3246 = vmatprep.subr.bf16.mxu0 %v3661_v37  ;;  %v3669_v45 = vld [vmem:[%s4527_s1 + $0x58] sm:$0xff]   ;;  %v3673_v49 = vld [vmem:[%s4527_s1 + $0x60] sm:$0xff]   ;;  %v3677_v53 = vld [vmem:[%s4527_s1 + $0x68] sm:$0xff]  }
  0xd7   : > { %3310 = vmatprep.subr.bf16.mxu1 %v3662_v38  ;;  %v3670_v46 = vld [vmem:[%s4527_s1 + $0xd8] sm:$0xff]   ;;  %v3674_v50 = vld [vmem:[%s4527_s1 + $0xe0] sm:$0xff]   ;;  %v3678_v54 = vld [vmem:[%s4527_s1 + $0xe8] sm:$0xff]  }
  0xd8   : > { %v3671_v47 = vld [vmem:[%s4527_s1 + $0x18] sm:$0xff]   ;;  %v3675_v51 = vld [vmem:[%s4527_s1 + $0x20] sm:$0xff]   ;;  %v3679_v55 = vld [vmem:[%s4527_s1 + $0x28] sm:$0xff]  }
  0xd9   : > { %3247 = vmatpush3.bf16.msra.mxu0 %v3663_v39  ;;  %v3672_v48 = vld [vmem:[%s4527_s1 + $0x98] sm:$0xff]   ;;  %v3676_v52 = vld [vmem:[%s4527_s1 + $0xa0] sm:$0xff]   ;;  %v3680_v56 = vld [vmem:[%s4527_s1 + $0xa8] sm:$0xff]  }
  0xda   : > { %3311 = vmatpush3.bf16.msra.mxu1 %v3664_v40  ;;  %3248 = vmatprep.subr.bf16.mxu0 %v3665_v41  ;;  %v3681_v57 = vld [vmem:[%s4527_s1 + $0x70] sm:$0xff]   ;;  %v3685_v61 = vld [vmem:[%s4527_s1 + $0x78] sm:$0xff]   ;;  %v3689_v1 = vld [vmem:[%s4525_s6] ss:$36 sps:$4 sm:$0xff]  }
  0xdb   : > { %3312 = vmatprep.subr.bf16.mxu1 %v3666_v42  ;;  %v3682_v58 = vld [vmem:[%s4527_s1 + $0xf0] sm:$0xff]   ;;  %v3686_v62 = vld [vmem:[%s4527_s1 + $0xf8] sm:$0xff]   ;;  %v3691_v2 = vld [vmem:[%s4525_s6 + $0x4] ss:$36 sps:$4 sm:$0xff]  }
  0xdc   : > { %v3683_v59 = vld [vmem:[%s4527_s1 + $0x30] sm:$0xff]   ;;  %v3687_v63 = vld [vmem:[%s4527_s1 + $0x38] sm:$0xff]   ;;  %v3692_v3 = vld [vmem:[%s4525_s6 + $0x8] ss:$36 sps:$4 sm:$0xff]   ;;  %2127 = vmatprep.mubr.bf16.mxu0 %v3691_v2 }
  0xdd   : > { %3249 = vmatpush3.bf16.msra.mxu0 %v3667_v43  ;;  %v3684_v60 = vld [vmem:[%s4527_s1 + $0xb0] sm:$0xff]   ;;  %v3688_v0 = vld [vmem:[%s4527_s1 + $0xb8] sm:$0xff]   ;;  %v3695_v5 = vld [vmem:[%s4527_s1 + $0x140] sm:$0xff]  }
  0xde   : > { %3313 = vmatpush3.bf16.msra.mxu1 %v3668_v44  ;;  %3250 = vmatprep.subr.bf16.mxu0 %v3669_v45  ;;  %v3694_v4 = vld [vmem:[%s4525_s6 + $0xc] ss:$36 sps:$4 sm:$0xff]   ;;  %v3696_v6 = vld [vmem:[%s4527_s1 + $0x1c0] sm:$0xff]   ;;  %v3701_v10 = vld [vmem:[%s4525_s6 + $0x54] ss:$36 sps:$4 sm:$0xff]  }
  0xdf   : > { %3314 = vmatprep.subr.bf16.mxu1 %v3670_v46  ;;  %2224 = vmatprep.mubr.bf16.mxu1 %v3694_v4  ;;  %v3697_v7 = vld [vmem:[%s4527_s1 + $0x100] sm:$0xff]   ;;  %v3699_v9 = vld [vmem:[%s4525_s6 + $0x4c] ss:$36 sps:$4 sm:$0xff]   ;;  %v3709_v17 = vld [vmem:[%s4525_s6 + $0x94] ss:$36 sps:$4 sm:$0xff]  }
  0xe0   : > { %v3698_v8 = vld [vmem:[%s4527_s1 + $0x180] sm:$0xff]   ;;  %v3703_v11 = vld [vmem:[%s4525_s6 + $0x48] ss:$36 sps:$4 sm:$0xff]   ;;  %v3704_v12 = vld [vmem:[%s4525_s6 + $0x50] ss:$36 sps:$4 sm:$0xff]  }
  0xe1   : > { %3251 = vmatpush3.bf16.msra.mxu0 %v3671_v47  ;;  %v3705_v13 = vld [vmem:[%s4527_s1 + $0x148] sm:$0xff]   ;;  %v3711_v18 = vld [vmem:[%s4525_s6 + $0x9c] ss:$36 sps:$4 sm:$0xff]   ;;  %v3713_v19 = vld [vmem:[%s4525_s6 + $0x90] ss:$36 sps:$4 sm:$0xff]  }
  0xe2   : > { %3315 = vmatpush3.bf16.msra.mxu1 %v3672_v48  ;;  %3252 = vmatprep.subr.bf16.mxu0 %v3673_v49  ;;  %v3706_v14 = vld [vmem:[%s4527_s1 + $0x1c8] sm:$0xff]   ;;  %v3714_v20 = vld [vmem:[%s4525_s6 + $0x98] ss:$36 sps:$4 sm:$0xff]   ;;  %v3715_v21 = vld [vmem:[%s4527_s1 + $0x150] sm:$0xff]  }
  0xe3   : > { %3316 = vmatprep.subr.bf16.mxu1 %v3674_v50  ;;  %v3707_v15 = vld [vmem:[%s4527_s1 + $0x108] sm:$0xff]   ;;  %v3716_v22 = vld [vmem:[%s4527_s1 + $0x1d0] sm:$0xff]   ;;  %v3719_v25 = vld [vmem:[%s4525_s6 + $0xdc] ss:$36 sps:$4 sm:$0xff]  }
  0xe4   : > { %v3708_v16 = vld [vmem:[%s4527_s1 + $0x188] sm:$0xff]   ;;  %v3717_v23 = vld [vmem:[%s4527_s1 + $0x110] sm:$0xff]   ;;  %v3723_v27 = vld [vmem:[%s4525_s6 + $0xd8] ss:$36 sps:$4 sm:$0xff]  }
  0xe5   : > { %3253 = vmatpush3.bf16.msra.mxu0 %v3675_v51  ;;  %v3718_v24 = vld [vmem:[%s4527_s1 + $0x190] sm:$0xff]   ;;  %v3721_v26 = vld [vmem:[%s4525_s6 + $0xe4] ss:$36 sps:$4 sm:$0xff]   ;;  %v3725_v29 = vld [vmem:[%s4527_s1 + $0x158] sm:$0xff]  }
  0xe6   : > { %3317 = vmatpush3.bf16.msra.mxu1 %v3676_v52  ;;  %3254 = vmatprep.subr.bf16.mxu0 %v3677_v53  ;;  %v3724_v28 = vld [vmem:[%s4525_s6 + $0xe0] ss:$36 sps:$4 sm:$0xff]   ;;  %v3726_v30 = vld [vmem:[%s4527_s1 + $0x1d8] sm:$0xff]   ;;  %v3731_v34 = vld [vmem:[%s4525_s6 + $0x12c] ss:$36 sps:$4 sm:$0xff]  }
  0xe7   : > { %3318 = vmatprep.subr.bf16.mxu1 %v3678_v54  ;;  %v3727_v31 = vld [vmem:[%s4527_s1 + $0x118] sm:$0xff]   ;;  %v3729_v33 = vld [vmem:[%s4525_s6 + $0x124] ss:$36 sps:$4 sm:$0xff]   ;;  %v3739_v41 = vld [vmem:[%s4525_s6 + $0x16c] ss:$36 sps:$4 sm:$0xff]  }
  0xe8   : > { %v3728_v32 = vld [vmem:[%s4527_s1 + $0x198] sm:$0xff]   ;;  %v3733_v35 = vld [vmem:[%s4525_s6 + $0x120] ss:$36 sps:$4 sm:$0xff]   ;;  %v3734_v37 = vld [vmem:[%s4525_s6 + $0x128] ss:$36 sps:$4 sm:$0xff]  }
  0xe9   : > { %3255 = vmatpush3.bf16.msra.mxu0 %v3679_v55  ;;  %v3735_v36 = vld [vmem:[%s4527_s1 + $0x160] sm:$0xff]   ;;  %v3741_v42 = vld [vmem:[%s4525_s6 + $0x174] ss:$36 sps:$4 sm:$0xff]   ;;  %v3745_v43 = vld [vmem:[%s4527_s1 + $0x168] sm:$0xff]  }
  0xea   : > { %3319 = vmatpush3.bf16.msra.mxu1 %v3680_v56  ;;  %3256 = vmatprep.subr.bf16.mxu0 %v3681_v57  ;;  %v3736_v38 = vld [vmem:[%s4527_s1 + $0x1e0] sm:$0xff]   ;;  %v3746_v44 = vld [vmem:[%s4527_s1 + $0x1e8] sm:$0xff]   ;;  %v3744_v48 = vld [vmem:[%s4525_s6 + $0x170] ss:$36 sps:$4 sm:$0xff]  }
  0xeb   : > { %3320 = vmatprep.subr.bf16.mxu1 %v3682_v58  ;;  %v3737_v39 = vld [vmem:[%s4527_s1 + $0x120] sm:$0xff]   ;;  %v3743_v45 = vld [vmem:[%s4525_s6 + $0x168] ss:$36 sps:$4 sm:$0xff]   ;;  %v3749_v49 = vld [vmem:[%s4525_s6 + $0x1b4] ss:$36 sps:$4 sm:$0xff]  }
  0xec   : > { %v3738_v40 = vld [vmem:[%s4527_s1 + $0x1a0] sm:$0xff]   ;;  %v3747_v46 = vld [vmem:[%s4527_s1 + $0x128] sm:$0xff]   ;;  %v3755_v51 = vld [vmem:[%s4527_s1 + $0x170] sm:$0xff]  }
  0xed   : > { %3257 = vmatpush3.bf16.msra.mxu0 %v3683_v59  ;;  %v3748_v47 = vld [vmem:[%s4527_s1 + $0x1a8] sm:$0xff]   ;;  %v3751_v50 = vld [vmem:[%s4525_s6 + $0x1bc] ss:$36 sps:$4 sm:$0xff]   ;;  %v3756_v52 = vld [vmem:[%s4527_s1 + $0x1f0] sm:$0xff]  }
  0xee   : > { %3321 = vmatpush3.bf16.msra.mxu1 %v3684_v60  ;;  %3258 = vmatprep.subr.bf16.mxu0 %v3685_v61  ;;  %v3757_v53 = vld [vmem:[%s4527_s1 + $0x130] sm:$0xff]   ;;  %v3754_v56 = vld [vmem:[%s4525_s6 + $0x1b8] ss:$36 sps:$4 sm:$0xff]   ;;  %v3761_v58 = vld [vmem:[%s4525_s6 + $0x204] ss:$36 sps:$4 sm:$0xff]  }
  0xef   : > { %3322 = vmatprep.subr.bf16.mxu1 %v3686_v62  ;;  %v3758_v54 = vld [vmem:[%s4527_s1 + $0x1b0] sm:$0xff]   ;;  %v3759_v57 = vld [vmem:[%s4525_s6 + $0x1fc] ss:$36 sps:$4 sm:$0xff]  }
  0xf0   : > { %v3753_v55 = vld [vmem:[%s4525_s6 + $0x1b0] ss:$36 sps:$4 sm:$0xff]   ;;  %v3765_v59 = vld [vmem:[%s4527_s1 + $0x178] sm:$0xff]  }
  0xf1   : > { %3259 = vmatpush3.bf16.msra.mxu0 %v3687_v63  ;;  %v3766_v60 = vld [vmem:[%s4527_s1 + $0x1f8] sm:$0xff]   ;;  %v3769_v4 = vld [vmem:[%s4525_s6 + $0x10] ss:$36 sps:$4 sm:$0xff]  }
  0xf2   : > { %3323 = vmatpush3.bf16.msra.mxu1 %v3688_v0  ;;  %3372 = vmatprep.subr.bf16.mxu0 %v3695_v5  ;;  %v3767_v61 = vld [vmem:[%s4527_s1 + $0x138] sm:$0xff]   ;;  %v3764_v0 = vld [vmem:[%s4525_s6 + $0x200] ss:$36 sps:$4 sm:$0xff]  }
  0xf3   : > { %3436 = vmatprep.subr.bf16.mxu1 %v3696_v6  ;;  %v3768_v62 = vld [vmem:[%s4527_s1 + $0x1b8] sm:$0xff]  }
  0xf4   : > { %2128 = vmatmul.mubr.bf16.vlgmr.msra.gmra.mrb[0].mxu0 %v3689_v1  ;;  %v3763_v63 = vld [vmem:[%s4525_s6 + $0x1f8] ss:$36 sps:$4 sm:$0xff]   ;;  %v3775_v1 = vld [vmem:[%s4527_s1 + $0x200] sm:$0xff]  }
  0xf5   : > { %2225 = vmatmul.mubr.bf16.vlgmr.msra.gmra.mrb[0].mxu1 %v3692_v3  ;;  %3373 = vmatpush3.bf16.msra.mxu0 %v3697_v7  ;;  %v3771_v2 = vld [vmem:[%s4525_s6 + $0x14] ss:$36 sps:$4 sm:$0xff]   ;;  %v3774_v3 = vld [vmem:[%s4525_s6 + $0x1c] ss:$36 sps:$4 sm:$0xff]   ;;  %v3778_v7 = vld [vmem:[%s4525_s6 + $0x64] ss:$36 sps:$4 sm:$0xff]  }
  0xf6   : > { %3437 = vmatpush3.bf16.msra.mxu1 %v3698_v8  ;;  %2135 = vmatprep.mubr.bf16.mxu0 %v3699_v9  ;;  %v3772_v5 = vld [vmem:[%s4525_s6 + $0x18] ss:$36 sps:$4 sm:$0xff]   ;;  %v3782_v8 = vld [vmem:[%s4527_s1 + $0x208] sm:$0xff]   ;;  %v3789_v9 = vld [vmem:[%s4527_s1 + $0x210] sm:$0xff]  }
  0xf7   : > { %2232 = vmatprep.mubr.bf16.mxu1 %v3701_v10  ;;  %3374 = vmatprep.subr.bf16.mxu0 %v3705_v13  ;;  %v3776_v6 = vld [vmem:[%s4525_s6 + $0x5c] ss:$36 sps:$4 sm:$0xff]   ;;  %v3785_v13 = vld [vmem:[%s4525_s6 + $0xac] ss:$36 sps:$4 sm:$0xff]  }
  0xf8   : > { %3438 = vmatprep.subr.bf16.mxu1 %v3706_v14  ;;  %v3780_v10 = vld [vmem:[%s4525_s6 + $0x58] ss:$36 sps:$4 sm:$0xff]  }
  0xf9   : > { %3375 = vmatpush3.bf16.msra.mxu0 %v3707_v15  ;;  %v3796_v14 = vld [vmem:[%s4527_s1 + $0x218] sm:$0xff]   ;;  %v3803_v15 = vld [vmem:[%s4527_s1 + $0x220] sm:$0xff]  }
  0xfa   : > { %3439 = vmatpush3.bf16.msra.mxu1 %v3708_v16  ;;  %3376 = vmatprep.subr.bf16.mxu0 %v3715_v21  ;;  %v3787_v16 = vld [vmem:[%s4525_s6 + $0xa0] ss:$36 sps:$4 sm:$0xff]   ;;  %v3794_v21 = vld [vmem:[%s4525_s6 + $0xe8] ss:$36 sps:$4 sm:$0xff]  }
  0xfb   : > { %3440 = vmatprep.subr.bf16.mxu1 %v3716_v22  ;;  %v3817_v22 = vld [vmem:[%s4527_s1 + $0x230] sm:$0xff]  }
  0xfc   : > { %2136 = vmatmul.mubr.bf16.gmra.mrb[4].mxu0 %v3703_v11  ;;  %v3781_v11 = vld [vmem:[%s4525_s6 + $0x60] ss:$36 sps:$4 sm:$0xff]  }
  0xfd   : > { %2233 = vmatmul.mubr.bf16.gmra.mrb[4].mxu1 %v3704_v12  ;;  %2143 = vmatprep.mubr.bf16.mxu0 %v3709_v17  ;;  %v3783_v12 = vld [vmem:[%s4525_s6 + $0xa4] ss:$36 sps:$4 sm:$0xff]  }
  0xfe   : > { %2240 = vmatprep.mubr.bf16.mxu1 %v3711_v18  ;;  %3377 = vmatpush3.bf16.msra.mxu0 %v3717_v23  ;;  %v3788_v17 = vld [vmem:[%s4525_s6 + $0xa8] ss:$36 sps:$4 sm:$0xff]   ;;  %v3795_v23 = vld [vmem:[%s4525_s6 + $0xf0] ss:$36 sps:$4 sm:$0xff]  }
  0xff   : > { %3441 = vmatpush3.bf16.msra.mxu1 %v3718_v24  ;;  %3378 = vmatprep.subr.bf16.mxu0 %v3725_v29  ;;  %v3790_v18 = vld [vmem:[%s4525_s6 + $0xec] ss:$36 sps:$4 sm:$0xff]   ;;  %v3797_v24 = vld [vmem:[%s4525_s6 + $0x134] ss:$36 sps:$4 sm:$0xff]   ;;  %v3804_v29 = vld [vmem:[%s4525_s6 + $0x17c] ss:$36 sps:$4 sm:$0xff]  }
 0x100   : > { %3442 = vmatprep.subr.bf16.mxu1 %v3726_v30  ;;  %v3806_v30 = vld [vmem:[%s4525_s6 + $0x184] ss:$36 sps:$4 sm:$0xff]  }
 0x102   : > { %3379 = vmatpush3.bf16.msra.mxu0 %v3727_v31  ;;  %v3808_v31 = vld [vmem:[%s4525_s6 + $0x178] ss:$36 sps:$4 sm:$0xff]  }
 0x103   : > { %3443 = vmatpush3.bf16.msra.mxu1 %v3728_v32  ;;  %3380 = vmatprep.subr.bf16.mxu0 %v3735_v36  ;;  %v3809_v32 = vld [vmem:[%s4525_s6 + $0x180] ss:$36 sps:$4 sm:$0xff]   ;;  %v3816_v36 = vld [vmem:[%s4525_s6 + $0x1c8] ss:$36 sps:$4 sm:$0xff]  }
 0x104   : > { %2144 = vmatmul.mubr.bf16.gmra.mrb[8].mxu0 %v3713_v19  ;;  %3444 = vmatprep.subr.bf16.mxu1 %v3736_v38  ;;  %v3792_v19 = vld [vmem:[%s4525_s6 + $0xf4] ss:$36 sps:$4 sm:$0xff]  }
 0x105   : > { %2241 = vmatmul.mubr.bf16.gmra.mrb[8].mxu1 %v3714_v20  ;;  %2151 = vmatprep.mubr.bf16.mxu0 %v3719_v25  ;;  %v3810_v20 = vld [vmem:[%s4527_s1 + $0x228] sm:$0xff]   ;;  %v3799_v25 = vld [vmem:[%s4525_s6 + $0x13c] ss:$36 sps:$4 sm:$0xff]   ;;  %v3820_v38 = vld [vmem:[%s4525_s6 + $0x214] ss:$36 sps:$4 sm:$0xff]  }
 0x106   : > { %2248 = vmatprep.mubr.bf16.mxu1 %v3721_v26  ;;  %3381 = vmatpush3.bf16.msra.mxu0 %v3737_v39  ;;  %v3824_v26 = vld [vmem:[%s4527_s1 + $0x238] sm:$0xff]   ;;  %v3822_v39 = vld [vmem:[%s4525_s6 + $0x208] ss:$36 sps:$4 sm:$0xff]  }
 0x107   : > { %3445 = vmatpush3.bf16.msra.mxu1 %v3738_v40  ;;  %3382 = vmatprep.subr.bf16.mxu0 %v3745_v43  ;;  %v3823_v40 = vld [vmem:[%s4525_s6 + $0x210] ss:$36 sps:$4 sm:$0xff]   ;;  %v3827_v43 = vld [vmem:[%s4525_s6 + $0x68] ss:$36 sps:$4 sm:$0xff]  }
 0x108   : > { %3446 = vmatprep.subr.bf16.mxu1 %v3746_v44  ;;  %v3828_v44 = vld [vmem:[%s4525_s6 + $0x188] ss:$36 sps:$4 sm:$0xff]  }
 0x10a   : > { %3383 = vmatpush3.bf16.msra.mxu0 %v3747_v46  ;;  %v3830_v46 = vld [vmem:[%s4525_s6 + $0x1d0] ss:$36 sps:$4 sm:$0xff]  }
 0x10b   : > { %3447 = vmatpush3.bf16.msra.mxu1 %v3748_v47  ;;  %3384 = vmatprep.subr.bf16.mxu0 %v3755_v51  ;;  %v3831_v47 = vld [vmem:[%s4525_s6 + $0xf8] ss:$36 sps:$4 sm:$0xff]  }
 0x10c   : > { %2152 = vmatmul.mubr.bf16.gmra.mrb[12].mxu0 %v3723_v27  ;;  %3448 = vmatprep.subr.bf16.mxu1 %v3756_v52  ;;  %v3801_v27 = vld [vmem:[%s4525_s6 + $0x130] ss:$36 sps:$4 sm:$0xff]  }
 0x10d   : > { %2249 = vmatmul.mubr.bf16.gmra.mrb[12].mxu1 %v3724_v28  ;;  %2159 = vmatprep.mubr.bf16.mxu0 %v3729_v33  ;;  %v3802_v28 = vld [vmem:[%s4525_s6 + $0x138] ss:$36 sps:$4 sm:$0xff]   ;;  %v3811_v33 = vld [vmem:[%s4525_s6 + $0x1c4] ss:$36 sps:$4 sm:$0xff]  }
 0x10e   : > { %2256 = vmatprep.mubr.bf16.mxu1 %v3731_v34  ;;  %3385 = vmatpush3.bf16.msra.mxu0 %v3757_v53  ;;  %v3813_v34 = vld [vmem:[%s4525_s6 + $0x1cc] ss:$36 sps:$4 sm:$0xff]  }
 0x10f   : > { %3449 = vmatpush3.bf16.msra.mxu1 %v3758_v54  ;;  %3386 = vmatprep.subr.bf16.mxu0 %v3765_v59 }
 0x110   : > { %3450 = vmatprep.subr.bf16.mxu1 %v3766_v60 }
 0x112   : > { %3387 = vmatpush3.bf16.msra.mxu0 %v3767_v61 }
 0x113   : > { %3451 = vmatpush3.bf16.msra.mxu1 %v3768_v62  ;;  %3516 = vmatprep.subr.bf16.mxu0 %v3775_v1 }
 0x114   : > { %2160 = vmatmul.mubr.bf16.gmra.mrb[16].mxu0 %v3733_v35  ;;  %3548 = vmatprep.subr.bf16.mxu1 %v3775_v1  ;;  %v3815_v35 = vld [vmem:[%s4525_s6 + $0x1c0] ss:$36 sps:$4 sm:$0xff]  }
 0x115   : > { %2257 = vmatmul.mubr.bf16.gmra.mrb[16].mxu1 %v3734_v37  ;;  %2167 = vmatprep.mubr.bf16.mxu0 %v3739_v41  ;;  %v3818_v37 = vld [vmem:[%s4525_s6 + $0x20c] ss:$36 sps:$4 sm:$0xff]   ;;  %v3825_v41 = vld [vmem:[%s4525_s6 + $0x20] ss:$36 sps:$4 sm:$0xff]  }
 0x116   : > { %2264 = vmatprep.mubr.bf16.mxu1 %v3741_v42  ;;  %v3826_v42 = vld [vmem:[%s4525_s6 + $0x140] ss:$36 sps:$4 sm:$0xff]  }
 0x11c   : > { %2168 = vmatmul.mubr.bf16.gmra.mrb[20].mxu0 %v3743_v45  ;;  %v3829_v45 = vld [vmem:[%s4525_s6 + $0xb0] ss:$36 sps:$4 sm:$0xff]  }
 0x11d   : > { %2265 = vmatmul.mubr.bf16.gmra.mrb[20].mxu1 %v3744_v48  ;;  %2175 = vmatprep.mubr.bf16.mxu0 %v3749_v49  ;;  %v3832_v48 = vld [vmem:[%s4525_s6 + $0x218] ss:$36 sps:$4 sm:$0xff]  }
 0x11e   : > { %2272 = vmatprep.mubr.bf16.mxu1 %v3751_v50 }
 0x124   : > { %2176 = vmatmul.mubr.bf16.gmra.mrb[24].mxu0 %v3753_v55 }
 0x125   : > { %2273 = vmatmul.mubr.bf16.gmra.mrb[24].mxu1 %v3754_v56  ;;  %2183 = vmatprep.mubr.bf16.mxu0 %v3759_v57 }
 0x126   : > { %2280 = vmatprep.mubr.bf16.mxu1 %v3761_v58 }
 0x12c   : > { %2184 = vmatmul.mubr.bf16.gmra.mrb[28].mxu0 %v3763_v63 }
 0x12d   : > { %2281 = vmatmul.mubr.bf16.gmra.mrb[28].mxu1 %v3764_v0  ;;  %2321 = vmatprep.mubr.bf16.mxu0 %v3771_v2 }
 0x12e   : > { %2418 = vmatprep.mubr.bf16.mxu1 %v3774_v3 }
 0x134   : > { %2322 = vmatmul.mubr.bf16.vlgmr.msra.gmra.mrb[32].mxu0 %v3769_v4 }
 0x135   : > { %2419 = vmatmul.mubr.bf16.vlgmr.msra.gmra.mrb[32].mxu1 %v3772_v5  ;;  %3517 = vmatpush3.bf16.msra.mxu0 %v3775_v1 }
 0x136   : > { %3556 = vmatpush3.bf16.msra.mxu1 %v3775_v1  ;;  %2329 = vmatprep.mubr.bf16.mxu0 %v3776_v6 }
 0x137   : > { %2426 = vmatprep.mubr.bf16.mxu1 %v3778_v7  ;;  %3518 = vmatprep.subr.bf16.mxu0 %v3782_v8 }
 0x138   : > { %3549 = vmatprep.subr.bf16.mxu1 %v3782_v8 }
 0x139   : > { %3519 = vmatpush3.bf16.msra.mxu0 %v3782_v8 }
 0x13a   : > { %3557 = vmatpush3.bf16.msra.mxu1 %v3782_v8  ;;  %3520 = vmatprep.subr.bf16.mxu0 %v3789_v9 }
 0x13b   : > { %3550 = vmatprep.subr.bf16.mxu1 %v3789_v9 }
 0x13c   : > { %2330 = vmatmul.mubr.bf16.gmra.mrb[36].mxu0 %v3780_v10 }
 0x13d   : > { %2427 = vmatmul.mubr.bf16.gmra.mrb[36].mxu1 %v3781_v11  ;;  %2337 = vmatprep.mubr.bf16.mxu0 %v3783_v12 }
 0x13e   : > { %2434 = vmatprep.mubr.bf16.mxu1 %v3785_v13  ;;  %3521 = vmatpush3.bf16.msra.mxu0 %v3789_v9 }
 0x13f   : > { %3558 = vmatpush3.bf16.msra.mxu1 %v3789_v9  ;;  %3522 = vmatprep.subr.bf16.mxu0 %v3796_v14 }
 0x140   : > { %3551 = vmatprep.subr.bf16.mxu1 %v3796_v14 }
 0x142   : > { %3523 = vmatpush3.bf16.msra.mxu0 %v3796_v14 }
 0x143   : > { %3559 = vmatpush3.bf16.msra.mxu1 %v3796_v14  ;;  %3524 = vmatprep.subr.bf16.mxu0 %v3803_v15 }
 0x144   : > { %2338 = vmatmul.mubr.bf16.gmra.mrb[40].mxu0 %v3787_v16  ;;  %3552 = vmatprep.subr.bf16.mxu1 %v3803_v15 }
 0x145   : > { %2435 = vmatmul.mubr.bf16.gmra.mrb[40].mxu1 %v3788_v17  ;;  %2345 = vmatprep.mubr.bf16.mxu0 %v3790_v18 }
 0x146   : > { %2442 = vmatprep.mubr.bf16.mxu1 %v3792_v19  ;;  %3525 = vmatpush3.bf16.msra.mxu0 %v3803_v15 }
 0x147   : > { %3560 = vmatpush3.bf16.msra.mxu1 %v3803_v15  ;;  %3526 = vmatprep.subr.bf16.mxu0 %v3810_v20 }
 0x148   : > { %3553 = vmatprep.subr.bf16.mxu1 %v3810_v20 }
 0x14a   : > { %3527 = vmatpush3.bf16.msra.mxu0 %v3810_v20 }
 0x14b   : > { %3561 = vmatpush3.bf16.msra.mxu1 %v3810_v20  ;;  %3528 = vmatprep.subr.bf16.mxu0 %v3817_v22 }
 0x14c   : > { %2346 = vmatmul.mubr.bf16.gmra.mrb[44].mxu0 %v3794_v21  ;;  %3554 = vmatprep.subr.bf16.mxu1 %v3817_v22 }
 0x14d   : > { %2443 = vmatmul.mubr.bf16.gmra.mrb[44].mxu1 %v3795_v23  ;;  %2353 = vmatprep.mubr.bf16.mxu0 %v3797_v24 }
 0x14e   : > { %2450 = vmatprep.mubr.bf16.mxu1 %v3799_v25  ;;  %3529 = vmatpush3.bf16.msra.mxu0 %v3817_v22 }
 0x14f   : > { %3562 = vmatpush3.bf16.msra.mxu1 %v3817_v22  ;;  %3530 = vmatprep.subr.bf16.mxu0 %v3824_v26 }
 0x150   : > { %3555 = vmatprep.subr.bf16.mxu1 %v3824_v26 }
 0x152   : > { %3531 = vmatpush3.bf16.msra.mxu0 %v3824_v26 }
 0x153   : > { %3563 = vmatpush3.bf16.msra.mxu1 %v3824_v26 }
 0x154   : > { %2354 = vmatmul.mubr.bf16.gmra.mrb[48].mxu0 %v3801_v27 }
 0x155   : > { %2451 = vmatmul.mubr.bf16.gmra.mrb[48].mxu1 %v3802_v28  ;;  %2361 = vmatprep.mubr.bf16.mxu0 %v3804_v29 }
 0x156   : > { %2458 = vmatprep.mubr.bf16.mxu1 %v3806_v30 }
 0x15c   : > { %2362 = vmatmul.mubr.bf16.gmra.mrb[52].mxu0 %v3808_v31 }
 0x15d   : > { %2459 = vmatmul.mubr.bf16.gmra.mrb[52].mxu1 %v3809_v32  ;;  %2369 = vmatprep.mubr.bf16.mxu0 %v3811_v33 }
 0x15e   : > { %2466 = vmatprep.mubr.bf16.mxu1 %v3813_v34 }
 0x164   : > { %2370 = vmatmul.mubr.bf16.gmra.mrb[56].mxu0 %v3815_v35 }
 0x165   : > { %2467 = vmatmul.mubr.bf16.gmra.mrb[56].mxu1 %v3816_v36  ;;  %2377 = vmatprep.mubr.bf16.mxu0 %v3818_v37 }
 0x166   : > { %2474 = vmatprep.mubr.bf16.mxu1 %v3820_v38 }
 0x16c   : > { %2378 = vmatmul.mubr.bf16.gmra.mrb[60].mxu0 %v3822_v39 }
 0x16d   : > { %2475 = vmatmul.mubr.bf16.gmra.mrb[60].mxu1 %v3823_v40  ;;  %3532 = vmatprep.mubr.bf16.mxu0 %v3825_v41 }
 0x16e   : > { %3540 = vmatprep.mubr.bf16.mxu1 %v3826_v42 }
 0x174   : > { %3533 = vmatmul.mubr.bf16.vlgmr.msra.gmra.mrb[64].mxu0 %v3827_v43 }
 0x175   : > { %3541 = vmatmul.mubr.bf16.vlgmr.msra.gmra.mrb[64].mxu1 %v3828_v44  ;;  %3536 = vmatprep.mubr.bf16.mxu0 %v3829_v45 }
 0x176   : > { %3544 = vmatprep.mubr.bf16.mxu1 %v3830_v46 }
 0x17c   : > { %3537 = vmatmul.mubr.bf16.gmra.mrb[68].mxu0 %v3831_v47 }
 0x17d   : > { %3545 = vmatmul.mubr.bf16.gmra.mrb[68].mxu1 %v3832_v48 }
 0x1c7   : > { %v3260_v49 = vpop.f32.mrb[0].mxu0 }
 0x1c8   : > { %v3324_v50 = vpop.f32.mrb[0].mxu1  ;;  %v3261_v51 = vpop.f32.mrb[1].mxu0 }
 0x1c9   : > { %v3262_v52 = vadd.f32 %v3261_v51, %v3260_v49  ;;  %v3325_v53 = vpop.f32.mrb[1].mxu1  ;;  %v3263_v54 = vpop.f32.mrb[2].mxu0 }
 0x1ca   : > { %v3326_v55 = vadd.f32 %v3325_v53, %v3324_v50  ;;  %v3327_v56 = vpop.f32.mrb[2].mxu1  ;;  %v3264_v57 = vpop.f32.mrb[3].mxu0 }
 0x1cb   : > { %v3265_v58 = vadd.f32 %v3264_v57, %v3263_v54  ;;  %v3328_v59 = vpop.f32.mrb[3].mxu1 }
 0x1cc   : > { %v4676_v60 = vadd.f32 %v3326_v55, %v3262_v52  ;;  %v3329_v61 = vadd.f32 %v3328_v59, %v3327_v56 }
 0x1ce   : > { %v4678_v62 = vadd.f32 %v3329_v61, %v3265_v58 }
 0x1cf   : > { %v3266_v63 = vpop.f32.mrb[4].mxu0 }
 0x1d0   : > { %v3330_v0 = vpop.f32.mrb[4].mxu1  ;;  %v3267_v1 = vpop.f32.mrb[5].mxu0 }
 0x1d1   : > { %v3268_v2 = vadd.f32 %v3267_v1, %v3266_v63  ;;  %v3331_v3 = vpop.f32.mrb[5].mxu1  ;;  %v3269_v4 = vpop.f32.mrb[6].mxu0 }
 0x1d2   : > { %v3332_v5 = vadd.f32 %v3331_v3, %v3330_v0  ;;  %v3333_v6 = vpop.f32.mrb[6].mxu1  ;;  %v3270_v7 = vpop.f32.mrb[7].mxu0 }
 0x1d3   : > { %v3271_v8 = vadd.f32 %v3270_v7, %v3269_v4  ;;  %v3334_v9 = vpop.f32.mrb[7].mxu1 }
 0x1d4   : > { %v4680_v10 = vadd.f32 %v3332_v5, %v3268_v2  ;;  %v3335_v11 = vadd.f32 %v3334_v9, %v3333_v6 }
 0x1d6   : > { %v4682_v12 = vadd.f32 %v3335_v11, %v3271_v8 }
 0x1d7   : > { %v3272_v13 = vpop.f32.mrb[8].mxu0 }
 0x1d8   : > { %v3336_v14 = vpop.f32.mrb[8].mxu1  ;;  %v3273_v15 = vpop.f32.mrb[9].mxu0 }
 0x1d9   : > { %v3274_v16 = vadd.f32 %v3273_v15, %v3272_v13  ;;  %v3337_v17 = vpop.f32.mrb[9].mxu1  ;;  %v3275_v18 = vpop.f32.mrb[10].mxu0 }
 0x1da   : > { %v3338_v19 = vadd.f32 %v3337_v17, %v3336_v14  ;;  %v3339_v20 = vpop.f32.mrb[10].mxu1  ;;  %v3276_v21 = vpop.f32.mrb[11].mxu0 }
 0x1db   : > { %v3277_v22 = vadd.f32 %v3276_v21, %v3275_v18  ;;  %v3340_v23 = vpop.f32.mrb[11].mxu1 }
 0x1dc   : > { %v4684_v24 = vadd.f32 %v3338_v19, %v3274_v16  ;;  %v3341_v25 = vadd.f32 %v3340_v23, %v3339_v20 }
 0x1de   : > { %v4686_v26 = vadd.f32 %v3341_v25, %v3277_v22 }
 0x1df   : > { %v3278_v27 = vpop.f32.mrb[12].mxu0 }
 0x1e0   : > { %v3342_v28 = vpop.f32.mrb[12].mxu1  ;;  %v3279_v29 = vpop.f32.mrb[13].mxu0 }
 0x1e1   : > { %v3280_v30 = vadd.f32 %v3279_v29, %v3278_v27  ;;  %v3343_v31 = vpop.f32.mrb[13].mxu1  ;;  %v3281_v32 = vpop.f32.mrb[14].mxu0 }
 0x1e2   : > { %v3344_v33 = vadd.f32 %v3343_v31, %v3342_v28  ;;  %v3345_v34 = vpop.f32.mrb[14].mxu1  ;;  %v3282_v35 = vpop.f32.mrb[15].mxu0 }
 0x1e3   : > { %v3283_v36 = vadd.f32 %v3282_v35, %v3281_v32  ;;  %v3346_v37 = vpop.f32.mrb[15].mxu1 }
 0x1e4   : > { %v4688_v38 = vadd.f32 %v3344_v33, %v3280_v30  ;;  %v3347_v39 = vadd.f32 %v3346_v37, %v3345_v34 }
 0x1e6   : > { %v4690_v40 = vadd.f32 %v3347_v39, %v3283_v36 }
 0x1e7   : > { %v3284_v41 = vpop.f32.mrb[16].mxu0 }
 0x1e8   : > { %v3348_v42 = vpop.f32.mrb[16].mxu1  ;;  %v3285_v43 = vpop.f32.mrb[17].mxu0 }
 0x1e9   : > { %v3286_v44 = vadd.f32 %v3285_v43, %v3284_v41  ;;  %v3349_v45 = vpop.f32.mrb[17].mxu1  ;;  %v3287_v46 = vpop.f32.mrb[18].mxu0 }
 0x1ea   : > { %v3350_v47 = vadd.f32 %v3349_v45, %v3348_v42  ;;  %v3351_v48 = vpop.f32.mrb[18].mxu1  ;;  %v3288_v49 = vpop.f32.mrb[19].mxu0 }
 0x1eb   : > { %v3289_v50 = vadd.f32 %v3288_v49, %v3287_v46  ;;  %v3352_v51 = vpop.f32.mrb[19].mxu1 }
 0x1ec   : > { %v4692_v52 = vadd.f32 %v3350_v47, %v3286_v44  ;;  %v3353_v53 = vadd.f32 %v3352_v51, %v3351_v48 }
 0x1ee   : > { %v4694_v54 = vadd.f32 %v3353_v53, %v3289_v50 }
 0x1ef   : > { %v3290_v55 = vpop.f32.mrb[20].mxu0 }
 0x1f0   : > { %v3354_v56 = vpop.f32.mrb[20].mxu1  ;;  %v3291_v57 = vpop.f32.mrb[21].mxu0 }
 0x1f1   : > { %v3292_v58 = vadd.f32 %v3291_v57, %v3290_v55  ;;  %v3355_v59 = vpop.f32.mrb[21].mxu1  ;;  %v3293_v61 = vpop.f32.mrb[22].mxu0 }
 0x1f2   : > { %v3356_v63 = vadd.f32 %v3355_v59, %v3354_v56  ;;  %v3357_v0 = vpop.f32.mrb[22].mxu1  ;;  %v3294_v1 = vpop.f32.mrb[23].mxu0 }
 0x1f3   : > { %v3295_v2 = vadd.f32 %v3294_v1, %v3293_v61  ;;  %v3358_v3 = vpop.f32.mrb[23].mxu1 }
 0x1f4   : > { %v4696_v4 = vadd.f32 %v3356_v63, %v3292_v58  ;;  %v3359_v5 = vadd.f32 %v3358_v3, %v3357_v0 }
 0x1f6   : > { %v4698_v6 = vadd.f32 %v3359_v5, %v3295_v2 }
 0x1f7   : > { %v3296_v7 = vpop.f32.mrb[24].mxu0 }
 0x1f8   : > { %v3360_v8 = vpop.f32.mrb[24].mxu1  ;;  %v3297_v9 = vpop.f32.mrb[25].mxu0 }
 0x1f9   : > { %v3298_v11 = vadd.f32 %v3297_v9, %v3296_v7  ;;  %v3361_v13 = vpop.f32.mrb[25].mxu1  ;;  %v3299_v14 = vpop.f32.mrb[26].mxu0 }
 0x1fa   : > { %v3362_v15 = vadd.f32 %v3361_v13, %v3360_v8  ;;  %v3363_v16 = vpop.f32.mrb[26].mxu1  ;;  %v3300_v17 = vpop.f32.mrb[27].mxu0 }
 0x1fb   : > { %v3301_v18 = vadd.f32 %v3300_v17, %v3299_v14  ;;  %v3364_v19 = vpop.f32.mrb[27].mxu1 }
 0x1fc   : > { %v4700_v20 = vadd.f32 %v3362_v15, %v3298_v11  ;;  %v3365_v21 = vadd.f32 %v3364_v19, %v3363_v16 }
 0x1fe   : > { %v4702_v22 = vadd.f32 %v3365_v21, %v3301_v18 }
 0x1ff   : > { %v3302_v23 = vpop.f32.mrb[28].mxu0 }
 0x200   : > { %v3366_v25 = vpop.f32.mrb[28].mxu1  ;;  %v3303_v27 = vpop.f32.mrb[29].mxu0 }
 0x201   : > { %v3304_v28 = vadd.f32 %v3303_v27, %v3302_v23  ;;  %v3367_v29 = vpop.f32.mrb[29].mxu1  ;;  %v3305_v30 = vpop.f32.mrb[30].mxu0 }
 0x202   : > { %v3368_v31 = vadd.f32 %v3367_v29, %v3366_v25  ;;  %v3369_v32 = vpop.f32.mrb[30].mxu1  ;;  %v3306_v33 = vpop.f32.mrb[31].mxu0 }
 0x203   : > { %v3307_v34 = vadd.f32 %v3306_v33, %v3305_v30  ;;  %v3370_v35 = vpop.f32.mrb[31].mxu1 }
 0x204   : > { %v4704_v36 = vadd.f32 %v3368_v31, %v3304_v28  ;;  %v3371_v37 = vadd.f32 %v3370_v35, %v3369_v32 }
 0x206   : > { %v4706_v39 = vadd.f32 %v3371_v37, %v3307_v34 }
 0x207   : > { %v3388_v41 = vpop.f32.mrb[32].mxu0 }
 0x208   : > { %v3452_v42 = vpop.f32.mrb[32].mxu1  ;;  %v3389_v43 = vpop.f32.mrb[33].mxu0 }
 0x209   : > { %v3390_v44 = vadd.f32 %v3389_v43, %v3388_v41  ;;  %v3453_v45 = vpop.f32.mrb[33].mxu1  ;;  %v3391_v46 = vpop.f32.mrb[34].mxu0 }
 0x20a   : > { %v3454_v47 = vadd.f32 %v3453_v45, %v3452_v42  ;;  %v3455_v48 = vpop.f32.mrb[34].mxu1  ;;  %v3392_v49 = vpop.f32.mrb[35].mxu0 }
 0x20b   : > { %v2324_v50 = vadd.f32 %v3390_v44, %v4676_v60  ;;  %v3393_v51 = vadd.f32 %v3392_v49, %v3391_v46  ;;  %v3456_v53 = vpop.f32.mrb[35].mxu1 }
 0x20c   : > { %v3457_v55 = vadd.f32 %v3456_v53, %v3455_v48 }
 0x20d   : > { %v2327_v56 = vadd.f32 %v3393_v51, %v4678_v62  ;;  %v4710_v57 = vadd.f32 %v3454_v47, %v2324_v50 }
 0x20f   : > { %v3394_v58 = vpop.f32.mrb[36].mxu0  ;;  %v4712_v59 = vadd.f32 %v3457_v55, %v2327_v56 }
 0x210   : > { %v3458_v61 = vpop.f32.mrb[36].mxu1  ;;  %v3395_v63 = vpop.f32.mrb[37].mxu0 }
 0x211   : > { %v3396_v0 = vadd.f32 %v3395_v63, %v3394_v58  ;;  %v3459_v1 = vpop.f32.mrb[37].mxu1  ;;  %v3397_v2 = vpop.f32.mrb[38].mxu0 }
 0x212   : > { %v3460_v3 = vadd.f32 %v3459_v1, %v3458_v61  ;;  %v3461_v5 = vpop.f32.mrb[38].mxu1  ;;  %v3398_v7 = vpop.f32.mrb[39].mxu0 }
 0x213   : > { %v2332_v60 = vadd.f32 %v3396_v0, %v4680_v10  ;;  %v3399_v8 = vadd.f32 %v3398_v7, %v3397_v2  ;;  %v3462_v9 = vpop.f32.mrb[39].mxu1 }
 0x214   : > { %v3463_v11 = vadd.f32 %v3462_v9, %v3461_v5 }
 0x215   : > { %v2335_v62 = vadd.f32 %v3399_v8, %v4682_v12  ;;  %v4716_v13 = vadd.f32 %v3460_v3, %v2332_v60 }
 0x217   : > { %v3400_v14 = vpop.f32.mrb[40].mxu0  ;;  %v4718_v15 = vadd.f32 %v3463_v11, %v2335_v62 }
 0x218   : > { %v3464_v16 = vpop.f32.mrb[40].mxu1  ;;  %v3401_v17 = vpop.f32.mrb[41].mxu0 }
 0x219   : > { %v3402_v18 = vadd.f32 %v3401_v17, %v3400_v14  ;;  %v3465_v19 = vpop.f32.mrb[41].mxu1  ;;  %v3403_v21 = vpop.f32.mrb[42].mxu0 }
 0x21a   : > { %v3466_v23 = vadd.f32 %v3465_v19, %v3464_v16  ;;  %v3467_v25 = vpop.f32.mrb[42].mxu1  ;;  %v3404_v27 = vpop.f32.mrb[43].mxu0 }
 0x21b   : > { %v2340_v10 = vadd.f32 %v3402_v18, %v4684_v24  ;;  %v3405_v28 = vadd.f32 %v3404_v27, %v3403_v21  ;;  %v3468_v29 = vpop.f32.mrb[43].mxu1 }
 0x21c   : > { %v3469_v30 = vadd.f32 %v3468_v29, %v3467_v25 }
 0x21d   : > { %v2343_v12 = vadd.f32 %v3405_v28, %v4686_v26  ;;  %v4722_v31 = vadd.f32 %v3466_v23, %v2340_v10 }
 0x21f   : > { %v3406_v32 = vpop.f32.mrb[44].mxu0  ;;  %v4724_v33 = vadd.f32 %v3469_v30, %v2343_v12 }
 0x220   : > { %v3470_v34 = vpop.f32.mrb[44].mxu1  ;;  %v3407_v35 = vpop.f32.mrb[45].mxu0 }
 0x221   : > { %v3408_v37 = vadd.f32 %v3407_v35, %v3406_v32  ;;  %v3471_v41 = vpop.f32.mrb[45].mxu1  ;;  %v3409_v42 = vpop.f32.mrb[46].mxu0 }
 0x222   : > { %v3472_v43 = vadd.f32 %v3471_v41, %v3470_v34  ;;  %v3473_v44 = vpop.f32.mrb[46].mxu1  ;;  %v3410_v45 = vpop.f32.mrb[47].mxu0 }
 0x223   : > { %v2348_v24 = vadd.f32 %v3408_v37, %v4688_v38  ;;  %v3411_v46 = vadd.f32 %v3410_v45, %v3409_v42  ;;  %v3474_v47 = vpop.f32.mrb[47].mxu1 }
 0x224   : > { %v3475_v48 = vadd.f32 %v3474_v47, %v3473_v44 }
 0x225   : > { %v2351_v26 = vadd.f32 %v3411_v46, %v4690_v40  ;;  %v4728_v49 = vadd.f32 %v3472_v43, %v2348_v24 }
 0x227   : > { %v3412_v50 = vpop.f32.mrb[48].mxu0  ;;  %v4730_v51 = vadd.f32 %v3475_v48, %v2351_v26 }
 0x228   : > { %v3476_v53 = vpop.f32.mrb[48].mxu1  ;;  %v3413_v55 = vpop.f32.mrb[49].mxu0 }
 0x229   : > { %v3414_v56 = vadd.f32 %v3413_v55, %v3412_v50  ;;  %v3477_v58 = vpop.f32.mrb[49].mxu1  ;;  %v3415_v61 = vpop.f32.mrb[50].mxu0 }
 0x22a   : > { %v3478_v63 = vadd.f32 %v3477_v58, %v3476_v53  ;;  %v3479_v0 = vpop.f32.mrb[50].mxu1  ;;  %v3416_v1 = vpop.f32.mrb[51].mxu0 }
 0x22b   : > { %v2356_v38 = vadd.f32 %v3414_v56, %v4692_v52  ;;  %v3417_v2 = vadd.f32 %v3416_v1, %v3415_v61  ;;  %v3480_v3 = vpop.f32.mrb[51].mxu1 }
 0x22c   : > { %v3481_v5 = vadd.f32 %v3480_v3, %v3479_v0 }
 0x22d   : > { %v2359_v40 = vadd.f32 %v3417_v2, %v4694_v54  ;;  %v4734_v7 = vadd.f32 %v3478_v63, %v2356_v38  ;;  %v1057_v38 = vld [vmem:[#allocation2 + $0x10] sm:$0xff] }
 0x22f   : > { %v3418_v60 = vpop.f32.mrb[52].mxu0  ;;  %v4736_v8 = vadd.f32 %v3481_v5, %v2359_v40  ;;  %v1065_v40 = vld [vmem:[#allocation2 + $0x50] sm:$0xff] }
 0x230   : > { %v3482_v9 = vpop.f32.mrb[52].mxu1  ;;  %v3419_v11 = vpop.f32.mrb[53].mxu0 }
 0x231   : > { %v3420_v62 = vadd.f32 %v3419_v11, %v3418_v60  ;;  %v3483_v14 = vpop.f32.mrb[53].mxu1  ;;  %v3421_v16 = vpop.f32.mrb[54].mxu0 }
 0x232   : > { %v3484_v17 = vadd.f32 %v3483_v14, %v3482_v9  ;;  %v3485_v18 = vpop.f32.mrb[54].mxu1  ;;  %v3422_v19 = vpop.f32.mrb[55].mxu0  ;;  %v1055_v9 = vld [vmem:[#allocation2] sm:$0xff] }
 0x233   : > { %v2364_v52 = vadd.f32 %v3420_v62, %v4696_v4  ;;  %v3423_v21 = vadd.f32 %v3422_v19, %v3421_v16  ;;  %v3486_v23 = vpop.f32.mrb[55].mxu1  ;;  %v1063_v16 = vld [vmem:[#allocation2 + $0x40] sm:$0xff] }
 0x234   : > { %v3487_v25 = vadd.f32 %v3486_v23, %v3485_v18 }
 0x235   : > { %v2367_v54 = vadd.f32 %v3423_v21, %v4698_v6  ;;  %v2461_v27 = vadd.f32 %v3484_v17, %v2364_v52  ;;  %v1058_v17 = vld [vmem:[#allocation2 + $0x18] sm:$0xff] }
 0x236   : > { %v1066_v21 = vld [vmem:[#allocation2 + $0x58] sm:$0xff] }
 0x237   : > { %v3424_v10 = vpop.f32.mrb[56].mxu0  ;;  %v2464_v28 = vadd.f32 %v3487_v25, %v2367_v54  ;;  %v1056_v25 = vld [vmem:[#allocation2 + $0x8] sm:$0xff] }
 0x238   : > { %v3488_v29 = vpop.f32.mrb[56].mxu1  ;;  %v3425_v30 = vpop.f32.mrb[57].mxu0 }
 0x239   : > { %v3426_v12 = vadd.f32 %v3425_v30, %v3424_v10  ;;  %v3489_v32 = vpop.f32.mrb[57].mxu1  ;;  %v3427_v34 = vpop.f32.mrb[58].mxu0  ;;  %v1064_v30 = vld [vmem:[#allocation2 + $0x48] sm:$0xff] }
 0x23a   : > { %v3490_v35 = vadd.f32 %v3489_v32, %v3488_v29  ;;  %v3491_v37 = vpop.f32.mrb[58].mxu1  ;;  %v3428_v41 = vpop.f32.mrb[59].mxu0 }
 0x23b   : > { %v2372_v42 = vadd.f32 %v3426_v12, %v4700_v20  ;;  %v3429_v43 = vadd.f32 %v3428_v41, %v3427_v34  ;;  %v3492_v4 = vpop.f32.mrb[59].mxu1  ;;  %v1069_v41 = vld [vmem:[#allocation2 + $0x70] sm:$0xff] }
 0x23c   : > { %v3493_v44 = vadd.f32 %v3492_v4, %v3491_v37  ;;  %v1061_v37 = vld [vmem:[#allocation2 + $0x30] sm:$0xff] }
 0x23d   : > { %v2375_v45 = vadd.f32 %v3429_v43, %v4702_v22  ;;  %v4742_v24 = vadd.f32 %v3490_v35, %v2372_v42  ;;  %v1059_v43 = vld [vmem:[#allocation2 + $0x20] sm:$0xff] }
 0x23f   : > { %v3430_v6 = vpop.f32.mrb[60].mxu0  ;;  %v4744_v46 = vadd.f32 %v3493_v44, %v2375_v45  ;;  %v1067_v45 = vld [vmem:[#allocation2 + $0x60] sm:$0xff] }
 0x240   : > { %v3494_v47 = vpop.f32.mrb[60].mxu1  ;;  %v3431_v48 = vpop.f32.mrb[61].mxu0 }
 0x241   : > { %v3432_v26 = vadd.f32 %v3431_v48, %v3430_v6  ;;  %v3495_v50 = vpop.f32.mrb[61].mxu1  ;;  %v3433_v53 = vpop.f32.mrb[62].mxu0 }
 0x242   : > { %v3496_v55 = vadd.f32 %v3495_v50, %v3494_v47  ;;  %v3497_v56 = vpop.f32.mrb[62].mxu1  ;;  %v3434_v58 = vpop.f32.mrb[63].mxu0  ;;  %v1062_v47 = vld [vmem:[#allocation2 + $0x38] sm:$0xff] }
 0x243   : > { %v2380_v20 = vadd.f32 %v3432_v26, %v4704_v36  ;;  %v3435_v61 = vadd.f32 %v3434_v58, %v3433_v53  ;;  %v3498_v63 = vpop.f32.mrb[63].mxu1  ;;  %v1060_v58 = vld [vmem:[#allocation2 + $0x28] sm:$0xff] }
 0x244   : > { %v3499_v0 = vadd.f32 %v3498_v63, %v3497_v56 }
 0x245   : > { %v2383_v22 = vadd.f32 %v3435_v61, %v4706_v39  ;;  %v2477_v1 = vadd.f32 %v3496_v55, %v2380_v20  ;;  %v1070_v55 = vld [vmem:[#allocation2 + $0x78] sm:$0xff] }
 0x247   : > { %v3534_v2 = vpop.f32.mrb[64].mxu0  ;;  %v2480_v3 = vadd.f32 %v3499_v0, %v2383_v22  ;;  %v1068_v22 = vld [vmem:[#allocation2 + $0x68] sm:$0xff] }
 0x248   : > { %v2526_v5 = vadd.f32 %v3534_v2, %v4716_v13  ;;  %v3542_v60 = vpop.f32.mrb[64].mxu1  ;;  %v2517_v11 = vpop.f32.mrb[65].mxu0 }
 0x249   : > { %v2558_v62 = vadd.f32 %v3542_v60, %v2461_v27  ;;  %v2518_v14 = vadd.f32 %v2517_v11, %v4710_v57  ;;  %v2549_v36 = vpop.f32.mrb[65].mxu1  ;;  %v3535_v18 = vpop.f32.mrb[66].mxu0 }
 0x24a   : > { %v2582_v19 = vadd.f32 %v2526_v5, %v1057_v38  ;;  %v2550_v39 = vadd.f32 %v2549_v36, %v4734_v7  ;;  %v2529_v52 = vadd.f32 %v3535_v18, %v4718_v15  ;;  %v3543_v23 = vpop.f32.mrb[66].mxu1  ;;  %v2520_v13 = vpop.f32.mrb[67].mxu0 }
 0x24b   : > { %v2590_v54 = vadd.f32 %v2558_v62, %v1065_v40  ;;  %v2580_v10 = vadd.f32 %v2518_v14, %v1055_v9  ;;  %v2561_v29 = vadd.f32 %v3543_v23, %v2464_v28  ;;  %v2521_v27 = vadd.f32 %v2520_v13, %v4712_v59  ;;  %v2552_v57 = vpop.f32.mrb[67].mxu1 }
 0x24c   : > { %2598 = vst [vmem:[#allocation2 + $0x10] sm:$0xff] %v2582_v19  ;;  %v2588_v12 = vadd.f32 %v2550_v39, %v1063_v16  ;;  %v2583_v32 = vadd.f32 %v2529_v52, %v1058_v17  ;;  %v2553_v34 = vadd.f32 %v2552_v57, %v4736_v8 }
 0x24d   : > { %2606 = vst [vmem:[#allocation2 + $0x50] sm:$0xff] %v2590_v54  ;;  %2596 = vst [vmem:[#allocation2] sm:$0xff] %v2580_v10  ;;  %v2591_v7 = vadd.f32 %v2561_v29, %v1066_v21  ;;  %v2581_v15 = vadd.f32 %v2521_v27, %v1056_v25 }
 0x24e   : > { %2604 = vst [vmem:[#allocation2 + $0x40] sm:$0xff] %v2588_v12  ;;  %2599 = vst [vmem:[#allocation2 + $0x18] sm:$0xff] %v2583_v32  ;;  %v2589_v35 = vadd.f32 %v2553_v34, %v1064_v30 }
 0x24f   : > { %2607 = vst [vmem:[#allocation2 + $0x58] sm:$0xff] %v2591_v7  ;;  %2597 = vst [vmem:[#allocation2 + $0x8] sm:$0xff] %v2581_v15  ;;  %v3538_v28 = vpop.f32.mrb[68].mxu0 }
 0x250   : > { %2605 = vst [vmem:[#allocation2 + $0x48] sm:$0xff] %v2589_v35  ;;  %v2542_v59 = vadd.f32 %v3538_v28, %v4728_v49  ;;  %v3546_v42 = vpop.f32.mrb[68].mxu1  ;;  %v2533_v4 = vpop.f32.mrb[69].mxu0 }
 0x251   : > { %v2574_v44 = vadd.f32 %v3546_v42, %v2477_v1  ;;  %v2534_v8 = vadd.f32 %v2533_v4, %v4722_v31  ;;  %v2565_v6 = vpop.f32.mrb[69].mxu1  ;;  %v3539_v48 = vpop.f32.mrb[70].mxu0 }
 0x252   : > { %v2586_v26 = vadd.f32 %v2542_v59, %v1061_v37  ;;  %v2566_v50 = vadd.f32 %v2565_v6, %v4742_v24  ;;  %v2545_v53 = vadd.f32 %v3539_v48, %v4730_v51  ;;  %v3547_v56 = vpop.f32.mrb[70].mxu1  ;;  %v2536_v49 = vpop.f32.mrb[71].mxu0  ;;  %2615 = sbr.rel (%p3157_p5) target bundleno = 615 (0x267), region = 107 }
 0x253   : > { %v2594_v20 = vadd.f32 %v2574_v44, %v1069_v41  ;;  %v2584_v61 = vadd.f32 %v2534_v8, %v1059_v43  ;;  %v2577_v63 = vadd.f32 %v3547_v56, %v2480_v3  ;;  %v2537_v0 = vadd.f32 %v2536_v49, %v4724_v33  ;;  %v2568_v31 = vpop.f32.mrb[71].mxu1  ;;  %v2618_v9 = vld [vmem:[#allocation2 + $0x10] sm:$0xff] (!%p3157_p5) }
 0x254   : > { %2602 = vst [vmem:[#allocation2 + $0x30] sm:$0xff] %v2586_v26  ;;  %v2592_v1 = vadd.f32 %v2566_v50, %v1067_v45  ;;  %v2587_v38 = vadd.f32 %v2545_v53, %v1062_v47  ;;  %v2569_v2 = vadd.f32 %v2568_v31, %v4744_v46  ;;  %v2616_v33 = vld [vmem:[#allocation2] sm:$0xff] (!%p3157_p5)  ;;  %v2626_v54 = vld [vmem:[#allocation2 + $0x50] sm:$0xff] (!%p3157_p5) }
 0x255   : > { %2610 = vst [vmem:[#allocation2 + $0x70] sm:$0xff] %v2594_v20  ;;  %2600 = vst [vmem:[#allocation2 + $0x20] sm:$0xff] %v2584_v61  ;;  %v2595_v24 = vadd.f32 %v2577_v63, %v1070_v55  ;;  %v2585_v51 = vadd.f32 %v2537_v0, %v1060_v58  ;;  %v3158_v46 = vld [vmem:[%s1032_s4] ss:$0 sm:$0xff] (!%p3157_p5)  ;;  %v2619_v11 = vld [vmem:[#allocation2 + $0x18] sm:$0xff] (!%p3157_p5) }
 0x256   : > { %2608 = vst [vmem:[#allocation2 + $0x60] sm:$0xff] %v2592_v1  ;;  %2603 = vst [vmem:[#allocation2 + $0x38] sm:$0xff] %v2587_v38  ;;  %v2593_v5 = vadd.f32 %v2569_v2, %v1068_v22  ;;  %v2617_v3 = vld [vmem:[#allocation2 + $0x8] sm:$0xff] (!%p3157_p5)  ;;  %v2639_v40 = vadd.f32 (!%p3157_p5), %v3158_v46, %v2616_v33  ;;  %v2641_v14 = vadd.f32 (!%p3157_p5), %v3158_v46, %v2618_v9  ;;  %v2624_v25 = vld [vmem:[#allocation2 + $0x40] sm:$0xff] (!%p3157_p5) }
 0x257   : > { %2611 = vst [vmem:[#allocation2 + $0x78] sm:$0xff] %v2595_v24  ;;  %2601 = vst [vmem:[#allocation2 + $0x28] sm:$0xff] %v2585_v51  ;;  %v2640_v60 = vadd.f32 (!%p3157_p5), %v3158_v46, %v2617_v3  ;;  %v2642_v16 = vadd.f32 (!%p3157_p5), %v3158_v46, %v2619_v11  ;;  %v2625_v13 = vld [vmem:[#allocation2 + $0x48] sm:$0xff] (!%p3157_p5)  ;;  %v2627_v57 = vld [vmem:[#allocation2 + $0x58] sm:$0xff] (!%p3157_p5)  ;;  %v2647_v15 = vadd.f32 (!%p3157_p5), %v3158_v46, %v2624_v25 }
 0x258   : > { %2609 = vst [vmem:[#allocation2 + $0x68] sm:$0xff] %v2593_v5  ;;  %v2655_v39 = vmax.f32 (!%p3157_p5), %v2639_v40, 0.0  ;;  %v2657_v10 = vmax.f32 (!%p3157_p5), %v2641_v14, 0.0  ;;  %v2648_v59 = vadd.f32 (!%p3157_p5), %v3158_v46, %v2625_v13  ;;  %v2649_v41 = vadd.f32 (!%p3157_p5), %v3158_v46, %v2626_v54 }
 0x259   : > { %v2656_v52 = vmax.f32 %v2640_v60, 0.0  ;;  %v2658_v29 = vmax.f32 %v2642_v16, 0.0  ;;  %v2663_v44 = vmax.f32 %v2647_v15, 0.0  ;;  %v2650_v8 = vadd.f32 %v3158_v46, %v2627_v57 }
 0x25a   : > { %v2664_v47 = vmax.f32 %v2648_v59, 0.0  ;;  %v2665_v48 = vmax.f32 %v2649_v41, 0.0 }
 0x25b   : > { %v2622_v18 = vld [vmem:[#allocation2 + $0x30] sm:$0xff]  ;;  %v3200_v32 = vpack.c.bf16 %v2656_v52, %v2655_v39  ;;  %v3205_v37 = vpack.c.bf16 %v2658_v29, %v2657_v10  ;;  %v2666_v50 = vmax.f32 %v2650_v8, 0.0 }
 0x25c   : > { %v2620_v62 = vld [vmem:[#allocation2 + $0x20] sm:$0xff]  ;;  %v2645_v23 = vadd.f32 %v3158_v46, %v2622_v18  ;;  %v2630_v42 = vld [vmem:[#allocation2 + $0x70] sm:$0xff]  ;;  %v3220_v58 = vpack.c.bf16 %v2664_v47, %v2663_v44 }
 0x25d   : > { %v2643_v17 = vadd.f32 %v3158_v46, %v2620_v62  ;;  %v2623_v19 = vld [vmem:[#allocation2 + $0x38] sm:$0xff]  ;;  %v2628_v12 = vld [vmem:[#allocation2 + $0x60] sm:$0xff]  ;;  %3201 = vst [vmem:[%s4529_s25] sm:$0xff] %v3200_v32   ;;  %3237 = vst [vmem:[%s4529_s25 + $0x8] sm:$0xff] %v3205_v37   ;;  %v2653_v55 = vadd.f32 %v3158_v46, %v2630_v42  ;;  %v3225_v20 = vpack.c.bf16 %v2666_v50, %v2665_v48 }
 0x25e   : > { %v2621_v36 = vld [vmem:[#allocation2 + $0x28] sm:$0xff]  ;;  %v2646_v30 = vadd.f32 %v3158_v46, %v2623_v19  ;;  %v2661_v7 = vmax.f32 %v2645_v23, 0.0  ;;  %v2631_v43 = vld [vmem:[#allocation2 + $0x78] sm:$0xff]  ;;  %v2651_v45 = vadd.f32 %v3158_v46, %v2628_v12  ;;  %3240 = vst [vmem:[%s4529_s25 + $0x20] sm:$0xff] %v3220_v58  }
 0x25f   : > { %v2644_v21 = vadd.f32 %v3158_v46, %v2621_v36  ;;  %v2659_v27 = vmax.f32 %v2643_v17, 0.0  ;;  %v2629_v35 = vld [vmem:[#allocation2 + $0x68] sm:$0xff]  ;;  %v2654_v56 = vadd.f32 %v3158_v46, %v2631_v43  ;;  %v2669_v61 = vmax.f32 %v2653_v55, 0.0  ;;  %3241 = vst [vmem:[%s4529_s25 + $0x28] sm:$0xff] %v3225_v20  }
 0x260   : > { %v2662_v28 = vmax.f32 %v2646_v30, 0.0  ;;  %v2652_v26 = vadd.f32 %v3158_v46, %v2629_v35  ;;  %v2667_v53 = vmax.f32 %v2651_v45, 0.0 }
 0x261   : > { %v2660_v34 = vmax.f32 %v2644_v21, 0.0  ;;  %v2670_v63 = vmax.f32 %v2654_v56, 0.0 }
 0x262   : > { %v3215_v6 = vpack.c.bf16 %v2662_v28, %v2661_v7  ;;  %v2668_v49 = vmax.f32 %v2652_v26, 0.0 }
 0x263   : > { %v3210_v4 = vpack.c.bf16 %v2660_v34, %v2659_v27  ;;  %v3235_v22 = vpack.c.bf16 %v2670_v63, %v2669_v61 }
 0x264   : > { %3239 = vst [vmem:[%s4529_s25 + $0x18] sm:$0xff] %v3215_v6   ;;  %v3230_v0 = vpack.c.bf16 %v2668_v49, %v2667_v53 }
 0x265   : > { %3238 = vst [vmem:[%s4529_s25 + $0x10] sm:$0xff] %v3210_v4   ;;  %3243 = vst [vmem:[%s4529_s25 + $0x38] sm:$0xff] %v3235_v22  }
 0x266   : > { %3242 = vst [vmem:[%s4529_s25 + $0x30] sm:$0xff] %v3230_v0  }
 0x267 PF: > { %2757 = sbr.rel (!%p4036_p12) target bundleno = 627 (0x273), region = 111  ;;  %s3176_s14 = sshll.u32 (%p4036_p12), %s3907_s19, 2  ;;  %v2778_v31 = vld [vmem:[%s4529_s25] sm:$0xf] (%p4036_p12)  ;;  %v2780_v1 = vld [vmem:[%s4529_s25 + $0x4] sm:$0xf] (%p4036_p12) }
 0x268   : > { %s2762_s5 = scalar_lea.vmem (%p4036_p12), %s4832_s3, %s3176_s14  ;;  %v2782_v38 = vld [vmem:[%s4529_s25 + $0x8] sm:$0xf] (%p4036_p12)  ;;  %v2784_v2 = vld [vmem:[%s4529_s25 + $0xc] sm:$0xf] (%p4036_p12)  ;;  %v2794_v3 = vld [vmem:[%s4529_s25 + $0x20] sm:$0xf] (%p4036_p12) }
 0x269   : > { %2779 = vst [vmem:[%s2762_s5] sm:$0xf] (%p4036_p12), %v2778_v31  ;;  %2781 = vst [vmem:[%s2762_s5 + $0x8] sm:$0xf] (%p4036_p12), %v2780_v1  ;;  %v2796_v46 = vld [vmem:[%s4529_s25 + $0x24] sm:$0xf] (%p4036_p12) }
 0x26a   : > { %2783 = vst [vmem:[%s2762_s5 + $0x10] sm:$0xf] (%p4036_p12), %v2782_v38  ;;  %2785 = vst [vmem:[%s2762_s5 + $0x18] sm:$0xf] (%p4036_p12), %v2784_v2  ;;  %v2798_v40 = vld [vmem:[%s4529_s25 + $0x28] sm:$0xf] (%p4036_p12) }
 0x26b   : > { %v2790_v5 = vld [vmem:[%s4529_s25 + $0x18] sm:$0xf] (%p4036_p12)  ;;  %v2792_v33 = vld [vmem:[%s4529_s25 + $0x1c] sm:$0xf] (%p4036_p12)  ;;  %2795 = vst [vmem:[%s2762_s5 + $0x40] sm:$0xf] (%p4036_p12), %v2794_v3 }
 0x26c   : > { %v2786_v24 = vld [vmem:[%s4529_s25 + $0x10] sm:$0xf] (%p4036_p12)  ;;  %v2788_v51 = vld [vmem:[%s4529_s25 + $0x14] sm:$0xf] (%p4036_p12)  ;;  %2791 = vst [vmem:[%s2762_s5 + $0x30] sm:$0xf] (%p4036_p12), %v2790_v5 }
 0x26d   : > { %2787 = vst [vmem:[%s2762_s5 + $0x20] sm:$0xf] (%p4036_p12), %v2786_v24  ;;  %2789 = vst [vmem:[%s2762_s5 + $0x28] sm:$0xf] (%p4036_p12), %v2788_v51  ;;  %v2800_v60 = vld [vmem:[%s4529_s25 + $0x2c] sm:$0xf] (%p4036_p12) }
 0x26e   : > { %2793 = vst [vmem:[%s2762_s5 + $0x38] sm:$0xf] %v2792_v33  ;;  %2797 = vst [vmem:[%s2762_s5 + $0x48] sm:$0xf] %v2796_v46  ;;  %v2802_v9 = vld [vmem:[%s4529_s25 + $0x30] sm:$0xf] }
 0x26f   : > { %2799 = vst [vmem:[%s2762_s5 + $0x50] sm:$0xf] %v2798_v40  ;;  %v2804_v11 = vld [vmem:[%s4529_s25 + $0x34] sm:$0xf]  ;;  %2801 = vst [vmem:[%s2762_s5 + $0x58] sm:$0xf] %v2800_v60 }
 0x270   : > { %2803 = vst [vmem:[%s2762_s5 + $0x60] sm:$0xf] %v2802_v9  ;;  %2805 = vst [vmem:[%s2762_s5 + $0x68] sm:$0xf] %v2804_v11  ;;  %v2806_v62 = vld [vmem:[%s4529_s25 + $0x38] sm:$0xf] }
 0x271   : > { %v2808_v14 = vld [vmem:[%s4529_s25 + $0x3c] sm:$0xf]  ;;  %2807 = vst [vmem:[%s2762_s5 + $0x70] sm:$0xf] %v2806_v62 }
 0x272   : > { %2809 = vst [vmem:[%s2762_s5 + $0x78] sm:$0xf] %v2808_v14 }
 0x273 PF: > { %s13_s22 = sadd.s32 1, %s3919_s22   ;;  %s4842_s10 = sld [smem:[#allocation6_spill]] }
 0x274   : > { %p10_p6 = scmp.ge.s32.totalorder %s13_s22, 6   ;;  %s4843_s12 = smov %s3883_s13 }
 0x275   : > { %s4844_s13 = smov %s4034_s9  ;;  %s4845_s14 = smov %s3891_s15 }
 0x276   : > { %s4846_s15 = smov %s4031_s8  ;;  %s4847_s16 = smov %s3899_s17 }
 0x277   : > { %s4848_s17 = smov %s4017_s30  ;;  %s4849_s18 = smov %s3911_s20 }
 0x278   : > { %s4850_s19 = smov %s3915_s21  ;;  %s4851_s20 = smov %s4854_s24 }
 0x279   : > { %s4852_s21 = smov %s4842_s10  ;;  %12 = sbr.rel (!%p10_p6) target bundleno = 9 (0x9), region = 200 }

// kernel: encoder_forward.23
= control target key start
LH: loop header
LB: loop body
LE: loop exit
PB: predicated region body
PF: predicated region fallthrough
CT: control target
= control target key end

     0   :  { %s3773_s0 = inlined_call_operand.vmem [shape: bf16[32,2304], index: 0, kind: input, shape index: {}]   ;;  %s3774_s1 = inlined_call_operand.vmem [shape: bf16[2304,512], index: 1, kind: input, shape index: {}]   ;;  %s3775_s2 = inlined_call_operand.vmem [shape: f32[1,512], index: 2, kind: input, shape index: {}]   ;;  %s3776_s3 = inlined_call_operand.vmem [shape: f32[32,512], index: 3, kind: output, shape index: {}]  }
   0x1   :  { %3778 = sst [smem:[#allocation7_spill]] %s3773_s0 }
   0x2   :  { %3779 = sst [smem:[#allocation8_spill]] %s3774_s1 }
   0x3   :  { %s3081_s12 = smov 0   ;;  %s3083_s13 = smov 0  }
   0x4   :  { %s3085_s14 = smov 0   ;;  %s3087_s15 = smov 0  }
   0x5   :  { %s3089_s16 = smov 0   ;;  %s3091_s17 = smov 0  }
   0x6   :  { %s3093_s18 = smov 0   ;;  %s3095_s19 = smov 0  }
   0x7   :  { %s3097_s20 = smov 0   ;;  %s3099_s21 = smov 0  }
   0x8   :  { %s3101_s22 = smov 0  }
   0x9 LB: > { %s2396_s23 = sadd.s32 4294967295, %s3057_s22   ;;  %s25_s24 = sadd.s32 1, %s3049_s20  ;;  %s3057_s22 = sphi %s3101_s22, %s13_s22   ;;  %s3053_s21 = sphi %s3099_s21, %s3796_s21   ;;  %s3049_s20 = sphi %s3097_s20, %s3795_s20   ;;  %s3045_s19 = sphi %s3095_s19, %s3794_s19   ;;  %s3041_s18 = sphi %s3093_s18, %s3793_s18   ;;  %s3037_s17 = sphi %s3091_s17, %s3792_s17   ;;  %s3033_s16 = sphi %s3089_s16, %s3791_s16   ;;  %s3029_s15 = sphi %s3087_s15, %s3790_s15   ;;  %s3025_s14 = sphi %s3085_s14, %s3789_s14   ;;  %s3021_s13 = sphi %s3083_s13, %s3788_s13   ;;  %s3017_s12 = sphi %s3081_s12, %s3787_s12  }
   0xa   : > { %p26_p0 = scmp.ge.s32.totalorder %s25_s24, 2  ;;  %s28_s25 = sadd.s32 1, %s3053_s21 }
   0xb   : > { %s41_s26 = sadd.s32 1, %s3037_s17  ;;  %p48_p1 = scmp.ne.s32.totalorder %s3037_s17, %s3033_s16 }
   0xc   : > { %s3798_s24 = smov (%p26_p0, %s25_s24), 0  ;;  %s3800_s25 = smov (!%p26_p0, %s28_s25), %s3053_s21 }
   0xd   : > { %s37_s27 = ssub.s32 %s3049_s20, %s3798_s24  ;;  %p49_p2 = scmp.eq.s32.totalorder %s3057_s22, 0 }
   0xe   : > { %p30_p3 = scmp.ge.s32.totalorder %s3800_s25, 2  ;;  %p39_p4 = scmp.eq.s32.totalorder %s37_s27, 0 }
   0xf   : > { %p3148_p5 = por %p49_p2, %p48_p1  ;;  %s69_s29 = sadd.s32 1, %s3029_s15 }
  0x10   : > { %s3802_s25 = smov (%p30_p3, %s3800_s25), 0  ;;  %p76_p6 = scmp.ne.s32.totalorder %s3029_s15, %s3025_s14 }
  0x11   : > { %3781 = sst [smem:[#allocation6_spill]] %s3802_s25  ;;  %s65_s4 = ssub.s32 %s3053_s21, %s3802_s25 }
  0x12   : > { %s3156_s30 = scalar_select %p39_p4, %s3037_s17, %s41_s26  }
  0x13   : > { %s66_s5 = sor.u32 %s65_s4, %s37_s27  ;;  %p121_p7 = scmp.eq.s32.totalorder %s65_s4, 0 }
  0x14   : > { %p67_p8 = scmp.eq.s32.totalorder %s66_s5, 0  ;;  %p3162_p9 = por %p76_p6, %p49_p2 }
  0x15   : > { %s123_s7 = sadd.s32 1, %s3021_s13  ;;  %p133_p10 = scmp.ne.s32.totalorder %s3021_s13, %s3017_s12 }
  0x16   : > { %s3170_s8 = scalar_select %p67_p8, %s3029_s15, %s69_s29  }
  0x17   : > { %s3173_s9 = scalar_select %p121_p7, %s3021_s13, %s123_s7  }
  0x18   : > { %p134_p11 = scmp.eq.s32.totalorder %s2396_s23, 3  ;;  %p2399_p13 = scmp.ge.s32.totalorder %s3057_s22, 4 }
  0x1a   : > { %p3175_p12 = por %p134_p11, %p133_p10  ;;  %156 = sbr.rel (%p2399_p13) target bundleno = 134 (0x86), region = 16 }
  0x21   : > { %159 = sbr.rel (!%p3148_p5) target bundleno = 52 (0x34), region = 20  ;;  %s161_s11 = sand.u32 (%p3148_p5), 1, %s3037_s17  }
  0x22   : > { %s2584_s26 = smul.u32 (%p3148_p5), 36, %s3049_s20  ;;  %s3784_s0 = sld [smem:[#allocation7_spill]] (%p3148_p5) }
  0x23   : > { %s2635_s27 = smul.u32 (%p3148_p5), 144, %s161_s11 }
  0x25   : > { %s3192_s23 = scalar_lea.vmem (%p3148_p5), [#allocation3], %s2635_s27 }
  0x28   : > { %s3187_s5 = scalar_lea.vmem %s3784_s0, %s2584_s26 }
  0x29   : > { %v184_v0 = vld [vmem:[%s3187_s5] sm:$0xff]  ;;  %v186_v1 = vld [vmem:[%s3187_s5 + $0x8] sm:$0xff]  ;;  %v188_v2 = vld [vmem:[%s3187_s5 + $0x10] sm:$0xff] }
  0x2a   : > { %185 = vst [vmem:[%s3192_s23] sm:$0xff] %v184_v0  ;;  %187 = vst [vmem:[%s3192_s23 + $0x8] sm:$0xff] %v186_v1  ;;  %v190_v3 = vld [vmem:[%s3187_s5 + $0x18] sm:$0xff]  ;;  %v192_v4 = vld [vmem:[%s3187_s5 + $0x48] sm:$0xff] }
  0x2b   : > { %189 = vst [vmem:[%s3192_s23 + $0x10] sm:$0xff] %v188_v2  ;;  %v194_v5 = vld [vmem:[%s3187_s5 + $0x50] sm:$0xff]  ;;  %191 = vst [vmem:[%s3192_s23 + $0x18] sm:$0xff] %v190_v3  ;;  %v196_v6 = vld [vmem:[%s3187_s5 + $0x58] sm:$0xff] }
  0x2c   : > { %193 = vst [vmem:[%s3192_s23 + $0x24] sm:$0xff] %v192_v4  ;;  %195 = vst [vmem:[%s3192_s23 + $0x2c] sm:$0xff] %v194_v5  ;;  %v198_v7 = vld [vmem:[%s3187_s5 + $0x60] sm:$0xff]  ;;  %v200_v8 = vld [vmem:[%s3187_s5 + $0x90] sm:$0xff] }
  0x2d   : > { %197 = vst [vmem:[%s3192_s23 + $0x34] sm:$0xff] %v196_v6  ;;  %199 = vst [vmem:[%s3192_s23 + $0x3c] sm:$0xff] %v198_v7  ;;  %v202_v9 = vld [vmem:[%s3187_s5 + $0x98] sm:$0xff]  ;;  %v204_v10 = vld [vmem:[%s3187_s5 + $0xa0] sm:$0xff] }
  0x2e   : > { %201 = vst [vmem:[%s3192_s23 + $0x48] sm:$0xff] %v200_v8  ;;  %v206_v11 = vld [vmem:[%s3187_s5 + $0xa8] sm:$0xff]  ;;  %203 = vst [vmem:[%s3192_s23 + $0x50] sm:$0xff] %v202_v9  ;;  %v208_v12 = vld [vmem:[%s3187_s5 + $0xd8] sm:$0xff] }
  0x2f   : > { %205 = vst [vmem:[%s3192_s23 + $0x58] sm:$0xff] %v204_v10  ;;  %207 = vst [vmem:[%s3192_s23 + $0x60] sm:$0xff] %v206_v11  ;;  %v210_v13 = vld [vmem:[%s3187_s5 + $0xe0] sm:$0xff]  ;;  %v212_v14 = vld [vmem:[%s3187_s5 + $0xe8] sm:$0xff] }
  0x30   : > { %209 = vst [vmem:[%s3192_s23 + $0x6c] sm:$0xff] %v208_v12  ;;  %211 = vst [vmem:[%s3192_s23 + $0x74] sm:$0xff] %v210_v13  ;;  %v214_v15 = vld [vmem:[%s3187_s5 + $0xf0] sm:$0xff]  ;;  %v2401_v16 = vld [vmem:[%s3187_s5 + $0x20] sm:$0xf] }
  0x31   : > { %213 = vst [vmem:[%s3192_s23 + $0x7c] sm:$0xff] %v212_v14  ;;  %v2403_v17 = vld [vmem:[%s3187_s5 + $0x68] sm:$0xf]  ;;  %215 = vst [vmem:[%s3192_s23 + $0x84] sm:$0xff] %v214_v15  ;;  %v2405_v18 = vld [vmem:[%s3187_s5 + $0xb0] sm:$0xf] }
  0x32   : > { %2402 = vst [vmem:[%s3192_s23 + $0x20] sm:$0xf] %v2401_v16  ;;  %2404 = vst [vmem:[%s3192_s23 + $0x44] sm:$0xf] %v2403_v17  ;;  %v2407_v19 = vld [vmem:[%s3187_s5 + $0xf8] sm:$0xf] }
  0x33   : > { %2406 = vst [vmem:[%s3192_s23 + $0x68] sm:$0xf] %v2405_v18  ;;  %2408 = vst [vmem:[%s3192_s23 + $0x8c] sm:$0xf] %v2407_v19 }
  0x34 PF: > { %236 = sbr.rel (!%p3162_p9) target bundleno = 134 (0x86), region = 46  ;;  %s238_s28 = sand.u32 (%p3162_p9), 1, %s3029_s15  }
  0x35   : > { %s2636_s7 = smul.u32 (%p3162_p9), 1152, %s238_s28  ;;  %s2409_s11 = sshll.u32 (%p3162_p9), %s3053_s21, 1 }
  0x36   : > { %s2585_s26 = smul.u32 (%p3162_p9), 576, %s3049_s20  ;;  %s3785_s1 = sld [smem:[#allocation8_spill]] (%p3162_p9) }
  0x37   : > { %s3244_s6 = scalar_lea.vmem (%p3162_p9), [#allocation4], %s2636_s7 }
  0x38   : > { %s244_s27 = sadd.s32 (%p3162_p9), %s2585_s26, %s2409_s11 }
  0x39   : > { %s2411_s29 = sshll.u32 (%p3162_p9), %s244_s27, 2 }
  0x3c   : > { %s3239_s25 = scalar_lea.vmem %s3785_s1, %s2411_s29 }
  0x3d   : > { %v560_v20 = vld [vmem:[%s3239_s25] sm:$0xff]  ;;  %v562_v21 = vld [vmem:[%s3239_s25 + $0x10] sm:$0xff] }
  0x3e   : > { %v564_v22 = vld [vmem:[%s3239_s25 + $0x20] sm:$0xff]  ;;  %561 = vst [vmem:[%s3244_s6] sm:$0xff] %v560_v20  ;;  %563 = vst [vmem:[%s3244_s6 + $0x8] sm:$0xff] %v562_v21  ;;  %v566_v23 = vld [vmem:[%s3239_s25 + $0x30] sm:$0xff] }
  0x3f   : > { %565 = vst [vmem:[%s3244_s6 + $0x10] sm:$0xff] %v564_v22  ;;  %v568_v24 = vld [vmem:[%s3239_s25 + $0x40] sm:$0xff]  ;;  %v570_v25 = vld [vmem:[%s3239_s25 + $0x50] sm:$0xff]  ;;  %567 = vst [vmem:[%s3244_s6 + $0x18] sm:$0xff] %v566_v23 }
  0x40   : > { %569 = vst [vmem:[%s3244_s6 + $0x20] sm:$0xff] %v568_v24  ;;  %571 = vst [vmem:[%s3244_s6 + $0x28] sm:$0xff] %v570_v25  ;;  %v572_v26 = vld [vmem:[%s3239_s25 + $0x60] sm:$0xff]  ;;  %v574_v27 = vld [vmem:[%s3239_s25 + $0x70] sm:$0xff] }
  0x41   : > { %v576_v28 = vld [vmem:[%s3239_s25 + $0x80] sm:$0xff]  ;;  %573 = vst [vmem:[%s3244_s6 + $0x30] sm:$0xff] %v572_v26  ;;  %575 = vst [vmem:[%s3244_s6 + $0x38] sm:$0xff] %v574_v27  ;;  %v578_v29 = vld [vmem:[%s3239_s25 + $0x90] sm:$0xff] }
  0x42   : > { %577 = vst [vmem:[%s3244_s6 + $0x40] sm:$0xff] %v576_v28  ;;  %v580_v30 = vld [vmem:[%s3239_s25 + $0xa0] sm:$0xff]  ;;  %v582_v31 = vld [vmem:[%s3239_s25 + $0xb0] sm:$0xff]  ;;  %579 = vst [vmem:[%s3244_s6 + $0x48] sm:$0xff] %v578_v29 }
  0x43   : > { %581 = vst [vmem:[%s3244_s6 + $0x50] sm:$0xff] %v580_v30  ;;  %583 = vst [vmem:[%s3244_s6 + $0x58] sm:$0xff] %v582_v31  ;;  %v584_v32 = vld [vmem:[%s3239_s25 + $0xc0] sm:$0xff]  ;;  %v586_v33 = vld [vmem:[%s3239_s25 + $0xd0] sm:$0xff] }
  0x44   : > { %v588_v34 = vld [vmem:[%s3239_s25 + $0xe0] sm:$0xff]  ;;  %585 = vst [vmem:[%s3244_s6 + $0x60] sm:$0xff] %v584_v32  ;;  %587 = vst [vmem:[%s3244_s6 + $0x68] sm:$0xff] %v586_v33  ;;  %v590_v35 = vld [vmem:[%s3239_s25 + $0xf0] sm:$0xff] }
  0x45   : > { %589 = vst [vmem:[%s3244_s6 + $0x70] sm:$0xff] %v588_v34  ;;  %v592_v36 = vld [vmem:[%s3239_s25 + $0x100] sm:$0xff]  ;;  %v594_v37 = vld [vmem:[%s3239_s25 + $0x110] sm:$0xff]  ;;  %591 = vst [vmem:[%s3244_s6 + $0x78] sm:$0xff] %v590_v35 }
  0x46   : > { %593 = vst [vmem:[%s3244_s6 + $0x80] sm:$0xff] %v592_v36  ;;  %595 = vst [vmem:[%s3244_s6 + $0x88] sm:$0xff] %v594_v37  ;;  %v596_v38 = vld [vmem:[%s3239_s25 + $0x120] sm:$0xff]  ;;  %v598_v39 = vld [vmem:[%s3239_s25 + $0x130] sm:$0xff] }
  0x47   : > { %v600_v40 = vld [vmem:[%s3239_s25 + $0x140] sm:$0xff]  ;;  %597 = vst [vmem:[%s3244_s6 + $0x90] sm:$0xff] %v596_v38  ;;  %599 = vst [vmem:[%s3244_s6 + $0x98] sm:$0xff] %v598_v39  ;;  %v602_v41 = vld [vmem:[%s3239_s25 + $0x150] sm:$0xff] }
  0x48   : > { %601 = vst [vmem:[%s3244_s6 + $0xa0] sm:$0xff] %v600_v40  ;;  %v604_v42 = vld [vmem:[%s3239_s25 + $0x160] sm:$0xff]  ;;  %v606_v43 = vld [vmem:[%s3239_s25 + $0x170] sm:$0xff]  ;;  %603 = vst [vmem:[%s3244_s6 + $0xa8] sm:$0xff] %v602_v41 }
  0x49   : > { %605 = vst [vmem:[%s3244_s6 + $0xb0] sm:$0xff] %v604_v42  ;;  %607 = vst [vmem:[%s3244_s6 + $0xb8] sm:$0xff] %v606_v43  ;;  %v608_v44 = vld [vmem:[%s3239_s25 + $0x180] sm:$0xff]  ;;  %v610_v45 = vld [vmem:[%s3239_s25 + $0x190] sm:$0xff] }
  0x4a   : > { %v612_v46 = vld [vmem:[%s3239_s25 + $0x1a0] sm:$0xff]  ;;  %609 = vst [vmem:[%s3244_s6 + $0xc0] sm:$0xff] %v608_v44  ;;  %611 = vst [vmem:[%s3244_s6 + $0xc8] sm:$0xff] %v610_v45  ;;  %v614_v47 = vld [vmem:[%s3239_s25 + $0x1b0] sm:$0xff] }
  0x4b   : > { %613 = vst [vmem:[%s3244_s6 + $0xd0] sm:$0xff] %v612_v46  ;;  %v616_v48 = vld [vmem:[%s3239_s25 + $0x1c0] sm:$0xff]  ;;  %v618_v49 = vld [vmem:[%s3239_s25 + $0x1d0] sm:$0xff]  ;;  %615 = vst [vmem:[%s3244_s6 + $0xd8] sm:$0xff] %v614_v47 }
  0x4c   : > { %617 = vst [vmem:[%s3244_s6 + $0xe0] sm:$0xff] %v616_v48  ;;  %619 = vst [vmem:[%s3244_s6 + $0xe8] sm:$0xff] %v618_v49  ;;  %v620_v50 = vld [vmem:[%s3239_s25 + $0x1e0] sm:$0xff]  ;;  %v622_v51 = vld [vmem:[%s3239_s25 + $0x1f0] sm:$0xff] }
  0x4d   : > { %v624_v52 = vld [vmem:[%s3239_s25 + $0x200] sm:$0xff]  ;;  %621 = vst [vmem:[%s3244_s6 + $0xf0] sm:$0xff] %v620_v50  ;;  %623 = vst [vmem:[%s3244_s6 + $0xf8] sm:$0xff] %v622_v51  ;;  %v626_v53 = vld [vmem:[%s3239_s25 + $0x210] sm:$0xff] }
  0x4e   : > { %625 = vst [vmem:[%s3244_s6 + $0x100] sm:$0xff] %v624_v52  ;;  %v628_v54 = vld [vmem:[%s3239_s25 + $0x220] sm:$0xff]  ;;  %v630_v55 = vld [vmem:[%s3239_s25 + $0x230] sm:$0xff]  ;;  %627 = vst [vmem:[%s3244_s6 + $0x108] sm:$0xff] %v626_v53 }
  0x4f   : > { %629 = vst [vmem:[%s3244_s6 + $0x110] sm:$0xff] %v628_v54  ;;  %631 = vst [vmem:[%s3244_s6 + $0x118] sm:$0xff] %v630_v55  ;;  %v632_v56 = vld [vmem:[%s3239_s25 + $0x240] sm:$0xff]  ;;  %v634_v57 = vld [vmem:[%s3239_s25 + $0x250] sm:$0xff] }
  0x50   : > { %v636_v58 = vld [vmem:[%s3239_s25 + $0x260] sm:$0xff]  ;;  %633 = vst [vmem:[%s3244_s6 + $0x120] sm:$0xff] %v632_v56  ;;  %635 = vst [vmem:[%s3244_s6 + $0x128] sm:$0xff] %v634_v57  ;;  %v638_v59 = vld [vmem:[%s3239_s25 + $0x270] sm:$0xff] }
  0x51   : > { %637 = vst [vmem:[%s3244_s6 + $0x130] sm:$0xff] %v636_v58  ;;  %v640_v60 = vld [vmem:[%s3239_s25 + $0x280] sm:$0xff]  ;;  %v642_v61 = vld [vmem:[%s3239_s25 + $0x290] sm:$0xff]  ;;  %639 = vst [vmem:[%s3244_s6 + $0x138] sm:$0xff] %v638_v59 }
  0x52   : > { %641 = vst [vmem:[%s3244_s6 + $0x140] sm:$0xff] %v640_v60  ;;  %643 = vst [vmem:[%s3244_s6 + $0x148] sm:$0xff] %v642_v61  ;;  %v644_v62 = vld [vmem:[%s3239_s25 + $0x2a0] sm:$0xff]  ;;  %v646_v63 = vld [vmem:[%s3239_s25 + $0x2b0] sm:$0xff] }
  0x53   : > { %v648_v0 = vld [vmem:[%s3239_s25 + $0x2c0] sm:$0xff]  ;;  %645 = vst [vmem:[%s3244_s6 + $0x150] sm:$0xff] %v644_v62  ;;  %647 = vst [vmem:[%s3244_s6 + $0x158] sm:$0xff] %v646_v63  ;;  %v650_v1 = vld [vmem:[%s3239_s25 + $0x2d0] sm:$0xff] }
  0x54   : > { %649 = vst [vmem:[%s3244_s6 + $0x160] sm:$0xff] %v648_v0  ;;  %v652_v2 = vld [vmem:[%s3239_s25 + $0x2e0] sm:$0xff]  ;;  %v654_v3 = vld [vmem:[%s3239_s25 + $0x2f0] sm:$0xff]  ;;  %651 = vst [vmem:[%s3244_s6 + $0x168] sm:$0xff] %v650_v1 }
  0x55   : > { %653 = vst [vmem:[%s3244_s6 + $0x170] sm:$0xff] %v652_v2  ;;  %655 = vst [vmem:[%s3244_s6 + $0x178] sm:$0xff] %v654_v3  ;;  %v656_v4 = vld [vmem:[%s3239_s25 + $0x300] sm:$0xff]  ;;  %v658_v5 = vld [vmem:[%s3239_s25 + $0x310] sm:$0xff] }
  0x56   : > { %v660_v6 = vld [vmem:[%s3239_s25 + $0x320] sm:$0xff]  ;;  %657 = vst [vmem:[%s3244_s6 + $0x180] sm:$0xff] %v656_v4  ;;  %659 = vst [vmem:[%s3244_s6 + $0x188] sm:$0xff] %v658_v5  ;;  %v662_v7 = vld [vmem:[%s3239_s25 + $0x330] sm:$0xff] }
  0x57   : > { %661 = vst [vmem:[%s3244_s6 + $0x190] sm:$0xff] %v660_v6  ;;  %v664_v8 = vld [vmem:[%s3239_s25 + $0x340] sm:$0xff]  ;;  %v666_v9 = vld [vmem:[%s3239_s25 + $0x350] sm:$0xff]  ;;  %663 = vst [vmem:[%s3244_s6 + $0x198] sm:$0xff] %v662_v7 }
  0x58   : > { %665 = vst [vmem:[%s3244_s6 + $0x1a0] sm:$0xff] %v664_v8  ;;  %667 = vst [vmem:[%s3244_s6 + $0x1a8] sm:$0xff] %v666_v9  ;;  %v668_v10 = vld [vmem:[%s3239_s25 + $0x360] sm:$0xff]  ;;  %v670_v11 = vld [vmem:[%s3239_s25 + $0x370] sm:$0xff] }
  0x59   : > { %v672_v12 = vld [vmem:[%s3239_s25 + $0x380] sm:$0xff]  ;;  %669 = vst [vmem:[%s3244_s6 + $0x1b0] sm:$0xff] %v668_v10  ;;  %671 = vst [vmem:[%s3244_s6 + $0x1b8] sm:$0xff] %v670_v11  ;;  %v674_v13 = vld [vmem:[%s3239_s25 + $0x390] sm:$0xff] }
  0x5a   : > { %673 = vst [vmem:[%s3244_s6 + $0x1c0] sm:$0xff] %v672_v12  ;;  %v676_v14 = vld [vmem:[%s3239_s25 + $0x3a0] sm:$0xff]  ;;  %v678_v15 = vld [vmem:[%s3239_s25 + $0x3b0] sm:$0xff]  ;;  %675 = vst [vmem:[%s3244_s6 + $0x1c8] sm:$0xff] %v674_v13 }
  0x5b   : > { %677 = vst [vmem:[%s3244_s6 + $0x1d0] sm:$0xff] %v676_v14  ;;  %679 = vst [vmem:[%s3244_s6 + $0x1d8] sm:$0xff] %v678_v15  ;;  %v680_v16 = vld [vmem:[%s3239_s25 + $0x3c0] sm:$0xff]  ;;  %v682_v17 = vld [vmem:[%s3239_s25 + $0x3d0] sm:$0xff] }
  0x5c   : > { %v684_v18 = vld [vmem:[%s3239_s25 + $0x3e0] sm:$0xff]  ;;  %681 = vst [vmem:[%s3244_s6 + $0x1e0] sm:$0xff] %v680_v16  ;;  %683 = vst [vmem:[%s3244_s6 + $0x1e8] sm:$0xff] %v682_v17  ;;  %v686_v19 = vld [vmem:[%s3239_s25 + $0x3f0] sm:$0xff] }
  0x5d   : > { %685 = vst [vmem:[%s3244_s6 + $0x1f0] sm:$0xff] %v684_v18  ;;  %v688_v20 = vld [vmem:[%s3239_s25 + $0x400] sm:$0xff]  ;;  %v690_v21 = vld [vmem:[%s3239_s25 + $0x410] sm:$0xff]  ;;  %687 = vst [vmem:[%s3244_s6 + $0x1f8] sm:$0xff] %v686_v19 }
  0x5e   : > { %689 = vst [vmem:[%s3244_s6 + $0x200] sm:$0xff] %v688_v20  ;;  %691 = vst [vmem:[%s3244_s6 + $0x208] sm:$0xff] %v690_v21  ;;  %v692_v22 = vld [vmem:[%s3239_s25 + $0x420] sm:$0xff]  ;;  %v694_v23 = vld [vmem:[%s3239_s25 + $0x430] sm:$0xff] }
  0x5f   : > { %v696_v24 = vld [vmem:[%s3239_s25 + $0x440] sm:$0xff]  ;;  %693 = vst [vmem:[%s3244_s6 + $0x210] sm:$0xff] %v692_v22  ;;  %695 = vst [vmem:[%s3244_s6 + $0x218] sm:$0xff] %v694_v23  ;;  %v698_v25 = vld [vmem:[%s3239_s25 + $0x450] sm:$0xff] }
  0x60   : > { %697 = vst [vmem:[%s3244_s6 + $0x220] sm:$0xff] %v696_v24  ;;  %v700_v26 = vld [vmem:[%s3239_s25 + $0x460] sm:$0xff]  ;;  %v702_v27 = vld [vmem:[%s3239_s25 + $0x470] sm:$0xff]  ;;  %699 = vst [vmem:[%s3244_s6 + $0x228] sm:$0xff] %v698_v25 }
  0x61   : > { %701 = vst [vmem:[%s3244_s6 + $0x230] sm:$0xff] %v700_v26  ;;  %703 = vst [vmem:[%s3244_s6 + $0x238] sm:$0xff] %v702_v27  ;;  %v704_v28 = vld [vmem:[%s3239_s25 + $0x480] sm:$0xff]  ;;  %v706_v29 = vld [vmem:[%s3239_s25 + $0x490] sm:$0xff] }
  0x62   : > { %v708_v30 = vld [vmem:[%s3239_s25 + $0x4a0] sm:$0xff]  ;;  %705 = vst [vmem:[%s3244_s6 + $0x240] sm:$0xff] %v704_v28  ;;  %707 = vst [vmem:[%s3244_s6 + $0x248] sm:$0xff] %v706_v29  ;;  %v710_v31 = vld [vmem:[%s3239_s25 + $0x4b0] sm:$0xff] }
  0x63   : > { %709 = vst [vmem:[%s3244_s6 + $0x250] sm:$0xff] %v708_v30  ;;  %v712_v32 = vld [vmem:[%s3239_s25 + $0x4c0] sm:$0xff]  ;;  %v714_v33 = vld [vmem:[%s3239_s25 + $0x4d0] sm:$0xff]  ;;  %711 = vst [vmem:[%s3244_s6 + $0x258] sm:$0xff] %v710_v31 }
  0x64   : > { %713 = vst [vmem:[%s3244_s6 + $0x260] sm:$0xff] %v712_v32  ;;  %715 = vst [vmem:[%s3244_s6 + $0x268] sm:$0xff] %v714_v33  ;;  %v716_v34 = vld [vmem:[%s3239_s25 + $0x4e0] sm:$0xff]  ;;  %v718_v35 = vld [vmem:[%s3239_s25 + $0x4f0] sm:$0xff] }
  0x65   : > { %v720_v36 = vld [vmem:[%s3239_s25 + $0x500] sm:$0xff]  ;;  %717 = vst [vmem:[%s3244_s6 + $0x270] sm:$0xff] %v716_v34  ;;  %719 = vst [vmem:[%s3244_s6 + $0x278] sm:$0xff] %v718_v35  ;;  %v722_v37 = vld [vmem:[%s3239_s25 + $0x510] sm:$0xff] }
  0x66   : > { %721 = vst [vmem:[%s3244_s6 + $0x280] sm:$0xff] %v720_v36  ;;  %v724_v38 = vld [vmem:[%s3239_s25 + $0x520] sm:$0xff]  ;;  %v726_v39 = vld [vmem:[%s3239_s25 + $0x530] sm:$0xff]  ;;  %723 = vst [vmem:[%s3244_s6 + $0x288] sm:$0xff] %v722_v37 }
  0x67   : > { %725 = vst [vmem:[%s3244_s6 + $0x290] sm:$0xff] %v724_v38  ;;  %727 = vst [vmem:[%s3244_s6 + $0x298] sm:$0xff] %v726_v39  ;;  %v728_v40 = vld [vmem:[%s3239_s25 + $0x540] sm:$0xff]  ;;  %v730_v41 = vld [vmem:[%s3239_s25 + $0x550] sm:$0xff] }
  0x68   : > { %v732_v42 = vld [vmem:[%s3239_s25 + $0x560] sm:$0xff]  ;;  %729 = vst [vmem:[%s3244_s6 + $0x2a0] sm:$0xff] %v728_v40  ;;  %731 = vst [vmem:[%s3244_s6 + $0x2a8] sm:$0xff] %v730_v41  ;;  %v734_v43 = vld [vmem:[%s3239_s25 + $0x570] sm:$0xff] }
  0x69   : > { %733 = vst [vmem:[%s3244_s6 + $0x2b0] sm:$0xff] %v732_v42  ;;  %v736_v44 = vld [vmem:[%s3239_s25 + $0x580] sm:$0xff]  ;;  %v738_v45 = vld [vmem:[%s3239_s25 + $0x590] sm:$0xff]  ;;  %735 = vst [vmem:[%s3244_s6 + $0x2b8] sm:$0xff] %v734_v43 }
  0x6a   : > { %737 = vst [vmem:[%s3244_s6 + $0x2c0] sm:$0xff] %v736_v44  ;;  %739 = vst [vmem:[%s3244_s6 + $0x2c8] sm:$0xff] %v738_v45  ;;  %v740_v46 = vld [vmem:[%s3239_s25 + $0x5a0] sm:$0xff]  ;;  %v742_v47 = vld [vmem:[%s3239_s25 + $0x5b0] sm:$0xff] }
  0x6b   : > { %v744_v48 = vld [vmem:[%s3239_s25 + $0x5c0] sm:$0xff]  ;;  %741 = vst [vmem:[%s3244_s6 + $0x2d0] sm:$0xff] %v740_v46  ;;  %743 = vst [vmem:[%s3244_s6 + $0x2d8] sm:$0xff] %v742_v47  ;;  %v746_v49 = vld [vmem:[%s3239_s25 + $0x5d0] sm:$0xff] }
  0x6c   : > { %745 = vst [vmem:[%s3244_s6 + $0x2e0] sm:$0xff] %v744_v48  ;;  %v748_v50 = vld [vmem:[%s3239_s25 + $0x5e0] sm:$0xff]  ;;  %v750_v51 = vld [vmem:[%s3239_s25 + $0x5f0] sm:$0xff]  ;;  %747 = vst [vmem:[%s3244_s6 + $0x2e8] sm:$0xff] %v746_v49 }
  0x6d   : > { %749 = vst [vmem:[%s3244_s6 + $0x2f0] sm:$0xff] %v748_v50  ;;  %751 = vst [vmem:[%s3244_s6 + $0x2f8] sm:$0xff] %v750_v51  ;;  %v752_v52 = vld [vmem:[%s3239_s25 + $0x600] sm:$0xff]  ;;  %v754_v53 = vld [vmem:[%s3239_s25 + $0x610] sm:$0xff] }
  0x6e   : > { %v756_v54 = vld [vmem:[%s3239_s25 + $0x620] sm:$0xff]  ;;  %753 = vst [vmem:[%s3244_s6 + $0x300] sm:$0xff] %v752_v52  ;;  %755 = vst [vmem:[%s3244_s6 + $0x308] sm:$0xff] %v754_v53  ;;  %v758_v55 = vld [vmem:[%s3239_s25 + $0x630] sm:$0xff] }
  0x6f   : > { %757 = vst [vmem:[%s3244_s6 + $0x310] sm:$0xff] %v756_v54  ;;  %v760_v56 = vld [vmem:[%s3239_s25 + $0x640] sm:$0xff]  ;;  %v762_v57 = vld [vmem:[%s3239_s25 + $0x650] sm:$0xff]  ;;  %759 = vst [vmem:[%s3244_s6 + $0x318] sm:$0xff] %v758_v55 }
  0x70   : > { %761 = vst [vmem:[%s3244_s6 + $0x320] sm:$0xff] %v760_v56  ;;  %763 = vst [vmem:[%s3244_s6 + $0x328] sm:$0xff] %v762_v57  ;;  %v764_v58 = vld [vmem:[%s3239_s25 + $0x660] sm:$0xff]  ;;  %v766_v59 = vld [vmem:[%s3239_s25 + $0x670] sm:$0xff] }
  0x71   : > { %v768_v60 = vld [vmem:[%s3239_s25 + $0x680] sm:$0xff]  ;;  %765 = vst [vmem:[%s3244_s6 + $0x330] sm:$0xff] %v764_v58  ;;  %767 = vst [vmem:[%s3244_s6 + $0x338] sm:$0xff] %v766_v59  ;;  %v770_v61 = vld [vmem:[%s3239_s25 + $0x690] sm:$0xff] }
  0x72   : > { %769 = vst [vmem:[%s3244_s6 + $0x340] sm:$0xff] %v768_v60  ;;  %v772_v62 = vld [vmem:[%s3239_s25 + $0x6a0] sm:$0xff]  ;;  %v774_v63 = vld [vmem:[%s3239_s25 + $0x6b0] sm:$0xff]  ;;  %771 = vst [vmem:[%s3244_s6 + $0x348] sm:$0xff] %v770_v61 }
  0x73   : > { %773 = vst [vmem:[%s3244_s6 + $0x350] sm:$0xff] %v772_v62  ;;  %775 = vst [vmem:[%s3244_s6 + $0x358] sm:$0xff] %v774_v63  ;;  %v776_v0 = vld [vmem:[%s3239_s25 + $0x6c0] sm:$0xff]  ;;  %v778_v1 = vld [vmem:[%s3239_s25 + $0x6d0] sm:$0xff] }
  0x74   : > { %v780_v2 = vld [vmem:[%s3239_s25 + $0x6e0] sm:$0xff]  ;;  %777 = vst [vmem:[%s3244_s6 + $0x360] sm:$0xff] %v776_v0  ;;  %779 = vst [vmem:[%s3244_s6 + $0x368] sm:$0xff] %v778_v1  ;;  %v782_v3 = vld [vmem:[%s3239_s25 + $0x6f0] sm:$0xff] }
  0x75   : > { %781 = vst [vmem:[%s3244_s6 + $0x370] sm:$0xff] %v780_v2  ;;  %v784_v4 = vld [vmem:[%s3239_s25 + $0x700] sm:$0xff]  ;;  %v786_v5 = vld [vmem:[%s3239_s25 + $0x710] sm:$0xff]  ;;  %783 = vst [vmem:[%s3244_s6 + $0x378] sm:$0xff] %v782_v3 }
  0x76   : > { %785 = vst [vmem:[%s3244_s6 + $0x380] sm:$0xff] %v784_v4  ;;  %787 = vst [vmem:[%s3244_s6 + $0x388] sm:$0xff] %v786_v5  ;;  %v788_v6 = vld [vmem:[%s3239_s25 + $0x720] sm:$0xff]  ;;  %v790_v7 = vld [vmem:[%s3239_s25 + $0x730] sm:$0xff] }
  0x77   : > { %v792_v8 = vld [vmem:[%s3239_s25 + $0x740] sm:$0xff]  ;;  %789 = vst [vmem:[%s3244_s6 + $0x390] sm:$0xff] %v788_v6  ;;  %791 = vst [vmem:[%s3244_s6 + $0x398] sm:$0xff] %v790_v7  ;;  %v794_v9 = vld [vmem:[%s3239_s25 + $0x750] sm:$0xff] }
  0x78   : > { %793 = vst [vmem:[%s3244_s6 + $0x3a0] sm:$0xff] %v792_v8  ;;  %v796_v10 = vld [vmem:[%s3239_s25 + $0x760] sm:$0xff]  ;;  %v798_v11 = vld [vmem:[%s3239_s25 + $0x770] sm:$0xff]  ;;  %795 = vst [vmem:[%s3244_s6 + $0x3a8] sm:$0xff] %v794_v9 }
  0x79   : > { %797 = vst [vmem:[%s3244_s6 + $0x3b0] sm:$0xff] %v796_v10  ;;  %799 = vst [vmem:[%s3244_s6 + $0x3b8] sm:$0xff] %v798_v11  ;;  %v800_v12 = vld [vmem:[%s3239_s25 + $0x780] sm:$0xff]  ;;  %v802_v13 = vld [vmem:[%s3239_s25 + $0x790] sm:$0xff] }
  0x7a   : > { %v804_v14 = vld [vmem:[%s3239_s25 + $0x7a0] sm:$0xff]  ;;  %801 = vst [vmem:[%s3244_s6 + $0x3c0] sm:$0xff] %v800_v12  ;;  %803 = vst [vmem:[%s3244_s6 + $0x3c8] sm:$0xff] %v802_v13  ;;  %v806_v15 = vld [vmem:[%s3239_s25 + $0x7b0] sm:$0xff] }
  0x7b   : > { %805 = vst [vmem:[%s3244_s6 + $0x3d0] sm:$0xff] %v804_v14  ;;  %v808_v16 = vld [vmem:[%s3239_s25 + $0x7c0] sm:$0xff]  ;;  %v810_v17 = vld [vmem:[%s3239_s25 + $0x7d0] sm:$0xff]  ;;  %807 = vst [vmem:[%s3244_s6 + $0x3d8] sm:$0xff] %v806_v15 }
  0x7c   : > { %809 = vst [vmem:[%s3244_s6 + $0x3e0] sm:$0xff] %v808_v16  ;;  %811 = vst [vmem:[%s3244_s6 + $0x3e8] sm:$0xff] %v810_v17  ;;  %v812_v18 = vld [vmem:[%s3239_s25 + $0x7e0] sm:$0xff]  ;;  %v814_v19 = vld [vmem:[%s3239_s25 + $0x7f0] sm:$0xff] }
  0x7d   : > { %v816_v20 = vld [vmem:[%s3239_s25 + $0x800] sm:$0xff]  ;;  %813 = vst [vmem:[%s3244_s6 + $0x3f0] sm:$0xff] %v812_v18  ;;  %815 = vst [vmem:[%s3244_s6 + $0x3f8] sm:$0xff] %v814_v19  ;;  %v818_v21 = vld [vmem:[%s3239_s25 + $0x810] sm:$0xff] }
  0x7e   : > { %817 = vst [vmem:[%s3244_s6 + $0x400] sm:$0xff] %v816_v20  ;;  %v820_v22 = vld [vmem:[%s3239_s25 + $0x820] sm:$0xff]  ;;  %v822_v23 = vld [vmem:[%s3239_s25 + $0x830] sm:$0xff]  ;;  %819 = vst [vmem:[%s3244_s6 + $0x408] sm:$0xff] %v818_v21 }
  0x7f   : > { %821 = vst [vmem:[%s3244_s6 + $0x410] sm:$0xff] %v820_v22  ;;  %823 = vst [vmem:[%s3244_s6 + $0x418] sm:$0xff] %v822_v23  ;;  %v824_v24 = vld [vmem:[%s3239_s25 + $0x840] sm:$0xff]  ;;  %v826_v25 = vld [vmem:[%s3239_s25 + $0x850] sm:$0xff] }
  0x80   : > { %v828_v26 = vld [vmem:[%s3239_s25 + $0x860] sm:$0xff]  ;;  %825 = vst [vmem:[%s3244_s6 + $0x420] sm:$0xff] %v824_v24  ;;  %827 = vst [vmem:[%s3244_s6 + $0x428] sm:$0xff] %v826_v25  ;;  %v830_v27 = vld [vmem:[%s3239_s25 + $0x870] sm:$0xff] }
  0x81   : > { %829 = vst [vmem:[%s3244_s6 + $0x430] sm:$0xff] %v828_v26  ;;  %v832_v28 = vld [vmem:[%s3239_s25 + $0x880] sm:$0xff]  ;;  %v834_v29 = vld [vmem:[%s3239_s25 + $0x890] sm:$0xff]  ;;  %831 = vst [vmem:[%s3244_s6 + $0x438] sm:$0xff] %v830_v27 }
  0x82   : > { %833 = vst [vmem:[%s3244_s6 + $0x440] sm:$0xff] %v832_v28  ;;  %835 = vst [vmem:[%s3244_s6 + $0x448] sm:$0xff] %v834_v29  ;;  %v836_v30 = vld [vmem:[%s3239_s25 + $0x8a0] sm:$0xff]  ;;  %v838_v31 = vld [vmem:[%s3239_s25 + $0x8b0] sm:$0xff] }
  0x83   : > { %v840_v32 = vld [vmem:[%s3239_s25 + $0x8c0] sm:$0xff]  ;;  %837 = vst [vmem:[%s3244_s6 + $0x450] sm:$0xff] %v836_v30  ;;  %839 = vst [vmem:[%s3244_s6 + $0x458] sm:$0xff] %v838_v31  ;;  %v842_v33 = vld [vmem:[%s3239_s25 + $0x8d0] sm:$0xff] }
  0x84   : > { %841 = vst [vmem:[%s3244_s6 + $0x460] sm:$0xff] %v840_v32  ;;  %v844_v34 = vld [vmem:[%s3239_s25 + $0x8e0] sm:$0xff]  ;;  %v846_v35 = vld [vmem:[%s3239_s25 + $0x8f0] sm:$0xff]  ;;  %843 = vst [vmem:[%s3244_s6 + $0x468] sm:$0xff] %v842_v33 }
  0x85   : > { %845 = vst [vmem:[%s3244_s6 + $0x470] sm:$0xff] %v844_v34  ;;  %847 = vst [vmem:[%s3244_s6 + $0x478] sm:$0xff] %v846_v35 }
  0x86 PF: > { %p2412_p0 = scmp.ge.s32.totalorder %s3057_s22, 1  ;;  %p860_p1 = scmp.lt.s32.totalorder %s3057_s22, 5 }
  0x88   : > { %p861_p2 = pnand %p2412_p0, %p860_p1 }
  0x89   : > { %s867_s0 = sand.u32 (!%p861_p2), 1, %s3033_s16   ;;  %s874_s5 = sand.u32 (!%p861_p2), 1, %s3025_s14  }
  0x8a   : > { %864 = sbr.rel (%p861_p2) target bundleno = 554 (0x22a), region = 88  ;;  %s901_s28 = sand.u32 (!%p861_p2), 1, %s3017_s12  }
  0x8b   : > { %s2637_s23 = smul.u32 (!%p861_p2), 144, %s867_s0  ;;  %s2413_s7 = sshll.u32 (!%p861_p2), %s901_s28, 6 }
  0x8c   : > { %s2638_s25 = smul.u32 (!%p861_p2), 1152, %s874_s5  ;;  %s2414_s11 = sshll.u32 (!%p861_p2), %s3045_s19, 1 }
  0x8d   : > { %p909_p3 = scmp.lt.s32.totalorder (!%p861_p2), %s2414_s11, 3  ;;  %s3543_s4 = scalar_lea.vmem (!%p861_p2), [#allocation3], %s2637_s23 }
  0x8e   : > { %s3545_s6 = scalar_lea.vmem (!%p861_p2), [#allocation4], %s2638_s25  ;;  %s3547_s1 = scalar_lea.vmem (!%p861_p2), [#allocation5], %s2413_s7 }
  0x8f   : > { %p2415_p4 = scmp.ne.s32.totalorder (!%p861_p2), %s3041_s18, 0 }
  0x91   : > { %s3804_s11 = smov (!%p909_p3, %s2414_s11), 3  ;;  %919 = sbr.rel (%p2415_p4) target bundleno = 152 (0x98), region = 100 }
  0x92   : > { %s911_s29 = scalar_lea.vmem %s3775_s2, %s3804_s11  ;;  %v3059_v36 = vmov (!%p2415_p4), 0.0  }
  0x93   : > { %920 = vst [vmem:[#allocation2] sm:$0xff] (!%p2415_p4), %v3059_v36  ;;  %921 = vst [vmem:[#allocation2 + $0x8] sm:$0xff] (!%p2415_p4), %v3059_v36 }
  0x94   : > { %922 = vst [vmem:[#allocation2 + $0x10] sm:$0xff] (!%p2415_p4), %v3059_v36  ;;  %923 = vst [vmem:[#allocation2 + $0x18] sm:$0xff] (!%p2415_p4), %v3059_v36 }
  0x95   : > { %924 = vst [vmem:[#allocation2 + $0x20] sm:$0xff] (!%p2415_p4), %v3059_v36  ;;  %925 = vst [vmem:[#allocation2 + $0x28] sm:$0xff] (!%p2415_p4), %v3059_v36 }
  0x96   : > { %926 = vst [vmem:[#allocation2 + $0x30] sm:$0xff] (!%p2415_p4), %v3059_v36  ;;  %927 = vst [vmem:[#allocation2 + $0x38] sm:$0xff] (!%p2415_p4), %v3059_v36 }
  0x98 PF: > { %v2729_v37 = vld [vmem:[%s3545_s6 + $0x4] ss:$8 sps:$4 sm:$0xff]   ;;  %v2733_v39 = vld [vmem:[%s3545_s6] ss:$8 sps:$4 sm:$0xff]   ;;  %v2735_v41 = vld [vmem:[%s3545_s6 + $0x14] ss:$8 sps:$4 sm:$0xff]  }
  0x99   : > { %v2731_v38 = vld [vmem:[%s3545_s6 + $0x204] ss:$8 sps:$4 sm:$0xff]   ;;  %1912 = vmatprep.subr.bf16.mxu1 %v2729_v37  ;;  %v2734_v40 = vld [vmem:[%s3545_s6 + $0x200] ss:$8 sps:$4 sm:$0xff]   ;;  %v2737_v42 = vld [vmem:[%s3545_s6 + $0x214] ss:$8 sps:$4 sm:$0xff]  }
  0x9a   : > { %2018 = vmatprep.subr.bf16.mxu0 %v2731_v38  ;;  %1913 = vmatpush1.bf16.msra.mxu1 %v2733_v39  ;;  %v2739_v43 = vld [vmem:[%s3545_s6 + $0x10] ss:$8 sps:$4 sm:$0xff]   ;;  %v2741_v45 = vld [vmem:[%s3545_s6 + $0x24] ss:$8 sps:$4 sm:$0xff]   ;;  %v2745_v47 = vld [vmem:[%s3545_s6 + $0x20] ss:$8 sps:$4 sm:$0xff]  }
  0x9b   : > { %2019 = vmatpush1.bf16.msra.mxu0 %v2734_v40  ;;  %1914 = vmatprep.subr.bf16.mxu1 %v2735_v41  ;;  %v2740_v44 = vld [vmem:[%s3545_s6 + $0x210] ss:$8 sps:$4 sm:$0xff]   ;;  %v2743_v46 = vld [vmem:[%s3545_s6 + $0x224] ss:$8 sps:$4 sm:$0xff]   ;;  %v2746_v48 = vld [vmem:[%s3545_s6 + $0x220] ss:$8 sps:$4 sm:$0xff]  }
  0x9c   : > { %2020 = vmatprep.subr.bf16.mxu0 %v2737_v42  ;;  %v2747_v49 = vld [vmem:[%s3545_s6 + $0x34] ss:$8 sps:$4 sm:$0xff]   ;;  %v2751_v51 = vld [vmem:[%s3545_s6 + $0x30] ss:$8 sps:$4 sm:$0xff]   ;;  %v2753_v53 = vld [vmem:[%s3545_s6 + $0x44] ss:$8 sps:$4 sm:$0xff]  }
  0x9d   : > { %v2749_v50 = vld [vmem:[%s3545_s6 + $0x234] ss:$8 sps:$4 sm:$0xff]   ;;  %v2752_v52 = vld [vmem:[%s3545_s6 + $0x230] ss:$8 sps:$4 sm:$0xff]   ;;  %v2755_v54 = vld [vmem:[%s3545_s6 + $0x244] ss:$8 sps:$4 sm:$0xff]  }
  0x9e   : > { %1915 = vmatpush1.bf16.msra.mxu1 %v2739_v43  ;;  %v2757_v55 = vld [vmem:[%s3545_s6 + $0x40] ss:$8 sps:$4 sm:$0xff]   ;;  %v2759_v57 = vld [vmem:[%s3545_s6 + $0x54] ss:$8 sps:$4 sm:$0xff]   ;;  %v2763_v59 = vld [vmem:[%s3545_s6 + $0x50] ss:$8 sps:$4 sm:$0xff]  }
  0x9f   : > { %2021 = vmatpush1.bf16.msra.mxu0 %v2740_v44  ;;  %1916 = vmatprep.subr.bf16.mxu1 %v2741_v45  ;;  %v2758_v56 = vld [vmem:[%s3545_s6 + $0x240] ss:$8 sps:$4 sm:$0xff]   ;;  %v2761_v58 = vld [vmem:[%s3545_s6 + $0x254] ss:$8 sps:$4 sm:$0xff]   ;;  %v2764_v60 = vld [vmem:[%s3545_s6 + $0x250] ss:$8 sps:$4 sm:$0xff]  }
  0xa0   : > { %2022 = vmatprep.subr.bf16.mxu0 %v2743_v46  ;;  %v2765_v61 = vld [vmem:[%s3545_s6 + $0x64] ss:$8 sps:$4 sm:$0xff]   ;;  %v2769_v63 = vld [vmem:[%s3545_s6 + $0x60] ss:$8 sps:$4 sm:$0xff]   ;;  %v2771_v1 = vld [vmem:[%s3545_s6 + $0x74] ss:$8 sps:$4 sm:$0xff]  }
  0xa1   : > { %v2767_v62 = vld [vmem:[%s3545_s6 + $0x264] ss:$8 sps:$4 sm:$0xff]   ;;  %v2770_v0 = vld [vmem:[%s3545_s6 + $0x260] ss:$8 sps:$4 sm:$0xff]   ;;  %v2773_v2 = vld [vmem:[%s3545_s6 + $0x274] ss:$8 sps:$4 sm:$0xff]  }
  0xa2   : > { %1917 = vmatpush1.bf16.msra.mxu1 %v2745_v47  ;;  %v2775_v3 = vld [vmem:[%s3545_s6 + $0x70] ss:$8 sps:$4 sm:$0xff]   ;;  %v2777_v5 = vld [vmem:[%s3545_s6 + $0x84] ss:$8 sps:$4 sm:$0xff]   ;;  %v2781_v7 = vld [vmem:[%s3545_s6 + $0x80] ss:$8 sps:$4 sm:$0xff]  }
  0xa3   : > { %2023 = vmatpush1.bf16.msra.mxu0 %v2746_v48  ;;  %1918 = vmatprep.subr.bf16.mxu1 %v2747_v49  ;;  %v2776_v4 = vld [vmem:[%s3545_s6 + $0x270] ss:$8 sps:$4 sm:$0xff]   ;;  %v2779_v6 = vld [vmem:[%s3545_s6 + $0x284] ss:$8 sps:$4 sm:$0xff]   ;;  %v2782_v8 = vld [vmem:[%s3545_s6 + $0x280] ss:$8 sps:$4 sm:$0xff]  }
  0xa4   : > { %2024 = vmatprep.subr.bf16.mxu0 %v2749_v50  ;;  %v2783_v9 = vld [vmem:[%s3545_s6 + $0x94] ss:$8 sps:$4 sm:$0xff]   ;;  %v2787_v11 = vld [vmem:[%s3545_s6 + $0x90] ss:$8 sps:$4 sm:$0xff]   ;;  %v2789_v13 = vld [vmem:[%s3545_s6 + $0xa4] ss:$8 sps:$4 sm:$0xff]  }
  0xa5   : > { %v2785_v10 = vld [vmem:[%s3545_s6 + $0x294] ss:$8 sps:$4 sm:$0xff]   ;;  %v2788_v12 = vld [vmem:[%s3545_s6 + $0x290] ss:$8 sps:$4 sm:$0xff]   ;;  %v2791_v14 = vld [vmem:[%s3545_s6 + $0x2a4] ss:$8 sps:$4 sm:$0xff]  }
  0xa6   : > { %1919 = vmatpush1.bf16.msra.mxu1 %v2751_v51  ;;  %v2793_v15 = vld [vmem:[%s3545_s6 + $0xa0] ss:$8 sps:$4 sm:$0xff]   ;;  %v2795_v17 = vld [vmem:[%s3545_s6 + $0xb4] ss:$8 sps:$4 sm:$0xff]   ;;  %v2799_v19 = vld [vmem:[%s3545_s6 + $0xb0] ss:$8 sps:$4 sm:$0xff]  }
  0xa7   : > { %2025 = vmatpush1.bf16.msra.mxu0 %v2752_v52  ;;  %1920 = vmatprep.subr.bf16.mxu1 %v2753_v53  ;;  %v2794_v16 = vld [vmem:[%s3545_s6 + $0x2a0] ss:$8 sps:$4 sm:$0xff]   ;;  %v2797_v18 = vld [vmem:[%s3545_s6 + $0x2b4] ss:$8 sps:$4 sm:$0xff]   ;;  %v2800_v20 = vld [vmem:[%s3545_s6 + $0x2b0] ss:$8 sps:$4 sm:$0xff]  }
  0xa8   : > { %2026 = vmatprep.subr.bf16.mxu0 %v2755_v54  ;;  %v2827_v21 = vld [vmem:[%s3543_s4 + $0x4] ss:$36 sps:$4 sm:$0xff]   ;;  %v2833_v24 = vld [vmem:[%s3543_s4 + $0x14] ss:$36 sps:$4 sm:$0xff]   ;;  %p2578_p5 = scmp.ne.s32.totalorder %s3041_s18, 1 }
  0xa9   : > { %v2801_v22 = vld [vmem:[%s3545_s6 + $0xc4] ss:$8 sps:$4 sm:$0xff]   ;;  %1944 = vmatprep.mubr.bf16.mxu1 %v2827_v21  ;;  %v2805_v25 = vld [vmem:[%s3545_s6 + $0xc0] ss:$8 sps:$4 sm:$0xff]   ;;  %v2807_v27 = vld [vmem:[%s3545_s6 + $0xd4] ss:$8 sps:$4 sm:$0xff]   ;;  %2050 = vmatprep.mubr.bf16.mxu0 %v2833_v24 }
  0xaa   : > { %1921 = vmatpush1.bf16.msra.mxu1 %v2757_v55  ;;  %v2803_v23 = vld [vmem:[%s3545_s6 + $0x2c4] ss:$8 sps:$4 sm:$0xff]   ;;  %v2806_v26 = vld [vmem:[%s3545_s6 + $0x2c0] ss:$8 sps:$4 sm:$0xff]   ;;  %v2809_v28 = vld [vmem:[%s3545_s6 + $0x2d4] ss:$8 sps:$4 sm:$0xff]  }
  0xab   : > { %2027 = vmatpush1.bf16.msra.mxu0 %v2758_v56  ;;  %1922 = vmatprep.subr.bf16.mxu1 %v2759_v57  ;;  %v2811_v29 = vld [vmem:[%s3545_s6 + $0xd0] ss:$8 sps:$4 sm:$0xff]   ;;  %v2813_v31 = vld [vmem:[%s3545_s6 + $0xe4] ss:$8 sps:$4 sm:$0xff]   ;;  %v2817_v33 = vld [vmem:[%s3545_s6 + $0xe0] ss:$8 sps:$4 sm:$0xff]  }
  0xac   : > { %2028 = vmatprep.subr.bf16.mxu0 %v2761_v58  ;;  %v2812_v30 = vld [vmem:[%s3545_s6 + $0x2d0] ss:$8 sps:$4 sm:$0xff]   ;;  %v2815_v32 = vld [vmem:[%s3545_s6 + $0x2e4] ss:$8 sps:$4 sm:$0xff]   ;;  %v2818_v34 = vld [vmem:[%s3545_s6 + $0x2e0] ss:$8 sps:$4 sm:$0xff]  }
  0xad   : > { %v2819_v35 = vld [vmem:[%s3545_s6 + $0xf4] ss:$8 sps:$4 sm:$0xff]   ;;  %v2823_v37 = vld [vmem:[%s3545_s6 + $0xf0] ss:$8 sps:$4 sm:$0xff]   ;;  %v2830_v39 = vld [vmem:[%s3545_s6 + $0x104] ss:$8 sps:$4 sm:$0xff]  }
  0xae   : > { %1923 = vmatpush1.bf16.msra.mxu1 %v2763_v59  ;;  %v2821_v36 = vld [vmem:[%s3545_s6 + $0x2f4] ss:$8 sps:$4 sm:$0xff]   ;;  %v2824_v38 = vld [vmem:[%s3545_s6 + $0x2f0] ss:$8 sps:$4 sm:$0xff]   ;;  %v2836_v40 = vld [vmem:[%s3545_s6 + $0x304] ss:$8 sps:$4 sm:$0xff]  }
  0xaf   : > { %2029 = vmatpush1.bf16.msra.mxu0 %v2764_v60  ;;  %1924 = vmatprep.subr.bf16.mxu1 %v2765_v61  ;;  %v2825_v41 = vld [vmem:[%s3543_s4] ss:$36 sps:$4 sm:$0xff]   ;;  %v2831_v43 = vld [vmem:[%s3543_s4 + $0x10] ss:$36 sps:$4 sm:$0xff]  }
  0xb0   : > { %2030 = vmatprep.subr.bf16.mxu0 %v2767_v62  ;;  %v2828_v42 = vld [vmem:[%s3545_s6 + $0x100] ss:$8 sps:$4 sm:$0xff]   ;;  %v2839_v45 = vld [vmem:[%s3545_s6 + $0x114] ss:$8 sps:$4 sm:$0xff]   ;;  %v2837_v47 = vld [vmem:[%s3545_s6 + $0x110] ss:$8 sps:$4 sm:$0xff]  }
  0xb1   : > { %v2834_v44 = vld [vmem:[%s3545_s6 + $0x300] ss:$8 sps:$4 sm:$0xff]   ;;  %v2842_v46 = vld [vmem:[%s3545_s6 + $0x314] ss:$8 sps:$4 sm:$0xff]   ;;  %v2840_v48 = vld [vmem:[%s3545_s6 + $0x310] ss:$8 sps:$4 sm:$0xff]  }
  0xb2   : > { %1925 = vmatpush1.bf16.msra.mxu1 %v2769_v63  ;;  %v2845_v49 = vld [vmem:[%s3545_s6 + $0x124] ss:$8 sps:$4 sm:$0xff]   ;;  %v2843_v51 = vld [vmem:[%s3545_s6 + $0x120] ss:$8 sps:$4 sm:$0xff]   ;;  %v2851_v53 = vld [vmem:[%s3545_s6 + $0x134] ss:$8 sps:$4 sm:$0xff]  }
  0xb3   : > { %2031 = vmatpush1.bf16.msra.mxu0 %v2770_v0  ;;  %1926 = vmatprep.subr.bf16.mxu1 %v2771_v1  ;;  %v2848_v50 = vld [vmem:[%s3545_s6 + $0x324] ss:$8 sps:$4 sm:$0xff]   ;;  %v2846_v52 = vld [vmem:[%s3545_s6 + $0x320] ss:$8 sps:$4 sm:$0xff]   ;;  %v2854_v54 = vld [vmem:[%s3545_s6 + $0x334] ss:$8 sps:$4 sm:$0xff]  }
  0xb4   : > { %2032 = vmatprep.subr.bf16.mxu0 %v2773_v2  ;;  %v2849_v55 = vld [vmem:[%s3545_s6 + $0x130] ss:$8 sps:$4 sm:$0xff]   ;;  %v2857_v57 = vld [vmem:[%s3545_s6 + $0x144] ss:$8 sps:$4 sm:$0xff]   ;;  %v2855_v59 = vld [vmem:[%s3545_s6 + $0x140] ss:$8 sps:$4 sm:$0xff]  }
  0xb5   : > { %v2852_v56 = vld [vmem:[%s3545_s6 + $0x330] ss:$8 sps:$4 sm:$0xff]   ;;  %v2860_v58 = vld [vmem:[%s3545_s6 + $0x344] ss:$8 sps:$4 sm:$0xff]   ;;  %v2858_v60 = vld [vmem:[%s3545_s6 + $0x340] ss:$8 sps:$4 sm:$0xff]  }
  0xb6   : > { %1927 = vmatpush1.bf16.msra.mxu1 %v2775_v3  ;;  %v2863_v61 = vld [vmem:[%s3545_s6 + $0x154] ss:$8 sps:$4 sm:$0xff]   ;;  %v2861_v63 = vld [vmem:[%s3545_s6 + $0x150] ss:$8 sps:$4 sm:$0xff]   ;;  %v2869_v1 = vld [vmem:[%s3545_s6 + $0x164] ss:$8 sps:$4 sm:$0xff]  }
  0xb7   : > { %2033 = vmatpush1.bf16.msra.mxu0 %v2776_v4  ;;  %1928 = vmatprep.subr.bf16.mxu1 %v2777_v5  ;;  %v2866_v62 = vld [vmem:[%s3545_s6 + $0x354] ss:$8 sps:$4 sm:$0xff]   ;;  %v2864_v0 = vld [vmem:[%s3545_s6 + $0x350] ss:$8 sps:$4 sm:$0xff]   ;;  %v2872_v5 = vld [vmem:[%s3545_s6 + $0x364] ss:$8 sps:$4 sm:$0xff]  }
  0xb8   : > { %2034 = vmatprep.subr.bf16.mxu0 %v2779_v6  ;;  %v2915_v2 = vld [vmem:[%s3543_s4 + $0x4c] ss:$36 sps:$4 sm:$0xff]   ;;  %v2917_v3 = vld [vmem:[%s3543_s4 + $0x5c] ss:$36 sps:$4 sm:$0xff]  }
  0xb9   : > { %v2919_v4 = vld [vmem:[%s3543_s4 + $0x48] ss:$36 sps:$4 sm:$0xff]   ;;  %v2923_v6 = vld [vmem:[%s3543_s4 + $0x58] ss:$36 sps:$4 sm:$0xff]  }
  0xba   : > { %1929 = vmatpush1.bf16.msra.mxu1 %v2781_v7  ;;  %v2867_v7 = vld [vmem:[%s3545_s6 + $0x160] ss:$8 sps:$4 sm:$0xff]   ;;  %v2885_v21 = vld [vmem:[%s3545_s6 + $0x190] ss:$8 sps:$4 sm:$0xff]   ;;  %v2896_v24 = vld [vmem:[%s3545_s6 + $0x3a4] ss:$8 sps:$4 sm:$0xff]  }
  0xbb   : > { %2035 = vmatpush1.bf16.msra.mxu0 %v2782_v8  ;;  %1930 = vmatprep.subr.bf16.mxu1 %v2783_v9  ;;  %v2870_v8 = vld [vmem:[%s3545_s6 + $0x360] ss:$8 sps:$4 sm:$0xff]   ;;  %v2875_v9 = vld [vmem:[%s3545_s6 + $0x174] ss:$8 sps:$4 sm:$0xff]  }
  0xbc   : > { %2036 = vmatprep.subr.bf16.mxu0 %v2785_v10  ;;  %v2878_v10 = vld [vmem:[%s3545_s6 + $0x374] ss:$8 sps:$4 sm:$0xff]  }
  0xbe   : > { %1931 = vmatpush1.bf16.msra.mxu1 %v2787_v11  ;;  %v2873_v11 = vld [vmem:[%s3545_s6 + $0x170] ss:$8 sps:$4 sm:$0xff]  }
  0xbf   : > { %2037 = vmatpush1.bf16.msra.mxu0 %v2788_v12  ;;  %1932 = vmatprep.subr.bf16.mxu1 %v2789_v13  ;;  %v2876_v12 = vld [vmem:[%s3545_s6 + $0x370] ss:$8 sps:$4 sm:$0xff]   ;;  %v2881_v13 = vld [vmem:[%s3545_s6 + $0x184] ss:$8 sps:$4 sm:$0xff]  }
  0xc0   : > { %2038 = vmatprep.subr.bf16.mxu0 %v2791_v14  ;;  %v2935_v14 = vld [vmem:[%s3543_s4 + $0xc] ss:$36 sps:$4 sm:$0xff]  }
  0xc2   : > { %1933 = vmatpush1.bf16.msra.mxu1 %v2793_v15  ;;  %v2884_v15 = vld [vmem:[%s3545_s6 + $0x384] ss:$8 sps:$4 sm:$0xff]  }
  0xc3   : > { %2039 = vmatpush1.bf16.msra.mxu0 %v2794_v16  ;;  %1934 = vmatprep.subr.bf16.mxu1 %v2795_v17  ;;  %v2938_v16 = vld [vmem:[%s3543_s4 + $0x1c] ss:$36 sps:$4 sm:$0xff]  }
  0xc4   : > { %2040 = vmatprep.subr.bf16.mxu0 %v2797_v18  ;;  %v2879_v17 = vld [vmem:[%s3545_s6 + $0x180] ss:$8 sps:$4 sm:$0xff]  }
  0xc5   : > { %v2882_v18 = vld [vmem:[%s3545_s6 + $0x380] ss:$8 sps:$4 sm:$0xff]  }
  0xc6   : > { %1935 = vmatpush1.bf16.msra.mxu1 %v2799_v19  ;;  %v2887_v19 = vld [vmem:[%s3545_s6 + $0x194] ss:$8 sps:$4 sm:$0xff]  }
  0xc7   : > { %2041 = vmatpush1.bf16.msra.mxu0 %v2800_v20  ;;  %1936 = vmatprep.subr.bf16.mxu1 %v2801_v22  ;;  %v2890_v20 = vld [vmem:[%s3545_s6 + $0x394] ss:$8 sps:$4 sm:$0xff]   ;;  %v2888_v22 = vld [vmem:[%s3545_s6 + $0x390] ss:$8 sps:$4 sm:$0xff]  }
  0xc8   : > { %2042 = vmatprep.subr.bf16.mxu0 %v2803_v23  ;;  %v2893_v23 = vld [vmem:[%s3545_s6 + $0x1a4] ss:$8 sps:$4 sm:$0xff]  }
  0xca   : > { %1937 = vmatpush1.bf16.msra.mxu1 %v2805_v25  ;;  %v2891_v25 = vld [vmem:[%s3545_s6 + $0x1a0] ss:$8 sps:$4 sm:$0xff]  }
  0xcb   : > { %2043 = vmatpush1.bf16.msra.mxu0 %v2806_v26  ;;  %1938 = vmatprep.subr.bf16.mxu1 %v2807_v27  ;;  %v2894_v26 = vld [vmem:[%s3545_s6 + $0x3a0] ss:$8 sps:$4 sm:$0xff]   ;;  %v2899_v27 = vld [vmem:[%s3545_s6 + $0x1b4] ss:$8 sps:$4 sm:$0xff]  }
  0xcc   : > { %2044 = vmatprep.subr.bf16.mxu0 %v2809_v28  ;;  %v2902_v28 = vld [vmem:[%s3545_s6 + $0x3b4] ss:$8 sps:$4 sm:$0xff]  }
  0xce   : > { %1939 = vmatpush1.bf16.msra.mxu1 %v2811_v29  ;;  %v2897_v29 = vld [vmem:[%s3545_s6 + $0x1b0] ss:$8 sps:$4 sm:$0xff]  }
  0xcf   : > { %2045 = vmatpush1.bf16.msra.mxu0 %v2812_v30  ;;  %1940 = vmatprep.subr.bf16.mxu1 %v2813_v31  ;;  %v2900_v30 = vld [vmem:[%s3545_s6 + $0x3b0] ss:$8 sps:$4 sm:$0xff]   ;;  %v2905_v31 = vld [vmem:[%s3545_s6 + $0x1c4] ss:$8 sps:$4 sm:$0xff]  }
  0xd0   : > { %2046 = vmatprep.subr.bf16.mxu0 %v2815_v32  ;;  %v2908_v32 = vld [vmem:[%s3545_s6 + $0x3c4] ss:$8 sps:$4 sm:$0xff]  }
  0xd2   : > { %1941 = vmatpush1.bf16.msra.mxu1 %v2817_v33  ;;  %v2903_v33 = vld [vmem:[%s3545_s6 + $0x1c0] ss:$8 sps:$4 sm:$0xff]  }
  0xd3   : > { %2047 = vmatpush1.bf16.msra.mxu0 %v2818_v34  ;;  %1942 = vmatprep.subr.bf16.mxu1 %v2819_v35  ;;  %v2906_v34 = vld [vmem:[%s3545_s6 + $0x3c0] ss:$8 sps:$4 sm:$0xff]   ;;  %v2911_v35 = vld [vmem:[%s3545_s6 + $0x1d4] ss:$8 sps:$4 sm:$0xff]  }
  0xd4   : > { %2048 = vmatprep.subr.bf16.mxu0 %v2821_v36  ;;  %v2914_v36 = vld [vmem:[%s3545_s6 + $0x3d4] ss:$8 sps:$4 sm:$0xff]  }
  0xd6   : > { %1943 = vmatpush1.bf16.msra.mxu1 %v2823_v37  ;;  %v2909_v37 = vld [vmem:[%s3545_s6 + $0x1d0] ss:$8 sps:$4 sm:$0xff]  }
  0xd7   : > { %2049 = vmatpush1.bf16.msra.mxu0 %v2824_v38  ;;  %1965 = vmatprep.subr.bf16.mxu1 %v2830_v39  ;;  %v2912_v38 = vld [vmem:[%s3545_s6 + $0x3d0] ss:$8 sps:$4 sm:$0xff]   ;;  %v2922_v39 = vld [vmem:[%s3545_s6 + $0x1e4] ss:$8 sps:$4 sm:$0xff]  }
  0xd8   : > { %2071 = vmatprep.subr.bf16.mxu0 %v2836_v40  ;;  %v2926_v40 = vld [vmem:[%s3545_s6 + $0x3e4] ss:$8 sps:$4 sm:$0xff]  }
  0xd9   : > { %1945 = vmatmul.mubr.bf16.vlgmr.msra.gmra.mrb[0].mxu1 %v2825_v41  ;;  %v2920_v41 = vld [vmem:[%s3545_s6 + $0x1e0] ss:$8 sps:$4 sm:$0xff]  }
  0xda   : > { %2051 = vmatmul.mubr.bf16.vlgmr.msra.gmra.mrb[0].mxu0 %v2831_v43  ;;  %1966 = vmatpush1.bf16.msra.mxu1 %v2828_v42  ;;  %v2924_v42 = vld [vmem:[%s3545_s6 + $0x3e0] ss:$8 sps:$4 sm:$0xff]   ;;  %v2929_v43 = vld [vmem:[%s3545_s6 + $0x1f4] ss:$8 sps:$4 sm:$0xff]  }
  0xdb   : > { %2072 = vmatpush1.bf16.msra.mxu0 %v2834_v44  ;;  %1967 = vmatprep.subr.bf16.mxu1 %v2839_v45  ;;  %v2932_v44 = vld [vmem:[%s3545_s6 + $0x3f4] ss:$8 sps:$4 sm:$0xff]   ;;  %v2927_v45 = vld [vmem:[%s3545_s6 + $0x1f0] ss:$8 sps:$4 sm:$0xff]  }
  0xdc   : > { %2073 = vmatprep.subr.bf16.mxu0 %v2842_v46  ;;  %1954 = vmatprep.mubr.bf16.mxu1 %v2915_v2  ;;  %v2930_v46 = vld [vmem:[%s3545_s6 + $0x3f0] ss:$8 sps:$4 sm:$0xff]   ;;  %v2965_v2 = vld [vmem:[%s3545_s6 + $0x464] ss:$8 sps:$4 sm:$0xff]  }
  0xdd   : > { %2060 = vmatprep.mubr.bf16.mxu0 %v2917_v3  ;;  %v2963_v3 = vld [vmem:[%s3545_s6 + $0x460] ss:$8 sps:$4 sm:$0xff]  }
  0xde   : > { %1968 = vmatpush1.bf16.msra.mxu1 %v2837_v47  ;;  %v2941_v47 = vld [vmem:[%s3545_s6 + $0x404] ss:$8 sps:$4 sm:$0xff]  }
  0xdf   : > { %2074 = vmatpush1.bf16.msra.mxu0 %v2840_v48  ;;  %1969 = vmatprep.subr.bf16.mxu1 %v2845_v49  ;;  %v2933_v48 = vld [vmem:[%s3543_s4 + $0x8] ss:$36 sps:$4 sm:$0xff]   ;;  %v2936_v49 = vld [vmem:[%s3543_s4 + $0x18] ss:$36 sps:$4 sm:$0xff]  }
  0xe0   : > { %2075 = vmatprep.subr.bf16.mxu0 %v2848_v50  ;;  %v2939_v50 = vld [vmem:[%s3545_s6 + $0x400] ss:$8 sps:$4 sm:$0xff]  }
  0xe1   : > { %1955 = vmatmul.mubr.bf16.gmra.mrb[4].mxu1 %v2919_v4  ;;  %v2968_v4 = vld [vmem:[%s3545_s6 + $0x474] ss:$8 sps:$4 sm:$0xff]  }
  0xe2   : > { %1970 = vmatpush1.bf16.msra.mxu1 %v2843_v51  ;;  %2061 = vmatmul.mubr.bf16.gmra.mrb[4].mxu0 %v2923_v6  ;;  %v2944_v51 = vld [vmem:[%s3545_s6 + $0x414] ss:$8 sps:$4 sm:$0xff]  }
  0xe3   : > { %2076 = vmatpush1.bf16.msra.mxu0 %v2846_v52  ;;  %1971 = vmatprep.subr.bf16.mxu1 %v2851_v53  ;;  %v2945_v52 = vld [vmem:[%s3543_s4 + $0x54] ss:$36 sps:$4 sm:$0xff]   ;;  %v2947_v53 = vld [vmem:[%s3543_s4 + $0x64] ss:$36 sps:$4 sm:$0xff]  }
  0xe4   : > { %2077 = vmatprep.subr.bf16.mxu0 %v2854_v54  ;;  %1997 = vmatprep.mubr.bf16.mxu1 %v2935_v14  ;;  %v2942_v54 = vld [vmem:[%s3545_s6 + $0x410] ss:$8 sps:$4 sm:$0xff]  }
  0xe5   : > { %2103 = vmatprep.mubr.bf16.mxu0 %v2938_v16  ;;  %v2969_v6 = vld [vmem:[%s3543_s4 + $0x20] ss:$36 sps:$4 sm:$0xff]  }
  0xe6   : > { %1972 = vmatpush1.bf16.msra.mxu1 %v2849_v55  ;;  %v2953_v55 = vld [vmem:[%s3545_s6 + $0x424] ss:$8 sps:$4 sm:$0xff]  }
  0xe7   : > { %2078 = vmatpush1.bf16.msra.mxu0 %v2852_v56  ;;  %1973 = vmatprep.subr.bf16.mxu1 %v2857_v57  ;;  %v2949_v56 = vld [vmem:[%s3543_s4 + $0x50] ss:$36 sps:$4 sm:$0xff]   ;;  %v2950_v57 = vld [vmem:[%s3543_s4 + $0x60] ss:$36 sps:$4 sm:$0xff]  }
  0xe8   : > { %2079 = vmatprep.subr.bf16.mxu0 %v2860_v58  ;;  %v2951_v58 = vld [vmem:[%s3545_s6 + $0x420] ss:$8 sps:$4 sm:$0xff]  }
  0xea   : > { %1974 = vmatpush1.bf16.msra.mxu1 %v2855_v59  ;;  %v2956_v59 = vld [vmem:[%s3545_s6 + $0x434] ss:$8 sps:$4 sm:$0xff]  }
  0xeb   : > { %2080 = vmatpush1.bf16.msra.mxu0 %v2858_v60  ;;  %1975 = vmatprep.subr.bf16.mxu1 %v2863_v61  ;;  %v2954_v60 = vld [vmem:[%s3545_s6 + $0x430] ss:$8 sps:$4 sm:$0xff]   ;;  %v2959_v61 = vld [vmem:[%s3545_s6 + $0x444] ss:$8 sps:$4 sm:$0xff]  }
  0xec   : > { %2081 = vmatprep.subr.bf16.mxu0 %v2866_v62  ;;  %v3060_v62 = vmov 0  }
  0xee   : > { %1976 = vmatpush1.bf16.msra.mxu1 %v2861_v63  ;;  %v2957_v63 = vld [vmem:[%s3545_s6 + $0x440] ss:$8 sps:$4 sm:$0xff]  }
  0xef   : > { %2082 = vmatpush1.bf16.msra.mxu0 %v2864_v0  ;;  %1977 = vmatprep.subr.bf16.mxu1 %v2869_v1  ;;  %v2962_v0 = vld [vmem:[%s3545_s6 + $0x454] ss:$8 sps:$4 sm:$0xff]   ;;  %v2960_v1 = vld [vmem:[%s3545_s6 + $0x450] ss:$8 sps:$4 sm:$0xff]  }
  0xf0   : > { %2083 = vmatprep.subr.bf16.mxu0 %v2872_v5  ;;  %v2966_v5 = vld [vmem:[%s3545_s6 + $0x470] ss:$8 sps:$4 sm:$0xff]  }
  0xf2   : > { %1978 = vmatpush1.bf16.msra.mxu1 %v2867_v7  ;;  %v2970_v7 = vld [vmem:[%s3543_s4 + $0x68] ss:$36 sps:$4 sm:$0xff]  }
  0xf3   : > { %2084 = vmatpush1.bf16.msra.mxu0 %v2870_v8  ;;  %1979 = vmatprep.subr.bf16.mxu1 %v2875_v9 }
  0xf4   : > { %2085 = vmatprep.subr.bf16.mxu0 %v2878_v10 }
  0xf6   : > { %1980 = vmatpush1.bf16.msra.mxu1 %v2873_v11 }
  0xf7   : > { %2086 = vmatpush1.bf16.msra.mxu0 %v2876_v12  ;;  %1981 = vmatprep.subr.bf16.mxu1 %v2881_v13 }
  0xf8   : > { %2087 = vmatprep.subr.bf16.mxu0 %v2884_v15 }
  0xfa   : > { %1982 = vmatpush1.bf16.msra.mxu1 %v2879_v17 }
  0xfb   : > { %2088 = vmatpush1.bf16.msra.mxu0 %v2882_v18  ;;  %1983 = vmatprep.subr.bf16.mxu1 %v2887_v19 }
  0xfc   : > { %2089 = vmatprep.subr.bf16.mxu0 %v2890_v20 }
  0xfe   : > { %1984 = vmatpush1.bf16.msra.mxu1 %v2885_v21 }
  0xff   : > { %2090 = vmatpush1.bf16.msra.mxu0 %v2888_v22  ;;  %1985 = vmatprep.subr.bf16.mxu1 %v2893_v23 }
 0x100   : > { %2091 = vmatprep.subr.bf16.mxu0 %v2896_v24  ;;  %v928_v24 = vld [vmem:[#allocation2] sm:$0xff] }
 0x102   : > { %1986 = vmatpush1.bf16.msra.mxu1 %v2891_v25 }
 0x103   : > { %2092 = vmatpush1.bf16.msra.mxu0 %v2894_v26  ;;  %1987 = vmatprep.subr.bf16.mxu1 %v2899_v27  ;;  %v932_v26 = vld [vmem:[#allocation2 + $0x20] sm:$0xff] }
 0x104   : > { %2093 = vmatprep.subr.bf16.mxu0 %v2902_v28 }
 0x106   : > { %1988 = vmatpush1.bf16.msra.mxu1 %v2897_v29 }
 0x107   : > { %2094 = vmatpush1.bf16.msra.mxu0 %v2900_v30  ;;  %1989 = vmatprep.subr.bf16.mxu1 %v2905_v31  ;;  %v929_v30 = vld [vmem:[#allocation2 + $0x8] sm:$0xff] }
 0x108   : > { %2095 = vmatprep.subr.bf16.mxu0 %v2908_v32  ;;  %v933_v32 = vld [vmem:[#allocation2 + $0x28] sm:$0xff] }
 0x10a   : > { %1990 = vmatpush1.bf16.msra.mxu1 %v2903_v33 }
 0x10b   : > { %2096 = vmatpush1.bf16.msra.mxu0 %v2906_v34  ;;  %1991 = vmatprep.subr.bf16.mxu1 %v2911_v35 }
 0x10c   : > { %2097 = vmatprep.subr.bf16.mxu0 %v2914_v36  ;;  %v930_v36 = vld [vmem:[#allocation2 + $0x10] sm:$0xff] }
 0x10e   : > { %1992 = vmatpush1.bf16.msra.mxu1 %v2909_v37 }
 0x10f   : > { %2098 = vmatpush1.bf16.msra.mxu0 %v2912_v38  ;;  %1993 = vmatprep.subr.bf16.mxu1 %v2922_v39  ;;  %v934_v38 = vld [vmem:[#allocation2 + $0x30] sm:$0xff] }
 0x110   : > { %2099 = vmatprep.subr.bf16.mxu0 %v2926_v40 }
 0x112   : > { %1994 = vmatpush1.bf16.msra.mxu1 %v2920_v41 }
 0x113   : > { %2100 = vmatpush1.bf16.msra.mxu0 %v2924_v42  ;;  %1995 = vmatprep.subr.bf16.mxu1 %v2929_v43 }
 0x114   : > { %2101 = vmatprep.subr.bf16.mxu0 %v2932_v44  ;;  %v931_v44 = vld [vmem:[#allocation2 + $0x18] sm:$0xff] }
 0x116   : > { %1996 = vmatpush1.bf16.msra.mxu1 %v2927_v45 }
 0x117   : > { %2102 = vmatpush1.bf16.msra.mxu0 %v2930_v46  ;;  %2587 = vmatprep.subr.bf16.mxu1 %v2941_v47  ;;  %v935_v46 = vld [vmem:[#allocation2 + $0x38] sm:$0xff] }
 0x118   : > { %2124 = vmatprep.subr.bf16.mxu0 %v2941_v47 }
 0x119   : > { %1998 = vmatmul.mubr.bf16.vlgmr.msra.gmra.mrb[0].mxu1 %v2933_v48 }
 0x11a   : > { %2104 = vmatmul.mubr.bf16.vlgmr.msra.gmra.mrb[0].mxu0 %v2936_v49  ;;  %2595 = vmatpush1.bf16.msra.mxu1 %v2939_v50 }
 0x11b   : > { %2125 = vmatpush1.bf16.msra.mxu0 %v2939_v50  ;;  %2588 = vmatprep.subr.bf16.mxu1 %v2944_v51 }
 0x11c   : > { %2126 = vmatprep.subr.bf16.mxu0 %v2944_v51  ;;  %2007 = vmatprep.mubr.bf16.mxu1 %v2945_v52 }
 0x11d   : > { %2113 = vmatprep.mubr.bf16.mxu0 %v2947_v53 }
 0x11e   : > { %2596 = vmatpush1.bf16.msra.mxu1 %v2942_v54 }
 0x11f   : > { %2127 = vmatpush1.bf16.msra.mxu0 %v2942_v54  ;;  %2589 = vmatprep.subr.bf16.mxu1 %v2953_v55 }
 0x120   : > { %2128 = vmatprep.subr.bf16.mxu0 %v2953_v55 }
 0x121   : > { %2008 = vmatmul.mubr.bf16.gmra.mrb[4].mxu1 %v2949_v56  ;;  %v2207_v56 = vlaneseq (!%p2578_p5) }
 0x122   : > { %2114 = vmatmul.mubr.bf16.gmra.mrb[4].mxu0 %v2950_v57  ;;  %2597 = vmatpush1.bf16.msra.mxu1 %v2951_v58 }
 0x123   : > { %2129 = vmatpush1.bf16.msra.mxu0 %v2951_v58  ;;  %2590 = vmatprep.subr.bf16.mxu1 %v2956_v59  ;;  %v2208_v57 = vshrl.u32 (!%p2578_p5), %v2207_v56, 7  ;;  %v2205_v58 = vld [vmem:[%s911_s29] sm:$0x3] (!%p2578_p5) }
 0x124   : > { %2130 = vmatprep.subr.bf16.mxu0 %v2956_v59  ;;  %2156 = vmatprep.mubr.bf16.mxu0 %v3060_v62 }
 0x125   : > { %2166 = vmatprep.mubr.bf16.mxu1 %v3060_v62  ;;  %v2213_v62 = vsub.s32 (!%p2578_p5), 1, %v2208_v57 }
 0x126   : > { %2598 = vmatpush1.bf16.msra.mxu1 %v2954_v60 }
 0x127   : > { %2131 = vmatpush1.bf16.msra.mxu0 %v2954_v60  ;;  %2591 = vmatprep.subr.bf16.mxu1 %v2959_v61  ;;  %v2209_v60 = vsub.s32 (!%p2578_p5), 0, %v2208_v57 }
 0x128   : > { %2132 = vmatprep.subr.bf16.mxu0 %v2959_v61 }
 0x12a   : > { %2599 = vmatpush1.bf16.msra.mxu1 %v2957_v63 }
 0x12b   : > { %2133 = vmatpush1.bf16.msra.mxu0 %v2957_v63  ;;  %2592 = vmatprep.subr.bf16.mxu1 %v2962_v0 }
 0x12c   : > { %2134 = vmatprep.subr.bf16.mxu0 %v2962_v0 }
 0x12e   : > { %2600 = vmatpush1.bf16.msra.mxu1 %v2960_v1 }
 0x12f   : > { %2135 = vmatpush1.bf16.msra.mxu0 %v2960_v1  ;;  %2593 = vmatprep.subr.bf16.mxu1 %v2965_v2 }
 0x130   : > { %2136 = vmatprep.subr.bf16.mxu0 %v2965_v2  ;;  %v2210_v2 = vrot.slane (!%p2578_p5), %v2205_v58, %v2209_v60 }
 0x132   : > { %2601 = vmatpush1.bf16.msra.mxu1 %v2963_v3 }
 0x133   : > { %2137 = vmatpush1.bf16.msra.mxu0 %v2963_v3  ;;  %2594 = vmatprep.subr.bf16.mxu1 %v2968_v4  ;;  %v2214_v3 = vrot.slane (!%p2578_p5), %v2205_v58, %v2213_v62 }
 0x134   : > { %2138 = vmatprep.subr.bf16.mxu0 %v2968_v4 }
 0x136   : > { %2602 = vmatpush1.bf16.msra.mxu1 %v2966_v5 }
 0x137   : > { %2139 = vmatpush1.bf16.msra.mxu0 %v2966_v5 }
 0x139   : > { %2167 = vmatmul.mubr.bf16.vlgmr.msra.gmra.mrb[8].mxu1 %v2970_v7 }
 0x13a   : > { %2157 = vmatmul.mubr.bf16.vlgmr.msra.gmra.mrb[0].mxu0 %v2969_v6 }
 0x1ec   : > { %v1999_v8 = vpop.f32.mrb[0].mxu1 }
 0x1ed   : > { %v2001_v9 = vpop.f32.mrb[1].mxu1 }
 0x1ee   : > { %v2003_v10 = vpop.f32.mrb[2].mxu1 }
 0x1ef   : > { %v2005_v11 = vpop.f32.mrb[3].mxu1 }
 0x1f4   : > { %v2009_v12 = vpop.f32.mrb[4].mxu1 }
 0x1f5   : > { %v2115_v13 = vpop.f32.mrb[4].mxu0  ;;  %v2011_v15 = vpop.f32.mrb[5].mxu1 }
 0x1f6   : > { %v2607_v14 = vadd.f32 %v2115_v13, %v2009_v12  ;;  %v2117_v16 = vpop.f32.mrb[5].mxu0  ;;  %v2013_v18 = vpop.f32.mrb[6].mxu1 }
 0x1f7   : > { %v2609_v17 = vadd.f32 %v2117_v16, %v2011_v15  ;;  %v2119_v19 = vpop.f32.mrb[6].mxu0  ;;  %v2015_v21 = vpop.f32.mrb[7].mxu1 }
 0x1f8   : > { %v2611_v20 = vadd.f32 %v2119_v19, %v2013_v18  ;;  %v2121_v22 = vpop.f32.mrb[7].mxu0 }
 0x1f9   : > { %v2613_v23 = vadd.f32 %v2121_v22, %v2015_v21 }
 0x20c   : > { %v2168_v27 = vpop.f32.mrb[8].mxu1 }
 0x20d   : > { %v2158_v25 = vpop.f32.mrb[0].mxu0  ;;  %v2608_v29 = vadd.f32 %v2607_v14, %v2168_v27  ;;  %v2170_v33 = vpop.f32.mrb[9].mxu1 }
 0x20e   : > { %v2603_v28 = vadd.f32 %v2158_v25, %v1999_v8  ;;  %v2160_v31 = vpop.f32.mrb[1].mxu0  ;;  %v2610_v35 = vadd.f32 %v2609_v17, %v2170_v33  ;;  %v2172_v39 = vpop.f32.mrb[10].mxu1 }
 0x20f   : > { %v2604_v34 = vadd.f32 %v2160_v31, %v2001_v9  ;;  %v2162_v37 = vpop.f32.mrb[2].mxu0  ;;  %v2181_v41 = vadd.f32 %v2608_v29, %v932_v26  ;;  %v2612_v43 = vadd.f32 %v2611_v20, %v2172_v39  ;;  %v2174_v47 = vpop.f32.mrb[11].mxu1  ;;  %2196 = sbr.rel (%p2578_p5) target bundleno = 546 (0x222), region = 104 }
 0x210   : > { %v2177_v40 = vadd.f32 %v2603_v28, %v928_v24  ;;  %v2605_v42 = vadd.f32 %v2162_v37, %v2003_v10  ;;  %v2164_v45 = vpop.f32.mrb[3].mxu0  ;;  %v2182_v49 = vadd.f32 %v2610_v35, %v933_v32  ;;  %v2614_v51 = vadd.f32 %v2613_v23, %v2174_v47 }
 0x211   : > { %v2178_v48 = vadd.f32 %v2604_v34, %v929_v30  ;;  %v2606_v50 = vadd.f32 %v2164_v45, %v2005_v11  ;;  %2189 = vst [vmem:[#allocation2 + $0x20] sm:$0xff] %v2181_v41  ;;  %v2183_v53 = vadd.f32 %v2612_v43, %v934_v38 }
 0x212   : > { %2185 = vst [vmem:[#allocation2] sm:$0xff] %v2177_v40  ;;  %v2179_v52 = vadd.f32 %v2605_v42, %v930_v36  ;;  %2190 = vst [vmem:[#allocation2 + $0x28] sm:$0xff] %v2182_v49  ;;  %v2184_v55 = vadd.f32 %v2614_v51, %v935_v46 }
 0x213   : > { %2186 = vst [vmem:[#allocation2 + $0x8] sm:$0xff] %v2178_v48  ;;  %v2180_v54 = vadd.f32 %v2606_v50, %v931_v44  ;;  %2191 = vst [vmem:[#allocation2 + $0x30] sm:$0xff] %v2183_v53 }
 0x214   : > { %2187 = vst [vmem:[#allocation2 + $0x10] sm:$0xff] %v2179_v52  ;;  %2192 = vst [vmem:[#allocation2 + $0x38] sm:$0xff] %v2184_v55 }
 0x215   : > { %2188 = vst [vmem:[#allocation2 + $0x18] sm:$0xff] %v2180_v54 }
 0x218   : > { %v2201_v1 = vld [vmem:[#allocation2 + $0x20] sm:$0xff] }
 0x219   : > { %v2197_v59 = vld [vmem:[#allocation2] sm:$0xff]  ;;  %v2202_v4 = vld [vmem:[#allocation2 + $0x28] sm:$0xff]  ;;  %v2221_v11 = vadd.f32 %v2210_v2, %v2201_v1 }
 0x21a   : > { %v2198_v61 = vld [vmem:[#allocation2 + $0x8] sm:$0xff]  ;;  %v2203_v5 = vld [vmem:[#allocation2 + $0x30] sm:$0xff]  ;;  %v2217_v7 = vadd.f32 %v2210_v2, %v2197_v59  ;;  %v2222_v12 = vadd.f32 %v2214_v3, %v2202_v4 }
 0x21b   : > { %v2199_v63 = vld [vmem:[#allocation2 + $0x10] sm:$0xff]  ;;  %v2204_v6 = vld [vmem:[#allocation2 + $0x38] sm:$0xff]  ;;  %v2218_v8 = vadd.f32 %v2214_v3, %v2198_v61  ;;  %v2223_v13 = vadd.f32 %v2210_v2, %v2203_v5  ;;  %v2229_v19 = vmax.f32 %v2221_v11, 0.0 }
 0x21c   : > { %v2200_v0 = vld [vmem:[#allocation2 + $0x18] sm:$0xff]  ;;  %v2219_v9 = vadd.f32 %v2210_v2, %v2199_v63  ;;  %v2224_v14 = vadd.f32 %v2214_v3, %v2204_v6  ;;  %v2225_v15 = vmax.f32 %v2217_v7, 0.0  ;;  %v2230_v20 = vmax.f32 %v2222_v12, 0.0 }
 0x21d   : > { %v2220_v10 = vadd.f32 %v2214_v3, %v2200_v0  ;;  %v2226_v16 = vmax.f32 %v2218_v8, 0.0  ;;  %v2231_v21 = vmax.f32 %v2223_v13, 0.0  ;;  %2237 = vst [vmem:[%s3547_s1 + $0x20] sm:$0xff] %v2229_v19 }
 0x21e   : > { %v2227_v17 = vmax.f32 %v2219_v9, 0.0  ;;  %v2232_v22 = vmax.f32 %v2224_v14, 0.0  ;;  %2233 = vst [vmem:[%s3547_s1] sm:$0xff] %v2225_v15  ;;  %2238 = vst [vmem:[%s3547_s1 + $0x28] sm:$0xff] %v2230_v20 }
 0x21f   : > { %v2228_v18 = vmax.f32 %v2220_v10, 0.0  ;;  %2234 = vst [vmem:[%s3547_s1 + $0x8] sm:$0xff] %v2226_v16  ;;  %2239 = vst [vmem:[%s3547_s1 + $0x30] sm:$0xff] %v2231_v21 }
 0x220   : > { %2235 = vst [vmem:[%s3547_s1 + $0x10] sm:$0xff] %v2227_v17  ;;  %2240 = vst [vmem:[%s3547_s1 + $0x38] sm:$0xff] %v2232_v22 }
 0x221   : > { %2236 = vst [vmem:[%s3547_s1 + $0x18] sm:$0xff] %v2228_v18 }
 0x222 PF: > { %2247 = sbr.rel (!%p3175_p12) target bundleno = 554 (0x22a), region = 108  ;;  %s2586_s16 = sshll.u32 (%p3175_p12), %s3045_s19, 4 }
 0x223   : > { %s2253_s5 = scalar_lea.vmem (%p3175_p12), %s3776_s3, %s2586_s16 }
 0x224   : > { %v2274_v27 = vld [vmem:[%s3547_s1 + $0x20] sm:$0xff] (%p3175_p12) }
 0x225   : > { %v2266_v23 = vld [vmem:[%s3547_s1] sm:$0xff] (%p3175_p12)  ;;  %v2276_v28 = vld [vmem:[%s3547_s1 + $0x28] sm:$0xff] (%p3175_p12)  ;;  %2275 = vst [vmem:[%s2253_s5 + $0x40] sm:$0xff] (%p3175_p12), %v2274_v27 }
 0x226   : > { %v2268_v24 = vld [vmem:[%s3547_s1 + $0x8] sm:$0xff] (%p3175_p12)  ;;  %2267 = vst [vmem:[%s2253_s5] sm:$0xff] (%p3175_p12), %v2266_v23  ;;  %2277 = vst [vmem:[%s2253_s5 + $0x48] sm:$0xff] (%p3175_p12), %v2276_v28  ;;  %v2278_v29 = vld [vmem:[%s3547_s1 + $0x30] sm:$0xff] (%p3175_p12) }
 0x227   : > { %v2270_v25 = vld [vmem:[%s3547_s1 + $0x10] sm:$0xff] (%p3175_p12)  ;;  %2269 = vst [vmem:[%s2253_s5 + $0x8] sm:$0xff] (%p3175_p12), %v2268_v24  ;;  %v2280_v30 = vld [vmem:[%s3547_s1 + $0x38] sm:$0xff] (%p3175_p12)  ;;  %2279 = vst [vmem:[%s2253_s5 + $0x60] sm:$0xff] (%p3175_p12), %v2278_v29 }
 0x228   : > { %v2272_v26 = vld [vmem:[%s3547_s1 + $0x18] sm:$0xff] (%p3175_p12)  ;;  %2271 = vst [vmem:[%s2253_s5 + $0x20] sm:$0xff] (%p3175_p12), %v2270_v25  ;;  %2281 = vst [vmem:[%s2253_s5 + $0x68] sm:$0xff] (%p3175_p12), %v2280_v30 }
 0x229   : > { %2273 = vst [vmem:[%s2253_s5 + $0x28] sm:$0xff] %v2272_v26 }
 0x22a PF: > { %s13_s22 = sadd.s32 1, %s3057_s22   ;;  %s3786_s10 = sld [smem:[#allocation6_spill]] }
 0x22b   : > { %p10_p6 = scmp.ge.s32.totalorder %s13_s22, 6   ;;  %s3787_s12 = smov %s3021_s13 }
 0x22c   : > { %s3788_s13 = smov %s3173_s9  ;;  %s3789_s14 = smov %s3029_s15 }
 0x22d   : > { %s3790_s15 = smov %s3170_s8  ;;  %s3791_s16 = smov %s3037_s17 }
 0x22e   : > { %s3792_s17 = smov %s3156_s30  ;;  %s3793_s18 = smov %s3049_s20 }
 0x22f   : > { %s3794_s19 = smov %s3053_s21  ;;  %s3795_s20 = smov %s3798_s24 }
 0x230   : > { %s3796_s21 = smov %s3786_s10  ;;  %12 = sbr.rel (!%p10_p6) target bundleno = 9 (0x9), region = 179 }

</bundles_post_ra>
